<compile_context>
chip_gen: v6e
topology: v6e:2x2x1
jax: 0.10.0
libtpu: 0.0.40
codegen_flags: <defaults>
</compile_context>

<pallas_src>
import jax
import jax.numpy as jnp
from jax.experimental import pallas as pl
from jax.experimental.pallas import tpu as pltpu

EPS = 1e-5


# ---------------- Fused Pallas kernel (Nb images per grid step) ----------------

def _identity_mapping_kernel(x_ref, s1_ref, b1_ref, w1t_ref, s2_ref, b2_ref,
                             w2r_ref, s3_ref, b3_ref, w3t_ref,
                             o_ref, h1p_ref, col_ref):
    """Whole pre-activation bottleneck + residual add, kept in VMEM.

    x_ref  : (Nb, C, H*W)      bf16  input images (NCHW, spatial flattened)
    o_ref  : (Nb, C, H*W)      bf16  output = block(x) + x
    h1p_ref: (c1, H+2, W+2)    f32   scratch: zero-padded stage-1 activations
    col_ref: (9*c1, H*W)       bf16  scratch: im2col buffer for the 3x3 conv
    """
    nb = x_ref.shape[0]
    HW = x_ref.shape[2]
    c1 = w1t_ref.shape[0]
    H = h1p_ref.shape[1] - 2
    W = h1p_ref.shape[2] - 2

    # Zero ONLY the 1-pixel border of the padded scratch (interior is fully
    # overwritten for every image below; the border is never written elsewhere).
    # Done once per grid step -> cheap and core-safe under "parallel" semantics.
    h1p_ref[:, 0:1, :] = jnp.zeros((c1, 1, W + 2), h1p_ref.dtype)
    h1p_ref[:, H + 1:H + 2, :] = jnp.zeros((c1, 1, W + 2), h1p_ref.dtype)
    h1p_ref[:, :, 0:1] = jnp.zeros((c1, H + 2, 1), h1p_ref.dtype)
    h1p_ref[:, :, W + 1:W + 2] = jnp.zeros((c1, H + 2, 1), h1p_ref.dtype)

    s1 = s1_ref[...]          # (C, 1)   f32 (folded BN)
    b1 = b1_ref[...]
    s2 = s2_ref[...]          # (c1, 1)
    b2 = b2_ref[...]
    s3 = s3_ref[...]          # (c2, 1)
    b3 = b3_ref[...]
    w1t = w1t_ref[...]        # (c1, C)     bf16
    w2r = w2r_ref[...]        # (c2, 9*c1)  bf16
    w3t = w3t_ref[...]        # (C, c2)     bf16

    for i in range(nb):                                   # nb is small & static
        xi = x_ref[i].astype(jnp.float32)                 # (C, HW) f32

        # ---- Stage A: bn1 -> relu -> conv1x1 -> bn2 -> relu ----
        a = jnp.maximum(xi * s1 + b1, 0.0).astype(jnp.bfloat16)
        h1 = jnp.dot(w1t, a, preferred_element_type=jnp.float32)      # (c1, HW)
        h1 = jnp.maximum(h1 * s2 + b2, 0.0)                           # f32

        # In-kernel zero padding (pad=1): write only the interior of the scratch.
        h1p_ref[:, 1:H + 1, 1:W + 1] = h1.reshape(c1, H, W)

        # ---- Stage B: 3x3 conv as im2col + ONE matmul (K = 9*c1) ----
        # TODO(synk): for lane-aligned production widths, pltpu.roll-based shifts
        # would avoid the per-tap window relayouts (perf only; results identical).
        for kh in range(3):
            for kw in range(3):
                k = kh * 3 + kw
                tap = h1p_ref[:, kh:kh + H, kw:kw + W].reshape(c1, HW)
                col_ref[k * c1:(k + 1) * c1, :] = tap.astype(jnp.bfloat16)
        h2 = jnp.dot(w2r, col_ref[...],
                     preferred_element_type=jnp.float32)              # (c2, HW)

        # ---- Stage C: bn3 -> relu -> conv1x1 + identity residual ----
        h2 = jnp.maximum(h2 * s3 + b3, 0.0).astype(jnp.bfloat16)
        out = jnp.dot(w3t, h2, preferred_element_type=jnp.float32) + xi
        o_ref[i] = out.astype(o_ref.dtype)


# ---------------- Wrapper ----------------

def identity_mapping_forward(x_nchw, params):
    N, C, H, W = x_nchw.shape
    HW = H * W

    w1 = params["w1"]                                  # (C,  c1)
    w2 = params["w2"]                                  # (3, 3, c1, c2)  HWIO
    w3 = params["w3"]                                  # (c2, C)
    c1, c2 = w1.shape[1], w2.shape[3]

    # Tiny one-time weight/BN preps (no activation-sized HBM traffic).
    w1t = w1.T.astype(jnp.bfloat16)                    # (c1, C)
    w2r = w2.reshape(9 * c1, c2).T.astype(jnp.bfloat16)   # (c2, 9*c1)
    w3t = w3.T.astype(jnp.bfloat16)                    # (C, c2)
    s1 = params["s1"].reshape(C, 1).astype(jnp.float32)
    b1 = params["b1"].reshape(C, 1).astype(jnp.float32)
    s2 = params["s2"].reshape(c1, 1).astype(jnp.float32)
    b2 = params["b2"].reshape(c1, 1).astype(jnp.float32)
    s3 = params["s3"].reshape(c2, 1).astype(jnp.float32)
    b3 = params["b3"].reshape(c2, 1).astype(jnp.float32)

    # NCHW stays NCHW: each image is a (C, H*W) matrix (reshape is free).
    x = x_nchw.reshape(N, C, HW)
    if x.dtype != jnp.bfloat16:
        # TODO(synk): keep the surrounding model bf16 end-to-end to drop this cast pass.
        x = x.astype(jnp.bfloat16)

    # ---- VMEM budgeting: pick images-per-step, derive vmem_limit_bytes ----
    io_bytes_per_image = C * HW * 2                               # bf16 block
    scratch_bytes = c1 * (H + 2) * (W + 2) * 4 + 9 * c1 * HW * 2
    weight_bytes = 2 * 2 * (c1 * C + 9 * c1 * c2 + C * c2)        # dbl-buffered bf16
    budget = 40 * 1024 * 1024        # safe under v7x's 64 MiB VMEM with headroom
    max_nb = max(1, N // 8)          # keep >= ~8 grid steps where possible (v7x: 2 TCs)
    nb = 1
    for cand in range(1, min(N, max_nb) + 1):
        if N % cand:
            continue
        need = 2 * 2 * cand * io_bytes_per_image + scratch_bytes + weight_bytes
        if need <= budget:
            nb = cand
    need = 2 * 2 * nb * io_bytes_per_image + scratch_bytes + weight_bytes
    vmem_limit = int(min(max(2 * need, 32 * 1024 * 1024), 100 * 1024 * 1024))

    out = pl.pallas_call(
        _identity_mapping_kernel,
        out_shape=jax.ShapeDtypeStruct((N, C, HW), jnp.bfloat16),
        grid=(N // nb,),
        in_specs=[
            pl.BlockSpec((nb, C, HW), lambda n: (n, 0, 0)),       # x
            pl.BlockSpec((C, 1), lambda n: (0, 0)),               # s1
            pl.BlockSpec((C, 1), lambda n: (0, 0)),               # b1
            pl.BlockSpec((c1, C), lambda n: (0, 0)),              # w1^T
            pl.BlockSpec((c1, 1), lambda n: (0, 0)),              # s2
            pl.BlockSpec((c1, 1), lambda n: (0, 0)),              # b2
            pl.BlockSpec((c2, 9 * c1), lambda n: (0, 0)),         # w2 reshaped^T
            pl.BlockSpec((c2, 1), lambda n: (0, 0)),              # s3
            pl.BlockSpec((c2, 1), lambda n: (0, 0)),              # b3
            pl.BlockSpec((C, c2), lambda n: (0, 0)),              # w3^T
        ],
        out_specs=pl.BlockSpec((nb, C, HW), lambda n: (n, 0, 0)),
        scratch_shapes=[
            pltpu.VMEM((c1, H + 2, W + 2), jnp.float32),   # padded stage-1 activations
            pltpu.VMEM((9 * c1, HW), jnp.bfloat16),        # im2col buffer (3x3 conv)
        ],
        compiler_params=pltpu.CompilerParams(
            dimension_semantics=("parallel",),             # shard batch across TCs (v7x)
            vmem_limit_bytes=vmem_limit,
        ),
    )(x, s1, b1, w1t, s2, b2, w2r, s3, b3, w3t)

    return out.reshape(N, C, H, W)                         # still NCHW, bf16


# ---------------- Pure-JAX reference (mirrors the kernel's bf16 matmul operands) ----------------

def _reference(x_nchw, p):
    x = jnp.transpose(x_nchw.astype(jnp.float32), (0, 2, 3, 1))        # NHWC f32
    h = jnp.maximum(x * p["s1"] + p["b1"], 0.0).astype(jnp.bfloat16)
    h = jnp.einsum("nhwc,cd->nhwd", h, p["w1"].astype(jnp.bfloat16),
                   preferred_element_type=jnp.float32)
    h = jnp.maximum(h * p["s2"] + p["b2"], 0.0).astype(jnp.bfloat16)
    h = jax.lax.conv_general_dilated(
        h, p["w2"].astype(jnp.bfloat16), window_strides=(1, 1), padding="SAME",
        dimension_numbers=("NHWC", "HWIO", "NHWC"),
        preferred_element_type=jnp.float32)
    h = jnp.maximum(h * p["s3"] + p["b3"], 0.0).astype(jnp.bfloat16)
    h = jnp.einsum("nhwc,cd->nhwd", h, p["w3"].astype(jnp.bfloat16),
                   preferred_element_type=jnp.float32)
    out = h + x
    return jnp.transpose(out, (0, 3, 1, 2))


if __name__ == "__main__":
    # identity_filters = [C, c1, c2, C]  (filters[-1:] + filters[1:]), stride = 1
    N, C, H, W = 2, 32, 16, 16
    c1, c2 = 16, 16

    key = jax.random.PRNGKey(0)
    keys = jax.random.split(key, 16)
    x = jax.random.normal(keys[0], (N, C, H, W), jnp.float32).astype(jnp.bfloat16)

    def bn_fold(kg, kb, km, kv, c):
        gamma = jax.random.normal(kg, (c,)) * 0.1 + 1.0
        beta = jax.random.normal(kb, (c,)) * 0.1
        mean = jax.random.normal(km, (c,)) * 0.1
        var = jnp.abs(jax.random.normal(kv, (c,))) * 0.1 + 0.9
        scale = gamma / jnp.sqrt(var + EPS)
        bias = beta - mean * scale
        return scale.astype(jnp.float32), bias.astype(jnp.float32)

    s1, b1 = bn_fold(keys[1], keys[2], keys[3], keys[4], C)
    s2, b2 = bn_fold(keys[5], keys[6], keys[7], keys[8], c1)
    s3, b3 = bn_fold(keys[9], keys[10], keys[11], keys[12], c2)

    params = dict(
        w1=(jax.random.normal(keys[13], (C, c1), jnp.float32) * 0.05),
        w2=(jax.random.normal(keys[14], (3, 3, c1, c2), jnp.float32) * 0.05),
        w3=(jax.random.normal(keys[15], (c2, C), jnp.float32) * 0.05),
        s1=s1, b1=b1, s2=s2, b2=b2, s3=s3, b3=b3,
    )

    fwd = jax.jit(identity_mapping_forward)
    out = jax.block_until_ready(fwd(x, params))
    ref = jax.block_until_ready(_reference(x, params))

    assert out.shape == (N, C, H, W)
    assert out.dtype == jnp.bfloat16
    assert jnp.allclose(out.astype(jnp.float32), ref.astype(jnp.float32),
                        rtol=2e-2, atol=2e-2), "mismatch vs reference"
    print("KERNEL_OK")
</pallas_src>

<mosaic_0001>
module attributes {stable_mosaic.version = 11 : i64} {
  func.func @_identity_mapping_kernel(%arg0: i32, %arg1: memref<1x32x256xbf16, #tpu.memory_space<vmem>>, %arg2: memref<32x1xf32, #tpu.memory_space<vmem>>, %arg3: memref<32x1xf32, #tpu.memory_space<vmem>>, %arg4: memref<16x32xbf16, #tpu.memory_space<vmem>>, %arg5: memref<16x1xf32, #tpu.memory_space<vmem>>, %arg6: memref<16x1xf32, #tpu.memory_space<vmem>>, %arg7: memref<16x144xbf16, #tpu.memory_space<vmem>>, %arg8: memref<16x1xf32, #tpu.memory_space<vmem>>, %arg9: memref<16x1xf32, #tpu.memory_space<vmem>>, %arg10: memref<32x16xbf16, #tpu.memory_space<vmem>>, %arg11: memref<1x32x256xbf16, #tpu.memory_space<vmem>>, %arg12: memref<16x18x18xf32, #tpu.memory_space<vmem>>, %arg13: memref<144x256xbf16, #tpu.memory_space<vmem>>) attributes {dimension_semantics = [#tpu.dimension_semantics<parallel>], iteration_bounds = array<i64: 2>, scalar_prefetch = 0 : i64, scratch_operands = 2 : i64, tpu.core_type = #tpu.core_type<tc>, window_params = [{transform_indices = @transform_0, window_bounds = array<i64: 1, 32, 256>}, {pipeline_mode = #tpu.pipeline_mode<synchronous>, transform_indices = @transform_1, window_bounds = array<i64: 32, 1>}, {pipeline_mode = #tpu.pipeline_mode<synchronous>, transform_indices = @transform_2, window_bounds = array<i64: 32, 1>}, {pipeline_mode = #tpu.pipeline_mode<synchronous>, transform_indices = @transform_3, window_bounds = array<i64: 16, 32>}, {pipeline_mode = #tpu.pipeline_mode<synchronous>, transform_indices = @transform_4, window_bounds = array<i64: 16, 1>}, {pipeline_mode = #tpu.pipeline_mode<synchronous>, transform_indices = @transform_5, window_bounds = array<i64: 16, 1>}, {pipeline_mode = #tpu.pipeline_mode<synchronous>, transform_indices = @transform_6, window_bounds = array<i64: 16, 144>}, {pipeline_mode = #tpu.pipeline_mode<synchronous>, transform_indices = @transform_7, window_bounds = array<i64: 16, 1>}, {pipeline_mode = #tpu.pipeline_mode<synchronous>, transform_indices = @transform_8, window_bounds = array<i64: 16, 1>}, {pipeline_mode = #tpu.pipeline_mode<synchronous>, transform_indices = @transform_9, window_bounds = array<i64: 32, 16>}, {transform_indices = @transform_10, window_bounds = array<i64: 1, 32, 256>}]} {
    %cst = arith.constant 0.000000e+00 : f32
    %0 = vector.broadcast %cst : f32 to vector<16x1x18xf32>
    %c0 = arith.constant 0 : index
    %c0_0 = arith.constant 0 : index
    %c0_1 = arith.constant 0 : index
    %1 = vector.load %arg12[%c0, %c0_0, %c0_1] : memref<16x18x18xf32, #tpu.memory_space<vmem>>, vector<16x1x18xf32>
    tpu.vector_store %arg12[%c0, %c0_0, %c0_1], %0 {strides = array<i32>} : memref<16x18x18xf32, #tpu.memory_space<vmem>>, vector<16x1x18xf32>,
    %cst_2 = arith.constant 0.000000e+00 : f32
    %2 = vector.broadcast %cst_2 : f32 to vector<16x1x18xf32>
    %c0_3 = arith.constant 0 : index
    %c17 = arith.constant 17 : index
    %c0_4 = arith.constant 0 : index
    %3 = vector.load %arg12[%c0_3, %c17, %c0_4] : memref<16x18x18xf32, #tpu.memory_space<vmem>>, vector<16x1x18xf32>
    tpu.vector_store %arg12[%c0_3, %c17, %c0_4], %2 {strides = array<i32>} : memref<16x18x18xf32, #tpu.memory_space<vmem>>, vector<16x1x18xf32>,
    %cst_5 = arith.constant 0.000000e+00 : f32
    %4 = vector.broadcast %cst_5 : f32 to vector<16x18x1xf32>
    %c0_6 = arith.constant 0 : index
    %c0_7 = arith.constant 0 : index
    %c0_8 = arith.constant 0 : index
    %5 = vector.load %arg12[%c0_6, %c0_7, %c0_8] : memref<16x18x18xf32, #tpu.memory_space<vmem>>, vector<16x18x1xf32>
    tpu.vector_store %arg12[%c0_6, %c0_7, %c0_8], %4 {strides = array<i32>} : memref<16x18x18xf32, #tpu.memory_space<vmem>>, vector<16x18x1xf32>,
    %cst_9 = arith.constant 0.000000e+00 : f32
    %6 = vector.broadcast %cst_9 : f32 to vector<16x18x1xf32>
    %c0_10 = arith.constant 0 : index
    %c0_11 = arith.constant 0 : index
    %c17_12 = arith.constant 17 : index
    %7 = vector.load %arg12[%c0_10, %c0_11, %c17_12] : memref<16x18x18xf32, #tpu.memory_space<vmem>>, vector<16x18x1xf32>
    tpu.vector_store %arg12[%c0_10, %c0_11, %c17_12], %6 {strides = array<i32>} : memref<16x18x18xf32, #tpu.memory_space<vmem>>, vector<16x18x1xf32>,
    %c0_13 = arith.constant 0 : index
    %c0_14 = arith.constant 0 : index
    %8 = vector.load %arg2[%c0_13, %c0_14] : memref<32x1xf32, #tpu.memory_space<vmem>>, vector<32x1xf32>
    %c0_15 = arith.constant 0 : index
    %c0_16 = arith.constant 0 : index
    %9 = vector.load %arg3[%c0_15, %c0_16] : memref<32x1xf32, #tpu.memory_space<vmem>>, vector<32x1xf32>
    %c0_17 = arith.constant 0 : index
    %c0_18 = arith.constant 0 : index
    %10 = vector.load %arg5[%c0_17, %c0_18] : memref<16x1xf32, #tpu.memory_space<vmem>>, vector<16x1xf32>
    %c0_19 = arith.constant 0 : index
    %c0_20 = arith.constant 0 : index
    %11 = vector.load %arg6[%c0_19, %c0_20] : memref<16x1xf32, #tpu.memory_space<vmem>>, vector<16x1xf32>
    %c0_21 = arith.constant 0 : index
    %c0_22 = arith.constant 0 : index
    %12 = vector.load %arg8[%c0_21, %c0_22] : memref<16x1xf32, #tpu.memory_space<vmem>>, vector<16x1xf32>
    %c0_23 = arith.constant 0 : index
    %c0_24 = arith.constant 0 : index
    %13 = vector.load %arg9[%c0_23, %c0_24] : memref<16x1xf32, #tpu.memory_space<vmem>>, vector<16x1xf32>
    %c0_25 = arith.constant 0 : index
    %c0_26 = arith.constant 0 : index
    %14 = vector.load %arg4[%c0_25, %c0_26] : memref<16x32xbf16, #tpu.memory_space<vmem>>, vector<16x32xbf16>
    %c0_27 = arith.constant 0 : index
    %c0_28 = arith.constant 0 : index
    %15 = vector.load %arg7[%c0_27, %c0_28] : memref<16x144xbf16, #tpu.memory_space<vmem>>, vector<16x144xbf16>
    %c0_29 = arith.constant 0 : index
    %c0_30 = arith.constant 0 : index
    %16 = vector.load %arg10[%c0_29, %c0_30] : memref<32x16xbf16, #tpu.memory_space<vmem>>, vector<32x16xbf16>
    %c0_31 = arith.constant 0 : index
    %c0_32 = arith.constant 0 : index
    %c0_33 = arith.constant 0 : index
    %17 = vector.load %arg1[%c0_31, %c0_32, %c0_33] : memref<1x32x256xbf16, #tpu.memory_space<vmem>>, vector<1x32x256xbf16>
    %18 = vector.shape_cast %17 : vector<1x32x256xbf16> to vector<32x256xbf16>
    %19 = arith.extf %18 : vector<32x256xbf16> to vector<32x256xf32>
    %20 = vector.broadcast %8 : vector<32x1xf32> to vector<32x256xf32>
    %21 = arith.mulf %19, %20 : vector<32x256xf32>
    %22 = vector.broadcast %9 : vector<32x1xf32> to vector<32x256xf32>
    %23 = arith.addf %21, %22 : vector<32x256xf32>
    %cst_34 = arith.constant 0.000000e+00 : f32
    %24 = vector.broadcast %cst_34 : f32 to vector<32x256xf32>
    %25 = arith.maximumf %23, %24 : vector<32x256xf32>
    %26 = arith.truncf %25 : vector<32x256xf32> to vector<32x256xbf16>
    %cst_35 = arith.constant dense<0.000000e+00> : vector<16x256xf32>
    %27 = tpu.matmul %14, %26, %cst_35 {dimension_numbers = #tpu.dot_dimension_numbers<[1], [0], [0], [1], [0, 0, 1, 1], [], []>} : vector<16x32xbf16>, vector<32x256xbf16>, vector<16x256xf32> -> vector<16x256xf32>
    %28 = vector.broadcast %10 : vector<16x1xf32> to vector<16x256xf32>
    %29 = arith.mulf %27, %28 : vector<16x256xf32>
    %30 = vector.broadcast %11 : vector<16x1xf32> to vector<16x256xf32>
    %31 = arith.addf %29, %30 : vector<16x256xf32>
    %cst_36 = arith.constant 0.000000e+00 : f32
    %32 = vector.broadcast %cst_36 : f32 to vector<16x256xf32>
    %33 = arith.maximumf %31, %32 : vector<16x256xf32>
    %34 = vector.shape_cast %33 : vector<16x256xf32> to vector<16x16x16xf32>
    %c0_37 = arith.constant 0 : index
    %c1 = arith.constant 1 : index
    %c1_38 = arith.constant 1 : index
    %35 = vector.load %arg12[%c0_37, %c1, %c1_38] : memref<16x18x18xf32, #tpu.memory_space<vmem>>, vector<16x16x16xf32>
    tpu.vector_store %arg12[%c0_37, %c1, %c1_38], %34 {strides = array<i32>} : memref<16x18x18xf32, #tpu.memory_space<vmem>>, vector<16x16x16xf32>,
    %c0_39 = arith.constant 0 : index
    %c0_40 = arith.constant 0 : index
    %c0_41 = arith.constant 0 : index
    %36 = vector.load %arg12[%c0_39, %c0_40, %c0_41] : memref<16x18x18xf32, #tpu.memory_space<vmem>>, vector<16x16x16xf32>
    %37 = vector.shape_cast %36 : vector<16x16x16xf32> to vector<16x256xf32>
    %38 = arith.truncf %37 : vector<16x256xf32> to vector<16x256xbf16>
    %c0_42 = arith.constant 0 : index
    %c0_43 = arith.constant 0 : index
    %39 = vector.load %arg13[%c0_42, %c0_43] : memref<144x256xbf16, #tpu.memory_space<vmem>>, vector<16x256xbf16>
    tpu.vector_store %arg13[%c0_42, %c0_43], %38 {strides = array<i32>} : memref<144x256xbf16, #tpu.memory_space<vmem>>, vector<16x256xbf16>,
    %c0_44 = arith.constant 0 : index
    %c0_45 = arith.constant 0 : index
    %c1_46 = arith.constant 1 : index
    %40 = vector.load %arg12[%c0_44, %c0_45, %c1_46] : memref<16x18x18xf32, #tpu.memory_space<vmem>>, vector<16x16x16xf32>
    %41 = vector.shape_cast %40 : vector<16x16x16xf32> to vector<16x256xf32>
    %42 = arith.truncf %41 : vector<16x256xf32> to vector<16x256xbf16>
    %c16 = arith.constant 16 : index
    %c0_47 = arith.constant 0 : index
    %43 = vector.load %arg13[%c16, %c0_47] : memref<144x256xbf16, #tpu.memory_space<vmem>>, vector<16x256xbf16>
    tpu.vector_store %arg13[%c16, %c0_47], %42 {strides = array<i32>} : memref<144x256xbf16, #tpu.memory_space<vmem>>, vector<16x256xbf16>,
    %c0_48 = arith.constant 0 : index
    %c0_49 = arith.constant 0 : index
    %c2 = arith.constant 2 : index
    %44 = vector.load %arg12[%c0_48, %c0_49, %c2] : memref<16x18x18xf32, #tpu.memory_space<vmem>>, vector<16x16x16xf32>
    %45 = vector.shape_cast %44 : vector<16x16x16xf32> to vector<16x256xf32>
    %46 = arith.truncf %45 : vector<16x256xf32> to vector<16x256xbf16>
    %c32 = arith.constant 32 : index
    %c0_50 = arith.constant 0 : index
    %47 = vector.load %arg13[%c32, %c0_50] : memref<144x256xbf16, #tpu.memory_space<vmem>>, vector<16x256xbf16>
    tpu.vector_store %arg13[%c32, %c0_50], %46 {strides = array<i32>} : memref<144x256xbf16, #tpu.memory_space<vmem>>, vector<16x256xbf16>,
    %c0_51 = arith.constant 0 : index
    %c1_52 = arith.constant 1 : index
    %c0_53 = arith.constant 0 : index
    %48 = vector.load %arg12[%c0_51, %c1_52, %c0_53] : memref<16x18x18xf32, #tpu.memory_space<vmem>>, vector<16x16x16xf32>
    %49 = vector.shape_cast %48 : vector<16x16x16xf32> to vector<16x256xf32>
    %50 = arith.truncf %49 : vector<16x256xf32> to vector<16x256xbf16>
    %c48 = arith.constant 48 : index
    %c0_54 = arith.constant 0 : index
    %51 = vector.load %arg13[%c48, %c0_54] : memref<144x256xbf16, #tpu.memory_space<vmem>>, vector<16x256xbf16>
    tpu.vector_store %arg13[%c48, %c0_54], %50 {strides = array<i32>} : memref<144x256xbf16, #tpu.memory_space<vmem>>, vector<16x256xbf16>,
    %c0_55 = arith.constant 0 : index
    %c1_56 = arith.constant 1 : index
    %c1_57 = arith.constant 1 : index
    %52 = vector.load %arg12[%c0_55, %c1_56, %c1_57] : memref<16x18x18xf32, #tpu.memory_space<vmem>>, vector<16x16x16xf32>
    %53 = vector.shape_cast %52 : vector<16x16x16xf32> to vector<16x256xf32>
    %54 = arith.truncf %53 : vector<16x256xf32> to vector<16x256xbf16>
    %c64 = arith.constant 64 : index
    %c0_58 = arith.constant 0 : index
    %55 = vector.load %arg13[%c64, %c0_58] : memref<144x256xbf16, #tpu.memory_space<vmem>>, vector<16x256xbf16>
    tpu.vector_store %arg13[%c64, %c0_58], %54 {strides = array<i32>} : memref<144x256xbf16, #tpu.memory_space<vmem>>, vector<16x256xbf16>,
    %c0_59 = arith.constant 0 : index
    %c1_60 = arith.constant 1 : index
    %c2_61 = arith.constant 2 : index
    %56 = vector.load %arg12[%c0_59, %c1_60, %c2_61] : memref<16x18x18xf32, #tpu.memory_space<vmem>>, vector<16x16x16xf32>
    %57 = vector.shape_cast %56 : vector<16x16x16xf32> to vector<16x256xf32>
    %58 = arith.truncf %57 : vector<16x256xf32> to vector<16x256xbf16>
    %c80 = arith.constant 80 : index
    %c0_62 = arith.constant 0 : index
    %59 = vector.load %arg13[%c80, %c0_62] : memref<144x256xbf16, #tpu.memory_space<vmem>>, vector<16x256xbf16>
    tpu.vector_store %arg13[%c80, %c0_62], %58 {strides = array<i32>} : memref<144x256xbf16, #tpu.memory_space<vmem>>, vector<16x256xbf16>,
    %c0_63 = arith.constant 0 : index
    %c2_64 = arith.constant 2 : index
    %c0_65 = arith.constant 0 : index
    %60 = vector.load %arg12[%c0_63, %c2_64, %c0_65] : memref<16x18x18xf32, #tpu.memory_space<vmem>>, vector<16x16x16xf32>
    %61 = vector.shape_cast %60 : vector<16x16x16xf32> to vector<16x256xf32>
    %62 = arith.truncf %61 : vector<16x256xf32> to vector<16x256xbf16>
    %c96 = arith.constant 96 : index
    %c0_66 = arith.constant 0 : index
    %63 = vector.load %arg13[%c96, %c0_66] : memref<144x256xbf16, #tpu.memory_space<vmem>>, vector<16x256xbf16>
    tpu.vector_store %arg13[%c96, %c0_66], %62 {strides = array<i32>} : memref<144x256xbf16, #tpu.memory_space<vmem>>, vector<16x256xbf16>,
    %c0_67 = arith.constant 0 : index
    %c2_68 = arith.constant 2 : index
    %c1_69 = arith.constant 1 : index
    %64 = vector.load %arg12[%c0_67, %c2_68, %c1_69] : memref<16x18x18xf32, #tpu.memory_space<vmem>>, vector<16x16x16xf32>
    %65 = vector.shape_cast %64 : vector<16x16x16xf32> to vector<16x256xf32>
    %66 = arith.truncf %65 : vector<16x256xf32> to vector<16x256xbf16>
    %c112 = arith.constant 112 : index
    %c0_70 = arith.constant 0 : index
    %67 = vector.load %arg13[%c112, %c0_70] : memref<144x256xbf16, #tpu.memory_space<vmem>>, vector<16x256xbf16>
    tpu.vector_store %arg13[%c112, %c0_70], %66 {strides = array<i32>} : memref<144x256xbf16, #tpu.memory_space<vmem>>, vector<16x256xbf16>,
    %c0_71 = arith.constant 0 : index
    %c2_72 = arith.constant 2 : index
    %c2_73 = arith.constant 2 : index
    %68 = vector.load %arg12[%c0_71, %c2_72, %c2_73] : memref<16x18x18xf32, #tpu.memory_space<vmem>>, vector<16x16x16xf32>
    %69 = vector.shape_cast %68 : vector<16x16x16xf32> to vector<16x256xf32>
    %70 = arith.truncf %69 : vector<16x256xf32> to vector<16x256xbf16>
    %c128 = arith.constant 128 : index
    %c0_74 = arith.constant 0 : index
    %71 = vector.load %arg13[%c128, %c0_74] : memref<144x256xbf16, #tpu.memory_space<vmem>>, vector<16x256xbf16>
    tpu.vector_store %arg13[%c128, %c0_74], %70 {strides = array<i32>} : memref<144x256xbf16, #tpu.memory_space<vmem>>, vector<16x256xbf16>,
    %c0_75 = arith.constant 0 : index
    %c0_76 = arith.constant 0 : index
    %72 = vector.load %arg13[%c0_75, %c0_76] : memref<144x256xbf16, #tpu.memory_space<vmem>>, vector<144x256xbf16>
    %cst_77 = arith.constant dense<0.000000e+00> : vector<16x256xf32>
    %73 = tpu.matmul %15, %72, %cst_77 {dimension_numbers = #tpu.dot_dimension_numbers<[1], [0], [0], [1], [0, 0, 1, 1], [], []>} : vector<16x144xbf16>, vector<144x256xbf16>, vector<16x256xf32> -> vector<16x256xf32>
    %74 = vector.broadcast %12 : vector<16x1xf32> to vector<16x256xf32>
    %75 = arith.mulf %73, %74 : vector<16x256xf32>
    %76 = vector.broadcast %13 : vector<16x1xf32> to vector<16x256xf32>
    %77 = arith.addf %75, %76 : vector<16x256xf32>
    %cst_78 = arith.constant 0.000000e+00 : f32
    %78 = vector.broadcast %cst_78 : f32 to vector<16x256xf32>
    %79 = arith.maximumf %77, %78 : vector<16x256xf32>
    %80 = arith.truncf %79 : vector<16x256xf32> to vector<16x256xbf16>
    %cst_79 = arith.constant dense<0.000000e+00> : vector<32x256xf32>
    %81 = tpu.matmul %16, %80, %cst_79 {dimension_numbers = #tpu.dot_dimension_numbers<[1], [0], [0], [1], [0, 0, 1, 1], [], []>} : vector<32x16xbf16>, vector<16x256xbf16>, vector<32x256xf32> -> vector<32x256xf32>
    %82 = arith.addf %81, %19 : vector<32x256xf32>
    %83 = arith.truncf %82 : vector<32x256xf32> to vector<32x256xbf16>
    %c0_80 = arith.constant 0 : index
    %c0_81 = arith.constant 0 : index
    %c0_82 = arith.constant 0 : index
    %84 = vector.load %arg11[%c0_80, %c0_81, %c0_82] : memref<1x32x256xbf16, #tpu.memory_space<vmem>>, vector<1x32x256xbf16>
    %85 = vector.shape_cast %84 : vector<1x32x256xbf16> to vector<32x256xbf16>
    %86 = vector.shape_cast %83 : vector<32x256xbf16> to vector<1x32x256xbf16>
    tpu.vector_store %arg11[%c0_80, %c0_81, %c0_82], %86 {strides = array<i32>} : memref<1x32x256xbf16, #tpu.memory_space<vmem>>, vector<1x32x256xbf16>,
    return
  }
  func.func @transform_0(%arg0: i32) -> (i32, i32, i32) {
    %c0_i32 = arith.constant 0 : i32
    %c0_i32_0 = arith.constant 0 : i32
    %c0_i32_1 = arith.constant 0 : i32
    return %arg0, %c0_i32, %c0_i32_0 : i32, i32, i32
  }
  func.func @transform_1(%arg0: i32) -> (i32, i32) {
    %c0_i32 = arith.constant 0 : i32
    %c0_i32_0 = arith.constant 0 : i32
    %c0_i32_1 = arith.constant 0 : i32
    return %c0_i32, %c0_i32_0 : i32, i32
  }
  func.func @transform_2(%arg0: i32) -> (i32, i32) {
    %c0_i32 = arith.constant 0 : i32
    %c0_i32_0 = arith.constant 0 : i32
    %c0_i32_1 = arith.constant 0 : i32
    return %c0_i32, %c0_i32_0 : i32, i32
  }
  func.func @transform_3(%arg0: i32) -> (i32, i32) {
    %c0_i32 = arith.constant 0 : i32
    %c0_i32_0 = arith.constant 0 : i32
    %c0_i32_1 = arith.constant 0 : i32
    return %c0_i32, %c0_i32_0 : i32, i32
  }
  func.func @transform_4(%arg0: i32) -> (i32, i32) {
    %c0_i32 = arith.constant 0 : i32
    %c0_i32_0 = arith.constant 0 : i32
    %c0_i32_1 = arith.constant 0 : i32
    return %c0_i32, %c0_i32_0 : i32, i32
  }
  func.func @transform_5(%arg0: i32) -> (i32, i32) {
    %c0_i32 = arith.constant 0 : i32
    %c0_i32_0 = arith.constant 0 : i32
    %c0_i32_1 = arith.constant 0 : i32
    return %c0_i32, %c0_i32_0 : i32, i32
  }
  func.func @transform_6(%arg0: i32) -> (i32, i32) {
    %c0_i32 = arith.constant 0 : i32
    %c0_i32_0 = arith.constant 0 : i32
    %c0_i32_1 = arith.constant 0 : i32
    return %c0_i32, %c0_i32_0 : i32, i32
  }
  func.func @transform_7(%arg0: i32) -> (i32, i32) {
    %c0_i32 = arith.constant 0 : i32
    %c0_i32_0 = arith.constant 0 : i32
    %c0_i32_1 = arith.constant 0 : i32
    return %c0_i32, %c0_i32_0 : i32, i32
  }
  func.func @transform_8(%arg0: i32) -> (i32, i32) {
    %c0_i32 = arith.constant 0 : i32
    %c0_i32_0 = arith.constant 0 : i32
    %c0_i32_1 = arith.constant 0 : i32
    return %c0_i32, %c0_i32_0 : i32, i32
  }
  func.func @transform_9(%arg0: i32) -> (i32, i32) {
    %c0_i32 = arith.constant 0 : i32
    %c0_i32_0 = arith.constant 0 : i32
    %c0_i32_1 = arith.constant 0 : i32
    return %c0_i32, %c0_i32_0 : i32, i32
  }
  func.func @transform_10(%arg0: i32) -> (i32, i32, i32) {
    %c0_i32 = arith.constant 0 : i32
    %c0_i32_0 = arith.constant 0 : i32
    %c0_i32_1 = arith.constant 0 : i32
    return %arg0, %c0_i32, %c0_i32_0 : i32, i32, i32
  }
}

</mosaic_0001>

<bundles_post_ra>
// kernel: identity_mapping_forward.1
= control target key start
LH: loop header
LB: loop body
LE: loop exit
PB: predicated region body
PF: predicated region fallthrough
CT: control target
= control target key end

     0   :  { %s10151_s13 = smov 0   ;;  %s15580_s0 = inlined_call_operand.vmem [shape: bf16[2,32,256], index: 0, kind: input, shape index: {}]   ;;  %s15581_s1 = inlined_call_operand.vmem [shape: f32[32,1], index: 1, kind: input, shape index: {}]   ;;  %s15582_s2 = inlined_call_operand.vmem [shape: f32[32,1], index: 2, kind: input, shape index: {}]   ;;  %s15583_s3 = inlined_call_operand.vmem [shape: bf16[16,32], index: 3, kind: input, shape index: {}]   ;;  %s15584_s4 = inlined_call_operand.vmem [shape: f32[16,1], index: 4, kind: input, shape index: {}]   ;;  %s15585_s5 = inlined_call_operand.vmem [shape: f32[16,1], index: 5, kind: input, shape index: {}]   ;;  %s15586_s6 = inlined_call_operand.vmem [shape: bf16[16,144], index: 6, kind: input, shape index: {}]   ;;  %s15587_s7 = inlined_call_operand.vmem [shape: f32[16,1], index: 7, kind: input, shape index: {}]   ;;  %s15588_s8 = inlined_call_operand.vmem [shape: f32[16,1], index: 8, kind: input, shape index: {}]   ;;  %s15589_s9 = inlined_call_operand.vmem [shape: bf16[32,16], index: 9, kind: input, shape index: {}]   ;;  %s15590_s10 = inlined_call_operand.vmem [shape: bf16[2,32,256], index: 10, kind: output, shape index: {}]  }
   0x1 LB: > { %s9168_s14 = sadd.s32 4294967295, %s10080_s13   ;;  %p9172_p0 = scmp.ge.s32.totalorder %s10080_s13, 1  ;;  %s10080_s13 = sphi %s10151_s13, %s20_s13  }
   0x2   : > { %p312_p1 = scmp.lt.s32.totalorder %s10080_s13, 3 }
   0x4   : > { %p313_p2 = pnand %p9172_p0, %p312_p1 }
   0x6   : > { %316 = sbr.rel (%p313_p2) target bundleno = 1860 (0x744), region = 60 }
   0xb   : > { %v496_v0 = vld [vmem:[%s15581_s1 + $0x10] sm:$0xff]  ;;  %v494_v1 = vld [vmem:[%s15581_s1] sm:$0xff]  ;;  %v15599_v2 = vmov 0   ;;  %v497_v3 = vld [vmem:[%s15581_s1 + $0x18] sm:$0xff]  ;;  %p350_p3 = scmp.lt.s32.totalorder %s9168_s14, 1  ;;  %vm603_vm0 = vcmask 261120  }
   0xc   : > { %9293 = vset.pattern.permute.xlu1 %v15599_v2  ;;  %9292 = vset.pattern.permute.xlu0 %v15599_v2  ;;  %v495_v4 = vld [vmem:[%s15581_s1 + $0x8] sm:$0xff]  ;;  %v498_v6 = vld [vmem:[%s15582_s2] sm:$0xff]  ;;  %v501_v7 = vld [vmem:[%s15582_s2 + $0x18] sm:$0xff]  ;;  %s10083_s27 = smov 112   ;;  %s10084_s28 = smov 96   ;;  %vm361_vm1 = vcmask 139264  }
   0xd   : > { %542 = vperm.xlu1 %9293, %v496_v0   ;;  %532 = vperm.xlu0 %9292, %v494_v1   ;;  %v499_v5 = vld [vmem:[%s15582_s2 + $0x8] sm:$0xff]  ;;  %v500_v8 = vld [vmem:[%s15582_s2 + $0x10] sm:$0xff]  ;;  %v502_v10 = vld [vmem:[%s15584_s4] sm:$0xff]  ;;  %s17386_s14 = smov (!%p350_p3, %s9168_s14), 1  ;;  %s10085_s29 = smov 80   ;;  %vm394_vm2 = vcmask 7168  }
   0xe   : > { %639 = vmatprep.mubr.bf16.mxu0 %v15599_v2  ;;  %v503_v9 = vld [vmem:[%s15584_s4 + $0x8] sm:$0xff]  ;;  %v504_v12 = vld [vmem:[%s15585_s5] sm:$0xff]  ;;  %s9228_s21 = sshll.u32 %s17386_s14, 5  ;;  %s10086_s30 = smov 64   ;;  %vm444_vm3 = vcmask 146568   ;;  %vm397_vm4 = vcmask 1024  }
   0xf   : > { %v505_v11 = vld [vmem:[%s15585_s5 + $0x8] sm:$0xff]  ;;  %s354_s24 = scalar_lea.vmem %s15580_s0, %s9228_s21  ;;  %v9924_v61 = vld [vmem:[%s15583_s3] sm:$0xff]   ;;  %s10087_s11 = smov 48   ;;  %vm447_vm5 = vcmask 140424   ;;  %vm1442_vm6 = vcmask 138248   ;;  %vm2163_vm7 = vcmask 130048  }
  0x10   : > { %v10210_v15 = vld [vmem:[%s354_s24] sm:$0xff]  ;;  %v10212_v16 = vld [vmem:[%s354_s24 + $0x8] sm:$0xff]  ;;  %v10214_v17 = vld [vmem:[%s354_s24 + $0x10] sm:$0xff]  ;;  %s10088_s12 = smov 32   ;;  %s10089_s15 = smov 16   ;;  %vm2168_vm8 = vcmask 392192  }
  0x11   : > { %547 = vperm.xlu1 %9293, %v497_v3   ;;  %537 = vperm.xlu0 %9292, %v495_v4   ;;  %16192 = vst [vmem:[#allocation4_spill] sm:$0xff] %v10210_v15  ;;  %16193 = vst [vmem:[#allocation5_spill] sm:$0xff] %v10212_v16  ;;  %v15597_v18 = vunpack.c.h.bf16 %v10210_v15  ;;  %v10217_v20 = vld [vmem:[%s354_s24 + $0x18] sm:$0xff]  ;;  %v15595_v22 = vunpack.c.h.bf16 %v10212_v16  ;;  %v15594_v23 = vunpack.c.l.bf16 %v10214_v17  ;;  %v15593_v24 = vunpack.c.h.bf16 %v10214_v17  ;;  %s10093_s16 = smov 1   ;;  %s10094_s17 = smov 127  }
  0x12   : > { %16194 = vst [vmem:[#allocation6_spill] sm:$0xff] %v10214_v17  ;;  %16195 = vst [vmem:[#allocation7_spill] sm:$0xff] %v10217_v20  ;;  %v15592_v25 = vunpack.c.l.bf16 %v10217_v20  ;;  %v15591_v26 = vunpack.c.h.bf16 %v10217_v20  ;;  %v15598_v27 = vunpack.c.l.bf16 %v10210_v15  ;;  %v15596_v29 = vunpack.c.l.bf16 %v10212_v16  ;;  %s10095_s18 = smov 126   ;;  %s359_s20 = scalar_lea.vmem %s15590_s10, %s9228_s21 }
  0x13   : > { %vm2171_vm9 = vcmask 523264   ;;  %vm2174_vm10 = vcmask 654336   ;;  %vm2177_vm11 = vcmask 785408   ;;  %vm2180_vm12 = vcmask 916480  }
  0x15   : > { %565 = vperm.xlu1 %9293, %v499_v5   ;;  %560 = vperm.xlu0 %9292, %v498_v6  }
  0x19   : > { %575 = vperm.xlu1 %9293, %v501_v7   ;;  %570 = vperm.xlu0 %9292, %v500_v8  }
  0x1d   : > { %657 = vperm.xlu1 %9293, %v503_v9   ;;  %652 = vperm.xlu0 %9292, %v502_v10  }
  0x21   : > { %671 = vperm.xlu1 %9293, %v505_v11   ;;  %666 = vperm.xlu0 %9292, %v504_v12  }
  0x88   : > { %v543_v13 = vpop.permute.xlu1 %542  ;;  %v533_v14 = vpop.permute.xlu0 %532 }
  0x89   : > { %v551_v28 = vmul.f32 %v533_v14, %v15597_v18  ;;  %v554_v35 = vmul.f32 %v543_v13, %v15594_v23  ;;  %v555_v36 = vmul.f32 %v543_v13, %v15593_v24  ;;  %v550_v39 = vmul.f32 %v533_v14, %v15598_v27 }
  0x8c   : > { %v548_v19 = vpop.permute.xlu1 %547  ;;  %v538_v21 = vpop.permute.xlu0 %537 }
  0x8d   : > { %v553_v30 = vmul.f32 %v538_v21, %v15595_v22  ;;  %v556_v37 = vmul.f32 %v548_v19, %v15592_v25  ;;  %v557_v38 = vmul.f32 %v548_v19, %v15591_v26  ;;  %v552_v40 = vmul.f32 %v538_v21, %v15596_v29 }
  0x90   : > { %v566_v31 = vpop.permute.xlu1 %565  ;;  %v561_v32 = vpop.permute.xlu0 %560 }
  0x91   : > { %v581_v33 = vadd.f32 %v566_v31, %v553_v30  ;;  %v579_v34 = vadd.f32 %v561_v32, %v551_v28  ;;  %v580_v47 = vadd.f32 %v566_v31, %v552_v40  ;;  %v578_v49 = vadd.f32 %v561_v32, %v550_v39 }
  0x92   : > { %v10090_v31 = vmov 0.0   ;;  %v10091_v39 = vmov 1983009808  }
  0x93   : > { %v589_v48 = vmax.f32 %v581_v33, 0.0  ;;  %v587_v50 = vmax.f32 %v579_v34, 0.0  ;;  %v588_v57 = vmax.f32 %v580_v47, 0.0  ;;  %v586_v58 = vmax.f32 %v578_v49, 0.0  ;;  %362 = vst.msk [vmem:[#allocation2] sm:$0x1] %vm361_vm1, %v10090_v31 }
  0x94   : > { %v576_v41 = vpop.permute.xlu1 %575  ;;  %v571_v42 = vpop.permute.xlu0 %570  ;;  %396 = vst.msk [vmem:[#allocation2 + $0x8] sm:$0xff] %vm394_vm2, %v10090_v31  ;;  %400 = vst.msk [vmem:[#allocation2 + $0x20] sm:$0xff] %vm394_vm2, %v10090_v31  ;;  %v773_v40 = vunpack.c.l.s4 %v10091_v39  ;;  %v10092_v47 = vmov 1934713408  }
  0x95   : > { %v584_v43 = vadd.f32 %v576_v41, %v556_v37  ;;  %v582_v44 = vadd.f32 %v571_v42, %v554_v35  ;;  %v583_v45 = vadd.f32 %v571_v42, %v555_v36  ;;  %v585_v46 = vadd.f32 %v576_v41, %v557_v38  ;;  %363 = vst.msk [vmem:[#allocation2 + $0x18] sm:$0x1] %vm361_vm1, %v10090_v31 }
  0x96   : > { %v595_v59 = vpack.c.bf16 %v589_v48, %v587_v50  ;;  %v594_v60 = vpack.c.bf16 %v588_v57, %v586_v58  ;;  %364 = vst.msk [vmem:[#allocation2 + $0x30] sm:$0x1] %vm361_vm1, %v10090_v31  ;;  %365 = vst.msk [vmem:[#allocation2 + $0x48] sm:$0x1] %vm361_vm1, %v10090_v31  ;;  %v775_v41 = vlaneseq  ;;  %v837_v48 = vunpack.c.l.s4 %v10092_v47 }
  0x97   : > { %v591_v51 = vmax.f32 %v583_v45, 0.0  ;;  %v593_v52 = vmax.f32 %v585_v46, 0.0  ;;  %v590_v53 = vmax.f32 %v582_v44, 0.0  ;;  %v592_v54 = vmax.f32 %v584_v43, 0.0  ;;  %366 = vst.msk [vmem:[#allocation2 + $0x60] sm:$0x1] %vm361_vm1, %v10090_v31 }
  0x98   : > { %v653_v62 = vpop.permute.xlu0 %652  ;;  %v658_v63 = vpop.permute.xlu1 %657  ;;  %367 = vst.msk [vmem:[#allocation2 + $0x78] sm:$0x1] %vm361_vm1, %v10090_v31  ;;  %368 = vst.msk [vmem:[#allocation2 + $0x90] sm:$0x1] %vm361_vm1, %v10090_v31  ;;  %v774_v44 = vunpack.c.0.s8 %v773_v40  ;;  %v776_v45 = vshrl.u32 %v775_v41, 7 }
  0x99   : > { %v597_v55 = vpack.c.bf16 %v593_v52, %v591_v51  ;;  %v596_v56 = vpack.c.bf16 %v592_v54, %v590_v53  ;;  %369 = vst.msk [vmem:[#allocation2 + $0xa8] sm:$0x1] %vm361_vm1, %v10090_v31  ;;  %370 = vst.msk [vmem:[#allocation2 + $0xc0] sm:$0x1] %vm361_vm1, %v10090_v31 }
  0x9a   : > { %371 = vst.msk [vmem:[#allocation2 + $0xd8] sm:$0x1] %vm361_vm1, %v10090_v31  ;;  %372 = vst.msk [vmem:[#allocation2 + $0xf0] sm:$0x1] %vm361_vm1, %v10090_v31  ;;  %v10513_v51 = vsub.s32 %v774_v44, %v776_v45 }
  0x9b   : > { %619 = vmatprep.subr.bf16.mxu0 %v597_v55  ;;  %373 = vst.msk [vmem:[#allocation2 + $0x108] sm:$0x1] %vm361_vm1, %v10090_v31  ;;  %374 = vst.msk [vmem:[#allocation2 + $0x120] sm:$0x1] %vm361_vm1, %v10090_v31  ;;  %v838_v55 = vunpack.c.0.s8 %v837_v48 }
  0x9c   : > { %620 = vmatpush1.bf16.msra.mxu0 %v596_v56  ;;  %v667_v3 = vpop.permute.xlu0 %666  ;;  %v672_v9 = vpop.permute.xlu1 %671  ;;  %375 = vst.msk [vmem:[#allocation2 + $0x138] sm:$0x1] %vm361_vm1, %v10090_v31  ;;  %376 = vst.msk [vmem:[#allocation2 + $0x150] sm:$0x1] %vm361_vm1, %v10090_v31 }
  0x9d   : > { %621 = vmatprep.subr.bf16.mxu0 %v595_v59  ;;  %377 = vst.msk [vmem:[#allocation2 + $0x168] sm:$0x1] %vm361_vm1, %v10090_v31  ;;  %378 = vst.msk [vmem:[#allocation2 + $0x11] sm:$0x1] %vm361_vm1, %v10090_v31 }
  0x9e   : > { %379 = vst.msk [vmem:[#allocation2 + $0x29] sm:$0x1] %vm361_vm1, %v10090_v31  ;;  %380 = vst.msk [vmem:[#allocation2 + $0x41] sm:$0x1] %vm361_vm1, %v10090_v31 }
  0x9f   : > { %381 = vst.msk [vmem:[#allocation2 + $0x59] sm:$0x1] %vm361_vm1, %v10090_v31  ;;  %382 = vst.msk [vmem:[#allocation2 + $0x71] sm:$0x1] %vm361_vm1, %v10090_v31 }
  0xa0   : > { %622 = vmatpush1.bf16.msra.mxu0 %v594_v60  ;;  %383 = vst.msk [vmem:[#allocation2 + $0x89] sm:$0x1] %vm361_vm1, %v10090_v31  ;;  %384 = vst.msk [vmem:[#allocation2 + $0xa1] sm:$0x1] %vm361_vm1, %v10090_v31 }
  0xa1   : > { %385 = vst.msk [vmem:[#allocation2 + $0xb9] sm:$0x1] %vm361_vm1, %v10090_v31  ;;  %386 = vst.msk [vmem:[#allocation2 + $0xd1] sm:$0x1] %vm361_vm1, %v10090_v31 }
  0xa2   : > { %387 = vst.msk [vmem:[#allocation2 + $0xe9] sm:$0x1] %vm361_vm1, %v10090_v31  ;;  %388 = vst.msk [vmem:[#allocation2 + $0x101] sm:$0x1] %vm361_vm1, %v10090_v31 }
  0xa3   : > { %9178 = vmatmul.mubr.msk.bf16.vlgmr.msra.gmra.mxu0 %vm603_vm0, %v9924_v61  ;;  %389 = vst.msk [vmem:[#allocation2 + $0x119] sm:$0x1] %vm361_vm1, %v10090_v31  ;;  %390 = vst.msk [vmem:[#allocation2 + $0x131] sm:$0x1] %vm361_vm1, %v10090_v31 }
  0xa4   : > { %9064 = vmatprep.mubr.bf16.mxu0 %v15599_v2  ;;  %391 = vst.msk [vmem:[#allocation2 + $0x149] sm:$0x1] %vm361_vm1, %v10090_v31  ;;  %392 = vst.msk [vmem:[#allocation2 + $0x161] sm:$0x1] %vm361_vm1, %v10090_v31 }
  0xa5   : > { %393 = vst.msk [vmem:[#allocation2 + $0x179] sm:$0x1] %vm361_vm1, %v10090_v31 }
  0xa6   : > { %403 = vst.msk [vmem:[#allocation2 + $0x38] sm:$0xff] %vm394_vm2, %v10090_v31  ;;  %406 = vst.msk [vmem:[#allocation2 + $0x50] sm:$0xff] %vm394_vm2, %v10090_v31 }
  0xa7   : > { %409 = vst.msk [vmem:[#allocation2 + $0x68] sm:$0xff] %vm394_vm2, %v10090_v31  ;;  %412 = vst.msk [vmem:[#allocation2 + $0x80] sm:$0xff] %vm394_vm2, %v10090_v31 }
  0xa8   : > { %415 = vst.msk [vmem:[#allocation2 + $0x98] sm:$0xff] %vm394_vm2, %v10090_v31  ;;  %418 = vst.msk [vmem:[#allocation2 + $0xb0] sm:$0xff] %vm394_vm2, %v10090_v31 }
  0xa9   : > { %421 = vst.msk [vmem:[#allocation2 + $0xc8] sm:$0xff] %vm394_vm2, %v10090_v31  ;;  %424 = vst.msk [vmem:[#allocation2 + $0xe0] sm:$0xff] %vm394_vm2, %v10090_v31 }
  0xaa   : > { %427 = vst.msk [vmem:[#allocation2 + $0xf8] sm:$0xff] %vm394_vm2, %v10090_v31  ;;  %430 = vst.msk [vmem:[#allocation2 + $0x110] sm:$0xff] %vm394_vm2, %v10090_v31 }
  0xab   : > { %433 = vst.msk [vmem:[#allocation2 + $0x128] sm:$0xff] %vm394_vm2, %v10090_v31  ;;  %436 = vst.msk [vmem:[#allocation2 + $0x140] sm:$0xff] %vm394_vm2, %v10090_v31 }
  0xac   : > { %439 = vst.msk [vmem:[#allocation2 + $0x158] sm:$0xff] %vm394_vm2, %v10090_v31  ;;  %442 = vst.msk [vmem:[#allocation2 + $0x170] sm:$0xff] %vm394_vm2, %v10090_v31 }
  0xad   : > { %395 = vst.msk [vmem:[#allocation2] sm:$0xff] %vm394_vm2, %v10090_v31  ;;  %399 = vst.msk [vmem:[#allocation2 + $0x18] sm:$0xff] %vm394_vm2, %v10090_v31 }
  0xae   : > { %446 = vst.msk [vmem:[#allocation2 + $0x8] sm:$0xff] %vm444_vm3, %v10090_v31  ;;  %450 = vst.msk [vmem:[#allocation2 + $0x20] sm:$0xff] %vm444_vm3, %v10090_v31 }
  0xaf   : > { %402 = vst.msk [vmem:[#allocation2 + $0x30] sm:$0xff] %vm394_vm2, %v10090_v31  ;;  %405 = vst.msk [vmem:[#allocation2 + $0x48] sm:$0xff] %vm394_vm2, %v10090_v31 }
  0xb0   : > { %408 = vst.msk [vmem:[#allocation2 + $0x60] sm:$0xff] %vm394_vm2, %v10090_v31  ;;  %411 = vst.msk [vmem:[#allocation2 + $0x78] sm:$0xff] %vm394_vm2, %v10090_v31 }
  0xb1   : > { %414 = vst.msk [vmem:[#allocation2 + $0x90] sm:$0xff] %vm394_vm2, %v10090_v31  ;;  %417 = vst.msk [vmem:[#allocation2 + $0xa8] sm:$0xff] %vm394_vm2, %v10090_v31 }
  0xb2   : > { %420 = vst.msk [vmem:[#allocation2 + $0xc0] sm:$0xff] %vm394_vm2, %v10090_v31  ;;  %423 = vst.msk [vmem:[#allocation2 + $0xd8] sm:$0xff] %vm394_vm2, %v10090_v31 }
  0xb3   : > { %426 = vst.msk [vmem:[#allocation2 + $0xf0] sm:$0xff] %vm394_vm2, %v10090_v31  ;;  %429 = vst.msk [vmem:[#allocation2 + $0x108] sm:$0xff] %vm394_vm2, %v10090_v31 }
  0xb4   : > { %432 = vst.msk [vmem:[#allocation2 + $0x120] sm:$0xff] %vm394_vm2, %v10090_v31  ;;  %435 = vst.msk [vmem:[#allocation2 + $0x138] sm:$0xff] %vm394_vm2, %v10090_v31 }
  0xb5   : > { %438 = vst.msk [vmem:[#allocation2 + $0x150] sm:$0xff] %vm394_vm2, %v10090_v31  ;;  %441 = vst.msk [vmem:[#allocation2 + $0x168] sm:$0xff] %vm394_vm2, %v10090_v31 }
  0xb6   : > { %453 = vst.msk [vmem:[#allocation2 + $0x38] sm:$0xff] %vm444_vm3, %v10090_v31  ;;  %456 = vst.msk [vmem:[#allocation2 + $0x50] sm:$0xff] %vm444_vm3, %v10090_v31 }
  0xb7   : > { %459 = vst.msk [vmem:[#allocation2 + $0x68] sm:$0xff] %vm444_vm3, %v10090_v31  ;;  %462 = vst.msk [vmem:[#allocation2 + $0x80] sm:$0xff] %vm444_vm3, %v10090_v31 }
  0xb8   : > { %465 = vst.msk [vmem:[#allocation2 + $0x98] sm:$0xff] %vm444_vm3, %v10090_v31  ;;  %468 = vst.msk [vmem:[#allocation2 + $0xb0] sm:$0xff] %vm444_vm3, %v10090_v31 }
  0xb9   : > { %471 = vst.msk [vmem:[#allocation2 + $0xc8] sm:$0xff] %vm444_vm3, %v10090_v31  ;;  %474 = vst.msk [vmem:[#allocation2 + $0xe0] sm:$0xff] %vm444_vm3, %v10090_v31 }
  0xba   : > { %477 = vst.msk [vmem:[#allocation2 + $0xf8] sm:$0xff] %vm444_vm3, %v10090_v31  ;;  %480 = vst.msk [vmem:[#allocation2 + $0x110] sm:$0xff] %vm444_vm3, %v10090_v31 }
  0xbb   : > { %483 = vst.msk [vmem:[#allocation2 + $0x128] sm:$0xff] %vm444_vm3, %v10090_v31  ;;  %486 = vst.msk [vmem:[#allocation2 + $0x140] sm:$0xff] %vm444_vm3, %v10090_v31 }
  0xbc   : > { %489 = vst.msk [vmem:[#allocation2 + $0x158] sm:$0xff] %vm444_vm3, %v10090_v31  ;;  %492 = vst.msk [vmem:[#allocation2 + $0x170] sm:$0xff] %vm444_vm3, %v10090_v31 }
  0xbd   : > { %445 = vst.msk [vmem:[#allocation2] sm:$0xff] %vm444_vm3, %v10090_v31  ;;  %449 = vst.msk [vmem:[#allocation2 + $0x18] sm:$0xff] %vm444_vm3, %v10090_v31 }
  0xbe   : > { %452 = vst.msk [vmem:[#allocation2 + $0x30] sm:$0xff] %vm444_vm3, %v10090_v31  ;;  %455 = vst.msk [vmem:[#allocation2 + $0x48] sm:$0xff] %vm444_vm3, %v10090_v31 }
  0xbf   : > { %458 = vst.msk [vmem:[#allocation2 + $0x60] sm:$0xff] %vm444_vm3, %v10090_v31  ;;  %461 = vst.msk [vmem:[#allocation2 + $0x78] sm:$0xff] %vm444_vm3, %v10090_v31 }
  0xc0   : > { %464 = vst.msk [vmem:[#allocation2 + $0x90] sm:$0xff] %vm444_vm3, %v10090_v31  ;;  %467 = vst.msk [vmem:[#allocation2 + $0xa8] sm:$0xff] %vm444_vm3, %v10090_v31 }
  0xc1   : > { %470 = vst.msk [vmem:[#allocation2 + $0xc0] sm:$0xff] %vm444_vm3, %v10090_v31  ;;  %473 = vst.msk [vmem:[#allocation2 + $0xd8] sm:$0xff] %vm444_vm3, %v10090_v31 }
  0xc2   : > { %476 = vst.msk [vmem:[#allocation2 + $0xf0] sm:$0xff] %vm444_vm3, %v10090_v31  ;;  %479 = vst.msk [vmem:[#allocation2 + $0x108] sm:$0xff] %vm444_vm3, %v10090_v31 }
  0xc3   : > { %482 = vst.msk [vmem:[#allocation2 + $0x120] sm:$0xff] %vm444_vm3, %v10090_v31  ;;  %485 = vst.msk [vmem:[#allocation2 + $0x138] sm:$0xff] %vm444_vm3, %v10090_v31 }
  0xc4   : > { %488 = vst.msk [vmem:[#allocation2 + $0x150] sm:$0xff] %vm444_vm3, %v10090_v31  ;;  %491 = vst.msk [vmem:[#allocation2 + $0x168] sm:$0xff] %vm444_vm3, %v10090_v31 }
  0xc5   : > { %398 = vst.msk [vmem:[#allocation2 + $0x10] sm:$0x3] %vm397_vm4, %v10090_v31  ;;  %401 = vst.msk [vmem:[#allocation2 + $0x28] sm:$0x3] %vm397_vm4, %v10090_v31 }
  0xc6   : > { %404 = vst.msk [vmem:[#allocation2 + $0x40] sm:$0x3] %vm397_vm4, %v10090_v31  ;;  %407 = vst.msk [vmem:[#allocation2 + $0x58] sm:$0x3] %vm397_vm4, %v10090_v31 }
  0xc7   : > { %410 = vst.msk [vmem:[#allocation2 + $0x70] sm:$0x3] %vm397_vm4, %v10090_v31  ;;  %413 = vst.msk [vmem:[#allocation2 + $0x88] sm:$0x3] %vm397_vm4, %v10090_v31 }
  0xc8   : > { %416 = vst.msk [vmem:[#allocation2 + $0xa0] sm:$0x3] %vm397_vm4, %v10090_v31  ;;  %419 = vst.msk [vmem:[#allocation2 + $0xb8] sm:$0x3] %vm397_vm4, %v10090_v31 }
  0xc9   : > { %422 = vst.msk [vmem:[#allocation2 + $0xd0] sm:$0x3] %vm397_vm4, %v10090_v31  ;;  %425 = vst.msk [vmem:[#allocation2 + $0xe8] sm:$0x3] %vm397_vm4, %v10090_v31 }
  0xca   : > { %428 = vst.msk [vmem:[#allocation2 + $0x100] sm:$0x3] %vm397_vm4, %v10090_v31  ;;  %431 = vst.msk [vmem:[#allocation2 + $0x118] sm:$0x3] %vm397_vm4, %v10090_v31 }
  0xcb   : > { %434 = vst.msk [vmem:[#allocation2 + $0x130] sm:$0x3] %vm397_vm4, %v10090_v31  ;;  %437 = vst.msk [vmem:[#allocation2 + $0x148] sm:$0x3] %vm397_vm4, %v10090_v31 }
  0xcc   : > { %440 = vst.msk [vmem:[#allocation2 + $0x160] sm:$0x3] %vm397_vm4, %v10090_v31  ;;  %443 = vst.msk [vmem:[#allocation2 + $0x178] sm:$0x3] %vm397_vm4, %v10090_v31 }
  0xcd   : > { %448 = vst.msk [vmem:[#allocation2 + $0x10] sm:$0x3] %vm447_vm5, %v10090_v31  ;;  %451 = vst.msk [vmem:[#allocation2 + $0x28] sm:$0x3] %vm447_vm5, %v10090_v31 }
  0xce   : > { %454 = vst.msk [vmem:[#allocation2 + $0x40] sm:$0x3] %vm447_vm5, %v10090_v31  ;;  %457 = vst.msk [vmem:[#allocation2 + $0x58] sm:$0x3] %vm447_vm5, %v10090_v31 }
  0xcf   : > { %460 = vst.msk [vmem:[#allocation2 + $0x70] sm:$0x3] %vm447_vm5, %v10090_v31  ;;  %463 = vst.msk [vmem:[#allocation2 + $0x88] sm:$0x3] %vm447_vm5, %v10090_v31 }
  0xd0   : > { %466 = vst.msk [vmem:[#allocation2 + $0xa0] sm:$0x3] %vm447_vm5, %v10090_v31  ;;  %469 = vst.msk [vmem:[#allocation2 + $0xb8] sm:$0x3] %vm447_vm5, %v10090_v31 }
  0xd1   : > { %472 = vst.msk [vmem:[#allocation2 + $0xd0] sm:$0x3] %vm447_vm5, %v10090_v31  ;;  %475 = vst.msk [vmem:[#allocation2 + $0xe8] sm:$0x3] %vm447_vm5, %v10090_v31 }
  0xd2   : > { %478 = vst.msk [vmem:[#allocation2 + $0x100] sm:$0x3] %vm447_vm5, %v10090_v31  ;;  %481 = vst.msk [vmem:[#allocation2 + $0x118] sm:$0x3] %vm447_vm5, %v10090_v31 }
  0xd3   : > { %484 = vst.msk [vmem:[#allocation2 + $0x130] sm:$0x3] %vm447_vm5, %v10090_v31  ;;  %487 = vst.msk [vmem:[#allocation2 + $0x148] sm:$0x3] %vm447_vm5, %v10090_v31 }
  0xd4   : > { %490 = vst.msk [vmem:[#allocation2 + $0x160] sm:$0x3] %vm447_vm5, %v10090_v31  ;;  %493 = vst.msk [vmem:[#allocation2 + $0x178] sm:$0x3] %vm447_vm5, %v10090_v31 }
 0x163   : > { %v641_v0 = vpop.f32.mrf.mxu0 }
 0x164   : > { %v660_v1 = vmul.f32 %v653_v62, %v641_v0 }
 0x165   : > { %v643_v4 = vpop.f32.mrf.mxu0 }
 0x166   : > { %v674_v5 = vadd.f32 %v667_v3, %v660_v1  ;;  %v661_v12 = vmul.f32 %v653_v62, %v643_v4 }
 0x167   : > { %v645_v6 = vpop.f32.mrf.mxu0 }
 0x168   : > { %v10247_v7 = vmax.f32 %v674_v5, 0.0  ;;  %v662_v8 = vmul.f32 %v658_v63, %v645_v6  ;;  %v675_v14 = vadd.f32 %v667_v3, %v661_v12 }
 0x169   : > { %v647_v13 = vpop.f32.mrf.mxu0 }
 0x16a   : > { %v676_v10 = vadd.f32 %v672_v9, %v662_v8  ;;  %684 = vrot.lane.b32.xlu0 %v10247_v7, %s10083_s27  ;;  %v663_v19 = vmul.f32 %v658_v63, %v647_v13  ;;  %v10277_v21 = vmax.f32 %v675_v14, 0.0  ;;  %v10522_v63 = vsub.s32 %v838_v55, %v776_v45 }
 0x16c   : > { %v10251_v11 = vmax.f32 %v676_v10, 0.0  ;;  %v677_v28 = vadd.f32 %v672_v9, %v663_v19 }
 0x16e   : > { %690 = vrot.lane.b32.xlu0 %v10247_v7, %s10084_s28  ;;  %686 = vrot.lane.b32.xlu1 %v10251_v11, %s10083_s27  ;;  %v10283_v30 = vmax.f32 %v677_v28, 0.0 }
 0x172   : > { %696 = vrot.lane.b32.xlu0 %v10247_v7, %s10085_s29  ;;  %692 = vrot.lane.b32.xlu1 %v10251_v11, %s10084_s28 }
 0x176   : > { %702 = vrot.lane.b32.xlu0 %v10247_v7, %s10086_s30  ;;  %698 = vrot.lane.b32.xlu1 %v10251_v11, %s10085_s29 }
 0x17a   : > { %708 = vrot.lane.b32.xlu0 %v10247_v7, %s10087_s11  ;;  %704 = vrot.lane.b32.xlu1 %v10251_v11, %s10086_s30 }
 0x17e   : > { %714 = vrot.lane.b32.xlu0 %v10247_v7, %s10088_s12  ;;  %710 = vrot.lane.b32.xlu1 %v10251_v11, %s10087_s11 }
 0x182   : > { %720 = vrot.lane.b32.xlu0 %v10247_v7, %s10089_s15  ;;  %716 = vrot.lane.b32.xlu1 %v10251_v11, %s10088_s12 }
 0x186   : > { %728 = vrot.lane.b32.xlu0 %v10277_v21, %s10083_s27  ;;  %722 = vrot.lane.b32.xlu1 %v10251_v11, %s10089_s15 }
 0x18a   : > { %734 = vrot.lane.b32.xlu0 %v10277_v21, %s10084_s28  ;;  %730 = vrot.lane.b32.xlu1 %v10283_v30, %s10083_s27 }
 0x18e   : > { %740 = vrot.lane.b32.xlu0 %v10277_v21, %s10085_s29  ;;  %736 = vrot.lane.b32.xlu1 %v10283_v30, %s10084_s28 }
 0x192   : > { %746 = vrot.lane.b32.xlu0 %v10277_v21, %s10086_s30  ;;  %742 = vrot.lane.b32.xlu1 %v10283_v30, %s10085_s29 }
 0x196   : > { %752 = vrot.lane.b32.xlu0 %v10277_v21, %s10087_s11  ;;  %748 = vrot.lane.b32.xlu1 %v10283_v30, %s10086_s30 }
 0x19a   : > { %758 = vrot.lane.b32.xlu0 %v10277_v21, %s10088_s12  ;;  %754 = vrot.lane.b32.xlu1 %v10283_v30, %s10087_s11 }
 0x19e   : > { %764 = vrot.lane.b32.xlu0 %v10277_v21, %s10089_s15  ;;  %760 = vrot.lane.b32.xlu1 %v10283_v30, %s10088_s12 }
 0x1a2   : > { %766 = vrot.lane.b32.xlu1 %v10283_v30, %s10089_s15 }
 0x1dc   : > { %v685_v32 = vpop.permute.xlu0 %684 }
 0x1e0   : > { %v691_v33 = vpop.permute.xlu0 %690  ;;  %v10503_v34 = vpop.permute.xlu1 %686 }
 0x1e1   : > { %v770_v52 = vcombine.low %v10247_v7, %v691_v33  ;;  %v771_v28 = vcombine.high %v10247_v7, %v691_v33 }
 0x1e3   : > { %v778_v57 = vrot.slane %v770_v52, %v10513_v51  ;;  %v10549_v7 = vrot.slane %v771_v28, %v10513_v51 }
 0x1e4   : > { %v697_v35 = vpop.permute.xlu0 %696  ;;  %v10505_v36 = vpop.permute.xlu1 %692 }
 0x1e5   : > { %v786_v46 = vcombine.low %v685_v32, %v697_v35  ;;  %v787_v12 = vcombine.high %v685_v32, %v697_v35 }
 0x1e7   : > { %v794_v53 = vrot.slane %v786_v46, %v10513_v51 }
 0x1e8   : > { %v703_v37 = vpop.permute.xlu0 %702  ;;  %v10507_v38 = vpop.permute.xlu1 %698 }
 0x1e9   : > { %v834_v60 = vcombine.low %v778_v57, %v794_v53  ;;  %v835_v13 = vcombine.high %v778_v57, %v794_v53 }
 0x1eb   : > { %v842_v3 = vrot.slane %v834_v60, %v10522_v63  ;;  %v849_v35 = vrot.slane %v835_v13, %v10522_v63 }
 0x1ec   : > { %v709_v42 = vpop.permute.xlu0 %708  ;;  %v10509_v43 = vpop.permute.xlu1 %704 }
 0x1f0   : > { %v715_v49 = vpop.permute.xlu0 %714  ;;  %v10511_v50 = vpop.permute.xlu1 %710 }
 0x1f1   : > { %v802_v54 = vcombine.low %v703_v37, %v715_v49  ;;  %v803_v14 = vcombine.high %v703_v37, %v715_v49 }
 0x1f3   : > { %v810_v61 = vrot.slane %v802_v54, %v10513_v51  ;;  %v817_v32 = vrot.slane %v803_v14, %v10513_v51 }
 0x1f4   : > { %v721_v56 = vpop.permute.xlu0 %720  ;;  %v10518_v59 = vpop.permute.xlu1 %716 }
 0x1f5   : > { %v818_v58 = vcombine.low %v709_v42, %v721_v56  ;;  %v819_v8 = vcombine.high %v709_v42, %v721_v56  ;;  %v10541_v42 = vrot.slane %v787_v12, %v10513_v51 }
 0x1f7   : > { %v826_v62 = vrot.slane %v818_v58, %v10513_v51  ;;  %v833_v39 = vrot.slane %v819_v8, %v10513_v51  ;;  %v850_v46 = vcombine.low %v10549_v7, %v10541_v42 }
 0x1f8   : > { %v10524_v0 = vpop.permute.xlu0 %728  ;;  %v10528_v5 = vpop.permute.xlu1 %722 }
 0x1f9   : > { %v866_v1 = vcombine.low %v810_v61, %v826_v62  ;;  %v867_v9 = vcombine.high %v810_v61, %v826_v62  ;;  %v882_v33 = vcombine.low %v817_v32, %v833_v39  ;;  %v858_v54 = vrot.slane %v850_v46, %v10522_v63 }
 0x1fa   : > { %v883_v55 = vcombine.high %v817_v32, %v833_v39  ;;  %v1090_v57 = vcombine.low %v10511_v50, %v10528_v5  ;;  %v851_v61 = vcombine.high %v10549_v7, %v10541_v42  ;;  %v1058_v62 = vcombine.low %v10503_v34, %v10507_v38 }
 0x1fb   : > { %v874_v4 = vrot.slane %v866_v1, %v10522_v63  ;;  %v881_v41 = vrot.slane %v867_v9, %v10522_v63  ;;  %v10559_v52 = vrot.slane %v882_v33, %v10522_v63  ;;  %v1042_v9 = vcombine.low %v10251_v11, %v10505_v36 }
 0x1fc   : > { %v10530_v6 = vpop.permute.xlu0 %734  ;;  %v10538_v44 = vpop.permute.xlu1 %730  ;;  %v897_v12 = vrot.slane %v883_v55, %v10522_v63  ;;  %v1098_v13 = vrot.slane %v1090_v57, %v10513_v51 }
 0x1fd   : > { %v898_v10 = vcombine.low %v842_v3, %v874_v4  ;;  %v899_v40 = vcombine.high %v842_v3, %v874_v4  ;;  %v900_v45 = vcombine.low %v849_v35, %v881_v41  ;;  %v901_v49 = vcombine.high %v849_v35, %v881_v41 }
 0x1fe   : > { %v906_v58 = vcombine.low %v10277_v21, %v10530_v6  ;;  %v902_v60 = vcombine.low %v858_v54, %v10559_v52  ;;  %v1074_v3 = vcombine.low %v10509_v43, %v10518_v59  ;;  %v903_v39 = vcombine.high %v858_v54, %v10559_v52 }
 0x1ff   : > { %1346 = vrot.lane.b32.xlu0 %v898_v10, %s10093_s16  ;;  %v865_v41 = vrot.slane %v851_v61, %v10522_v63  ;;  %v1050_v7 = vrot.slane %v1042_v9, %v10513_v51 }
 0x200   : > { %v10533_v19 = vpop.permute.xlu0 %740  ;;  %v10554_v47 = vpop.permute.xlu1 %736  ;;  %v914_v14 = vrot.slane %v906_v58, %v10513_v51  ;;  %v1082_v42 = vrot.slane %v1074_v3, %v10513_v51 }
 0x201   : > { %v922_v53 = vcombine.low %v10524_v0, %v10533_v19  ;;  %v905_v55 = vcombine.high %v865_v41, %v897_v12 }
 0x203   : > { %1350 = vrot.lane.b32.xlu0 %v899_v40, %s10093_s16  ;;  %v10581_v4 = vrot.slane %v922_v53, %v10513_v51  ;;  %v1066_v40 = vrot.slane %v1058_v62, %v10513_v51 }
 0x204   : > { %v10546_v37 = vpop.permute.xlu0 %746  ;;  %v10576_v1 = vpop.permute.xlu1 %742 }
 0x205   : > { %v970_v32 = vcombine.low %v914_v14, %v10581_v4  ;;  %v1106_v52 = vcombine.low %v1050_v7, %v1066_v40  ;;  %v971_v9 = vcombine.high %v914_v14, %v10581_v4  ;;  %v1075_v4 = vcombine.high %v10509_v43, %v10518_v59 }
 0x207   : > { %1354 = vrot.lane.b32.xlu0 %v900_v45, %s10093_s16  ;;  %v1138_v45 = vcombine.low %v1082_v42, %v1098_v13  ;;  %v978_v53 = vrot.slane %v970_v32, %v10522_v63  ;;  %v1114_v3 = vrot.slane %v1106_v52, %v10522_v63  ;;  %v1089_v32 = vrot.slane %v1075_v4, %v10513_v51 }
 0x208   : > { %v10556_v48 = vpop.permute.xlu0 %752  ;;  %v10665_v33 = vpop.permute.xlu1 %748 }
 0x209   : > { %v1146_v61 = vrot.slane %v1138_v45, %v10522_v63 }
 0x20b   : > { %1358 = vrot.lane.b32.xlu0 %v901_v49, %s10093_s16  ;;  %v904_v49 = vcombine.low %v865_v41, %v897_v12  ;;  %v907_v12 = vcombine.high %v10277_v21, %v10530_v6  ;;  %v1170_v41 = vcombine.low %v1114_v3, %v1146_v61  ;;  %v985_v21 = vrot.slane %v971_v9, %v10522_v63 }
 0x20c   : > { %v10565_v56 = vpop.permute.xlu0 %758  ;;  %v10672_v62 = vpop.permute.xlu1 %754  ;;  %v1171_v59 = vcombine.high %v1114_v3, %v1146_v61 }
 0x20d   : > { %v938_v8 = vcombine.low %v10546_v37, %v10565_v56 }
 0x20f   : > { %1362 = vrot.lane.b32.xlu0 %v902_v60, %s10093_s16  ;;  %v946_v35 = vrot.slane %v938_v8, %v10513_v51  ;;  %v923_v8 = vcombine.high %v10524_v0, %v10533_v19 }
 0x210   : > { %v765_v10 = vpop.permute.xlu0 %764 }
 0x211   : > { %v954_v28 = vcombine.low %v10556_v48, %v765_v10  ;;  %v955_v57 = vcombine.high %v10556_v48, %v765_v10  ;;  %v1091_v48 = vcombine.high %v10511_v50, %v10528_v5  ;;  %v1139_v10 = vcombine.high %v1082_v42, %v1098_v13 }
 0x212   : > { %v937_v14 = vrot.slane %v923_v8, %v10513_v51  ;;  %v1043_v5 = vcombine.high %v10251_v11, %v10505_v36  ;;  %v1194_v8 = vcombine.low %v10538_v44, %v10576_v1 }
 0x213   : > { %v962_v31 = vrot.slane %v954_v28, %v10513_v51  ;;  %1366 = vrot.lane.b32.xlu0 %v903_v39, %s10093_s16  ;;  %v939_v28 = vcombine.high %v10546_v37, %v10565_v56  ;;  %v969_v39 = vrot.slane %v955_v57, %v10513_v51  ;;  %v1059_v37 = vcombine.high %v10503_v34, %v10507_v38  ;;  %v10701_v38 = vpop.permute.xlu1 %760 }
 0x214   : > { %v1107_v56 = vcombine.high %v1050_v7, %v1066_v40  ;;  %v1105_v6 = vrot.slane %v1091_v48, %v10513_v51  ;;  %v921_v34 = vrot.slane %v907_v12, %v10513_v51  ;;  %v1153_v40 = vrot.slane %v1139_v10, %v10522_v63 }
 0x215   : > { %v1002_v46 = vcombine.low %v946_v35, %v962_v31  ;;  %v1003_v58 = vcombine.high %v946_v35, %v962_v31  ;;  %v953_v50 = vrot.slane %v939_v28, %v10513_v51  ;;  %v1073_v42 = vrot.slane %v1059_v37, %v10513_v51 }
 0x216   : > { %v986_v35 = vcombine.low %v921_v34, %v937_v14  ;;  %v1121_v11 = vrot.slane %v1107_v56, %v10522_v63  ;;  %v1057_v36 = vrot.slane %v1043_v5, %v10513_v51  ;;  %v1154_v31 = vcombine.low %v1089_v32, %v1105_v6 }
 0x217   : > { %1370 = vrot.lane.b32.xlu0 %v904_v49, %s10093_s16  ;;  %v1010_v54 = vrot.slane %v1002_v46, %v10522_v63  ;;  %v1017_v19 = vrot.slane %v1003_v58, %v10522_v63  ;;  %v1018_v43 = vcombine.low %v953_v50, %v969_v39  ;;  %v767_v52 = vpop.permute.xlu1 %766  ;;  %v987_v3 = vcombine.high %v921_v34, %v937_v14 }
 0x218   : > { %v1172_v7 = vcombine.low %v1121_v11, %v1153_v40  ;;  %v1122_v49 = vcombine.low %v1057_v36, %v1073_v42  ;;  %v1226_v57 = vcombine.low %v10672_v62, %v767_v52  ;;  %v1173_v58 = vcombine.high %v1121_v11, %v1153_v40 }
 0x219   : > { %v1034_v60 = vcombine.low %v978_v53, %v1010_v54  ;;  %v1035_v0 = vcombine.high %v978_v53, %v1010_v54  ;;  %v1036_v13 = vcombine.low %v985_v21, %v1017_v19  ;;  %v1037_v45 = vcombine.high %v985_v21, %v1017_v19 }
 0x21a   : > { %v1026_v46 = vrot.slane %v1018_v43, %v10522_v63  ;;  %v994_v53 = vrot.slane %v986_v35, %v10522_v63  ;;  %v1162_v54 = vrot.slane %v1154_v31, %v10522_v63  ;;  %v1130_v61 = vrot.slane %v1122_v49, %v10522_v63 }
 0x21b   : > { %1374 = vrot.lane.b32.xlu0 %v905_v55, %s10093_s16  ;;  %1348 = vrot.lane.b32.xlu1 %v1034_v60, %s10093_s16  ;;  %v1019_v55 = vcombine.high %v953_v50, %v969_v39  ;;  %v1210_v9 = vcombine.low %v10665_v33, %v10701_v38  ;;  %v1155_v28 = vcombine.high %v1089_v32, %v1105_v6 }
 0x21c   : > { %v1038_v60 = vcombine.low %v994_v53, %v1026_v46  ;;  %v1178_v48 = vcombine.low %v10283_v30, %v10554_v47  ;;  %v1234_v10 = vrot.slane %v1226_v57, %v10513_v51  ;;  %v1174_v12 = vcombine.low %v1130_v61, %v1162_v54 }
 0x21d   : > { %v1039_v39 = vcombine.high %v994_v53, %v1026_v46  ;;  %v1202_v19 = vrot.slane %v1194_v8, %v10513_v51  ;;  %v1218_v37 = vrot.slane %v1210_v9, %v10513_v51  ;;  %v1001_v56 = vrot.slane %v987_v3, %v10522_v63 }
 0x21e   : > { %v1169_v4 = vrot.slane %v1155_v28, %v10522_v63  ;;  %v1186_v14 = vrot.slane %v1178_v48, %v10513_v51  ;;  %v1175_v21 = vcombine.high %v1130_v61, %v1162_v54 }
 0x21f   : > { %1378 = vrot.lane.b32.xlu0 %v1170_v41, %s10093_s16  ;;  %1352 = vrot.lane.b32.xlu1 %v1035_v0, %s10093_s16  ;;  %v1033_v41 = vrot.slane %v1019_v55, %v10522_v63  ;;  %v1123_v0 = vcombine.high %v1057_v36, %v1073_v42  ;;  %v1274_v50 = vcombine.low %v1218_v37, %v1234_v10 }
 0x220   : > { %v1242_v6 = vcombine.low %v1186_v14, %v1202_v19  ;;  %v1227_v42 = vcombine.high %v10672_v62, %v767_v52  ;;  %v1275_v32 = vcombine.high %v1218_v37, %v1234_v10  ;;  %v1195_v36 = vcombine.high %v10538_v44, %v10576_v1 }
 0x221   : > { %v1040_v5 = vcombine.low %v1001_v56, %v1033_v41  ;;  %v1137_v34 = vrot.slane %v1123_v0, %v10522_v63  ;;  %v1243_v31 = vcombine.high %v1186_v14, %v1202_v19 }
 0x222   : > { %v1250_v40 = vrot.slane %v1242_v6, %v10522_v63  ;;  %v1241_v46 = vrot.slane %v1227_v42, %v10513_v51  ;;  %v1289_v49 = vrot.slane %v1275_v32, %v10522_v63  ;;  %v1209_v52 = vrot.slane %v1195_v36, %v10513_v51 }
 0x223   : > { %1382 = vrot.lane.b32.xlu0 %v1171_v59, %s10093_s16  ;;  %1356 = vrot.lane.b32.xlu1 %v1036_v13, %s10093_s16  ;;  %v1176_v43 = vcombine.low %v1137_v34, %v1169_v4  ;;  %v1041_v59 = vcombine.high %v1001_v56, %v1033_v41  ;;  %v1282_v13 = vrot.slane %v1274_v50, %v10522_v63 }
 0x224   : > { %v1177_v35 = vcombine.high %v1137_v34, %v1169_v4  ;;  %v1257_v1 = vrot.slane %v1243_v31, %v10522_v63 }
 0x225   : > { %v1306_v11 = vcombine.low %v1250_v40, %v1282_v13  ;;  %v1307_v62 = vcombine.high %v1250_v40, %v1282_v13 }
 0x226   : > { %v1308_v53 = vcombine.low %v1257_v1, %v1289_v49 }
 0x227   : > { %1386 = vrot.lane.b32.xlu0 %v1172_v7, %s10093_s16  ;;  %1360 = vrot.lane.b32.xlu1 %v1037_v45, %s10093_s16  ;;  %v1211_v7 = vcombine.high %v10665_v33, %v10701_v38  ;;  %v1179_v45 = vcombine.high %v10283_v30, %v10554_v47  ;;  %v1309_v30 = vcombine.high %v1257_v1, %v1289_v49 }
 0x229   : > { %v1225_v44 = vrot.slane %v1211_v7, %v10513_v51  ;;  %v1193_v33 = vrot.slane %v1179_v45, %v10513_v51 }
 0x22b   : > { %1390 = vrot.lane.b32.xlu0 %v1173_v58, %s10093_s16  ;;  %1364 = vrot.lane.b32.xlu1 %v1038_v60, %s10093_s16  ;;  %v1290_v38 = vcombine.low %v1225_v44, %v1241_v46  ;;  %v1258_v54 = vcombine.low %v1193_v33, %v1209_v52  ;;  %v1291_v57 = vcombine.high %v1225_v44, %v1241_v46 }
 0x22c   : > { %v1259_v60 = vcombine.high %v1193_v33, %v1209_v52 }
 0x22d   : > { %v1298_v47 = vrot.slane %v1290_v38, %v10522_v63  ;;  %v1266_v55 = vrot.slane %v1258_v54, %v10522_v63  ;;  %v1305_v3 = vrot.slane %v1291_v57, %v10522_v63 }
 0x22e   : > { %v1273_v8 = vrot.slane %v1259_v60, %v10522_v63 }
 0x22f   : > { %1394 = vrot.lane.b32.xlu0 %v1174_v12, %s10093_s16  ;;  %1368 = vrot.lane.b32.xlu1 %v1039_v39, %s10093_s16  ;;  %v1310_v58 = vcombine.low %v1266_v55, %v1298_v47  ;;  %v1311_v61 = vcombine.high %v1266_v55, %v1298_v47 }
 0x230   : > { %v1312_v9 = vcombine.low %v1273_v8, %v1305_v3  ;;  %v1313_v28 = vcombine.high %v1273_v8, %v1305_v3 }
 0x233   : > { %1398 = vrot.lane.b32.xlu0 %v1175_v21, %s10093_s16  ;;  %1372 = vrot.lane.b32.xlu1 %v1040_v5, %s10093_s16 }
 0x237   : > { %1402 = vrot.lane.b32.xlu0 %v1176_v43, %s10093_s16  ;;  %1376 = vrot.lane.b32.xlu1 %v1041_v59, %s10093_s16 }
 0x23b   : > { %1406 = vrot.lane.b32.xlu0 %v1177_v35, %s10093_s16  ;;  %1380 = vrot.lane.b32.xlu1 %v1306_v11, %s10093_s16 }
 0x23f   : > { %1384 = vrot.lane.b32.xlu1 %v1307_v62, %s10093_s16 }
 0x243   : > { %1388 = vrot.lane.b32.xlu1 %v1308_v53, %s10093_s16 }
 0x247   : > { %1392 = vrot.lane.b32.xlu1 %v1309_v30, %s10093_s16 }
 0x24b   : > { %1396 = vrot.lane.b32.xlu1 %v1310_v58, %s10093_s16 }
 0x24f   : > { %1400 = vrot.lane.b32.xlu1 %v1311_v61, %s10093_s16 }
 0x253   : > { %1404 = vrot.lane.b32.xlu1 %v1312_v9, %s10093_s16 }
 0x257   : > { %1408 = vrot.lane.b32.xlu1 %v1313_v28, %s10093_s16 }
 0x271   : > { %v1347_v48 = vpop.permute.xlu0 %1346 }
 0x272   : > { %1443 = vst.msk [vmem:[#allocation2 + $0x1] sm:$0xff] %vm1442_vm6, %v1347_v48 }
 0x275   : > { %v1351_v10 = vpop.permute.xlu0 %1350 }
 0x276   : > { %1445 = vst.msk [vmem:[#allocation2 + $0x19] sm:$0xff] %vm1442_vm6, %v1351_v10 }
 0x279   : > { %v1355_v12 = vpop.permute.xlu0 %1354  ;;  %v10769_v39 = vld [vmem:[#allocation2] sm:$0xff] }
 0x27a   : > { %1447 = vst.msk [vmem:[#allocation2 + $0x31] sm:$0xff] %vm1442_vm6, %v1355_v12  ;;  %2275 = vrot.lane.b32.xlu0 %v10769_v39, %s10094_s17 }
 0x27d   : > { %v1359_v41 = vpop.permute.xlu0 %1358  ;;  %v10774_v0 = vld [vmem:[#allocation2 + $0x18] sm:$0xff] }
 0x27e   : > { %v10776_v19 = vld [vmem:[#allocation2 + $0x19] sm:$0xff]  ;;  %1449 = vst.msk [vmem:[#allocation2 + $0x49] sm:$0xff] %vm1442_vm6, %v1359_v41  ;;  %2279 = vrot.lane.b32.xlu0 %v10774_v0, %s10094_s17 }
 0x27f   : > { %5583 = vrot.lane.b32.xlu1 %v10776_v19, %s10095_s18 }
 0x281   : > { %v1363_v37 = vpop.permute.xlu0 %1362  ;;  %v10783_v56 = vld [vmem:[#allocation2 + $0x30] sm:$0xff] }
 0x282   : > { %1451 = vst.msk [vmem:[#allocation2 + $0x61] sm:$0xff] %vm1442_vm6, %v1363_v37  ;;  %2283 = vrot.lane.b32.xlu0 %v10783_v56, %s10094_s17  ;;  %v9989_v4 = vld [vmem:[#allocation2 + $0x5] ss:$48 sps:$4 sm:$0xff]   ;;  %v9925_v45 = vld [vmem:[#allocation2] ss:$48 sps:$4 sm:$0xff]  }
 0x283   : > { %v10800_v43 = vrot.slane %v9989_v4, %v10513_v51  ;;  %v9949_v33 = vld [vmem:[#allocation2 + $0x1] ss:$48 sps:$4 sm:$0xff]   ;;  %v10840_v58 = vrot.slane %v9925_v45, %v10513_v51 }
 0x284   : > { %v10855_v3 = vrot.slane %v9949_v33, %v10513_v51 }
 0x285   : > { %v1367_v14 = vpop.permute.xlu0 %1366  ;;  %v10788_v50 = vld [vmem:[#allocation2 + $0x48] sm:$0xff]  ;;  %16197 = vst [vmem:[#allocation9_spill] sm:$0xff] %v10840_v58 }
 0x286   : > { %v10790_v21 = vld [vmem:[#allocation2 + $0x49] sm:$0xff]  ;;  %1453 = vst.msk [vmem:[#allocation2 + $0x79] sm:$0xff] %vm1442_vm6, %v1367_v14  ;;  %2287 = vrot.lane.b32.xlu0 %v10788_v50, %s10094_s17  ;;  %16198 = vst [vmem:[#allocation10_spill] sm:$0xff] %v10855_v3 }
 0x287   : > { %5591 = vrot.lane.b32.xlu1 %v10790_v21, %s10095_s18  ;;  %v9990_v5 = vld [vmem:[#allocation2 + $0x1d] ss:$48 sps:$4 sm:$0xff]   ;;  %v9927_v7 = vld [vmem:[#allocation2 + $0x18] ss:$48 sps:$4 sm:$0xff]  }
 0x288   : > { %v10803_v59 = vrot.slane %v9990_v5, %v10513_v51  ;;  %v9951_v46 = vld [vmem:[#allocation2 + $0x19] ss:$48 sps:$4 sm:$0xff]   ;;  %v10834_v53 = vrot.slane %v9927_v7, %v10513_v51 }
 0x289   : > { %v1371_v6 = vpop.permute.xlu0 %1370  ;;  %v10797_v34 = vld [vmem:[#allocation2 + $0x60] sm:$0xff]  ;;  %v10837_v30 = vrot.slane %v9951_v46, %v10513_v51 }
 0x28a   : > { %1455 = vst.msk [vmem:[#allocation2 + $0x91] sm:$0xff] %vm1442_vm6, %v1371_v6  ;;  %2291 = vrot.lane.b32.xlu0 %v10797_v34, %s10094_s17  ;;  %v4040_v13 = vcombine.high %v10800_v43, %v10803_v59  ;;  %v1571_v48 = vcombine.low %v10840_v58, %v10834_v53 }
 0x28b   : > { %16196 = vst [vmem:[#allocation8_spill] sm:$0xff] %v10837_v30  ;;  %v4023_v12 = vcombine.low %v10855_v3, %v10837_v30 }
 0x28c   : > { %v10885_v6 = vrot.slane %v1571_v48, %v10522_v63 }
 0x28d   : > { %v1375_v40 = vpop.permute.xlu0 %1374  ;;  %v1349_v42 = vpop.permute.xlu1 %1348  ;;  %v10810_v32 = vld [vmem:[#allocation2 + $0x78] sm:$0xff] }
 0x28e   : > { %v10812_v35 = vld [vmem:[#allocation2 + $0x79] sm:$0xff]  ;;  %1457 = vst.msk [vmem:[#allocation2 + $0xa9] sm:$0xff] %vm1442_vm6, %v1375_v40  ;;  %1444 = vst.msk [vmem:[#allocation2 + $0x9] sm:$0xff] %vm1442_vm6, %v1349_v42  ;;  %2295 = vrot.lane.b32.xlu0 %v10810_v32, %s10094_s17  ;;  %v4039_v42 = vcombine.low %v10800_v43, %v10803_v59 }
 0x28f   : > { %5599 = vrot.lane.b32.xlu1 %v10812_v35, %s10095_s18  ;;  %16203 = vst [vmem:[#allocation15_spill] sm:$0xff] %v10885_v6 }
 0x290   : > { %v10904_v46 = vrot.slane %v4039_v42, %v10522_v63 }
 0x291   : > { %v1379_v11 = vpop.permute.xlu0 %1378  ;;  %v1353_v36 = vpop.permute.xlu1 %1352  ;;  %v10820_v31 = vld [vmem:[#allocation2 + $0x90] sm:$0xff] }
 0x292   : > { %1459 = vst.msk [vmem:[#allocation2 + $0xc1] sm:$0xff] %vm1442_vm6, %v1379_v11  ;;  %1446 = vst.msk [vmem:[#allocation2 + $0x21] sm:$0xff] %vm1442_vm6, %v1353_v36  ;;  %2299 = vrot.lane.b32.xlu0 %v10820_v31, %s10094_s17  ;;  %v9929_v1 = vld [vmem:[#allocation2 + $0x60] ss:$48 sps:$4 sm:$0xff]   ;;  %v9991_v28 = vld [vmem:[#allocation2 + $0x65] ss:$48 sps:$4 sm:$0xff]   ;;  %v10891_v11 = vrot.slane %v4023_v12, %v10522_v63 }
 0x293   : > { %v9953_v38 = vld [vmem:[#allocation2 + $0x61] ss:$48 sps:$4 sm:$0xff]   ;;  %v10843_v60 = vrot.slane %v9929_v1, %v10513_v51  ;;  %v4006_v40 = vrot.slane %v9991_v28, %v10513_v51  ;;  %16205 = vst [vmem:[#allocation17_spill] sm:$0xff] %v10904_v46 }
 0x294   : > { %v10858_v8 = vrot.slane %v9953_v38, %v10513_v51  ;;  %16204 = vst [vmem:[#allocation16_spill] sm:$0xff] %v10891_v11 }
 0x295   : > { %v1383_v62 = vpop.permute.xlu0 %1382  ;;  %v1357_v49 = vpop.permute.xlu1 %1356  ;;  %v10826_v52 = vld [vmem:[#allocation2 + $0xa8] sm:$0xff] }
 0x296   : > { %v5529_v44 = vld [vmem:[#allocation2 + $0xa9] sm:$0xff]  ;;  %1461 = vst.msk [vmem:[#allocation2 + $0xd9] sm:$0xff] %vm1442_vm6, %v1383_v62  ;;  %1448 = vst.msk [vmem:[#allocation2 + $0x39] sm:$0xff] %vm1442_vm6, %v1357_v49  ;;  %2303 = vrot.lane.b32.xlu0 %v10826_v52, %s10094_s17 }
 0x297   : > { %5607 = vrot.lane.b32.xlu1 %v5529_v44, %s10095_s18  ;;  %v9931_v54 = vld [vmem:[#allocation2 + $0x78] ss:$48 sps:$4 sm:$0xff]   ;;  %16199 = vst [vmem:[#allocation11_spill] sm:$0xff] %v10858_v8  ;;  %v9992_v41 = vld [vmem:[#allocation2 + $0x7d] ss:$48 sps:$4 sm:$0xff]  }
 0x298   : > { %v9955_v47 = vld [vmem:[#allocation2 + $0x79] ss:$48 sps:$4 sm:$0xff]   ;;  %v10846_v61 = vrot.slane %v9931_v54, %v10513_v51  ;;  %v4022_v5 = vrot.slane %v9992_v41, %v10513_v51 }
 0x299   : > { %v1387_v55 = vpop.permute.xlu0 %1386  ;;  %v1361_v57 = vpop.permute.xlu1 %1360  ;;  %v10861_v9 = vrot.slane %v9955_v47, %v10513_v51  ;;  %v11110_v46 = vld [vmem:[#allocation2 + $0x1a] sm:$0xff] }
 0x29a   : > { %1463 = vst.msk [vmem:[#allocation2 + $0xf1] sm:$0xff] %vm1442_vm6, %v1387_v55  ;;  %1450 = vst.msk [vmem:[#allocation2 + $0x51] sm:$0xff] %vm1442_vm6, %v1361_v57  ;;  %3133 = vrot.lane.b32.xlu0 %v10769_v39, %s10095_s18  ;;  %v1603_v10 = vcombine.low %v10843_v60, %v10846_v61  ;;  %v4071_v7 = vcombine.low %v4006_v40, %v4022_v5  ;;  %v4072_v49 = vcombine.high %v4006_v40, %v4022_v5  ;;  %v5519_v40 = vld [vmem:[#allocation2 + $0x31] sm:$0xff] }
 0x29b   : > { %4725 = vrot.lane.b32.xlu1 %v10776_v19, %s10094_s17  ;;  %16200 = vst [vmem:[#allocation12_spill] sm:$0xff] %v10861_v9  ;;  %v4055_v39 = vcombine.low %v10858_v8, %v10861_v9 }
 0x29c   : > { %v10872_v4 = vrot.slane %v1603_v10, %v10522_v63  ;;  %v10907_v62 = vrot.slane %v4071_v7, %v10522_v63 }
 0x29d   : > { %v1391_v19 = vpop.permute.xlu0 %1390  ;;  %v1365_v37 = vpop.permute.xlu1 %1364  ;;  %v10881_v14 = vrot.slane %v4055_v39, %v10522_v63  ;;  %v2216_v10 = vld [vmem:[#allocation2 + $0x38] sm:$0xff] }
 0x29e   : > { %16201 = vst [vmem:[#allocation13_spill] sm:$0xff] %v10872_v4  ;;  %1465 = vst.msk [vmem:[#allocation2 + $0x109] sm:$0xff] %vm1442_vm6, %v1391_v19  ;;  %3137 = vrot.lane.b32.xlu0 %v10774_v0, %s10095_s18  ;;  %v5515_v19 = vld [vmem:[#allocation2 + $0x1] sm:$0xff]  ;;  %v10021_v17 = vld [vmem:[#allocation2 + $0xa] ss:$48 sps:$4 sm:$0xff]  }
 0x29f   : > { %1452 = vst.msk [vmem:[#allocation2 + $0x69] sm:$0xff] %vm1442_vm6, %v1365_v37  ;;  %4733 = vrot.lane.b32.xlu1 %v10790_v21, %s10094_s17  ;;  %16202 = vst [vmem:[#allocation14_spill] sm:$0xff] %v10881_v14 }
 0x2a0   : > { %16206 = vst [vmem:[#allocation18_spill] sm:$0xff] %v10907_v62 }
 0x2a1   : > { %v1395_v0 = vpop.permute.xlu0 %1394  ;;  %v1369_v36 = vpop.permute.xlu1 %1368  ;;  %v2218_v39 = vld [vmem:[#allocation2 + $0x50] sm:$0xff] }
 0x2a2   : > { %1467 = vst.msk [vmem:[#allocation2 + $0x121] sm:$0xff] %vm1442_vm6, %v1395_v0  ;;  %1454 = vst.msk [vmem:[#allocation2 + $0x81] sm:$0xff] %vm1442_vm6, %v1369_v36  ;;  %3141 = vrot.lane.b32.xlu0 %v10783_v56, %s10095_s18  ;;  %v10920_v56 = vrot.slane %v4040_v13, %v10522_v63  ;;  %v2214_v13 = vld [vmem:[#allocation2 + $0x20] sm:$0xff] }
 0x2a3   : > { %4741 = vrot.lane.b32.xlu1 %v10812_v35, %s10094_s17  ;;  %v10923_v35 = vrot.slane %v4072_v49, %v10522_v63  ;;  %v5523_v0 = vld [vmem:[#allocation2 + $0x61] sm:$0xff]  ;;  %v5527_v49 = vld [vmem:[#allocation2 + $0x91] sm:$0xff] }
 0x2a4   : > { %v10005_v26 = vld [vmem:[#allocation2 + $0xc2] ss:$48 sps:$4 sm:$0xff]  }
 0x2a5   : > { %v1399_v1 = vpop.permute.xlu0 %1398  ;;  %v1373_v33 = vpop.permute.xlu1 %1372  ;;  %v9994_v28 = vld [vmem:[#allocation2 + $0xdd] ss:$48 sps:$4 sm:$0xff]   ;;  %v10023_v2 = vld [vmem:[#allocation2 + $0x22] ss:$48 sps:$4 sm:$0xff]   ;;  %v11068_v20 = vrot.slane %v10005_v26, %v10513_v51 }
 0x2a6   : > { %1469 = vst.msk [vmem:[#allocation2 + $0x139] sm:$0xff] %vm1442_vm6, %v1399_v1  ;;  %1456 = vst.msk [vmem:[#allocation2 + $0x99] sm:$0xff] %vm1442_vm6, %v1373_v33  ;;  %3145 = vrot.lane.b32.xlu0 %v10788_v50, %s10095_s18  ;;  %v2212_v50 = vld [vmem:[#allocation2 + $0x8] sm:$0xff]  ;;  %v10947_v12 = vrot.slane %v9994_v28, %v10513_v51  ;;  %v10047_v15 = vld [vmem:[#allocation2 + $0x21] ss:$48 sps:$4 sm:$0xff]  }
 0x2a7   : > { %4749 = vrot.lane.b32.xlu1 %v5529_v44, %s10094_s17  ;;  %v9993_v44 = vld [vmem:[#allocation2 + $0xc5] ss:$48 sps:$4 sm:$0xff]   ;;  %16221 = vst [vmem:[#allocation33_spill] sm:$0xff] %v11068_v20  ;;  %v5524_v8 = vld [vmem:[#allocation2 + $0x69] sm:$0xff] }
 0x2a8   : > { %v2220_v37 = vld [vmem:[#allocation2 + $0x68] sm:$0xff] }
 0x2a9   : > { %v1403_v55 = vpop.permute.xlu0 %1402  ;;  %v1377_v57 = vpop.permute.xlu1 %1376  ;;  %v2222_v42 = vld [vmem:[#allocation2 + $0x80] sm:$0xff]  ;;  %v9965_v28 = vld [vmem:[#allocation2 + $0x8] ss:$48 sps:$4 sm:$0xff]  }
 0x2aa   : > { %1471 = vst.msk [vmem:[#allocation2 + $0x151] sm:$0xff] %vm1442_vm6, %v1403_v55  ;;  %1458 = vst.msk [vmem:[#allocation2 + $0xb1] sm:$0xff] %vm1442_vm6, %v1377_v57  ;;  %3149 = vrot.lane.b32.xlu0 %v10797_v34, %s10095_s18  ;;  %v10944_v34 = vrot.slane %v9993_v44, %v10513_v51  ;;  %v10976_v55 = vld [vmem:[#allocation2 + $0xa] sm:$0xff]  ;;  %v10981_v57 = vld [vmem:[#allocation2 + $0x3a] sm:$0xff] }
 0x2ab   : > { %2277 = vrot.lane.b32.xlu1 %v2212_v50, %s10094_s17  ;;  %v9967_v44 = vld [vmem:[#allocation2 + $0x20] ss:$48 sps:$4 sm:$0xff]  }
 0x2ad   : > { %v1407_v43 = vpop.permute.xlu0 %1406  ;;  %v1381_v59 = vpop.permute.xlu1 %1380  ;;  %v2224_v36 = vld [vmem:[#allocation2 + $0x98] sm:$0xff] }
 0x2ae   : > { %1473 = vst.msk [vmem:[#allocation2 + $0x169] sm:$0xff] %vm1442_vm6, %v1407_v43  ;;  %1460 = vst.msk [vmem:[#allocation2 + $0xc9] sm:$0xff] %vm1442_vm6, %v1381_v59  ;;  %3153 = vrot.lane.b32.xlu0 %v10810_v32, %s10095_s18  ;;  %v10991_v43 = vld [vmem:[#allocation2 + $0x9a] sm:$0xff]  ;;  %v10996_v59 = vld [vmem:[#allocation2 + $0x2] sm:$0xff] }
 0x2af   : > { %2281 = vrot.lane.b32.xlu1 %v2214_v13, %s10094_s17  ;;  %v11044_v22 = vld [vmem:[#allocation2 + $0x92] sm:$0xff] }
 0x2b1   : > { %v1385_v48 = vpop.permute.xlu1 %1384  ;;  %v2226_v1 = vld [vmem:[#allocation2 + $0xb0] sm:$0xff] }
 0x2b2   : > { %1462 = vst.msk [vmem:[#allocation2 + $0xe1] sm:$0xff] %vm1442_vm6, %v1385_v48  ;;  %3157 = vrot.lane.b32.xlu0 %v10820_v31, %s10095_s18  ;;  %v11046_v29 = vld [vmem:[#allocation2 + $0xb2] sm:$0xff] }
 0x2b3   : > { %2285 = vrot.lane.b32.xlu1 %v2216_v10, %s10094_s17  ;;  %v10027_v45 = vld [vmem:[#allocation2 + $0x82] ss:$48 sps:$4 sm:$0xff]  }
 0x2b5   : > { %v1389_v32 = vpop.permute.xlu1 %1388  ;;  %v10011_v23 = vld [vmem:[#allocation2 + $0x13a] ss:$48 sps:$4 sm:$0xff]  }
 0x2b6   : > { %1464 = vst.msk [vmem:[#allocation2 + $0xf9] sm:$0xff] %vm1442_vm6, %v1389_v32  ;;  %3161 = vrot.lane.b32.xlu0 %v10826_v52, %s10095_s18  ;;  %v11006_v32 = vld [vmem:[#allocation2 + $0x32] sm:$0xff] }
 0x2b7   : > { %2289 = vrot.lane.b32.xlu1 %v2218_v39, %s10094_s17 }
 0x2b9   : > { %v1393_v31 = vpop.permute.xlu1 %1392 }
 0x2ba   : > { %1466 = vst.msk [vmem:[#allocation2 + $0x111] sm:$0xff] %vm1442_vm6, %v1393_v31  ;;  %5579 = vrot.lane.b32.xlu0 %v5515_v19, %s10095_s18  ;;  %v11011_v31 = vrot.slane %v9967_v44, %v10513_v51 }
 0x2bb   : > { %2293 = vrot.lane.b32.xlu1 %v2220_v37, %s10094_s17 }
 0x2bc   : > { %16208 = vst [vmem:[#allocation20_spill] sm:$0xff] %v11011_v31 }
 0x2bd   : > { %v1397_v5 = vpop.permute.xlu1 %1396  ;;  %v9973_v44 = vld [vmem:[#allocation2 + $0xc8] ss:$48 sps:$4 sm:$0xff]  }
 0x2be   : > { %1468 = vst.msk [vmem:[#allocation2 + $0x129] sm:$0xff] %vm1442_vm6, %v1397_v5  ;;  %5587 = vrot.lane.b32.xlu0 %v5519_v40, %s10095_s18  ;;  %v10003_v5 = vld [vmem:[#allocation2 + $0x7a] ss:$48 sps:$4 sm:$0xff]   ;;  %v11065_v41 = vrot.slane %v9973_v44, %v10513_v51  ;;  %v11080_v44 = vrot.slane %v10011_v23, %v10513_v51 }
 0x2bf   : > { %2297 = vrot.lane.b32.xlu1 %v2222_v42, %s10094_s17  ;;  %v11042_v24 = vrot.slane %v10003_v5, %v10513_v51 }
 0x2c0   : > { %16220 = vst [vmem:[#allocation32_spill] sm:$0xff] %v11065_v41  ;;  %16223 = vst [vmem:[#allocation35_spill] sm:$0xff] %v11080_v44 }
 0x2c1   : > { %v1401_v52 = vpop.permute.xlu1 %1400  ;;  %16214 = vst [vmem:[#allocation26_spill] sm:$0xff] %v11042_v24  ;;  %v10031_v16 = vld [vmem:[#allocation2 + $0xe2] ss:$48 sps:$4 sm:$0xff]  }
 0x2c2   : > { %1470 = vst.msk [vmem:[#allocation2 + $0x141] sm:$0xff] %vm1442_vm6, %v1401_v52  ;;  %5595 = vrot.lane.b32.xlu0 %v5523_v0, %s10095_s18  ;;  %v9975_v52 = vld [vmem:[#allocation2 + $0xe0] ss:$48 sps:$4 sm:$0xff]  }
 0x2c3   : > { %2301 = vrot.lane.b32.xlu1 %v2224_v36, %s10094_s17  ;;  %v11049_v18 = vrot.slane %v9975_v52, %v10513_v51  ;;  %v10009_v52 = vld [vmem:[#allocation2 + $0x122] ss:$48 sps:$4 sm:$0xff]  }
 0x2c5   : > { %v1405_v7 = vpop.permute.xlu1 %1404  ;;  %16215 = vst [vmem:[#allocation27_spill] sm:$0xff] %v11049_v18 }
 0x2c6   : > { %1472 = vst.msk [vmem:[#allocation2 + $0x159] sm:$0xff] %vm1442_vm6, %v1405_v7  ;;  %5603 = vrot.lane.b32.xlu0 %v5527_v49, %s10095_s18 }
 0x2c7   : > { %2305 = vrot.lane.b32.xlu1 %v2226_v1, %s10094_s17 }
 0x2c9   : > { %v1409_v33 = vpop.permute.xlu1 %1408 }
 0x2ca   : > { %1474 = vst.msk [vmem:[#allocation2 + $0x171] sm:$0xff] %vm1442_vm6, %v1409_v33  ;;  %4721 = vrot.lane.b32.xlu0 %v5515_v19, %s10094_s17  ;;  %v9971_v19 = vld [vmem:[#allocation2 + $0x80] ss:$48 sps:$4 sm:$0xff]  }
 0x2cb   : > { %3135 = vrot.lane.b32.xlu1 %v2212_v50, %s10095_s18  ;;  %v10986_v50 = vld [vmem:[#allocation2 + $0x6a] sm:$0xff]  ;;  %v11027_v33 = vld [vmem:[#allocation2 + $0x82] sm:$0xff] }
 0x2ce   : > { %4729 = vrot.lane.b32.xlu0 %v5519_v40, %s10094_s17  ;;  %v11017_v40 = vld [vmem:[#allocation2 + $0x62] sm:$0xff] }
 0x2cf   : > { %3139 = vrot.lane.b32.xlu1 %v2214_v13, %s10095_s18  ;;  %v10998_v13 = vld [vmem:[#allocation2 + $0x22] sm:$0xff] }
 0x2d1   : > { %v9979_v27 = vld [vmem:[#allocation2 + $0x140] ss:$48 sps:$4 sm:$0xff]  }
 0x2d2   : > { %4737 = vrot.lane.b32.xlu0 %v5523_v0, %s10094_s17  ;;  %v10035_v54 = vld [vmem:[#allocation2 + $0x142] ss:$48 sps:$4 sm:$0xff]  }
 0x2d3   : > { %3143 = vrot.lane.b32.xlu1 %v2216_v10, %s10095_s18  ;;  %v9999_v10 = vld [vmem:[#allocation2 + $0x1a] ss:$48 sps:$4 sm:$0xff]  }
 0x2d4   : > { %v11025_v7 = vrot.slane %v9999_v10, %v10513_v51 }
 0x2d6   : > { %4745 = vrot.lane.b32.xlu0 %v5527_v49, %s10094_s17  ;;  %16211 = vst [vmem:[#allocation23_spill] sm:$0xff] %v11025_v7  ;;  %v10001_v49 = vld [vmem:[#allocation2 + $0x62] ss:$48 sps:$4 sm:$0xff]  }
 0x2d7   : > { %3147 = vrot.lane.b32.xlu1 %v2218_v39, %s10095_s18  ;;  %v11008_v39 = vld [vmem:[#allocation2 + $0x52] sm:$0xff]  ;;  %v11057_v5 = vrot.slane %v10001_v49, %v10513_v51  ;;  %v10025_v49 = vld [vmem:[#allocation2 + $0x6a] ss:$48 sps:$4 sm:$0xff]  }
 0x2d9   : > { %16218 = vst [vmem:[#allocation30_spill] sm:$0xff] %v11057_v5 }
 0x2da   : > { %7169 = vrot.lane.b32.xlu0 %v10976_v55, %s10094_s17 }
 0x2db   : > { %3151 = vrot.lane.b32.xlu1 %v2220_v37, %s10095_s18  ;;  %v9997_v37 = vld [vmem:[#allocation2 + $0x2] ss:$48 sps:$4 sm:$0xff]  }
 0x2dc   : > { %v11039_v10 = vrot.slane %v9997_v37, %v10513_v51  ;;  %v9977_v37 = vld [vmem:[#allocation2 + $0x128] ss:$48 sps:$4 sm:$0xff]  }
 0x2dd   : > { %v11113_v62 = vrot.slane %v9977_v37, %v10513_v51 }
 0x2de   : > { %7177 = vrot.lane.b32.xlu0 %v10981_v57, %s10094_s17  ;;  %16213 = vst [vmem:[#allocation25_spill] sm:$0xff] %v11039_v10  ;;  %v6469_v38 = vcombine.low %v11039_v10, %v11025_v7  ;;  %v11085_v10 = vrot.slane %v9979_v27, %v10513_v51  ;;  %v1979_v7 = vcombine.low %v11065_v41, %v11049_v18  ;;  %v10049_v18 = vld [vmem:[#allocation2 + $0x69] ss:$48 sps:$4 sm:$0xff]  }
 0x2df   : > { %3155 = vrot.lane.b32.xlu1 %v2222_v42, %s10095_s18  ;;  %v11020_v42 = vrot.slane %v9965_v28, %v10513_v51  ;;  %v11036_v28 = vrot.slane %v9971_v19, %v10513_v51  ;;  %v11106_v41 = vrot.slane %v10035_v54, %v10513_v51  ;;  %16231 = vst [vmem:[#allocation43_spill] sm:$0xff] %v11113_v62 }
 0x2e0   : > { %16224 = vst [vmem:[#allocation36_spill] sm:$0xff] %v11085_v10 }
 0x2e1   : > { %16209 = vst [vmem:[#allocation21_spill] sm:$0xff] %v11020_v42  ;;  %v1843_v25 = vcombine.low %v11020_v42, %v11011_v31  ;;  %16212 = vst [vmem:[#allocation24_spill] sm:$0xff] %v11036_v28  ;;  %v11090_v42 = vrot.slane %v10023_v2, %v10513_v51  ;;  %v11093_v31 = vrot.slane %v10027_v45, %v10513_v51  ;;  %v10045_v2 = vld [vmem:[#allocation2 + $0x9] ss:$48 sps:$4 sm:$0xff]  }
 0x2e2   : > { %7185 = vrot.lane.b32.xlu0 %v10986_v50, %s10094_s17  ;;  %16230 = vst [vmem:[#allocation42_spill] sm:$0xff] %v11106_v41  ;;  %v11108_v45 = vld [vmem:[#allocation2 + $0x9] sm:$0xff] }
 0x2e3   : > { %3159 = vrot.lane.b32.xlu1 %v2224_v36, %s10095_s18  ;;  %v9969_v36 = vld [vmem:[#allocation2 + $0x68] ss:$48 sps:$4 sm:$0xff]   ;;  %16225 = vst [vmem:[#allocation37_spill] sm:$0xff] %v11090_v42  ;;  %16226 = vst [vmem:[#allocation38_spill] sm:$0xff] %v11093_v31 }
 0x2e4   : > { %v11054_v19 = vrot.slane %v9969_v36, %v10513_v51  ;;  %v11071_v36 = vrot.slane %v1843_v25, %v10522_v63  ;;  %v10033_v25 = vld [vmem:[#allocation2 + $0x12a] ss:$48 sps:$4 sm:$0xff]  }
 0x2e5   : > { %v11131_v37 = vrot.slane %v10033_v25, %v10513_v51  ;;  %v11149_v25 = vld [vmem:[#allocation2 + $0x39] sm:$0xff] }
 0x2e6   : > { %7193 = vrot.lane.b32.xlu0 %v10991_v43, %s10094_s17  ;;  %16217 = vst [vmem:[#allocation29_spill] sm:$0xff] %v11054_v19  ;;  %16222 = vst [vmem:[#allocation34_spill] sm:$0xff] %v11071_v36  ;;  %v1875_v26 = vcombine.low %v11054_v19, %v11036_v28  ;;  %v11101_v19 = vrot.slane %v10009_v52, %v10513_v51  ;;  %v10051_v28 = vld [vmem:[#allocation2 + $0x81] ss:$48 sps:$4 sm:$0xff]   ;;  %v11119_v52 = vrot.slane %v10025_v49, %v10513_v51 }
 0x2e7   : > { %3163 = vrot.lane.b32.xlu1 %v2226_v1, %s10095_s18  ;;  %v10007_v1 = vld [vmem:[#allocation2 + $0xda] ss:$48 sps:$4 sm:$0xff]   ;;  %16235 = vst [vmem:[#allocation47_spill] sm:$0xff] %v11131_v37  ;;  %v2011_v49 = vcombine.low %v11113_v62, %v11085_v10 }
 0x2e8   : > { %v11062_v47 = vrot.slane %v10007_v1, %v10513_v51  ;;  %v6501_v1 = vcombine.low %v11057_v5, %v11042_v24  ;;  %v10029_v5 = vld [vmem:[#allocation2 + $0xca] ss:$48 sps:$4 sm:$0xff]   ;;  %v11098_v24 = vrot.slane %v6469_v38, %v10522_v63  ;;  %16229 = vst [vmem:[#allocation41_spill] sm:$0xff] %v11101_v19  ;;  %v11116_v38 = vrot.slane %v10021_v17, %v10513_v51 }
 0x2e9   : > { %16233 = vst [vmem:[#allocation45_spill] sm:$0xff] %v11119_v52  ;;  %v6637_v54 = vcombine.low %v11101_v19, %v11080_v44  ;;  %v11134_v17 = vrot.slane %v10047_v15, %v10513_v51  ;;  %v11143_v11 = vrot.slane %v10029_v5, %v10513_v51  ;;  %v6909_v15 = vcombine.low %v11131_v37, %v11106_v41  ;;  %v10055_v5 = vld [vmem:[#allocation2 + $0xe1] ss:$48 sps:$4 sm:$0xff]  }
 0x2ea   : > { %7167 = vrot.lane.b32.xlu0 %v10996_v59, %s10094_s17  ;;  %16219 = vst [vmem:[#allocation31_spill] sm:$0xff] %v11062_v47  ;;  %16228 = vst [vmem:[#allocation40_spill] sm:$0xff] %v11098_v24  ;;  %v6605_v27 = vcombine.low %v11068_v20, %v11062_v47  ;;  %v11122_v20 = vrot.slane %v10031_v16, %v10513_v51  ;;  %v6741_v16 = vcombine.low %v11116_v38, %v11090_v42  ;;  %v11160_v42 = vld [vmem:[#allocation2 + $0x4a] sm:$0xff] }
 0x2eb   : > { %7173 = vrot.lane.b32.xlu1 %v10998_v13, %s10094_s17  ;;  %16232 = vst [vmem:[#allocation44_spill] sm:$0xff] %v11116_v38  ;;  %v6773_v47 = vcombine.low %v11119_v52, %v11093_v31  ;;  %16236 = vst [vmem:[#allocation48_spill] sm:$0xff] %v11143_v11  ;;  %v11154_v44 = vrot.slane %v10045_v2, %v10513_v51  ;;  %v11157_v38 = vrot.slane %v10049_v18, %v10513_v51  ;;  %v10053_v31 = vld [vmem:[#allocation2 + $0xc9] ss:$48 sps:$4 sm:$0xff]   ;;  %v10059_v41 = vld [vmem:[#allocation2 + $0x141] ss:$48 sps:$4 sm:$0xff]  }
 0x2ec   : > { %v11004_v48 = vpop.permute.xlu0 %2275  ;;  %16234 = vst [vmem:[#allocation46_spill] sm:$0xff] %v11122_v20  ;;  %v4287_v52 = vrot.slane %v10051_v28, %v10513_v51  ;;  %v11163_v62 = vrot.slane %v6501_v1, %v10522_v63  ;;  %v11166_v10 = vrot.slane %v1875_v26, %v10522_v63  ;;  %v11169_v37 = vrot.slane %v1979_v7, %v10522_v63  ;;  %v10057_v18 = vld [vmem:[#allocation2 + $0x129] ss:$48 sps:$4 sm:$0xff]  }
 0x2ed   : > { %16207 = vst [vmem:[#allocation19_spill] sm:$0xff] %v11004_v48  ;;  %v6877_v2 = vcombine.low %v11143_v11, %v11122_v20  ;;  %v11178_v28 = vrot.slane %v6637_v54, %v10522_v63  ;;  %v4295_v1 = vcombine.low %v11154_v44, %v11134_v17  ;;  %v11184_v26 = vrot.slane %v6605_v27, %v10522_v63 }
 0x2ee   : > { %7175 = vrot.lane.b32.xlu0 %v11006_v32, %s10094_s17  ;;  %16239 = vst [vmem:[#allocation51_spill] sm:$0xff] %v11163_v62  ;;  %16240 = vst [vmem:[#allocation52_spill] sm:$0xff] %v11166_v10  ;;  %v4327_v7 = vcombine.low %v11157_v38, %v4287_v52  ;;  %v11187_v11 = vrot.slane %v2011_v49, %v10522_v63  ;;  %v11190_v20 = vrot.slane %v6741_v16, %v10522_v63  ;;  %v11207_v16 = vld [vmem:[#allocation2 + $0x7a] sm:$0xff] }
 0x2ef   : > { %7181 = vrot.lane.b32.xlu1 %v11008_v39, %s10094_s17  ;;  %16241 = vst [vmem:[#allocation53_spill] sm:$0xff] %v11169_v37  ;;  %16242 = vst [vmem:[#allocation54_spill] sm:$0xff] %v11178_v28  ;;  %v11193_v6 = vrot.slane %v6773_v47, %v10522_v63  ;;  %v11200_v3 = vrot.slane %v6909_v15, %v10522_v63  ;;  %v4375_v27 = vrot.slane %v10053_v31, %v10513_v51  ;;  %v11240_v28 = vld [vmem:[#allocation2 + $0xaa] sm:$0xff] }
 0x2f0   : > { %v11022_v0 = vpop.permute.xlu0 %2279  ;;  %16243 = vst [vmem:[#allocation55_spill] sm:$0xff] %v11184_v26  ;;  %16244 = vst [vmem:[#allocation56_spill] sm:$0xff] %v11187_v11  ;;  %v11203_v30 = vrot.slane %v4327_v7, %v10522_v63  ;;  %v4391_v49 = vrot.slane %v10055_v5, %v10513_v51  ;;  %v11210_v47 = vrot.slane %v6877_v2, %v10522_v63 }
 0x2f1   : > { %16210 = vst [vmem:[#allocation22_spill] sm:$0xff] %v11022_v0  ;;  %v11145_v14 = vpop.permute.xlu1 %5583  ;;  %16245 = vst [vmem:[#allocation57_spill] sm:$0xff] %v11190_v20  ;;  %v4407_v9 = vrot.slane %v10057_v18, %v10513_v51  ;;  %v4423_v58 = vrot.slane %v10059_v41, %v10513_v51  ;;  %v11220_v31 = vrot.slane %v4295_v1, %v10522_v63  ;;  %v5528_v18 = vld [vmem:[#allocation2 + $0x99] sm:$0xff] }
 0x2f2   : > { %7183 = vrot.lane.b32.xlu0 %v11017_v40, %s10094_s17  ;;  %16237 = vst [vmem:[#allocation49_spill] sm:$0xff] %v11145_v14  ;;  %16246 = vst [vmem:[#allocation58_spill] sm:$0xff] %v11193_v6  ;;  %v4431_v5 = vcombine.low %v4375_v27, %v4391_v49  ;;  %v4296_v26 = vcombine.high %v11154_v44, %v11134_v17  ;;  %v4328_v20 = vcombine.high %v11157_v38, %v4287_v52 }
 0x2f3   : > { %7189 = vrot.lane.b32.xlu1 %v11027_v33, %s10094_s17  ;;  %16249 = vst [vmem:[#allocation61_spill] sm:$0xff] %v11200_v3  ;;  %16250 = vst [vmem:[#allocation62_spill] sm:$0xff] %v11203_v30  ;;  %v4463_v7 = vcombine.low %v4407_v9, %v4423_v58  ;;  %v4432_v44 = vcombine.high %v4375_v27, %v4391_v49  ;;  %v4464_v17 = vcombine.high %v4407_v9, %v4423_v58  ;;  %v5518_v49 = vld [vmem:[#allocation2 + $0x21] sm:$0xff] }
 0x2f4   : > { %v11051_v21 = vpop.permute.xlu0 %2283  ;;  %16251 = vst [vmem:[#allocation63_spill] sm:$0xff] %v11210_v47  ;;  %16252 = vst [vmem:[#allocation64_spill] sm:$0xff] %v11220_v31  ;;  %v11243_v41 = vrot.slane %v4431_v5, %v10522_v63  ;;  %v4310_v31 = vrot.slane %v4296_v26, %v10522_v63  ;;  %v4342_v30 = vrot.slane %v4328_v20, %v10522_v63  ;;  %v9985_v47 = vld [vmem:[#allocation2 + $0xcc] ss:$48 sps:$4 sm:$0xff]  }
 0x2f5   : > { %16216 = vst [vmem:[#allocation28_spill] sm:$0xff] %v11051_v21  ;;  %v11246_v15 = vrot.slane %v4463_v7, %v10522_v63  ;;  %v2371_v2 = vcombine.low %v11004_v48, %v11051_v21  ;;  %v4446_v27 = vrot.slane %v4432_v44, %v10522_v63  ;;  %v4478_v58 = vrot.slane %v4464_v17, %v10522_v63 }
 0x2f6   : > { %7191 = vrot.lane.b32.xlu0 %v11044_v22, %s10094_s17  ;;  %16255 = vst [vmem:[#allocation67_spill] sm:$0xff] %v11243_v41  ;;  %v4361_v7 = vcombine.low %v4310_v31, %v4342_v30 }
 0x2f7   : > { %7197 = vrot.lane.b32.xlu1 %v11046_v29, %s10094_s17  ;;  %16256 = vst [vmem:[#allocation68_spill] sm:$0xff] %v11246_v15  ;;  %v4497_v26 = vcombine.low %v4446_v27, %v4478_v58  ;;  %v11283_v17 = vrot.slane %v2371_v2, %v10513_v51 }
 0x2f8   : > { %v11095_v23 = vpop.permute.xlu0 %2287 }
 0x2f9   : > { %16227 = vst [vmem:[#allocation39_spill] sm:$0xff] %v11095_v23  ;;  %v11195_v4 = vpop.permute.xlu1 %5591  ;;  %v2387_v1 = vcombine.low %v11022_v0, %v11095_v23  ;;  %16262 = vst [vmem:[#allocation74_spill] sm:$0xff] %v11283_v17  ;;  %v11289_v15 = vpack.i.bf16 %v4497_v26, %v4361_v7  ;;  %v5526_v7 = vld [vmem:[#allocation2 + $0x81] sm:$0xff] }
 0x2fa   : > { %5581 = vrot.lane.b32.xlu0 %v11108_v45, %s10095_s18  ;;  %16247 = vst [vmem:[#allocation59_spill] sm:$0xff] %v11195_v4  ;;  %v9982_v23 = vld [vmem:[#allocation2 + $0x24] ss:$48 sps:$4 sm:$0xff]  }
 0x2fb   : > { %7171 = vrot.lane.b32.xlu1 %v11110_v46, %s10094_s17  ;;  %16264 = vst [vmem:[#allocation76_spill] sm:$0xff] %v11289_v15 }
 0x2fc   : > { %v11147_v19 = vpop.permute.xlu0 %2291 }
 0x2fd   : > { %16238 = vst [vmem:[#allocation50_spill] sm:$0xff] %v11147_v19 }
 0x2fe   : > { %5589 = vrot.lane.b32.xlu0 %v11149_v25, %s10095_s18 }
 0x2ff   : > { %7179 = vrot.lane.b32.xlu1 %v11160_v42, %s10094_s17 }
 0x300   : > { %v11197_v54 = vpop.permute.xlu0 %2295 }
 0x301   : > { %16248 = vst [vmem:[#allocation60_spill] sm:$0xff] %v11197_v54  ;;  %v11230_v24 = vpop.permute.xlu1 %5599 }
 0x302   : > { %5597 = vrot.lane.b32.xlu0 %v5524_v8, %s10095_s18  ;;  %16253 = vst [vmem:[#allocation65_spill] sm:$0xff] %v11230_v24 }
 0x303   : > { %7187 = vrot.lane.b32.xlu1 %v11207_v16, %s10094_s17 }
 0x304   : > { %v11232_v62 = vpop.permute.xlu0 %2299 }
 0x305   : > { %16254 = vst [vmem:[#allocation66_spill] sm:$0xff] %v11232_v62  ;;  %v2403_v5 = vcombine.low %v11147_v19, %v11232_v62  ;;  %v11271_v19 = vrot.slane %v2387_v1, %v10513_v51  ;;  %v5522_v62 = vld [vmem:[#allocation2 + $0x51] sm:$0xff] }
 0x306   : > { %5605 = vrot.lane.b32.xlu0 %v5528_v18, %s10095_s18 }
 0x307   : > { %7195 = vrot.lane.b32.xlu1 %v11240_v28, %s10094_s17  ;;  %16259 = vst [vmem:[#allocation71_spill] sm:$0xff] %v11271_v19  ;;  %v11277_v20 = vrot.slane %v2403_v5, %v10513_v51  ;;  %v2435_v5 = vcombine.low %v11283_v17, %v11271_v19  ;;  %v4362_v17 = vcombine.high %v4310_v31, %v4342_v30  ;;  %v9995_v19 = vld [vmem:[#allocation2 + $0x125] ss:$48 sps:$4 sm:$0xff]  }
 0x308   : > { %v11260_v38 = vpop.permute.xlu0 %2303  ;;  %v4498_v30 = vcombine.high %v4446_v27, %v4478_v58  ;;  %v11336_v31 = vrot.slane %v9995_v19, %v10513_v51  ;;  %v16277_v27 = vcombine.high %v10944_v34, %v10947_v12 }
 0x309   : > { %16257 = vst [vmem:[#allocation69_spill] sm:$0xff] %v11260_v38  ;;  %v11262_v52 = vpop.permute.xlu1 %5607  ;;  %v2419_v9 = vcombine.low %v11197_v54, %v11260_v38  ;;  %16260 = vst [vmem:[#allocation72_spill] sm:$0xff] %v11277_v20  ;;  %v11306_v26 = vrot.slane %v2435_v5, %v10522_v63 }
 0x30a   : > { %16258 = vst [vmem:[#allocation70_spill] sm:$0xff] %v11262_v52  ;;  %4723 = vrot.lane.b32.xlu0 %v11108_v45, %s10094_s17  ;;  %v4190_v58 = vrot.slane %v16277_v27, %v10522_v63  ;;  %v16280_v27 = vcombine.low %v10920_v56, %v10923_v35 }
 0x30b   : > { %5585 = vrot.lane.b32.xlu1 %v5518_v49, %s10095_s18  ;;  %v11280_v44 = vrot.slane %v2419_v9, %v10513_v51  ;;  %16267 = vst [vmem:[#allocation79_spill] sm:$0xff] %v11306_v26  ;;  %v11342_v26 = vpack.i.bf16 %v4498_v30, %v4362_v17 }
 0x30c   : > { %v11285_v41 = vpop.permute.xlu0 %3133 }
 0x30d   : > { %16261 = vst [vmem:[#allocation73_spill] sm:$0xff] %v11280_v44  ;;  %16263 = vst [vmem:[#allocation75_spill] sm:$0xff] %v11285_v41  ;;  %v11287_v1 = vpop.permute.xlu1 %4725  ;;  %v2467_v45 = vcombine.low %v11277_v20, %v11280_v44  ;;  %v5530_v20 = vld [vmem:[#allocation2 + $0xb1] sm:$0xff] }
 0x30e   : > { %4731 = vrot.lane.b32.xlu0 %v11149_v25, %s10094_s17  ;;  %16274 = vst [vmem:[#allocation86_spill] sm:$0xff] %v11342_v26 }
 0x30f   : > { %5593 = vrot.lane.b32.xlu1 %v5522_v62, %s10095_s18  ;;  %v11299_v2 = vrot.slane %v2467_v45, %v10522_v63 }
 0x310   : > { %v11301_v9 = vpop.permute.xlu0 %3137 }
 0x311   : > { %16265 = vst [vmem:[#allocation77_spill] sm:$0xff] %v11299_v2  ;;  %16266 = vst [vmem:[#allocation78_spill] sm:$0xff] %v11301_v9  ;;  %v11303_v54 = vpop.permute.xlu1 %4733 }
 0x312   : > { %4739 = vrot.lane.b32.xlu0 %v5524_v8, %s10094_s17  ;;  %v9996_v8 = vld [vmem:[#allocation2 + $0x13d] ss:$48 sps:$4 sm:$0xff]  }
 0x313   : > { %5601 = vrot.lane.b32.xlu1 %v5526_v7, %s10095_s18 }
 0x314   : > { %v11310_v15 = vpop.permute.xlu0 %3141 }
 0x315   : > { %16268 = vst [vmem:[#allocation80_spill] sm:$0xff] %v11310_v15  ;;  %v11312_v25 = vpop.permute.xlu1 %4741 }
 0x316   : > { %4747 = vrot.lane.b32.xlu0 %v5528_v18, %s10094_s17  ;;  %v11330_v18 = vrot.slane %v9996_v8, %v10513_v51 }
 0x317   : > { %5609 = vrot.lane.b32.xlu1 %v5530_v20, %s10095_s18 }
 0x318   : > { %v11318_v44 = vpop.permute.xlu0 %3145  ;;  %v4208_v2 = vcombine.high %v11336_v31, %v11330_v18 }
 0x319   : > { %16269 = vst [vmem:[#allocation81_spill] sm:$0xff] %v11318_v44  ;;  %v11320_v5 = vpop.permute.xlu1 %4749  ;;  %v3245_v17 = vcombine.low %v11301_v9, %v11318_v44  ;;  %v9963_v44 = vld [vmem:[#allocation2 + $0x139] ss:$48 sps:$4 sm:$0xff]  }
 0x31a   : > { %8027 = vrot.lane.b32.xlu0 %v10976_v55, %s10095_s18 }
 0x31b   : > { %4727 = vrot.lane.b32.xlu1 %v5518_v49, %s10094_s17 }
 0x31c   : > { %v11325_v38 = vpop.permute.xlu0 %3149 }
 0x31d   : > { %16270 = vst [vmem:[#allocation82_spill] sm:$0xff] %v11325_v38  ;;  %v11327_v45 = vpop.permute.xlu1 %2277 }
 0x31e   : > { %16271 = vst [vmem:[#allocation83_spill] sm:$0xff] %v11327_v45  ;;  %8035 = vrot.lane.b32.xlu0 %v10981_v57, %s10095_s18 }
 0x31f   : > { %4735 = vrot.lane.b32.xlu1 %v5522_v62, %s10094_s17  ;;  %v4222_v62 = vrot.slane %v4208_v2, %v10522_v63  ;;  %v3229_v2 = vcombine.low %v11285_v41, %v11310_v15  ;;  %v16407_v41 = vld [vmem:[#allocation14_spill] sm:$0xff]  ;;  %v16408_v15 = vld [vmem:[#allocation16_spill] sm:$0xff] }
 0x320   : > { %v11338_v55 = vpop.permute.xlu0 %3153 }
 0x321   : > { %16272 = vst [vmem:[#allocation84_spill] sm:$0xff] %v11338_v55  ;;  %v11340_v49 = vpop.permute.xlu1 %2281 }
 0x322   : > { %16273 = vst [vmem:[#allocation85_spill] sm:$0xff] %v11340_v49  ;;  %8043 = vrot.lane.b32.xlu0 %v10986_v50, %s10095_s18  ;;  %v4229_v50 = vcombine.low %v4190_v58, %v4222_v62 }
 0x323   : > { %4743 = vrot.lane.b32.xlu1 %v5526_v7, %s10094_s17  ;;  %v4230_v7 = vcombine.high %v4190_v58, %v4222_v62  ;;  %v11382_v62 = vrot.slane %v3245_v17, %v10513_v51 }
 0x324   : > { %v11350_v57 = vpop.permute.xlu0 %3157  ;;  %v11374_v9 = vpack.i.bf16 %v4229_v50, %v16280_v27  ;;  %v11391_v50 = vrot.slane %v3229_v2, %v10513_v51 }
 0x325   : > { %16275 = vst [vmem:[#allocation87_spill] sm:$0xff] %v11350_v57  ;;  %v11352_v19 = vpop.permute.xlu1 %2285  ;;  %v3261_v8 = vcombine.low %v11325_v38, %v11350_v57  ;;  %16284 = vst [vmem:[#allocation93_spill] sm:$0xff] %v11382_v62  ;;  %v9948_v57 = vld [vmem:[#allocation2 + $0x13c] ss:$48 sps:$4 sm:$0xff]  }
 0x326   : > { %16276 = vst [vmem:[#allocation88_spill] sm:$0xff] %v11352_v19  ;;  %8051 = vrot.lane.b32.xlu0 %v10991_v43, %s10095_s18  ;;  %16281 = vst [vmem:[#allocation91_spill] sm:$0xff] %v11374_v9  ;;  %v16282_v43 = vcombine.high %v10920_v56, %v10923_v35  ;;  %v1706_v21 = vrot.slane %v9948_v57, %v10513_v51 }
 0x327   : > { %4751 = vrot.lane.b32.xlu1 %v5530_v20, %s10094_s17  ;;  %16285 = vst [vmem:[#allocation94_spill] sm:$0xff] %v11391_v50  ;;  %v11394_v27 = vrot.slane %v3261_v8, %v10513_v51 }
 0x328   : > { %v11367_v30 = vpop.permute.xlu0 %3161  ;;  %v11379_v20 = vpack.i.bf16 %v4230_v7, %v16282_v43  ;;  %v3293_v7 = vcombine.low %v11391_v50, %v11382_v62  ;;  %v11501_v50 = vld [vmem:[#allocation2 + $0xf0] sm:$0xff] }
 0x329   : > { %16278 = vst [vmem:[#allocation89_spill] sm:$0xff] %v11367_v30  ;;  %v11369_v26 = vpop.permute.xlu1 %2289  ;;  %v3277_v58 = vcombine.low %v11338_v55, %v11367_v30  ;;  %16286 = vst [vmem:[#allocation95_spill] sm:$0xff] %v11394_v27 }
 0x32a   : > { %16279 = vst [vmem:[#allocation90_spill] sm:$0xff] %v11369_v26  ;;  %16283 = vst [vmem:[#allocation92_spill] sm:$0xff] %v11379_v20  ;;  %8025 = vrot.lane.b32.xlu0 %v10996_v59, %s10095_s18  ;;  %v11419_v43 = vrot.slane %v3293_v7, %v10522_v63  ;;  %v5723_v20 = vcombine.low %v11230_v24, %v11262_v52  ;;  %v9947_v24 = vld [vmem:[#allocation2 + $0x124] ss:$48 sps:$4 sm:$0xff]  }
 0x32b   : > { %8031 = vrot.lane.b32.xlu1 %v10998_v13, %s10095_s18  ;;  %v11397_v56 = vrot.slane %v3277_v58, %v10513_v51 }
 0x32c   : > { %v11399_v35 = vpop.permute.xlu0 %5579  ;;  %16293 = vst [vmem:[#allocation102_spill] sm:$0xff] %v11419_v43 }
 0x32d   : > { %16287 = vst [vmem:[#allocation96_spill] sm:$0xff] %v11397_v56  ;;  %16288 = vst [vmem:[#allocation97_spill] sm:$0xff] %v11399_v35  ;;  %v11401_v17 = vpop.permute.xlu1 %2293  ;;  %v3325_v59 = vcombine.low %v11394_v27, %v11397_v56 }
 0x32e   : > { %16289 = vst [vmem:[#allocation98_spill] sm:$0xff] %v11401_v17  ;;  %8033 = vrot.lane.b32.xlu0 %v11006_v32, %s10095_s18  ;;  %v11443_v32 = vld [vmem:[#allocation2 + $0xc0] sm:$0xff] }
 0x32f   : > { %v11410_v13 = vrot.slane %v3325_v59, %v10522_v63  ;;  %8039 = vrot.lane.b32.xlu1 %v11008_v39, %s10095_s18 }
 0x330   : > { %v11414_v2 = vpop.permute.xlu0 %5587 }
 0x331   : > { %16290 = vst [vmem:[#allocation99_spill] sm:$0xff] %v11410_v13  ;;  %16291 = vst [vmem:[#allocation100_spill] sm:$0xff] %v11414_v2  ;;  %v11416_v8 = vpop.permute.xlu1 %2297  ;;  %v11472_v13 = vrot.slane %v5723_v20, %v10513_v51 }
 0x332   : > { %16292 = vst [vmem:[#allocation101_spill] sm:$0xff] %v11416_v8  ;;  %8041 = vrot.lane.b32.xlu0 %v11017_v40, %s10095_s18 }
 0x333   : > { %8047 = vrot.lane.b32.xlu1 %v11027_v33, %s10095_s18  ;;  %16301 = vst [vmem:[#allocation110_spill] sm:$0xff] %v11472_v13 }
 0x334   : > { %v11427_v58 = vpop.permute.xlu0 %5595 }
 0x335   : > { %16294 = vst [vmem:[#allocation103_spill] sm:$0xff] %v11427_v58  ;;  %v11429_v59 = vpop.permute.xlu1 %2301 }
 0x336   : > { %16295 = vst [vmem:[#allocation104_spill] sm:$0xff] %v11429_v59  ;;  %8049 = vrot.lane.b32.xlu0 %v11044_v22, %s10095_s18  ;;  %v2659_v22 = vcombine.low %v11340_v49, %v11369_v26  ;;  %v2675_v9 = vcombine.low %v11401_v17, %v11429_v59  ;;  %v11469_v59 = vld [vmem:[#allocation2 + $0xd8] sm:$0xff] }
 0x337   : > { %8055 = vrot.lane.b32.xlu1 %v11046_v29, %s10095_s18  ;;  %v5675_v29 = vcombine.low %v11399_v35, %v11414_v2  ;;  %v9981_v49 = vld [vmem:[#allocation2 + $0xc] ss:$48 sps:$4 sm:$0xff]  }
 0x338   : > { %v11435_v39 = vpop.permute.xlu0 %5603  ;;  %v12011_v55 = vrot.slane %v9981_v49, %v10513_v51 }
 0x339   : > { %16296 = vst [vmem:[#allocation105_spill] sm:$0xff] %v11435_v39  ;;  %v11437_v7 = vpop.permute.xlu1 %2305  ;;  %v5707_v40 = vcombine.low %v11427_v58, %v11435_v39  ;;  %v11478_v35 = vrot.slane %v5675_v29, %v10513_v51 }
 0x33a   : > { %16297 = vst [vmem:[#allocation106_spill] sm:$0xff] %v11437_v7  ;;  %v2691_v33 = vcombine.low %v11416_v8, %v11437_v7  ;;  %2307 = vrot.lane.b32.xlu0 %v11443_v32, %s10094_s17  ;;  %v5691_v8 = vcombine.low %v11145_v14, %v11195_v4  ;;  %v2643_v7 = vcombine.low %v11327_v45, %v11352_v19  ;;  %v11548_v45 = vld [vmem:[#allocation2 + $0x120] sm:$0xff]  ;;  %v11616_v19 = vld [vmem:[#allocation2 + $0x168] sm:$0xff] }
 0x33b   : > { %8029 = vrot.lane.b32.xlu1 %v11110_v46, %s10095_s18  ;;  %v11462_v58 = vrot.slane %v5707_v40, %v10513_v51  ;;  %v11475_v46 = vrot.slane %v2659_v22, %v10513_v51  ;;  %16303 = vst [vmem:[#allocation112_spill] sm:$0xff] %v11478_v35  ;;  %v11481_v40 = vrot.slane %v2675_v9, %v10513_v51  ;;  %v9961_v14 = vld [vmem:[#allocation2 + $0x121] ss:$48 sps:$4 sm:$0xff]   ;;  %v16412_v4 = vld [vmem:[#allocation17_spill] sm:$0xff] }
 0x33c   : > { %v11465_v39 = vrot.slane %v2691_v33, %v10513_v51  ;;  %v4722_v43 = vpop.permute.xlu0 %4721  ;;  %v4834_v33 = vcombine.high %v11287_v1, %v11303_v54  ;;  %v11490_v20 = vrot.slane %v5691_v8, %v10513_v51  ;;  %v11493_v22 = vrot.slane %v2643_v7, %v10513_v51 }
 0x33d   : > { %16298 = vst [vmem:[#allocation107_spill] sm:$0xff] %v11462_v58  ;;  %v11467_v17 = vpop.permute.xlu1 %3135  ;;  %16302 = vst [vmem:[#allocation111_spill] sm:$0xff] %v11475_v46  ;;  %v5771_v29 = vcombine.low %v11462_v58, %v11472_v13 }
 0x33e   : > { %16299 = vst [vmem:[#allocation108_spill] sm:$0xff] %v11465_v39  ;;  %16300 = vst [vmem:[#allocation109_spill] sm:$0xff] %v11467_v17  ;;  %2311 = vrot.lane.b32.xlu0 %v11469_v59, %s10094_s17  ;;  %v2739_v9 = vcombine.low %v11481_v40, %v11465_v39  ;;  %v5739_v8 = vcombine.low %v11478_v35, %v11490_v20  ;;  %v4848_v7 = vrot.slane %v4834_v33, %v10513_v51 }
 0x33f   : > { %16304 = vst [vmem:[#allocation113_spill] sm:$0xff] %v11481_v40  ;;  %8037 = vrot.lane.b32.xlu1 %v11160_v42, %s10095_s18  ;;  %16305 = vst [vmem:[#allocation114_spill] sm:$0xff] %v11490_v20  ;;  %v2707_v42 = vcombine.low %v11493_v22, %v11475_v46  ;;  %v11514_v40 = vrot.slane %v5771_v29, %v10522_v63  ;;  %v11521_v46 = vld [vmem:[#allocation2 + $0x108] sm:$0xff]  ;;  %v4833_v33 = vcombine.low %v11287_v1, %v11303_v54 }
 0x340   : > { %16306 = vst [vmem:[#allocation115_spill] sm:$0xff] %v11493_v22  ;;  %v4730_v2 = vpop.permute.xlu0 %4729  ;;  %v11517_v39 = vrot.slane %v2739_v9, %v10522_v63  ;;  %v4865_v29 = vcombine.low %v11312_v25, %v11320_v5 }
 0x341   : > { %v11499_v27 = vpop.permute.xlu1 %3139  ;;  %v4818_v56 = vcombine.high %v4722_v43, %v4730_v2  ;;  %16308 = vst [vmem:[#allocation117_spill] sm:$0xff] %v11514_v40  ;;  %v4817_v35 = vcombine.low %v4722_v43, %v4730_v2  ;;  %v4866_v2 = vcombine.high %v11312_v25, %v11320_v5  ;;  %v11551_v25 = vrot.slane %v4833_v33, %v10513_v51 }
 0x342   : > { %16307 = vst [vmem:[#allocation116_spill] sm:$0xff] %v11499_v27  ;;  %2315 = vrot.lane.b32.xlu0 %v11501_v50, %s10094_s17  ;;  %16309 = vst [vmem:[#allocation118_spill] sm:$0xff] %v11517_v39  ;;  %v11556_v5 = vrot.slane %v4865_v29, %v10513_v51 }
 0x343   : > { %v4832_v58 = vrot.slane %v4818_v56, %v10513_v51  ;;  %8045 = vrot.lane.b32.xlu1 %v11207_v16, %s10095_s18  ;;  %v11526_v56 = vrot.slane %v2707_v42, %v10522_v63  ;;  %v11529_v16 = vrot.slane %v5739_v8, %v10522_v63  ;;  %v11546_v42 = vrot.slane %v4817_v35, %v10513_v51 }
 0x344   : > { %v4738_v13 = vpop.permute.xlu0 %4737  ;;  %16315 = vst [vmem:[#allocation124_spill] sm:$0xff] %v11551_v25  ;;  %16316 = vst [vmem:[#allocation125_spill] sm:$0xff] %v11556_v5  ;;  %v4880_v1 = vrot.slane %v4866_v2, %v10513_v51 }
 0x345   : > { %v11519_v22 = vpop.permute.xlu1 %3143  ;;  %v4898_v20 = vcombine.high %v4832_v58, %v4848_v7  ;;  %16311 = vst [vmem:[#allocation120_spill] sm:$0xff] %v11526_v56  ;;  %16312 = vst [vmem:[#allocation121_spill] sm:$0xff] %v11529_v16  ;;  %v4881_v56 = vcombine.low %v11546_v42, %v11551_v25  ;;  %v11572_v16 = vld [vmem:[#allocation2 + $0x138] sm:$0xff] }
 0x346   : > { %16310 = vst [vmem:[#allocation119_spill] sm:$0xff] %v11519_v22  ;;  %2319 = vrot.lane.b32.xlu0 %v11521_v46, %s10094_s17  ;;  %16314 = vst [vmem:[#allocation123_spill] sm:$0xff] %v11546_v42 }
 0x347   : > { %8053 = vrot.lane.b32.xlu1 %v11240_v28, %s10095_s18  ;;  %v5533_v28 = vld [vmem:[#allocation2 + $0xd9] sm:$0xff] }
 0x348   : > { %v4746_v43 = vpop.permute.xlu0 %4745 }
 0x349   : > { %v11539_v54 = vpop.permute.xlu1 %3147  ;;  %v4849_v8 = vcombine.low %v4738_v13, %v4746_v43  ;;  %v4850_v62 = vcombine.high %v4738_v13, %v4746_v43  ;;  %v4897_v13 = vcombine.low %v4832_v58, %v4848_v7 }
 0x34a   : > { %16313 = vst [vmem:[#allocation122_spill] sm:$0xff] %v11539_v54  ;;  %2323 = vrot.lane.b32.xlu0 %v11548_v45, %s10094_s17 }
 0x34b   : > { %v11560_v9 = vrot.slane %v4849_v8, %v10513_v51  ;;  %v4864_v35 = vrot.slane %v4850_v62, %v10513_v51  ;;  %5615 = vrot.lane.b32.xlu1 %v5533_v28, %s10095_s18  ;;  %v5537_v62 = vld [vmem:[#allocation2 + $0x109] sm:$0xff] }
 0x34c   : > { %v11564_v43 = vpop.permute.xlu0 %7169 }
 0x34d   : > { %16317 = vst [vmem:[#allocation126_spill] sm:$0xff] %v11560_v9  ;;  %16318 = vst [vmem:[#allocation127_spill] sm:$0xff] %v11564_v43  ;;  %v11566_v33 = vpop.permute.xlu1 %3151  ;;  %v4913_v29 = vcombine.low %v11560_v9, %v11556_v5  ;;  %v4929_v39 = vcombine.low %v4864_v35, %v4880_v1  ;;  %v4930_v2 = vcombine.high %v4864_v35, %v4880_v1 }
 0x34e   : > { %16319 = vst [vmem:[#allocation128_spill] sm:$0xff] %v11566_v33  ;;  %2327 = vrot.lane.b32.xlu0 %v11572_v16, %s10094_s17  ;;  %v11587_v9 = vrot.slane %v4897_v13, %v10522_v63  ;;  %v11590_v1 = vrot.slane %v4898_v20, %v10522_v63  ;;  %v3517_v13 = vcombine.low %v11499_v27, %v11539_v54  ;;  %v5545_v20 = vld [vmem:[#allocation2 + $0x169] sm:$0xff] }
 0x34f   : > { %v11577_v58 = vrot.slane %v4913_v29, %v10522_v63  ;;  %v11580_v7 = vrot.slane %v4929_v39, %v10522_v63  ;;  %v11583_v8 = vrot.slane %v4930_v2, %v10522_v63  ;;  %5623 = vrot.lane.b32.xlu1 %v5537_v62, %s10095_s18  ;;  %v11597_v29 = vrot.slane %v4881_v56, %v10522_v63  ;;  %v11599_v39 = vld [vmem:[#allocation2 + $0x150] sm:$0xff]  ;;  %v5541_v2 = vld [vmem:[#allocation2 + $0x139] sm:$0xff] }
 0x350   : > { %16323 = vst [vmem:[#allocation132_spill] sm:$0xff] %v11587_v9  ;;  %16324 = vst [vmem:[#allocation133_spill] sm:$0xff] %v11590_v1  ;;  %v11592_v35 = vpop.permute.xlu0 %7177  ;;  %v3501_v56 = vcombine.low %v11467_v17, %v11519_v22  ;;  %v11634_v27 = vrot.slane %v3517_v13, %v10513_v51 }
 0x351   : > { %16320 = vst [vmem:[#allocation129_spill] sm:$0xff] %v11577_v58  ;;  %16321 = vst [vmem:[#allocation130_spill] sm:$0xff] %v11580_v7  ;;  %v11594_v5 = vpop.permute.xlu1 %3155 }
 0x352   : > { %16322 = vst [vmem:[#allocation131_spill] sm:$0xff] %v11583_v8  ;;  %16325 = vst [vmem:[#allocation134_spill] sm:$0xff] %v11592_v35  ;;  %2331 = vrot.lane.b32.xlu0 %v11599_v39, %s10094_s17  ;;  %v11646_v17 = vrot.slane %v3501_v56, %v10513_v51  ;;  %v9959_v8 = vld [vmem:[#allocation2 + $0xd9] ss:$48 sps:$4 sm:$0xff]  }
 0x353   : > { %16326 = vst [vmem:[#allocation135_spill] sm:$0xff] %v11594_v5  ;;  %16327 = vst [vmem:[#allocation136_spill] sm:$0xff] %v11597_v29  ;;  %5631 = vrot.lane.b32.xlu1 %v5541_v2, %s10095_s18  ;;  %v12003_v52 = vrot.slane %v9959_v8, %v10513_v51  ;;  %v12019_v8 = vld [vmem:[#allocation2 + $0x15a] sm:$0xff] }
 0x354   : > { %v11612_v25 = vpop.permute.xlu0 %7185  ;;  %16332 = vst [vmem:[#allocation141_spill] sm:$0xff] %v11634_v27  ;;  %16335 = vst [vmem:[#allocation144_spill] sm:$0xff] %v11646_v17 }
 0x355   : > { %16328 = vst [vmem:[#allocation137_spill] sm:$0xff] %v11612_v25  ;;  %v11614_v40 = vpop.permute.xlu1 %3159  ;;  %16414 = vst [vmem:[#allocation207_spill] sm:$0xff] %v12019_v8 }
 0x356   : > { %16329 = vst [vmem:[#allocation138_spill] sm:$0xff] %v11614_v40  ;;  %2335 = vrot.lane.b32.xlu0 %v11616_v19, %s10094_s17  ;;  %v3533_v7 = vcombine.low %v11566_v33, %v11614_v40 }
 0x357   : > { %5639 = vrot.lane.b32.xlu1 %v5545_v20, %s10095_s18 }
 0x358   : > { %v11627_v42 = vpop.permute.xlu0 %7193  ;;  %v11639_v33 = vrot.slane %v3533_v7, %v10513_v51 }
 0x359   : > { %16330 = vst [vmem:[#allocation139_spill] sm:$0xff] %v11627_v42  ;;  %v11629_v29 = vpop.permute.xlu1 %3163 }
 0x35a   : > { %16331 = vst [vmem:[#allocation140_spill] sm:$0xff] %v11629_v29  ;;  %v3549_v58 = vcombine.low %v11594_v5, %v11629_v29  ;;  %3165 = vrot.lane.b32.xlu0 %v11443_v32, %s10095_s18  ;;  %16333 = vst [vmem:[#allocation142_spill] sm:$0xff] %v11639_v33  ;;  %v3565_v32 = vcombine.low %v11646_v17, %v11634_v27  ;;  %v5543_v17 = vld [vmem:[#allocation2 + $0x151] sm:$0xff] }
 0x35b   : > { %4757 = vrot.lane.b32.xlu1 %v5533_v28, %s10094_s17 }
 0x35c   : > { %v11642_v40 = vrot.slane %v3549_v58, %v10513_v51  ;;  %v11648_v22 = vpop.permute.xlu0 %7167  ;;  %v11667_v56 = vrot.slane %v3565_v32, %v10522_v63  ;;  %v7567_v32 = vcombine.low %v11612_v25, %v11627_v42 }
 0x35d   : > { %16336 = vst [vmem:[#allocation145_spill] sm:$0xff] %v11648_v22  ;;  %v11650_v5 = vpop.permute.xlu1 %7173 }
 0x35e   : > { %16334 = vst [vmem:[#allocation143_spill] sm:$0xff] %v11642_v40  ;;  %16337 = vst [vmem:[#allocation146_spill] sm:$0xff] %v11650_v5  ;;  %v3597_v13 = vcombine.low %v11639_v33, %v11642_v40  ;;  %3169 = vrot.lane.b32.xlu0 %v11469_v59, %s10095_s18 }
 0x35f   : > { %4765 = vrot.lane.b32.xlu1 %v5537_v62, %s10094_s17  ;;  %16341 = vst [vmem:[#allocation150_spill] sm:$0xff] %v11667_v56 }
 0x360   : > { %v11660_v28 = vrot.slane %v3597_v13, %v10522_v63  ;;  %v11662_v58 = vpop.permute.xlu0 %7175 }
 0x361   : > { %16339 = vst [vmem:[#allocation148_spill] sm:$0xff] %v11662_v58  ;;  %v11664_v7 = vpop.permute.xlu1 %7181 }
 0x362   : > { %16338 = vst [vmem:[#allocation147_spill] sm:$0xff] %v11660_v28  ;;  %16340 = vst [vmem:[#allocation149_spill] sm:$0xff] %v11664_v7  ;;  %3173 = vrot.lane.b32.xlu0 %v11501_v50, %s10095_s18  ;;  %v7551_v13 = vcombine.low %v11650_v5, %v11664_v7  ;;  %v7535_v50 = vcombine.low %v11564_v43, %v11592_v35  ;;  %v7263_v43 = vcombine.low %v11648_v22, %v11662_v58  ;;  %v5535_v22 = vld [vmem:[#allocation2 + $0xf1] sm:$0xff]  ;;  %v5539_v7 = vld [vmem:[#allocation2 + $0x121] sm:$0xff] }
 0x363   : > { %4773 = vrot.lane.b32.xlu1 %v5541_v2, %s10094_s17 }
 0x364   : > { %v11672_v33 = vpop.permute.xlu0 %7183  ;;  %v11694_v56 = vrot.slane %v7551_v13, %v10513_v51  ;;  %v11709_v25 = vrot.slane %v7535_v50, %v10513_v51 }
 0x365   : > { %16342 = vst [vmem:[#allocation151_spill] sm:$0xff] %v11672_v33  ;;  %v11674_v59 = vpop.permute.xlu1 %7189 }
 0x366   : > { %16343 = vst [vmem:[#allocation152_spill] sm:$0xff] %v11674_v59  ;;  %3177 = vrot.lane.b32.xlu0 %v11521_v46, %s10095_s18  ;;  %16346 = vst [vmem:[#allocation155_spill] sm:$0xff] %v11694_v56  ;;  %v11698_v46 = vld [vmem:[#allocation2 + $0xc8] sm:$0xff] }
 0x367   : > { %4781 = vrot.lane.b32.xlu1 %v5545_v20, %s10094_s17  ;;  %v11701_v20 = vrot.slane %v7567_v32, %v10513_v51  ;;  %16349 = vst [vmem:[#allocation158_spill] sm:$0xff] %v11709_v25  ;;  %v7599_v32 = vcombine.low %v11709_v25, %v11694_v56 }
 0x368   : > { %v11687_v2 = vpop.permute.xlu0 %7191 }
 0x369   : > { %16344 = vst [vmem:[#allocation153_spill] sm:$0xff] %v11687_v2  ;;  %v11689_v40 = vpop.permute.xlu1 %7197  ;;  %16347 = vst [vmem:[#allocation156_spill] sm:$0xff] %v11701_v20 }
 0x36a   : > { %16345 = vst [vmem:[#allocation154_spill] sm:$0xff] %v11689_v40  ;;  %v7583_v62 = vcombine.low %v11674_v59, %v11689_v40  ;;  %3181 = vrot.lane.b32.xlu0 %v11548_v45, %s10095_s18 }
 0x36b   : > { %2309 = vrot.lane.b32.xlu1 %v11698_v46, %s10094_s17 }
 0x36c   : > { %v11704_v28 = vrot.slane %v7583_v62, %v10513_v51  ;;  %v11711_v42 = vpop.permute.xlu0 %5581  ;;  %v11721_v62 = vld [vmem:[#allocation2 + $0xe0] sm:$0xff] }
 0x36d   : > { %16350 = vst [vmem:[#allocation159_spill] sm:$0xff] %v11711_v42  ;;  %v11713_v13 = vpop.permute.xlu1 %7171 }
 0x36e   : > { %16348 = vst [vmem:[#allocation157_spill] sm:$0xff] %v11704_v28  ;;  %16351 = vst [vmem:[#allocation160_spill] sm:$0xff] %v11713_v13  ;;  %v7631_v45 = vcombine.low %v11701_v20, %v11704_v28  ;;  %3185 = vrot.lane.b32.xlu0 %v11572_v16, %s10095_s18  ;;  %v11733_v20 = vrot.slane %v7599_v32, %v10522_v63  ;;  %v11737_v28 = vld [vmem:[#allocation2 + $0xf8] sm:$0xff]  ;;  %v11751_v32 = vld [vmem:[#allocation2 + $0x110] sm:$0xff] }
 0x36f   : > { %2313 = vrot.lane.b32.xlu1 %v11721_v62, %s10094_s17 }
 0x370   : > { %v11726_v50 = vrot.slane %v7631_v45, %v10522_v63  ;;  %v11728_v59 = vpop.permute.xlu0 %5589  ;;  %16355 = vst [vmem:[#allocation164_spill] sm:$0xff] %v11733_v20 }
 0x371   : > { %16353 = vst [vmem:[#allocation162_spill] sm:$0xff] %v11728_v59  ;;  %v11730_v40 = vpop.permute.xlu1 %7179  ;;  %v5947_v54 = vcombine.low %v11711_v42, %v11728_v59 }
 0x372   : > { %16352 = vst [vmem:[#allocation161_spill] sm:$0xff] %v11726_v50  ;;  %16354 = vst [vmem:[#allocation163_spill] sm:$0xff] %v11730_v40  ;;  %3189 = vrot.lane.b32.xlu0 %v11599_v39, %s10095_s18  ;;  %v7279_v56 = vcombine.low %v11713_v13, %v11730_v40  ;;  %v7295_v39 = vcombine.low %v11672_v33, %v11687_v2  ;;  %v5531_v50 = vld [vmem:[#allocation2 + $0xc1] sm:$0xff]  ;;  %v11780_v2 = vrot.slane %v7263_v43, %v10513_v51 }
 0x373   : > { %2317 = vrot.lane.b32.xlu1 %v11737_v28, %s10094_s17  ;;  %v11769_v13 = vld [vmem:[#allocation2 + $0x128] sm:$0xff] }
 0x374   : > { %v11741_v16 = vpop.permute.xlu0 %5597  ;;  %v11772_v40 = vrot.slane %v7295_v39, %v10513_v51  ;;  %16363 = vst [vmem:[#allocation172_spill] sm:$0xff] %v11780_v2 }
 0x375   : > { %16356 = vst [vmem:[#allocation165_spill] sm:$0xff] %v11741_v16  ;;  %v11743_v25 = vpop.permute.xlu1 %7187 }
 0x376   : > { %16357 = vst [vmem:[#allocation166_spill] sm:$0xff] %v11743_v25  ;;  %3193 = vrot.lane.b32.xlu0 %v11616_v19, %s10095_s18  ;;  %v11766_v19 = vrot.slane %v7279_v56, %v10513_v51  ;;  %16361 = vst [vmem:[#allocation170_spill] sm:$0xff] %v11772_v40 }
 0x377   : > { %2321 = vrot.lane.b32.xlu1 %v11751_v32, %s10094_s17 }
 0x378   : > { %v11759_v35 = vpop.permute.xlu0 %5605  ;;  %16360 = vst [vmem:[#allocation169_spill] sm:$0xff] %v11766_v19  ;;  %v7327_v39 = vcombine.low %v11780_v2, %v11766_v19 }
 0x379   : > { %16358 = vst [vmem:[#allocation167_spill] sm:$0xff] %v11759_v35  ;;  %v11761_v45 = vpop.permute.xlu1 %7195  ;;  %v5979_v29 = vcombine.low %v11741_v16, %v11759_v35  ;;  %v11846_v16 = vrot.slane %v5947_v54, %v10513_v51 }
 0x37a   : > { %16359 = vst [vmem:[#allocation168_spill] sm:$0xff] %v11761_v45  ;;  %v7311_v20 = vcombine.low %v11743_v25, %v11761_v45  ;;  %5611 = vrot.lane.b32.xlu0 %v5531_v50, %s10095_s18 }
 0x37b   : > { %2325 = vrot.lane.b32.xlu1 %v11769_v13, %s10094_s17  ;;  %16377 = vst [vmem:[#allocation186_spill] sm:$0xff] %v11846_v16 }
 0x37c   : > { %v11775_v33 = vrot.slane %v7311_v20, %v10513_v51  ;;  %v11782_v25 = vpop.permute.xlu0 %4723  ;;  %v11791_v20 = vld [vmem:[#allocation2 + $0x140] sm:$0xff] }
 0x37d   : > { %16364 = vst [vmem:[#allocation173_spill] sm:$0xff] %v11782_v25  ;;  %v11784_v56 = vpop.permute.xlu1 %5585 }
 0x37e   : > { %16362 = vst [vmem:[#allocation171_spill] sm:$0xff] %v11775_v33  ;;  %16365 = vst [vmem:[#allocation174_spill] sm:$0xff] %v11784_v56  ;;  %v7359_v45 = vcombine.low %v11772_v40, %v11775_v33  ;;  %5619 = vrot.lane.b32.xlu0 %v5535_v22, %s10095_s18  ;;  %v11803_v40 = vrot.slane %v7327_v39, %v10522_v63  ;;  %v11806_v33 = vld [vmem:[#allocation2 + $0x158] sm:$0xff]  ;;  %v11819_v39 = vld [vmem:[#allocation2 + $0x170] sm:$0xff] }
 0x37f   : > { %2329 = vrot.lane.b32.xlu1 %v11791_v20, %s10094_s17 }
 0x380   : > { %v11796_v43 = vrot.slane %v7359_v45, %v10522_v63  ;;  %v11798_v58 = vpop.permute.xlu0 %4731  ;;  %16369 = vst [vmem:[#allocation178_spill] sm:$0xff] %v11803_v40 }
 0x381   : > { %16367 = vst [vmem:[#allocation176_spill] sm:$0xff] %v11798_v58  ;;  %v11800_v5 = vpop.permute.xlu1 %5593 }
 0x382   : > { %16366 = vst [vmem:[#allocation175_spill] sm:$0xff] %v11796_v43  ;;  %16368 = vst [vmem:[#allocation177_spill] sm:$0xff] %v11800_v5  ;;  %5627 = vrot.lane.b32.xlu0 %v5539_v7, %s10095_s18  ;;  %v5963_v27 = vcombine.low %v11784_v56, %v11800_v5  ;;  %v11838_v56 = vrot.slane %v5979_v29, %v10513_v51 }
 0x383   : > { %2333 = vrot.lane.b32.xlu1 %v11806_v33, %s10094_s17 }
 0x384   : > { %v11810_v2 = vpop.permute.xlu0 %4739  ;;  %v11834_v43 = vrot.slane %v5963_v27, %v10513_v51  ;;  %16375 = vst [vmem:[#allocation184_spill] sm:$0xff] %v11838_v56 }
 0x385   : > { %16370 = vst [vmem:[#allocation179_spill] sm:$0xff] %v11810_v2  ;;  %v11812_v19 = vpop.permute.xlu1 %5601 }
 0x386   : > { %16371 = vst [vmem:[#allocation180_spill] sm:$0xff] %v11812_v19  ;;  %5635 = vrot.lane.b32.xlu0 %v5543_v17, %s10095_s18  ;;  %16374 = vst [vmem:[#allocation183_spill] sm:$0xff] %v11834_v43  ;;  %v6011_v29 = vcombine.low %v11846_v16, %v11834_v43  ;;  %v5089_v43 = vcombine.low %v11782_v25, %v11798_v58  ;;  %v16391_v58 = vld [vmem:[#allocation12_spill] sm:$0xff] }
 0x387   : > { %2337 = vrot.lane.b32.xlu1 %v11819_v39, %s10094_s17 }
 0x388   : > { %v11827_v9 = vpop.permute.xlu0 %4747 }
 0x389   : > { %16372 = vst [vmem:[#allocation181_spill] sm:$0xff] %v11827_v9  ;;  %v11829_v45 = vpop.permute.xlu1 %5609 }
 0x38a   : > { %16373 = vst [vmem:[#allocation182_spill] sm:$0xff] %v11829_v45  ;;  %v5995_v40 = vcombine.low %v11812_v19, %v11829_v45  ;;  %4753 = vrot.lane.b32.xlu0 %v5531_v50, %s10094_s17  ;;  %v9944_v50 = vld [vmem:[#allocation2 + $0x7c] ss:$48 sps:$4 sm:$0xff]   ;;  %v11867_v45 = vrot.slane %v6011_v29, %v10522_v63 }
 0x38b   : > { %3167 = vrot.lane.b32.xlu1 %v11698_v46, %s10095_s18  ;;  %v1570_v16 = vrot.slane %v9944_v50, %v10513_v51 }
 0x38c   : > { %v11841_v5 = vrot.slane %v5995_v40, %v10513_v51  ;;  %v11848_v35 = vpop.permute.xlu0 %8027  ;;  %16383 = vst [vmem:[#allocation192_spill] sm:$0xff] %v11867_v45 }
 0x38d   : > { %16378 = vst [vmem:[#allocation187_spill] sm:$0xff] %v11848_v35  ;;  %v11850_v19 = vpop.permute.xlu1 %4727 }
 0x38e   : > { %16376 = vst [vmem:[#allocation185_spill] sm:$0xff] %v11841_v5  ;;  %16379 = vst [vmem:[#allocation188_spill] sm:$0xff] %v11850_v19  ;;  %v6043_v27 = vcombine.low %v11838_v56, %v11841_v5  ;;  %4761 = vrot.lane.b32.xlu0 %v5535_v22, %s10094_s17  ;;  %v9942_v56 = vld [vmem:[#allocation2 + $0x1c] ss:$48 sps:$4 sm:$0xff]   ;;  %v9943_v5 = vld [vmem:[#allocation2 + $0x64] ss:$48 sps:$4 sm:$0xff]  }
 0x38f   : > { %3171 = vrot.lane.b32.xlu1 %v11721_v62, %s10095_s18  ;;  %v9941_v22 = vld [vmem:[#allocation2 + $0x4] ss:$48 sps:$4 sm:$0xff]   ;;  %v1554_v42 = vrot.slane %v9943_v5, %v10513_v51 }
 0x390   : > { %v11860_v40 = vrot.slane %v6043_v27, %v10522_v63  ;;  %v11862_v54 = vpop.permute.xlu0 %8035  ;;  %v1522_v50 = vrot.slane %v9941_v22, %v10513_v51 }
 0x391   : > { %16381 = vst [vmem:[#allocation190_spill] sm:$0xff] %v11862_v54  ;;  %v11864_v46 = vpop.permute.xlu1 %4735  ;;  %v1620_v5 = vcombine.high %v1554_v42, %v1570_v16 }
 0x392   : > { %16380 = vst [vmem:[#allocation189_spill] sm:$0xff] %v11860_v40  ;;  %16382 = vst [vmem:[#allocation191_spill] sm:$0xff] %v11864_v46  ;;  %4769 = vrot.lane.b32.xlu0 %v5539_v7, %s10094_s17  ;;  %v5105_v29 = vcombine.low %v11850_v19, %v11864_v46  ;;  %v1538_v7 = vrot.slane %v9942_v56, %v10513_v51  ;;  %v1619_v56 = vcombine.low %v1554_v42, %v1570_v16  ;;  %v11899_v46 = vld [vmem:[#allocation2 + $0xca] sm:$0xff] }
 0x393   : > { %3175 = vrot.lane.b32.xlu1 %v11737_v28, %s10095_s18  ;;  %v5121_v28 = vcombine.low %v11810_v2, %v11827_v9  ;;  %16388 = vst [vmem:[#allocation197_spill] sm:$0xff] %v11899_v46 }
 0x394   : > { %v11872_v62 = vpop.permute.xlu0 %8043  ;;  %v11904_v2 = vrot.slane %v5105_v29, %v10513_v51  ;;  %v1587_v9 = vcombine.low %v1522_v50, %v1538_v7  ;;  %v1588_v25 = vcombine.high %v1522_v50, %v1538_v7  ;;  %v16395_v29 = vld [vmem:[#allocation8_spill] sm:$0xff] }
 0x395   : > { %16384 = vst [vmem:[#allocation193_spill] sm:$0xff] %v11872_v62  ;;  %v11874_v27 = vpop.permute.xlu1 %4743  ;;  %v11911_v42 = vrot.slane %v5121_v28, %v10513_v51  ;;  %v11934_v28 = vrot.slane %v1620_v5, %v10522_v63 }
 0x396   : > { %16385 = vst [vmem:[#allocation194_spill] sm:$0xff] %v11874_v27  ;;  %4777 = vrot.lane.b32.xlu0 %v5543_v17, %s10094_s17  ;;  %v1604_v17 = vcombine.high %v10843_v60, %v10846_v61  ;;  %v16392_v60 = vld [vmem:[#allocation11_spill] sm:$0xff]  ;;  %v11951_v5 = vrot.slane %v1588_v25, %v10522_v63 }
 0x397   : > { %3179 = vrot.lane.b32.xlu1 %v11751_v32, %s10095_s18  ;;  %v16389_v32 = vld [vmem:[#allocation9_spill] sm:$0xff]  ;;  %v4056_v61 = vcombine.high %v16392_v60, %v16391_v58  ;;  %16393 = vst [vmem:[#allocation12_spill] sm:$0xff] %v11911_v42  ;;  %v11938_v60 = vld [vmem:[#allocation2 + $0xfa] sm:$0xff] }
 0x398   : > { %v11891_v45 = vpop.permute.xlu0 %8051  ;;  %v1572_v22 = vcombine.high %v16389_v32, %v10834_v53  ;;  %16390 = vst [vmem:[#allocation9_spill] sm:$0xff] %v11904_v2  ;;  %v9935_v53 = vld [vmem:[#allocation2 + $0xd8] ss:$48 sps:$4 sm:$0xff]   ;;  %v16396_v32 = vld [vmem:[#allocation10_spill] sm:$0xff]  ;;  %v11928_v58 = vrot.slane %v1604_v17, %v10522_v63  ;;  %16400 = vst [vmem:[#allocation199_spill] sm:$0xff] %v11938_v60 }
 0x399   : > { %16386 = vst [vmem:[#allocation195_spill] sm:$0xff] %v11891_v45  ;;  %v11893_v40 = vpop.permute.xlu1 %4751 }
 0x39a   : > { %16387 = vst [vmem:[#allocation196_spill] sm:$0xff] %v11893_v40  ;;  %v5137_v19 = vcombine.low %v11874_v27, %v11893_v40  ;;  %7201 = vrot.lane.b32.xlu0 %v11899_v46, %s10094_s17  ;;  %v4024_v27 = vcombine.high %v16396_v32, %v16395_v29  ;;  %v11921_v40 = vrot.slane %v5089_v43, %v10513_v51  ;;  %v9933_v43 = vld [vmem:[#allocation2 + $0xc0] ss:$48 sps:$4 sm:$0xff]   ;;  %v9946_v32 = vld [vmem:[#allocation2 + $0xdc] ss:$48 sps:$4 sm:$0xff]  }
 0x39b   : > { %3183 = vrot.lane.b32.xlu1 %v11769_v13, %s10095_s18  ;;  %v11941_v29 = vrot.slane %v1572_v22, %v10522_v63  ;;  %v16401_v22 = vld [vmem:[#allocation13_spill] sm:$0xff]  ;;  %v1674_v38 = vrot.slane %v9946_v32, %v10513_v51 }
 0x39c   : > { %v11914_v16 = vrot.slane %v5137_v19, %v10513_v51  ;;  %16397 = vst [vmem:[#allocation8_spill] sm:$0xff] %v11921_v40  ;;  %v11923_v7 = vpop.permute.xlu0 %8025  ;;  %v11931_v19 = vrot.slane %v1619_v56, %v10522_v63  ;;  %v5153_v17 = vcombine.low %v11921_v40, %v11904_v2  ;;  %v11948_v56 = vrot.slane %v1587_v9, %v10522_v63  ;;  %v9945_v2 = vld [vmem:[#allocation2 + $0xc4] ss:$48 sps:$4 sm:$0xff]   ;;  %v16440_v46 = vld [vmem:[#allocation29_spill] sm:$0xff] }
 0x39d   : > { %16398 = vst [vmem:[#allocation10_spill] sm:$0xff] %v11923_v7  ;;  %v11925_v50 = vpop.permute.xlu1 %8031  ;;  %v11961_v40 = vrot.slane %v9935_v53, %v10513_v51  ;;  %v11964_v9 = vrot.slane %v4024_v27, %v10522_v63  ;;  %v11979_v27 = vld [vmem:[#allocation2 + $0x12a] sm:$0xff]  ;;  %v1658_v59 = vrot.slane %v9945_v2, %v10513_v51 }
 0x39e   : > { %16394 = vst [vmem:[#allocation11_spill] sm:$0xff] %v11914_v16  ;;  %16399 = vst [vmem:[#allocation198_spill] sm:$0xff] %v11925_v50  ;;  %v5185_v13 = vcombine.low %v11911_v42, %v11914_v16  ;;  %7209 = vrot.lane.b32.xlu0 %v11938_v60, %s10094_s17  ;;  %v11954_v42 = vrot.slane %v4056_v61, %v10522_v63  ;;  %v16402_v16 = vld [vmem:[#allocation15_spill] sm:$0xff]  ;;  %v11988_v30 = vrot.slane %v5153_v17, %v10522_v63  ;;  %v9937_v53 = vld [vmem:[#allocation2 + $0x120] ss:$48 sps:$4 sm:$0xff]  }
 0x39f   : > { %3187 = vrot.lane.b32.xlu1 %v11791_v20, %s10095_s18  ;;  %v9939_v61 = vld [vmem:[#allocation2 + $0x138] ss:$48 sps:$4 sm:$0xff]   ;;  %16406 = vst [vmem:[#allocation203_spill] sm:$0xff] %v11979_v27  ;;  %v9957_v20 = vld [vmem:[#allocation2 + $0xc1] ss:$48 sps:$4 sm:$0xff]   ;;  %v1723_v0 = vcombine.low %v1658_v59, %v1674_v38  ;;  %v1683_v2 = vrot.slane %v9937_v53, %v10513_v51  ;;  %v1724_v60 = vcombine.high %v1658_v59, %v1674_v38 }
 0x3a0   : > { %v11967_v25 = vrot.slane %v5185_v13, %v10522_v63  ;;  %v11969_v1 = vpop.permute.xlu0 %8033  ;;  %v1651_v13 = vrot.slane %v9933_v43, %v10513_v51  ;;  %16409 = vst [vmem:[#allocation204_spill] sm:$0xff] %v11988_v30  ;;  %v1699_v32 = vrot.slane %v9939_v61, %v10513_v51  ;;  %v4103_v61 = vrot.slane %v9957_v20, %v10513_v51 }
 0x3a1   : > { %16404 = vst [vmem:[#allocation201_spill] sm:$0xff] %v11969_v1  ;;  %v11977_v26 = vpop.permute.xlu1 %8039  ;;  %v4151_v30 = vrot.slane %v9963_v44, %v10513_v51  ;;  %v8425_v38 = vcombine.low %v11872_v62, %v11891_v45  ;;  %v12057_v45 = vld [vmem:[#allocation2 + $0xe2] sm:$0xff] }
 0x3a2   : > { %16403 = vst [vmem:[#allocation200_spill] sm:$0xff] %v11967_v25  ;;  %16405 = vst [vmem:[#allocation202_spill] sm:$0xff] %v11977_v26  ;;  %7217 = vrot.lane.b32.xlu0 %v11979_v27, %s10094_s17  ;;  %v1707_v17 = vcombine.low %v1651_v13, %v11961_v40  ;;  %v1708_v43 = vcombine.high %v1651_v13, %v11961_v40  ;;  %v8409_v49 = vcombine.low %v11925_v50, %v11977_v26 }
 0x3a3   : > { %3191 = vrot.lane.b32.xlu1 %v11806_v33, %s10095_s18  ;;  %v16411_v33 = vld [vmem:[#allocation18_spill] sm:$0xff]  ;;  %v1690_v40 = vrot.slane %v9947_v24, %v10513_v51  ;;  %v4159_v20 = vcombine.low %v4103_v61, %v12003_v52  ;;  %v4160_v13 = vcombine.high %v4103_v61, %v12003_v52  ;;  %v8393_v25 = vcombine.low %v11848_v35, %v11862_v54 }
 0x3a4   : > { %v12007_v27 = vpop.permute.xlu0 %8041  ;;  %v12033_v57 = vrot.slane %v1707_v17, %v10522_v63  ;;  %v1739_v44 = vcombine.low %v1683_v2, %v1699_v32  ;;  %v12047_v17 = vld [vmem:[#allocation2 + $0xc2] sm:$0xff]  ;;  %v1740_v24 = vcombine.high %v1683_v2, %v1699_v32  ;;  %v1810_v52 = vrot.slane %v9982_v23, %v10513_v51  ;;  %16420 = vst [vmem:[#allocation213_spill] sm:$0xff] %v12057_v45 }
 0x3a5   : > { %16410 = vst [vmem:[#allocation205_spill] sm:$0xff] %v12007_v27  ;;  %v12017_v48 = vpop.permute.xlu1 %8047  ;;  %16418 = vst [vmem:[#allocation211_spill] sm:$0xff] %v12047_v17  ;;  %v1755_v50 = vcombine.low %v1690_v40, %v1706_v21  ;;  %v1756_v26 = vcombine.high %v1690_v40, %v1706_v21  ;;  %v12051_v61 = vrot.slane %v8409_v49, %v10513_v51  ;;  %v16421_v2 = vld [vmem:[#allocation20_spill] sm:$0xff]  ;;  %v16422_v49 = vld [vmem:[#allocation21_spill] sm:$0xff] }
 0x3a6   : > { %16413 = vst [vmem:[#allocation206_spill] sm:$0xff] %v12017_v48  ;;  %7225 = vrot.lane.b32.xlu0 %v12019_v8, %s10094_s17  ;;  %16415 = vst [vmem:[#allocation208_spill] sm:$0xff] %v12033_v57  ;;  %v12065_v21 = vrot.slane %v1723_v0, %v10522_v63  ;;  %v12068_v23 = vrot.slane %v1724_v60, %v10522_v63  ;;  %v1844_v40 = vcombine.high %v16422_v49, %v16421_v2  ;;  %v9983_v60 = vld [vmem:[#allocation2 + $0x6c] ss:$48 sps:$4 sm:$0xff]   ;;  %v12104_v49 = vld [vmem:[#allocation2 + $0x112] sm:$0xff] }
 0x3a7   : > { %3195 = vrot.lane.b32.xlu1 %v11819_v39, %s10095_s18  ;;  %v4135_v39 = vrot.slane %v9961_v14, %v10513_v51  ;;  %16419 = vst [vmem:[#allocation212_spill] sm:$0xff] %v12051_v61  ;;  %v12060_v14 = vrot.slane %v1708_v43, %v10522_v63  ;;  %v12076_v43 = vrot.slane %v8425_v38, %v10513_v51  ;;  %16430 = vst [vmem:[#allocation219_spill] sm:$0xff] %v12104_v49  ;;  %v16439_v8 = vld [vmem:[#allocation24_spill] sm:$0xff] }
 0x3a8   : > { %v12042_v59 = vpop.permute.xlu0 %8049  ;;  %v12084_v0 = vrot.slane %v1739_v44, %v10522_v63  ;;  %v12095_v38 = vrot.slane %v1756_v26, %v10522_v63  ;;  %v12115_v26 = vrot.slane %v4160_v13, %v10522_v63  ;;  %v12131_v13 = vrot.slane %v1844_v40, %v10522_v63  ;;  %v9986_v40 = vld [vmem:[#allocation2 + $0xe4] ss:$48 sps:$4 sm:$0xff]  }
 0x3a9   : > { %16416 = vst [vmem:[#allocation209_spill] sm:$0xff] %v12042_v59  ;;  %v12045_v53 = vpop.permute.xlu1 %8055  ;;  %v4191_v35 = vcombine.low %v4135_v39, %v4151_v30  ;;  %v4192_v32 = vcombine.high %v4135_v39, %v4151_v30  ;;  %16424 = vst [vmem:[#allocation21_spill] sm:$0xff] %v12076_v43  ;;  %v12088_v30 = vld [vmem:[#allocation2 + $0xf2] sm:$0xff]  ;;  %v1754_v39 = vrot.slane %v1740_v24, %v10522_v63 }
 0x3aa   : > { %16417 = vst [vmem:[#allocation210_spill] sm:$0xff] %v12045_v53  ;;  %v8441_v62 = vcombine.low %v12017_v48, %v12045_v53  ;;  %7199 = vrot.lane.b32.xlu0 %v12047_v17, %s10094_s17  ;;  %v12073_v48 = vrot.slane %v8393_v25, %v10513_v51  ;;  %16427 = vst [vmem:[#allocation216_spill] sm:$0xff] %v12084_v0  ;;  %v12092_v25 = vrot.slane %v1755_v50, %v10522_v63 }
 0x3ab   : > { %7205 = vrot.lane.b32.xlu1 %v12057_v45, %s10094_s17  ;;  %16429 = vst [vmem:[#allocation218_spill] sm:$0xff] %v12088_v30  ;;  %v12107_v24 = vrot.slane %v4159_v20, %v10522_v63  ;;  %v12110_v50 = vrot.slane %v4191_v35, %v10522_v63  ;;  %v1773_v17 = vcombine.low %v12060_v14, %v1754_v39 }
 0x3ac   : > { %16423 = vst [vmem:[#allocation20_spill] sm:$0xff] %v12073_v48  ;;  %v12079_v53 = vrot.slane %v8441_v62, %v10513_v51  ;;  %v12081_v54 = vpop.permute.xlu0 %2307  ;;  %v1859_v62 = vcombine.low %v12011_v55, %v1810_v52  ;;  %v8457_v2 = vcombine.low %v12073_v48, %v12051_v61  ;;  %v12118_v48 = vrot.slane %v4192_v32, %v10522_v63 }
 0x3ad   : > { %16426 = vst [vmem:[#allocation215_spill] sm:$0xff] %v12081_v54  ;;  %v12086_v45 = vpop.permute.xlu1 %8029  ;;  %16431 = vst [vmem:[#allocation220_spill] sm:$0xff] %v12107_v24  ;;  %v4175_v61 = vcombine.low %v10944_v34, %v10947_v12  ;;  %v12134_v32 = vrot.slane %v9983_v60, %v10513_v51  ;;  %v1774_v34 = vcombine.high %v12060_v14, %v1754_v39  ;;  %v12153_v60 = vld [vmem:[#allocation2 + $0x142] sm:$0xff] }
 0x3ae   : > { %16425 = vst [vmem:[#allocation214_spill] sm:$0xff] %v12079_v53  ;;  %16428 = vst [vmem:[#allocation217_spill] sm:$0xff] %v12086_v45  ;;  %v8489_v44 = vcombine.low %v12076_v43, %v12079_v53  ;;  %7207 = vrot.lane.b32.xlu0 %v12088_v30, %s10094_s17  ;;  %v9984_v43 = vld [vmem:[#allocation2 + $0x84] ss:$48 sps:$4 sm:$0xff]   ;;  %v1860_v53 = vcombine.high %v12011_v55, %v1810_v52  ;;  %v1776_v12 = vcombine.high %v12065_v21, %v12092_v25 }
 0x3af   : > { %16432 = vst [vmem:[#allocation221_spill] sm:$0xff] %v12110_v50  ;;  %7213 = vrot.lane.b32.xlu1 %v12104_v49, %s10094_s17  ;;  %v1772_v49 = vcombine.high %v12033_v57, %v12084_v0  ;;  %v12138_v55 = vld [vmem:[#allocation2 + $0x122] sm:$0xff]  ;;  %v1778_v52 = vcombine.high %v12068_v23, %v12095_v38  ;;  %v12149_v57 = vrot.slane %v8457_v2, %v10522_v63  ;;  %16438 = vst [vmem:[#allocation227_spill] sm:$0xff] %v12153_v60 }
 0x3b0   : > { %v12124_v20 = vrot.slane %v8489_v44, %v10522_v63  ;;  %v12126_v35 = vpop.permute.xlu0 %2311  ;;  %16436 = vst [vmem:[#allocation225_spill] sm:$0xff] %v12138_v55  ;;  %v12146_v44 = vrot.slane %v1859_v62, %v10522_v63  ;;  %v4224_v0 = vcombine.high %v12107_v24, %v12110_v50  ;;  %v1876_v6 = vcombine.high %v16440_v46, %v16439_v8 }
 0x3b1   : > { %16434 = vst [vmem:[#allocation223_spill] sm:$0xff] %v12126_v35  ;;  %v12136_v30 = vpop.permute.xlu1 %8037  ;;  %16437 = vst [vmem:[#allocation226_spill] sm:$0xff] %v12149_v57  ;;  %v4226_v62 = vcombine.high %v12115_v26, %v12118_v48  ;;  %v1842_v2 = vrot.slane %v9984_v43, %v10513_v51  ;;  %v12169_v3 = vrot.slane %v4175_v61, %v10522_v63  ;;  %v12186_v61 = vld [vmem:[#allocation2 + $0x152] sm:$0xff]  ;;  %v12264_v57 = vld [vmem:[#allocation2 + $0xda] sm:$0xff] }
 0x3b2   : > { %16433 = vst [vmem:[#allocation222_spill] sm:$0xff] %v12124_v20  ;;  %16435 = vst [vmem:[#allocation224_spill] sm:$0xff] %v12136_v30  ;;  %7215 = vrot.lane.b32.xlu0 %v12138_v55, %s10094_s17  ;;  %v12166_v55 = vrot.slane %v1860_v53, %v10522_v63  ;;  %v16443_v46 = vcombine.high %v16402_v16, %v16401_v22  ;;  %v1775_v14 = vcombine.low %v12065_v21, %v12092_v25 }
 0x3b3   : > { %7221 = vrot.lane.b32.xlu1 %v12153_v60, %s10094_s17  ;;  %16441 = vst [vmem:[#allocation24_spill] sm:$0xff] %v12169_v3  ;;  %v4207_v43 = vcombine.low %v11336_v31, %v11330_v18  ;;  %v16445_v50 = vcombine.high %v11941_v29, %v11928_v58  ;;  %v16449_v18 = vcombine.high %v11951_v5, %v11934_v28 }
 0x3b4   : > { %v12171_v24 = vpop.permute.xlu0 %2315  ;;  %v12176_v8 = vpack.i.bf16 %v1772_v49, %v16443_v46  ;;  %v16447_v49 = vcombine.high %v11948_v56, %v11931_v19  ;;  %v1946_v21 = vrot.slane %v9986_v40, %v10513_v51  ;;  %v8137_v25 = vcombine.low %v12086_v45, %v12136_v30  ;;  %v10013_v45 = vld [vmem:[#allocation2 + $0x6] ss:$48 sps:$4 sm:$0xff]  }
 0x3b5   : > { %16442 = vst [vmem:[#allocation29_spill] sm:$0xff] %v12171_v24  ;;  %v12184_v39 = vpop.permute.xlu1 %8045  ;;  %v12191_v60 = vpack.i.bf16 %v1774_v34, %v16445_v50  ;;  %v12201_v31 = vpack.i.bf16 %v1778_v52, %v16449_v18  ;;  %v12208_v50 = vld [vmem:[#allocation2 + $0x172] sm:$0xff]  ;;  %v16451_v34 = vcombine.high %v16408_v15, %v16407_v41  ;;  %v12221_v40 = vrot.slane %v1876_v6, %v10522_v63  ;;  %v16462_v15 = vld [vmem:[#allocation32_spill] sm:$0xff] }
 0x3b6   : > { %16444 = vst [vmem:[#allocation228_spill] sm:$0xff] %v12184_v39  ;;  %v12196_v46 = vpack.i.bf16 %v1776_v12, %v16447_v49  ;;  %7223 = vrot.lane.b32.xlu0 %v12186_v61, %s10094_s17  ;;  %v16453_v49 = vcombine.low %v11941_v29, %v11928_v58  ;;  %v1777_v18 = vcombine.low %v12068_v23, %v12095_v38 }
 0x3b7   : > { %16446 = vst [vmem:[#allocation229_spill] sm:$0xff] %v12191_v60  ;;  %16450 = vst [vmem:[#allocation231_spill] sm:$0xff] %v12201_v31  ;;  %v12213_v12 = vpack.i.bf16 %v4224_v0, %v16451_v34  ;;  %7229 = vrot.lane.b32.xlu1 %v12208_v50, %s10094_s17  ;;  %v1891_v53 = vcombine.low %v12134_v32, %v1842_v2  ;;  %v1930_v41 = vrot.slane %v9985_v47, %v10513_v51  ;;  %v12246_v47 = vld [vmem:[#allocation2 + $0xc9] sm:$0xff] }
 0x3b8   : > { %16448 = vst [vmem:[#allocation230_spill] sm:$0xff] %v12196_v46  ;;  %v12218_v52 = vpack.i.bf16 %v1773_v17, %v16453_v49  ;;  %v1892_v0 = vcombine.high %v12134_v32, %v1842_v2  ;;  %v8121_v58 = vcombine.low %v11923_v7, %v11969_v1  ;;  %v8153_v29 = vcombine.low %v12007_v27, %v12042_v59  ;;  %v12234_v6 = vpop.permute.xlu0 %2319  ;;  %v16461_v49 = vld [vmem:[#allocation27_spill] sm:$0xff] }
 0x3b9   : > { %16452 = vst [vmem:[#allocation232_spill] sm:$0xff] %v12213_v12  ;;  %16455 = vst [vmem:[#allocation234_spill] sm:$0xff] %v12234_v6  ;;  %v16456_v17 = vcombine.high %v11964_v9, %v11954_v42  ;;  %v12242_v23 = vrot.slane %v4207_v43, %v10522_v63  ;;  %v12244_v38 = vpop.permute.xlu1 %8053  ;;  %v16459_v32 = vcombine.low %v11948_v56, %v11931_v19  ;;  %v9988_v56 = vld [vmem:[#allocation2 + $0x144] ss:$48 sps:$4 sm:$0xff]   ;;  %v10014_v19 = vld [vmem:[#allocation2 + $0x1e] ss:$48 sps:$4 sm:$0xff]  }
 0x3ba   : > { %16454 = vst [vmem:[#allocation233_spill] sm:$0xff] %v12218_v52  ;;  %16458 = vst [vmem:[#allocation236_spill] sm:$0xff] %v12244_v38  ;;  %v1980_v22 = vcombine.high %v16462_v15, %v16461_v49  ;;  %v1995_v16 = vcombine.low %v1930_v41, %v1946_v21  ;;  %v8169_v43 = vcombine.low %v12184_v39, %v12244_v38  ;;  %5613 = vrot.lane.b32.xlu0 %v12246_v47, %s10095_s18  ;;  %v16467_v49 = vld [vmem:[#allocation30_spill] sm:$0xff]  ;;  %v16476_v38 = vld [vmem:[#allocation25_spill] sm:$0xff] }
 0x3bb   : > { %v12239_v34 = vpack.i.bf16 %v4226_v62, %v16456_v17  ;;  %v12251_v2 = vpack.i.bf16 %v1775_v14, %v16459_v32  ;;  %v4225_v62 = vcombine.low %v12115_v26, %v12118_v48  ;;  %v12258_v17 = vrot.slane %v8137_v25, %v10513_v51  ;;  %7203 = vrot.lane.b32.xlu1 %v12264_v57, %s10094_s17  ;;  %v16466_v32 = vld [vmem:[#allocation26_spill] sm:$0xff]  ;;  %v16485_v1 = vld [vmem:[#allocation51_spill] sm:$0xff] }
 0x3bc   : > { %v1996_v15 = vcombine.high %v1930_v41, %v1946_v21  ;;  %v16464_v48 = vcombine.low %v11951_v5, %v11934_v28  ;;  %v12276_v14 = vrot.slane %v1891_v53, %v10522_v63  ;;  %v12279_v25 = vrot.slane %v1892_v0, %v10522_v63  ;;  %v12292_v5 = vpop.permute.xlu0 %2323  ;;  %v9987_v53 = vld [vmem:[#allocation2 + $0x12c] ss:$48 sps:$4 sm:$0xff]  }
 0x3bd   : > { %16457 = vst [vmem:[#allocation235_spill] sm:$0xff] %v12239_v34  ;;  %16460 = vst [vmem:[#allocation237_spill] sm:$0xff] %v12251_v2  ;;  %v6502_v39 = vcombine.high %v16467_v49, %v16466_v32  ;;  %v12284_v41 = vrot.slane %v8121_v58, %v10513_v51  ;;  %v12287_v21 = vrot.slane %v8153_v29, %v10513_v51  ;;  %v12296_v0 = vpop.permute.xlu1 %5615  ;;  %v16475_v49 = vld [vmem:[#allocation23_spill] sm:$0xff] }
 0x3be   : > { %16463 = vst [vmem:[#allocation27_spill] sm:$0xff] %v12258_v17  ;;  %v12273_v26 = vpack.i.bf16 %v1777_v18, %v16464_v48  ;;  %v12290_v28 = vrot.slane %v8169_v43, %v10513_v51  ;;  %16471 = vst [vmem:[#allocation239_spill] sm:$0xff] %v12292_v5  ;;  %v4227_v18 = vcombine.low %v12169_v3, %v12242_v23  ;;  %v12298_v48 = vld [vmem:[#allocation2 + $0xf9] sm:$0xff] }
 0x3bf   : > { %16468 = vst [vmem:[#allocation26_spill] sm:$0xff] %v12284_v41  ;;  %16469 = vst [vmem:[#allocation30_spill] sm:$0xff] %v12287_v21  ;;  %v12301_v32 = vrot.slane %v1980_v22, %v10522_v63  ;;  %v12304_v58 = vrot.slane %v1995_v16, %v10522_v63  ;;  %v16473_v29 = vcombine.low %v11964_v9, %v11954_v42  ;;  %5621 = vrot.lane.b32.xlu0 %v12298_v48, %s10095_s18  ;;  %v12319_v16 = vld [vmem:[#allocation2 + $0x10a] sm:$0xff] }
 0x3c0   : > { %16465 = vst [vmem:[#allocation32_spill] sm:$0xff] %v12273_v26  ;;  %16470 = vst [vmem:[#allocation238_spill] sm:$0xff] %v12290_v28  ;;  %v6470_v20 = vcombine.high %v16476_v38, %v16475_v49  ;;  %v8185_v30 = vcombine.low %v12284_v41, %v12258_v17  ;;  %v8217_v27 = vcombine.low %v12287_v21, %v12290_v28  ;;  %v10016_v9 = vld [vmem:[#allocation2 + $0x7e] ss:$48 sps:$4 sm:$0xff]   ;;  %7211 = vrot.lane.b32.xlu1 %v12319_v16, %s10094_s17  ;;  %v12340_v21 = vpop.permute.xlu0 %2327  ;;  %v10019_v26 = vld [vmem:[#allocation2 + $0x126] ss:$48 sps:$4 sm:$0xff]  }
 0x3c1   : > { %16472 = vst [vmem:[#allocation240_spill] sm:$0xff] %v12296_v0  ;;  %v12309_v43 = vpack.i.bf16 %v4225_v62, %v16473_v29  ;;  %16477 = vst [vmem:[#allocation23_spill] sm:$0xff] %v12319_v16  ;;  %v1978_v22 = vrot.slane %v9988_v56, %v10513_v51  ;;  %v12323_v42 = vrot.slane %v1996_v15, %v10522_v63  ;;  %v10015_v56 = vld [vmem:[#allocation2 + $0x66] ss:$48 sps:$4 sm:$0xff]   ;;  %v12350_v7 = vpop.permute.xlu1 %5623 }
 0x3c2   : > { %v12332_v29 = vrot.slane %v6502_v39, %v10522_v63  ;;  %v12335_v49 = vrot.slane %v10014_v19, %v10513_v51  ;;  %v12338_v15 = vrot.slane %v8217_v27, %v10522_v63  ;;  %16479 = vst [vmem:[#allocation242_spill] sm:$0xff] %v12340_v21  ;;  %v16480_v28 = vld [vmem:[#allocation36_spill] sm:$0xff]  ;;  %v16481_v41 = vld [vmem:[#allocation43_spill] sm:$0xff]  ;;  %v1962_v38 = vrot.slane %v9987_v53, %v10513_v51  ;;  %v12352_v19 = vld [vmem:[#allocation2 + $0x129] sm:$0xff] }
 0x3c3   : > { %16474 = vst [vmem:[#allocation241_spill] sm:$0xff] %v12309_v43  ;;  %v2012_v17 = vcombine.high %v16481_v41, %v16480_v28  ;;  %v16482_v62 = vcombine.low %v16412_v4, %v16411_v33  ;;  %v10020_v39 = vld [vmem:[#allocation2 + $0x13e] ss:$48 sps:$4 sm:$0xff]   ;;  %16484 = vst [vmem:[#allocation43_spill] sm:$0xff] %v12350_v7  ;;  %v12359_v41 = vrot.slane %v6470_v20, %v10522_v63  ;;  %5629 = vrot.lane.b32.xlu0 %v12352_v19, %s10095_s18 }
 0x3c4   : > { %16478 = vst [vmem:[#allocation25_spill] sm:$0xff] %v12338_v15  ;;  %v16486_v27 = vld [vmem:[#allocation40_spill] sm:$0xff]  ;;  %v12362_v28 = vrot.slane %v10013_v45, %v10513_v51  ;;  %v2028_v43 = vcombine.high %v1962_v38, %v1978_v22  ;;  %v12372_v2 = vrot.slane %v10016_v9, %v10513_v51  ;;  %v16489_v20 = vld [vmem:[#allocation31_spill] sm:$0xff]  ;;  %v12381_v52 = vrot.slane %v10015_v56, %v10513_v51  ;;  %v16493_v7 = vld [vmem:[#allocation41_spill] sm:$0xff] }
 0x3c5   : > { %v12348_v59 = vpack.i.bf16 %v4227_v18, %v16482_v62  ;;  %v10018_v53 = vld [vmem:[#allocation2 + $0xde] ss:$48 sps:$4 sm:$0xff]   ;;  %v12365_v18 = vrot.slane %v8185_v30, %v10522_v63  ;;  %v2026_v9 = vrot.slane %v2012_v17, %v10522_v63  ;;  %v1910_v45 = vcombine.high %v12131_v13, %v12221_v40 }
 0x3c6   : > { %v12369_v62 = vld [vmem:[#allocation2 + $0x13a] sm:$0xff]  ;;  %v16490_v30 = vld [vmem:[#allocation33_spill] sm:$0xff]  ;;  %v6485_v12 = vcombine.low %v12362_v28, %v12335_v49  ;;  %v6536_v46 = vcombine.high %v12359_v41, %v12332_v29  ;;  %v12421_v15 = vrot.slane %v10019_v26, %v10513_v51 }
 0x3c7   : > { %16483 = vst [vmem:[#allocation36_spill] sm:$0xff] %v12348_v59  ;;  %16487 = vst [vmem:[#allocation243_spill] sm:$0xff] %v12365_v18  ;;  %v2027_v59 = vcombine.low %v1962_v38, %v1978_v22  ;;  %7219 = vrot.lane.b32.xlu1 %v12369_v62, %s10094_s17  ;;  %v6606_v34 = vcombine.high %v16490_v30, %v16489_v20  ;;  %v10017_v22 = vld [vmem:[#allocation2 + $0xc6] ss:$48 sps:$4 sm:$0xff]   ;;  %v12385_v38 = vpop.permute.xlu0 %2331  ;;  %v12395_v30 = vpop.permute.xlu1 %5631  ;;  %v12416_v20 = vrot.slane %v2028_v43, %v10522_v63 }
 0x3c8   : > { %16488 = vst [vmem:[#allocation244_spill] sm:$0xff] %v12369_v62  ;;  %16491 = vst [vmem:[#allocation31_spill] sm:$0xff] %v12385_v38  ;;  %v16492_v0 = vld [vmem:[#allocation35_spill] sm:$0xff]  ;;  %v12391_v62 = vrot.slane %v10020_v39, %v10513_v51  ;;  %v6517_v18 = vcombine.low %v12381_v52, %v12372_v2  ;;  %v2539_v17 = vcombine.low %v12292_v5, %v12385_v38 }
 0x3c9   : > { %v6638_v31 = vcombine.high %v16493_v7, %v16492_v0  ;;  %16494 = vst [vmem:[#allocation33_spill] sm:$0xff] %v12395_v30  ;;  %v12397_v56 = vld [vmem:[#allocation2 + $0x159] sm:$0xff]  ;;  %v12406_v7 = vrot.slane %v10018_v53, %v10513_v51  ;;  %v12410_v0 = vld [vmem:[#allocation2 + $0x16a] sm:$0xff]  ;;  %v12413_v39 = vrot.slane %v2027_v59, %v10522_v63  ;;  %v2523_v53 = vcombine.low %v12126_v35, %v12234_v6 }
 0x3ca   : > { %5637 = vrot.lane.b32.xlu0 %v12397_v56, %s10095_s18  ;;  %16495 = vst [vmem:[#allocation35_spill] sm:$0xff] %v12410_v0  ;;  %v6620_v59 = vrot.slane %v6606_v34, %v10522_v63  ;;  %v12431_v43 = vrot.slane %v10017_v22, %v10513_v51  ;;  %v2045_v33 = vcombine.low %v12301_v32, %v2026_v9 }
 0x3cb   : > { %7227 = vrot.lane.b32.xlu1 %v12410_v0, %s10094_s17  ;;  %v12433_v30 = vpop.permute.xlu0 %2335  ;;  %v6652_v26 = vrot.slane %v6638_v31, %v10522_v63  ;;  %v12438_v4 = vrot.slane %v6485_v12, %v10522_v63  ;;  %v6653_v5 = vcombine.low %v12421_v15, %v12391_v62  ;;  %v2507_v38 = vcombine.low %v12081_v54, %v12171_v24  ;;  %v12446_v22 = vpop.permute.xlu1 %5639  ;;  %v12453_v31 = vld [vmem:[#allocation2 + $0xe1] sm:$0xff] }
 0x3cc   : > { %16496 = vst [vmem:[#allocation41_spill] sm:$0xff] %v12433_v30  ;;  %v2555_v34 = vcombine.low %v12340_v21, %v12433_v30  ;;  %16497 = vst [vmem:[#allocation245_spill] sm:$0xff] %v12446_v22  ;;  %v2044_v35 = vcombine.high %v11169_v37, %v11187_v11  ;;  %v2046_v6 = vcombine.high %v12301_v32, %v2026_v9  ;;  %v16501_v9 = vld [vmem:[#allocation54_spill] sm:$0xff]  ;;  %v16502_v37 = vld [vmem:[#allocation55_spill] sm:$0xff] }
 0x3cd   : > { %v2047_v12 = vcombine.low %v12304_v58, %v12413_v39  ;;  %v2049_v54 = vcombine.low %v12323_v42, %v12416_v20  ;;  %v6525_v24 = vrot.slane %v6517_v18, %v10522_v63  ;;  %v6621_v21 = vcombine.low %v12431_v43, %v12406_v7 }
 0x3ce   : > { %4755 = vrot.lane.b32.xlu0 %v12246_v47, %s10094_s17  ;;  %v12463_v11 = vrot.slane %v2523_v53, %v10513_v51  ;;  %v12466_v32 = vrot.slane %v2539_v17, %v10513_v51  ;;  %v12469_v47 = vrot.slane %v2555_v34, %v10513_v51  ;;  %v6670_v30 = vcombine.high %v16502_v37, %v16501_v9 }
 0x3cf   : > { %5617 = vrot.lane.b32.xlu1 %v12453_v31, %s10095_s18  ;;  %v12475_v0 = vpop.permute.xlu0 %3165  ;;  %v16504_v18 = vcombine.low %v12131_v13, %v12221_v40  ;;  %v6671_v53 = vcombine.low %v6620_v59, %v6652_v26  ;;  %v6672_v16 = vcombine.high %v6620_v59, %v6652_v26  ;;  %v6661_v17 = vrot.slane %v6653_v5, %v10522_v63  ;;  %v12488_v3 = vpop.permute.xlu1 %4757 }
 0x3d0   : > { %16498 = vst [vmem:[#allocation246_spill] sm:$0xff] %v12463_v11  ;;  %16499 = vst [vmem:[#allocation247_spill] sm:$0xff] %v12466_v32  ;;  %v12484_v34 = vrot.slane %v2507_v38, %v10513_v51  ;;  %v2603_v60 = vcombine.low %v12466_v32, %v12469_v47  ;;  %v16506_v9 = vcombine.high %v11071_v36, %v11166_v10 }
 0x3d1   : > { %16500 = vst [vmem:[#allocation248_spill] sm:$0xff] %v12469_v47  ;;  %16503 = vst [vmem:[#allocation249_spill] sm:$0xff] %v12475_v0  ;;  %v12480_v22 = vpack.i.bf16 %v2045_v33, %v16504_v18  ;;  %v12495_v13 = vpack.i.bf16 %v2046_v6, %v1910_v45  ;;  %v12499_v33 = vld [vmem:[#allocation2 + $0x111] sm:$0xff]  ;;  %v16507_v40 = vcombine.low %v12146_v44, %v12276_v14 }
 0x3d2   : > { %16505 = vst [vmem:[#allocation250_spill] sm:$0xff] %v12484_v34  ;;  %v12493_v37 = vpack.i.bf16 %v2044_v35, %v16506_v9  ;;  %4763 = vrot.lane.b32.xlu0 %v12298_v48, %s10094_s17  ;;  %v2048_v38 = vcombine.high %v12304_v58, %v12413_v39  ;;  %v6629_v59 = vrot.slane %v6621_v21, %v10522_v63  ;;  %v10044_v18 = vld [vmem:[#allocation2 + $0x146] ss:$48 sps:$4 sm:$0xff]  }
 0x3d3   : > { %v12504_v5 = vpack.i.bf16 %v2047_v12, %v16507_v40  ;;  %v6518_v35 = vcombine.high %v12381_v52, %v12372_v2  ;;  %v2571_v6 = vcombine.low %v12484_v34, %v12463_v11  ;;  %5625 = vrot.lane.b32.xlu1 %v12499_v33, %s10095_s18  ;;  %v16508_v48 = vcombine.low %v12166_v55, %v12279_v25  ;;  %v12524_v58 = vpop.permute.xlu0 %3169  ;;  %v16518_v40 = vld [vmem:[#allocation63_spill] sm:$0xff]  ;;  %v16534_v34 = vld [vmem:[#allocation22_spill] sm:$0xff] }
 0x3d4   : > { %v2050_v26 = vcombine.high %v12323_v42, %v12416_v20  ;;  %v6486_v21 = vcombine.high %v12362_v28, %v12335_v49  ;;  %16509 = vst [vmem:[#allocation251_spill] sm:$0xff] %v12524_v58  ;;  %v16510_v52 = vcombine.high %v16486_v27, %v16485_v1  ;;  %v16511_v39 = vcombine.low %v12359_v41, %v12332_v29  ;;  %v12541_v20 = vpop.permute.xlu1 %4765  ;;  %v12548_v29 = vld [vmem:[#allocation2 + $0x141] sm:$0xff] }
 0x3d5   : > { %v12518_v45 = vpack.i.bf16 %v2049_v54, %v16508_v48  ;;  %v12536_v54 = vpack.i.bf16 %v6672_v16, %v6536_v46  ;;  %v6673_v9 = vcombine.low %v6629_v59, %v6661_v17  ;;  %v12539_v42 = vrot.slane %v2603_v60, %v10522_v63  ;;  %v16521_v48 = vld [vmem:[#allocation38_spill] sm:$0xff] }
 0x3d6   : > { %v12529_v2 = vpack.i.bf16 %v6670_v30, %v16510_v52  ;;  %v12534_v12 = vpack.i.bf16 %v6671_v53, %v16511_v39  ;;  %v6537_v49 = vcombine.low %v12438_v4, %v6525_v24  ;;  %v1914_v28 = vcombine.high %v12166_v55, %v12279_v25  ;;  %4771 = vrot.lane.b32.xlu0 %v12352_v19, %s10094_s17  ;;  %v10043_v53 = vld [vmem:[#allocation2 + $0x12e] ss:$48 sps:$4 sm:$0xff]   ;;  %v10038_v52 = vld [vmem:[#allocation2 + $0x26] ss:$48 sps:$4 sm:$0xff]  }
 0x3d7   : > { %16512 = vst [vmem:[#allocation252_spill] sm:$0xff] %v12539_v42  ;;  %v6674_v30 = vcombine.high %v6629_v59, %v6661_v17  ;;  %v16513_v46 = vcombine.high %v12146_v44, %v12276_v14  ;;  %v6538_v60 = vcombine.high %v12438_v4, %v6525_v24  ;;  %v12557_v41 = vrot.slane %v6518_v35, %v10522_v63  ;;  %v10040_v24 = vld [vmem:[#allocation2 + $0x86] ss:$48 sps:$4 sm:$0xff]   ;;  %v12573_v17 = vpop.permute.xlu0 %3173  ;;  %v10039_v1 = vld [vmem:[#allocation2 + $0x6e] ss:$48 sps:$4 sm:$0xff]  }
 0x3d8   : > { %v6654_v55 = vcombine.high %v12421_v15, %v12391_v62  ;;  %v12562_v25 = vrot.slane %v2571_v6, %v10522_v63  ;;  %5633 = vrot.lane.b32.xlu1 %v12548_v29, %s10095_s18  ;;  %v12566_v19 = vpack.i.bf16 %v2050_v26, %v1914_v28  ;;  %v12569_v44 = vrot.slane %v6486_v21, %v10522_v63  ;;  %v10042_v14 = vld [vmem:[#allocation2 + $0xe6] ss:$48 sps:$4 sm:$0xff]   ;;  %v12583_v39 = vpop.permute.xlu1 %4773 }
 0x3d9   : > { %v12553_v16 = vpack.i.bf16 %v2048_v38, %v16513_v46  ;;  %v6622_v4 = vcombine.high %v12431_v43, %v12406_v7  ;;  %16516 = vst [vmem:[#allocation255_spill] sm:$0xff] %v12573_v17  ;;  %v12575_v15 = vpack.i.bf16 %v6673_v9, %v6537_v49  ;;  %v16517_v62 = vld [vmem:[#allocation61_spill] sm:$0xff]  ;;  %v16520_v35 = vld [vmem:[#allocation44_spill] sm:$0xff]  ;;  %v12585_v7 = vpack.i.bf16 %v6674_v30, %v6538_v60  ;;  %v16524_v43 = vld [vmem:[#allocation46_spill] sm:$0xff] }
 0x3da   : > { %16514 = vst [vmem:[#allocation253_spill] sm:$0xff] %v12562_v25  ;;  %16515 = vst [vmem:[#allocation254_spill] sm:$0xff] %v12566_v19  ;;  %v6942_v38 = vcombine.high %v16518_v40, %v16517_v62  ;;  %v16519_v59 = vld [vmem:[#allocation37_spill] sm:$0xff]  ;;  %v16525_v28 = vld [vmem:[#allocation48_spill] sm:$0xff]  ;;  %v6876_v49 = vrot.slane %v10044_v18, %v10513_v51  ;;  %4779 = vrot.lane.b32.xlu0 %v12397_v56, %s10094_s17  ;;  %v6539_v30 = vcombine.low %v12569_v44, %v12557_v41 }
 0x3db   : > { %v6742_v6 = vcombine.high %v16520_v35, %v16519_v59  ;;  %v16522_v26 = vld [vmem:[#allocation45_spill] sm:$0xff]  ;;  %16523 = vst [vmem:[#allocation37_spill] sm:$0xff] %v12585_v7  ;;  %v6878_v46 = vcombine.high %v16525_v28, %v16524_v43  ;;  %v12594_v59 = vld [vmem:[#allocation2 + $0x171] sm:$0xff]  ;;  %v6668_v60 = vrot.slane %v6654_v55, %v10522_v63  ;;  %v6636_v62 = vrot.slane %v6622_v4, %v10522_v63 }
 0x3dc   : > { %v6774_v21 = vcombine.high %v16522_v26, %v16521_v48  ;;  %v10041_v9 = vld [vmem:[#allocation2 + $0xce] ss:$48 sps:$4 sm:$0xff]   ;;  %5641 = vrot.lane.b32.xlu1 %v12594_v59, %s10095_s18  ;;  %v6740_v56 = vrot.slane %v10040_v24, %v10513_v51  ;;  %v6844_v27 = vrot.slane %v10042_v14, %v10513_v51  ;;  %v12620_v36 = vpop.permute.xlu1 %4781  ;;  %v6724_v24 = vrot.slane %v10039_v1, %v10513_v51  ;;  %v10068_v7 = vld [vmem:[#allocation2 + $0x145] ss:$48 sps:$4 sm:$0xff]  }
 0x3dd   : > { %v16526_v35 = vld [vmem:[#allocation58_spill] sm:$0xff]  ;;  %v16527_v48 = vld [vmem:[#allocation57_spill] sm:$0xff]  ;;  %v16529_v28 = vld [vmem:[#allocation47_spill] sm:$0xff]  ;;  %v12614_v55 = vrot.slane %v6742_v6, %v10522_v63  ;;  %v12623_v4 = vrot.slane %v6878_v46, %v10522_v63  ;;  %v6828_v14 = vrot.slane %v10041_v9, %v10513_v51  ;;  %v6675_v6 = vcombine.low %v6636_v62, %v6668_v60 }
 0x3de   : > { %v6806_v26 = vcombine.high %v16527_v48, %v16526_v35  ;;  %v16528_v43 = vld [vmem:[#allocation42_spill] sm:$0xff]  ;;  %v6860_v35 = vrot.slane %v10043_v53, %v10513_v51  ;;  %v12609_v48 = vpop.permute.xlu0 %3177  ;;  %v6676_v46 = vcombine.high %v6636_v62, %v6668_v60  ;;  %v6789_v1 = vcombine.low %v6724_v24, %v6740_v56  ;;  %v16533_v9 = vld [vmem:[#allocation39_spill] sm:$0xff]  ;;  %v16537_v62 = vld [vmem:[#allocation28_spill] sm:$0xff] }
 0x3df   : > { %v6910_v40 = vcombine.high %v16529_v28, %v16528_v43  ;;  %v10037_v18 = vld [vmem:[#allocation2 + $0xe] ss:$48 sps:$4 sm:$0xff]   ;;  %16530 = vst [vmem:[#allocation44_spill] sm:$0xff] %v12609_v48  ;;  %v12617_v43 = vrot.slane %v6774_v21, %v10522_v63  ;;  %v6708_v28 = vrot.slane %v10038_v52, %v10513_v51  ;;  %v6540_v52 = vcombine.high %v12569_v44, %v12557_v41 }
 0x3e0   : > { %v12611_v10 = vpack.i.bf16 %v6942_v38, %v6806_v26  ;;  %v6925_v53 = vcombine.low %v6860_v35, %v6876_v49  ;;  %v16532_v38 = vld [vmem:[#allocation197_spill] sm:$0xff]  ;;  %v6692_v21 = vrot.slane %v10037_v18, %v10513_v51  ;;  %v6926_v25 = vcombine.high %v6860_v35, %v6876_v49  ;;  %4759 = vrot.lane.b32.xlu1 %v12453_v31, %s10094_s17  ;;  %v16538_v35 = vld [vmem:[#allocation19_spill] sm:$0xff] }
 0x3e1   : > { %8059 = vrot.lane.b32.xlu0 %v16532_v38, %s10095_s18  ;;  %v6924_v26 = vrot.slane %v6910_v40, %v10522_v63  ;;  %v6893_v42 = vcombine.low %v6828_v14, %v6844_v27  ;;  %v2388_v11 = vcombine.high %v16534_v34, %v16533_v9  ;;  %v6790_v47 = vcombine.high %v6724_v24, %v6740_v56  ;;  %v16539_v34 = vld [vmem:[#allocation199_spill] sm:$0xff]  ;;  %v16547_v9 = vld [vmem:[#allocation49_spill] sm:$0xff] }
 0x3e2   : > { %16531 = vst [vmem:[#allocation38_spill] sm:$0xff] %v12611_v10  ;;  %v12637_v32 = vpop.permute.xlu0 %3181  ;;  %v6757_v38 = vcombine.low %v6692_v21, %v6708_v28  ;;  %v6894_v40 = vcombine.high %v6828_v14, %v6844_v27  ;;  %v12639_v10 = vpop.permute.xlu1 %2309  ;;  %v6807_v49 = vcombine.low %v12614_v55, %v12617_v43  ;;  %v6808_v31 = vcombine.high %v12614_v55, %v12617_v43 }
 0x3e3   : > { %16535 = vst [vmem:[#allocation45_spill] sm:$0xff] %v12637_v32  ;;  %16536 = vst [vmem:[#allocation46_spill] sm:$0xff] %v12639_v10  ;;  %v6933_v41 = vrot.slane %v6925_v53, %v10522_v63  ;;  %v6758_v44 = vcombine.high %v6692_v21, %v6708_v28  ;;  %v2372_v60 = vcombine.high %v16538_v35, %v16537_v62  ;;  %v16544_v21 = vld [vmem:[#allocation60_spill] sm:$0xff]  ;;  %v16549_v35 = vld [vmem:[#allocation71_spill] sm:$0xff] }
 0x3e4   : > { %v12650_v18 = vpack.i.bf16 %v6675_v6, %v6539_v30  ;;  %v6943_v27 = vcombine.low %v12623_v4, %v6924_v26  ;;  %v6940_v56 = vrot.slane %v6926_v25, %v10522_v63  ;;  %4767 = vrot.lane.b32.xlu1 %v12499_v33, %s10094_s17  ;;  %v12656_v24 = vpack.i.bf16 %v6676_v46, %v6540_v52  ;;  %v16543_v33 = vld [vmem:[#allocation69_spill] sm:$0xff] }
 0x3e5   : > { %8067 = vrot.lane.b32.xlu0 %v16539_v34, %s10095_s18  ;;  %v6944_v55 = vcombine.high %v12623_v4, %v6924_v26  ;;  %v6797_v43 = vrot.slane %v6789_v1, %v10522_v63  ;;  %v6901_v28 = vrot.slane %v6893_v42, %v10522_v63  ;;  %v12662_v14 = vrot.slane %v2388_v11, %v10513_v51  ;;  %v16546_v1 = vld [vmem:[#allocation59_spill] sm:$0xff]  ;;  %v16550_v34 = vld [vmem:[#allocation74_spill] sm:$0xff] }
 0x3e6   : > { %16540 = vst [vmem:[#allocation48_spill] sm:$0xff] %v12650_v18  ;;  %16541 = vst [vmem:[#allocation42_spill] sm:$0xff] %v12656_v24  ;;  %v12664_v30 = vpop.permute.xlu0 %3185  ;;  %v6765_v53 = vrot.slane %v6757_v38, %v10522_v63  ;;  %v6804_v25 = vrot.slane %v6790_v47, %v10522_v63  ;;  %v6908_v6 = vrot.slane %v6894_v40, %v10522_v63  ;;  %v12671_v46 = vpop.permute.xlu1 %2313  ;;  %v16548_v38 = vld [vmem:[#allocation203_spill] sm:$0xff]  ;;  %v16552_v24 = vld [vmem:[#allocation50_spill] sm:$0xff] }
 0x3e7   : > { %16542 = vst [vmem:[#allocation47_spill] sm:$0xff] %v12664_v30  ;;  %v2420_v52 = vcombine.high %v16544_v21, %v16543_v33  ;;  %16545 = vst [vmem:[#allocation197_spill] sm:$0xff] %v12671_v46  ;;  %v6945_v4 = vcombine.low %v6901_v28, %v6933_v41  ;;  %v6946_v26 = vcombine.high %v6901_v28, %v6933_v41  ;;  %v16551_v21 = vld [vmem:[#allocation66_spill] sm:$0xff] }
 0x3e8   : > { %v6772_v42 = vrot.slane %v6758_v44, %v10522_v63  ;;  %v12675_v11 = vrot.slane %v2372_v60, %v10513_v51  ;;  %v5692_v62 = vcombine.high %v16547_v9, %v16546_v1  ;;  %v6947_v47 = vcombine.low %v6908_v6, %v6940_v56  ;;  %4775 = vrot.lane.b32.xlu1 %v12548_v29, %s10094_s17  ;;  %v10062_v60 = vld [vmem:[#allocation2 + $0x25] ss:$48 sps:$4 sm:$0xff]  }
 0x3e9   : > { %8075 = vrot.lane.b32.xlu0 %v16548_v38, %s10095_s18  ;;  %v6948_v40 = vcombine.high %v6908_v6, %v6940_v56  ;;  %v2436_v33 = vcombine.high %v16550_v34, %v16549_v35  ;;  %v2404_v18 = vcombine.high %v16552_v24, %v16551_v21  ;;  %v6809_v41 = vcombine.low %v6765_v53, %v6797_v43  ;;  %v10064_v28 = vld [vmem:[#allocation2 + $0x85] ss:$48 sps:$4 sm:$0xff]   ;;  %v10061_v35 = vld [vmem:[#allocation2 + $0xd] ss:$48 sps:$4 sm:$0xff]  }
 0x3ea   : > { %v6810_v44 = vcombine.high %v6765_v53, %v6797_v43  ;;  %v2451_v1 = vcombine.low %v12675_v11, %v12662_v14  ;;  %v12689_v9 = vpop.permute.xlu0 %3189  ;;  %v12691_v38 = vpack.i.bf16 %v6943_v27, %v6807_v49  ;;  %v6811_v56 = vcombine.low %v6772_v42, %v6804_v25  ;;  %v10063_v34 = vld [vmem:[#allocation2 + $0x6d] ss:$48 sps:$4 sm:$0xff]   ;;  %v12694_v21 = vpop.permute.xlu1 %2317 }
 0x3eb   : > { %16553 = vst [vmem:[#allocation39_spill] sm:$0xff] %v12689_v9  ;;  %v6812_v6 = vcombine.high %v6772_v42, %v6804_v25  ;;  %v2434_v24 = vrot.slane %v2420_v52, %v10513_v51  ;;  %16555 = vst [vmem:[#allocation28_spill] sm:$0xff] %v12694_v21  ;;  %v12696_v29 = vpack.i.bf16 %v6944_v55, %v6808_v31  ;;  %v16559_v27 = vld [vmem:[#allocation207_spill] sm:$0xff] }
 0x3ec   : > { %16554 = vst [vmem:[#allocation22_spill] sm:$0xff] %v12691_v38  ;;  %v12698_v43 = vpack.i.bf16 %v6945_v4, %v6809_v41  ;;  %v12700_v53 = vpack.i.bf16 %v6946_v26, %v6810_v44  ;;  %v2452_v19 = vcombine.high %v12675_v11, %v12662_v14  ;;  %v12705_v49 = vrot.slane %v5692_v62, %v10513_v51  ;;  %v10066_v26 = vld [vmem:[#allocation2 + $0xe5] ss:$48 sps:$4 sm:$0xff]   ;;  %v10067_v42 = vld [vmem:[#allocation2 + $0x12d] ss:$48 sps:$4 sm:$0xff]  }
 0x3ed   : > { %16556 = vst [vmem:[#allocation19_spill] sm:$0xff] %v12696_v29  ;;  %8083 = vrot.lane.b32.xlu0 %v16559_v27, %s10095_s18  ;;  %v12709_v25 = vpack.i.bf16 %v6947_v47, %v6811_v56  ;;  %v12711_v52 = vpack.i.bf16 %v6948_v40, %v6812_v6  ;;  %v12714_v31 = vrot.slane %v2436_v33, %v10522_v63  ;;  %v16564_v62 = vld [vmem:[#allocation73_spill] sm:$0xff]  ;;  %v16565_v47 = vld [vmem:[#allocation72_spill] sm:$0xff]  ;;  %v16568_v6 = vld [vmem:[#allocation70_spill] sm:$0xff] }
 0x3ee   : > { %16557 = vst [vmem:[#allocation199_spill] sm:$0xff] %v12698_v43  ;;  %16558 = vst [vmem:[#allocation69_spill] sm:$0xff] %v12700_v53  ;;  %v2418_v55 = vrot.slane %v2404_v18, %v10513_v51  ;;  %4783 = vrot.lane.b32.xlu1 %v12594_v59, %s10094_s17  ;;  %v12720_v14 = vrot.slane %v10062_v60, %v10513_v51  ;;  %v12723_v4 = vrot.slane %v10064_v28, %v10513_v51  ;;  %v12730_v33 = vpop.permute.xlu0 %3193  ;;  %v10065_v41 = vld [vmem:[#allocation2 + $0xcd] ss:$48 sps:$4 sm:$0xff]   ;;  %v12738_v56 = vpop.permute.xlu1 %2321 }
 0x3ef   : > { %16560 = vst [vmem:[#allocation60_spill] sm:$0xff] %v12709_v25  ;;  %16561 = vst [vmem:[#allocation59_spill] sm:$0xff] %v12711_v52  ;;  %v12726_v11 = vrot.slane %v2451_v1, %v10522_v63  ;;  %v2468_v40 = vcombine.high %v16565_v47, %v16564_v62  ;;  %v12733_v18 = vrot.slane %v10061_v35, %v10513_v51  ;;  %v16569_v27 = vld [vmem:[#allocation65_spill] sm:$0xff]  ;;  %v16570_v47 = vld [vmem:[#allocation211_spill] sm:$0xff] }
 0x3f0   : > { %16562 = vst [vmem:[#allocation49_spill] sm:$0xff] %v12714_v31  ;;  %16566 = vst [vmem:[#allocation71_spill] sm:$0xff] %v12730_v33  ;;  %v4278_v59 = vrot.slane %v10063_v34, %v10513_v51  ;;  %v2483_v44 = vcombine.low %v2418_v55, %v2434_v24  ;;  %v2484_v60 = vcombine.high %v2418_v55, %v2434_v24  ;;  %v16571_v24 = vld [vmem:[#allocation68_spill] sm:$0xff]  ;;  %v16572_v55 = vld [vmem:[#allocation67_spill] sm:$0xff] }
 0x3f1   : > { %16563 = vst [vmem:[#allocation203_spill] sm:$0xff] %v12726_v11  ;;  %v3413_v28 = vcombine.low %v12664_v30, %v12730_v33  ;;  %16567 = vst [vmem:[#allocation74_spill] sm:$0xff] %v12738_v56  ;;  %v12741_v1 = vrot.slane %v10068_v7, %v10513_v51  ;;  %v5724_v62 = vcombine.high %v16569_v27, %v16568_v6  ;;  %8057 = vrot.lane.b32.xlu0 %v16570_v47, %s10095_s18  ;;  %v16573_v25 = vld [vmem:[#allocation213_spill] sm:$0xff]  ;;  %v16594_v43 = vld [vmem:[#allocation78_spill] sm:$0xff] }
 0x3f2   : > { %v3381_v35 = vcombine.low %v12524_v58, %v12609_v48  ;;  %v3397_v34 = vcombine.low %v12637_v32, %v12689_v9  ;;  %v4496_v52 = vcombine.high %v16572_v55, %v16571_v24  ;;  %8063 = vrot.lane.b32.xlu1 %v16573_v25, %s10095_s18  ;;  %v4311_v7 = vcombine.low %v12733_v18, %v12720_v14  ;;  %v12767_v24 = vpop.permute.xlu0 %5611  ;;  %v16576_v55 = vld [vmem:[#allocation62_spill] sm:$0xff]  ;;  %v16577_v25 = vld [vmem:[#allocation64_spill] sm:$0xff]  ;;  %v16615_v31 = vld [vmem:[#allocation95_spill] sm:$0xff] }
 0x3f3   : > { %v4343_v6 = vcombine.low %v4278_v59, %v12723_v4  ;;  %v12759_v27 = vrot.slane %v10066_v26, %v10513_v51  ;;  %v4414_v53 = vrot.slane %v10067_v42, %v10513_v51  ;;  %v3365_v32 = vcombine.low %v12475_v0, %v12573_v17  ;;  %16575 = vst [vmem:[#allocation50_spill] sm:$0xff] %v12767_v24  ;;  %v12783_v0 = vpop.permute.xlu1 %2325 }
 0x3f4   : > { %v12765_v47 = vrot.slane %v3413_v28, %v10513_v51  ;;  %v4360_v9 = vcombine.high %v16577_v25, %v16576_v55  ;;  %v12772_v58 = vrot.slane %v10065_v41, %v10513_v51  ;;  %v12775_v48 = vrot.slane %v2468_v40, %v10522_v63  ;;  %16581 = vst [vmem:[#allocation70_spill] sm:$0xff] %v12783_v0  ;;  %v16585_v40 = vld [vmem:[#allocation218_spill] sm:$0xff]  ;;  %v16587_v25 = vld [vmem:[#allocation219_spill] sm:$0xff] }
 0x3f5   : > { %v12778_v26 = vrot.slane %v2483_v44, %v10522_v63  ;;  %v12781_v42 = vrot.slane %v2484_v60, %v10522_v63  ;;  %v4479_v28 = vcombine.low %v4414_v53, %v12741_v1  ;;  %v12787_v17 = vrot.slane %v2452_v19, %v10522_v63  ;;  %8065 = vrot.lane.b32.xlu0 %v16585_v40, %s10095_s18 }
 0x3f6   : > { %16574 = vst [vmem:[#allocation66_spill] sm:$0xff] %v12765_v47  ;;  %16578 = vst [vmem:[#allocation207_spill] sm:$0xff] %v12775_v48  ;;  %v12790_v55 = vrot.slane %v3381_v35, %v10513_v51  ;;  %v12793_v41 = vrot.slane %v3397_v34, %v10513_v51  ;;  %v12797_v44 = vpack.i.bf16 %v4496_v52, %v4360_v9  ;;  %8071 = vrot.lane.b32.xlu1 %v16587_v25, %s10095_s18  ;;  %v12817_v52 = vpop.permute.xlu0 %5619  ;;  %v16614_v48 = vld [vmem:[#allocation96_spill] sm:$0xff] }
 0x3f7   : > { %16579 = vst [vmem:[#allocation73_spill] sm:$0xff] %v12778_v26  ;;  %16580 = vst [vmem:[#allocation72_spill] sm:$0xff] %v12781_v42  ;;  %v12800_v60 = vrot.slane %v5724_v62, %v10513_v51  ;;  %v12805_v19 = vrot.slane %v4311_v7, %v10522_v63  ;;  %v12808_v35 = vrot.slane %v4343_v6, %v10522_v63  ;;  %v16596_v6 = vld [vmem:[#allocation89_spill] sm:$0xff]  ;;  %v16597_v62 = vld [vmem:[#allocation84_spill] sm:$0xff] }
 0x3f8   : > { %16582 = vst [vmem:[#allocation65_spill] sm:$0xff] %v12787_v17  ;;  %16583 = vst [vmem:[#allocation211_spill] sm:$0xff] %v12790_v55  ;;  %v4447_v34 = vcombine.low %v12772_v58, %v12759_v27  ;;  %v12813_v30 = vrot.slane %v3365_v32, %v10513_v51  ;;  %v3461_v9 = vcombine.low %v12793_v41, %v12765_v47  ;;  %v16593_v47 = vld [vmem:[#allocation81_spill] sm:$0xff]  ;;  %v16604_v26 = vld [vmem:[#allocation90_spill] sm:$0xff] }
 0x3f9   : > { %16584 = vst [vmem:[#allocation213_spill] sm:$0xff] %v12793_v41  ;;  %16586 = vst [vmem:[#allocation218_spill] sm:$0xff] %v12797_v44  ;;  %v4344_v7 = vcombine.high %v4278_v59, %v12723_v4  ;;  %v12822_v44 = vpop.permute.xlu1 %2329  ;;  %v4487_v41 = vrot.slane %v4479_v28, %v10522_v63  ;;  %v3246_v29 = vcombine.high %v16594_v43, %v16593_v47  ;;  %v16595_v4 = vld [vmem:[#allocation225_spill] sm:$0xff]  ;;  %v16598_v28 = vld [vmem:[#allocation227_spill] sm:$0xff] }
 0x3fa   : > { %16588 = vst [vmem:[#allocation219_spill] sm:$0xff] %v12813_v30  ;;  %16589 = vst [vmem:[#allocation256_spill] sm:$0xff] %v12817_v52  ;;  %v3429_v25 = vcombine.low %v12813_v30, %v12790_v55  ;;  %8073 = vrot.lane.b32.xlu0 %v16595_v4, %s10095_s18  ;;  %v4312_v33 = vcombine.high %v12733_v18, %v12720_v14  ;;  %v3278_v32 = vcombine.high %v16597_v62, %v16596_v6  ;;  %v16599_v4 = vld [vmem:[#allocation80_spill] sm:$0xff]  ;;  %v16600_v55 = vld [vmem:[#allocation75_spill] sm:$0xff]  ;;  %v12854_v14 = vpop.permute.xlu0 %5627 }
 0x3fb   : > { %16592 = vst [vmem:[#allocation257_spill] sm:$0xff] %v12822_v44  ;;  %8079 = vrot.lane.b32.xlu1 %v16598_v28, %s10095_s18  ;;  %v4455_v47 = vrot.slane %v4447_v34, %v10522_v63  ;;  %v4480_v30 = vcombine.high %v4414_v53, %v12741_v1  ;;  %v3230_v40 = vcombine.high %v16600_v55, %v16599_v4  ;;  %v16602_v6 = vld [vmem:[#allocation87_spill] sm:$0xff]  ;;  %v16603_v28 = vld [vmem:[#allocation82_spill] sm:$0xff]  ;;  %v16605_v34 = vld [vmem:[#allocation85_spill] sm:$0xff] }
 0x3fc   : > { %v12852_v59 = vrot.slane %v3461_v9, %v10522_v63  ;;  %v4358_v62 = vrot.slane %v4344_v7, %v10522_v63  ;;  %v3262_v43 = vcombine.high %v16603_v28, %v16602_v6  ;;  %v2660_v11 = vcombine.high %v16605_v34, %v16604_v26  ;;  %v16608_v26 = vld [vmem:[#allocation88_spill] sm:$0xff]  ;;  %v16609_v28 = vld [vmem:[#allocation83_spill] sm:$0xff] }
 0x3fd   : > { %v12863_v53 = vpop.permute.xlu1 %2333  ;;  %v4499_v1 = vcombine.low %v4455_v47, %v4487_v41  ;;  %v4448_v55 = vcombine.high %v12772_v58, %v12759_v27  ;;  %v3260_v9 = vrot.slane %v3246_v29, %v10513_v51  ;;  %v12869_v4 = vrot.slane %v3429_v25, %v10522_v63 }
 0x3fe   : > { %16601 = vst [vmem:[#allocation81_spill] sm:$0xff] %v12852_v59  ;;  %16606 = vst [vmem:[#allocation78_spill] sm:$0xff] %v12863_v53  ;;  %8081 = vrot.lane.b32.xlu0 %v12186_v61, %s10095_s18  ;;  %v4363_v7 = vcombine.low %v12805_v19, %v12808_v35  ;;  %v4326_v6 = vrot.slane %v4312_v33, %v10522_v63  ;;  %v2644_v34 = vcombine.high %v16609_v28, %v16608_v26  ;;  %v12885_v27 = vpop.permute.xlu0 %5635  ;;  %v16616_v33 = vld [vmem:[#allocation100_spill] sm:$0xff] }
 0x3ff   : > { %16607 = vst [vmem:[#allocation225_spill] sm:$0xff] %v12869_v4  ;;  %v3292_v18 = vrot.slane %v3278_v32, %v10513_v51  ;;  %8087 = vrot.lane.b32.xlu1 %v12208_v50, %s10095_s18  ;;  %v4364_v58 = vcombine.high %v12805_v19, %v12808_v35  ;;  %v4494_v29 = vrot.slane %v4480_v30, %v10522_v63  ;;  %v16612_v30 = vld [vmem:[#allocation93_spill] sm:$0xff]  ;;  %v16613_v35 = vld [vmem:[#allocation94_spill] sm:$0xff] }
 0x400   : > { %v3244_v61 = vrot.slane %v3230_v40, %v10513_v51  ;;  %v4500_v25 = vcombine.high %v4455_v47, %v4487_v41  ;;  %v4365_v42 = vcombine.low %v4326_v6, %v4358_v62  ;;  %v3276_v26 = vrot.slane %v3262_v43, %v10513_v51  ;;  %v16617_v41 = vld [vmem:[#allocation97_spill] sm:$0xff] }
 0x401   : > { %v2674_v32 = vrot.slane %v2660_v11, %v10513_v51  ;;  %v12891_v28 = vpop.permute.xlu1 %2337  ;;  %v12893_v50 = vpack.i.bf16 %v4499_v1, %v4363_v7  ;;  %v4462_v19 = vrot.slane %v4448_v55, %v10522_v63  ;;  %v3294_v40 = vcombine.high %v16613_v35, %v16612_v30  ;;  %v16618_v30 = vld [vmem:[#allocation111_spill] sm:$0xff] }
 0x402   : > { %16610 = vst [vmem:[#allocation89_spill] sm:$0xff] %v12891_v28  ;;  %v3309_v17 = vcombine.low %v3244_v61, %v3260_v9  ;;  %v3326_v38 = vcombine.high %v16615_v31, %v16614_v48  ;;  %v5676_v47 = vcombine.high %v16617_v41, %v16616_v33  ;;  %9295 = vrot.lane.b32.xlu0 %v12176_v8, %s10089_s15  ;;  %v16619_v35 = vld [vmem:[#allocation115_spill] sm:$0xff]  ;;  %v12909_v4 = vpop.permute.xlu0 %4753  ;;  %v16620_v31 = vld [vmem:[#allocation24_spill] sm:$0xff] }
 0x403   : > { %16611 = vst [vmem:[#allocation84_spill] sm:$0xff] %v12893_v50  ;;  %v3310_v11 = vcombine.high %v3244_v61, %v3260_v9  ;;  %v2658_v43 = vrot.slane %v2644_v34, %v10513_v51  ;;  %v3341_v1 = vcombine.low %v3276_v26, %v3292_v18  ;;  %8061 = vrot.lane.b32.xlu1 %v12264_v57, %s10095_s18 }
 0x404   : > { %v4501_v55 = vcombine.low %v4462_v19, %v4494_v29  ;;  %v3342_v7 = vcombine.high %v3276_v26, %v3292_v18  ;;  %v2708_v50 = vcombine.high %v16619_v35, %v16618_v30  ;;  %v4502_v48 = vcombine.high %v4462_v19, %v4494_v29 }
 0x405   : > { %v4228_v33 = vcombine.high %v16620_v31, %v12242_v23  ;;  %v2723_v41 = vcombine.low %v2658_v43, %v2674_v32  ;;  %v2724_v8 = vcombine.high %v2658_v43, %v2674_v32  ;;  %v12913_v9 = vpop.permute.xlu1 %3167  ;;  %v12915_v34 = vpack.i.bf16 %v4500_v25, %v4364_v58  ;;  %v16624_v23 = vld [vmem:[#allocation229_spill] sm:$0xff] }
 0x406   : > { %16621 = vst [vmem:[#allocation227_spill] sm:$0xff] %v12913_v9  ;;  %v4366_v61 = vcombine.high %v4326_v6, %v4358_v62  ;;  %v12918_v57 = vrot.slane %v3294_v40, %v10522_v63  ;;  %v12921_v18 = vrot.slane %v3309_v17, %v10522_v63  ;;  %v12924_v26 = vrot.slane %v3326_v38, %v10522_v63  ;;  %v16627_v17 = vld [vmem:[#allocation23_spill] sm:$0xff]  ;;  %v12947_v19 = vpop.permute.xlu0 %4761 }
 0x407   : > { %16622 = vst [vmem:[#allocation80_spill] sm:$0xff] %v12915_v34  ;;  %v5690_v29 = vrot.slane %v5676_v47, %v10513_v51  ;;  %9305 = vrot.lane.b32.xlu0 %v16624_v23, %s10087_s11  ;;  %v12930_v32 = vrot.slane %v3310_v11, %v10522_v63  ;;  %v12933_v58 = vrot.slane %v3341_v1, %v10522_v63  ;;  %v16632_v47 = vld [vmem:[#allocation17_spill] sm:$0xff]  ;;  %v16633_v11 = vld [vmem:[#allocation18_spill] sm:$0xff] }
 0x408   : > { %16623 = vst [vmem:[#allocation75_spill] sm:$0xff] %v12921_v18  ;;  %v4970_v62 = vcombine.high %v12488_v3, %v12541_v20  ;;  %8069 = vrot.lane.b32.xlu1 %v16627_v17, %s10095_s18  ;;  %v12939_v6 = vpack.i.bf16 %v4501_v55, %v4365_v42  ;;  %v12942_v38 = vrot.slane %v3342_v7, %v10522_v63  ;;  %v16638_v55 = vld [vmem:[#allocation114_spill] sm:$0xff]  ;;  %v16639_v7 = vld [vmem:[#allocation112_spill] sm:$0xff] }
 0x409   : > { %16625 = vst [vmem:[#allocation87_spill] sm:$0xff] %v12930_v32  ;;  %16626 = vst [vmem:[#allocation82_spill] sm:$0xff] %v12933_v58  ;;  %v12945_v25 = vrot.slane %v2708_v50, %v10522_v63  ;;  %v12949_v40 = vpack.i.bf16 %v4502_v48, %v4366_v61  ;;  %v16634_v43 = vcombine.high %v16632_v47, %v16633_v11  ;;  %v12966_v31 = vpop.permute.xlu1 %3171  ;;  %v16643_v23 = vld [vmem:[#allocation102_spill] sm:$0xff]  ;;  %v16644_v47 = vld [vmem:[#allocation105_spill] sm:$0xff] }
 0x40a   : > { %16628 = vst [vmem:[#allocation90_spill] sm:$0xff] %v12939_v6  ;;  %16629 = vst [vmem:[#allocation85_spill] sm:$0xff] %v12942_v38  ;;  %v12957_v30 = vrot.slane %v2723_v41, %v10522_v63  ;;  %v12960_v42 = vrot.slane %v2724_v8, %v10522_v63  ;;  %v5740_v35 = vcombine.high %v16639_v7, %v16638_v55  ;;  %v16642_v41 = vld [vmem:[#allocation99_spill] sm:$0xff]  ;;  %v16656_v17 = vld [vmem:[#allocation106_spill] sm:$0xff] }
 0x40b   : > { %16630 = vst [vmem:[#allocation88_spill] sm:$0xff] %v12945_v25  ;;  %16631 = vst [vmem:[#allocation83_spill] sm:$0xff] %v12949_v40  ;;  %v12954_v1 = vpack.i.bf16 %v4228_v33, %v16634_v43  ;;  %v4954_v50 = vcombine.high %v12909_v4, %v12947_v19  ;;  %v5755_v48 = vcombine.low %v5690_v29, %v12705_v49  ;;  %v16641_v33 = vld [vmem:[#allocation230_spill] sm:$0xff]  ;;  %v16645_v11 = vld [vmem:[#allocation103_spill] sm:$0xff] }
 0x40c   : > { %16636 = vst [vmem:[#allocation94_spill] sm:$0xff] %v12957_v30  ;;  %16637 = vst [vmem:[#allocation96_spill] sm:$0xff] %v12960_v42  ;;  %v5756_v61 = vcombine.high %v5690_v29, %v12705_v49  ;;  %9315 = vrot.lane.b32.xlu0 %v16641_v33, %s10085_s29  ;;  %v5708_v43 = vcombine.high %v16645_v11, %v16644_v47  ;;  %v12979_v55 = vrot.slane %v4970_v62, %v10513_v51  ;;  %v16646_v49 = vld [vmem:[#allocation244_spill] sm:$0xff]  ;;  %v4770_v33 = vpop.permute.xlu0 %4769  ;;  %v16657_v38 = vld [vmem:[#allocation101_spill] sm:$0xff] }
 0x40d   : > { %16635 = vst [vmem:[#allocation93_spill] sm:$0xff] %v12954_v1  ;;  %16640 = vst [vmem:[#allocation95_spill] sm:$0xff] %v12966_v31  ;;  %v12982_v7 = vrot.slane %v4954_v50, %v10513_v51  ;;  %8077 = vrot.lane.b32.xlu1 %v16646_v49, %s10095_s18  ;;  %v12997_v47 = vrot.slane %v5740_v35, %v10522_v63  ;;  %v16648_v11 = vld [vmem:[#allocation104_spill] sm:$0xff]  ;;  %v16649_v49 = vld [vmem:[#allocation98_spill] sm:$0xff]  ;;  %v5843_v29 = vcombine.low %v12854_v14, %v12885_v27  ;;  %v13005_v40 = vpop.permute.xlu1 %3175 }
 0x40e   : > { %v2676_v1 = vcombine.high %v16649_v49, %v16648_v11  ;;  %16650 = vst [vmem:[#allocation97_spill] sm:$0xff] %v13005_v40  ;;  %v13008_v8 = vrot.slane %v5755_v48, %v10522_v63  ;;  %v13011_v62 = vrot.slane %v5756_v61, %v10522_v63  ;;  %v16653_v50 = vld [vmem:[#allocation245_spill] sm:$0xff]  ;;  %v2827_v11 = vcombine.low %v12822_v44, %v12891_v28  ;;  %v16655_v49 = vld [vmem:[#allocation231_spill] sm:$0xff]  ;;  %v16660_v44 = vld [vmem:[#allocation240_spill] sm:$0xff] }
 0x40f   : > { %16647 = vst [vmem:[#allocation100_spill] sm:$0xff] %v12997_v47  ;;  %v16654_v35 = vld [vmem:[#allocation33_spill] sm:$0xff]  ;;  %v13020_v34 = vrot.slane %v5708_v43, %v10513_v51  ;;  %v2692_v32 = vcombine.high %v16657_v38, %v16656_v17  ;;  %v5002_v48 = vcombine.high %v12583_v39, %v12620_v36  ;;  %v5811_v61 = vcombine.low %v12767_v24, %v12817_v52 }
 0x410   : > { %16651 = vst [vmem:[#allocation111_spill] sm:$0xff] %v13008_v8  ;;  %16652 = vst [vmem:[#allocation115_spill] sm:$0xff] %v13011_v62  ;;  %v5859_v6 = vcombine.low %v16654_v35, %v16653_v50  ;;  %9325 = vrot.lane.b32.xlu0 %v16655_v49, %s10083_s27  ;;  %v16658_v35 = vld [vmem:[#allocation35_spill] sm:$0xff]  ;;  %v5001_v49 = vcombine.low %v12583_v39, %v12620_v36  ;;  %v2795_v43 = vcombine.low %v12671_v46, %v12738_v56  ;;  %v4778_v17 = vpop.permute.xlu0 %4777 }
 0x411   : > { %8085 = vrot.lane.b32.xlu1 %v16658_v35, %s10095_s18  ;;  %v16659_v50 = vld [vmem:[#allocation43_spill] sm:$0xff]  ;;  %v2811_v38 = vcombine.low %v12783_v0, %v12863_v53  ;;  %v13039_v58 = vrot.slane %v5843_v29, %v10513_v51  ;;  %v4953_v24 = vcombine.low %v12909_v4, %v12947_v19  ;;  %v4985_v35 = vcombine.low %v4770_v33, %v4778_v17  ;;  %v13043_v18 = vpop.permute.xlu1 %3179  ;;  %v16663_v29 = vld [vmem:[#allocation232_spill] sm:$0xff] }
 0x412   : > { %v5827_v28 = vcombine.low %v16660_v44, %v16659_v50  ;;  %v4986_v52 = vcombine.high %v4770_v33, %v4778_v17  ;;  %16661 = vst [vmem:[#allocation24_spill] sm:$0xff] %v13043_v18  ;;  %v13046_v44 = vrot.slane %v5859_v6, %v10513_v51  ;;  %v4969_v36 = vcombine.low %v12488_v3, %v12541_v20  ;;  %v16666_v3 = vld [vmem:[#allocation233_spill] sm:$0xff]  ;;  %v16675_v46 = vld [vmem:[#allocation235_spill] sm:$0xff] }
 0x413   : > { %v2779_v39 = vcombine.low %v12639_v10, %v12694_v21  ;;  %v13053_v0 = vrot.slane %v2827_v11, %v10513_v51  ;;  %v5016_v4 = vrot.slane %v5002_v48, %v10513_v51  ;;  %v13059_v19 = vrot.slane %v5811_v61, %v10513_v51 }
 0x414   : > { %9330 = vrot.lane.b32.xlu0 %v16663_v29, %s10089_s15  ;;  %v13062_v6 = vrot.slane %v4985_v35, %v10513_v51  ;;  %v5000_v33 = vrot.slane %v4986_v52, %v10513_v51  ;;  %v13068_v20 = vrot.slane %v5827_v28, %v10513_v51  ;;  %v13071_v11 = vrot.slane %v5001_v49, %v10513_v51  ;;  %v13079_v61 = vpop.permute.xlu0 %7201 }
 0x415   : > { %16662 = vst [vmem:[#allocation229_spill] sm:$0xff] %v13053_v0  ;;  %16664 = vst [vmem:[#allocation23_spill] sm:$0xff] %v13059_v19  ;;  %9300 = vrot.lane.b32.xlu1 %v16666_v3, %s10088_s12  ;;  %v13074_v17 = vrot.slane %v2795_v43, %v10513_v51  ;;  %v13077_v48 = vrot.slane %v2811_v38, %v10513_v51  ;;  %v5907_v52 = vcombine.low %v13039_v58, %v13046_v44  ;;  %v13086_v3 = vpop.permute.xlu1 %3183 }
 0x416   : > { %16665 = vst [vmem:[#allocation17_spill] sm:$0xff] %v13062_v6  ;;  %16667 = vst [vmem:[#allocation18_spill] sm:$0xff] %v13068_v20  ;;  %v13084_v35 = vrot.slane %v4953_v24, %v10513_v51  ;;  %v5065_v29 = vcombine.low %v5000_v33, %v5016_v4  ;;  %v5066_v28 = vcombine.high %v5000_v33, %v5016_v4  ;;  %v16678_v33 = vld [vmem:[#allocation110_spill] sm:$0xff] }
 0x417   : > { %16668 = vst [vmem:[#allocation114_spill] sm:$0xff] %v13071_v11  ;;  %16669 = vst [vmem:[#allocation112_spill] sm:$0xff] %v13074_v17  ;;  %v2690_v49 = vrot.slane %v2676_v1, %v10513_v51  ;;  %v2706_v43 = vrot.slane %v2692_v32, %v10513_v51  ;;  %v13091_v53 = vrot.slane %v2779_v39, %v10513_v51  ;;  %v16677_v39 = vld [vmem:[#allocation237_spill] sm:$0xff] }
 0x418   : > { %16670 = vst [vmem:[#allocation230_spill] sm:$0xff] %v13077_v48  ;;  %16671 = vst [vmem:[#allocation105_spill] sm:$0xff] %v13079_v61  ;;  %v2875_v38 = vcombine.low %v13077_v48, %v13053_v0  ;;  %9340 = vrot.lane.b32.xlu0 %v16675_v46, %s10087_s11  ;;  %v13098_v24 = vrot.slane %v4969_v36, %v10513_v51  ;;  %v5875_v4 = vcombine.low %v13059_v19, %v13068_v20  ;;  %v16679_v48 = vld [vmem:[#allocation107_spill] sm:$0xff]  ;;  %v13116_v10 = vpop.permute.xlu0 %7209  ;;  %v16716_v19 = vld [vmem:[#allocation117_spill] sm:$0xff] }
 0x419   : > { %16672 = vst [vmem:[#allocation103_spill] sm:$0xff] %v13084_v35  ;;  %16673 = vst [vmem:[#allocation244_spill] sm:$0xff] %v13086_v3  ;;  %v5033_v1 = vcombine.low %v12982_v7, %v12979_v55  ;;  %v5049_v32 = vcombine.low %v13062_v6, %v13071_v11  ;;  %9310 = vrot.lane.b32.xlu1 %v16677_v39, %s10086_s30  ;;  %v5772_v0 = vcombine.high %v16679_v48, %v16678_v33  ;;  %v13127_v33 = vpop.permute.xlu1 %3187  ;;  %v16684_v11 = vld [vmem:[#allocation108_spill] sm:$0xff]  ;;  %v16717_v20 = vld [vmem:[#allocation121_spill] sm:$0xff] }
 0x41a   : > { %16674 = vst [vmem:[#allocation104_spill] sm:$0xff] %v13091_v53  ;;  %16676 = vst [vmem:[#allocation98_spill] sm:$0xff] %v13098_v24  ;;  %v5787_v46 = vcombine.low %v13020_v34, %v12800_v60  ;;  %v5788_v36 = vcombine.high %v13020_v34, %v12800_v60  ;;  %v2843_v56 = vcombine.low %v13091_v53, %v13074_v17  ;;  %v16685_v60 = vld [vmem:[#allocation113_spill] sm:$0xff] }
 0x41b   : > { %16680 = vst [vmem:[#allocation231_spill] sm:$0xff] %v13116_v10  ;;  %v13119_v21 = vrot.slane %v5907_v52, %v10522_v63  ;;  %v5017_v39 = vcombine.low %v13084_v35, %v13098_v24  ;;  %v13124_v6 = vrot.slane %v5065_v29, %v10522_v63  ;;  %v5080_v48 = vrot.slane %v5066_v28, %v10522_v63  ;;  %v16708_v24 = vld [vmem:[#allocation130_spill] sm:$0xff] }
 0x41c   : > { %16683 = vst [vmem:[#allocation35_spill] sm:$0xff] %v13127_v33  ;;  %v2740_v34 = vcombine.high %v16685_v60, %v16684_v11  ;;  %v2755_v50 = vcombine.low %v2690_v49, %v2706_v43  ;;  %v2756_v53 = vcombine.high %v2690_v49, %v2706_v43  ;;  %v13132_v17 = vrot.slane %v2875_v38, %v10522_v63  ;;  %v16691_v49 = vld [vmem:[#allocation32_spill] sm:$0xff] }
 0x41d   : > { %16681 = vst [vmem:[#allocation106_spill] sm:$0xff] %v13119_v21  ;;  %16682 = vst [vmem:[#allocation101_spill] sm:$0xff] %v13124_v6  ;;  %9355 = vrot.lane.b32.xlu0 %v12480_v22, %s10088_s12  ;;  %v13137_v52 = vrot.slane %v5875_v4, %v10522_v63  ;;  %v13140_v29 = vrot.slane %v5033_v1, %v10522_v63  ;;  %v16689_v28 = vcombine.high %v12982_v7, %v12979_v55  ;;  %v13163_v55 = vpop.permute.xlu0 %7217  ;;  %v13168_v1 = vpop.permute.xlu1 %3191 }
 0x41e   : > { %16686 = vst [vmem:[#allocation232_spill] sm:$0xff] %v13132_v17  ;;  %v13147_v11 = vrot.slane %v5049_v32, %v10522_v63  ;;  %9320 = vrot.lane.b32.xlu1 %v16691_v49, %s10084_s28  ;;  %v13152_v43 = vrot.slane %v5772_v0, %v10522_v63  ;;  %v13155_v22 = vrot.slane %v5787_v46, %v10522_v63  ;;  %16696 = vst [vmem:[#allocation32_spill] sm:$0xff] %v13163_v55  ;;  %v16702_v49 = vld [vmem:[#allocation241_spill] sm:$0xff] }
 0x41f   : > { %16687 = vst [vmem:[#allocation233_spill] sm:$0xff] %v13137_v52  ;;  %16688 = vst [vmem:[#allocation235_spill] sm:$0xff] %v13140_v29  ;;  %v5048_v35 = vrot.slane %v16689_v28, %v10522_v63  ;;  %v13158_v38 = vrot.slane %v5788_v36, %v10522_v63  ;;  %v13161_v4 = vrot.slane %v2843_v56, %v10522_v63  ;;  %v16703_v0 = vld [vmem:[#allocation133_spill] sm:$0xff] }
 0x420   : > { %16690 = vst [vmem:[#allocation237_spill] sm:$0xff] %v13147_v11  ;;  %16692 = vst [vmem:[#allocation110_spill] sm:$0xff] %v13152_v43  ;;  %v13166_v7 = vrot.slane %v5017_v39, %v10522_v63  ;;  %v5086_v46 = vcombine.high %v13140_v29, %v13124_v6  ;;  %v13175_v36 = vrot.slane %v2740_v34, %v10522_v63  ;;  %v16704_v29 = vld [vmem:[#allocation131_spill] sm:$0xff]  ;;  %v16713_v39 = vld [vmem:[#allocation140_spill] sm:$0xff] }
 0x421   : > { %16693 = vst [vmem:[#allocation107_spill] sm:$0xff] %v13155_v22  ;;  %16694 = vst [vmem:[#allocation108_spill] sm:$0xff] %v13158_v38  ;;  %v5087_v32 = vcombine.low %v5048_v35, %v5080_v48  ;;  %v13178_v56 = vrot.slane %v2755_v50, %v10522_v63  ;;  %9365 = vrot.lane.b32.xlu0 %v12504_v5, %s10086_s30  ;;  %v5088_v60 = vcombine.high %v5048_v35, %v5080_v48  ;;  %v16707_v50 = vld [vmem:[#allocation132_spill] sm:$0xff]  ;;  %v16711_v35 = vld [vmem:[#allocation122_spill] sm:$0xff] }
 0x422   : > { %16695 = vst [vmem:[#allocation113_spill] sm:$0xff] %v13161_v4  ;;  %16697 = vst [vmem:[#allocation258_spill] sm:$0xff] %v13166_v7  ;;  %v13185_v28 = vrot.slane %v2756_v53, %v10522_v63  ;;  %9335 = vrot.lane.b32.xlu1 %v16702_v49, %s10088_s12  ;;  %v16705_v34 = vcombine.low %v16703_v0, %v16704_v29  ;;  %v16709_v52 = vcombine.high %v16707_v50, %v16708_v24  ;;  %v16712_v48 = vld [vmem:[#allocation116_spill] sm:$0xff]  ;;  %v16714_v4 = vld [vmem:[#allocation135_spill] sm:$0xff]  ;;  %v13205_v49 = vpop.permute.xlu0 %7225 }
 0x423   : > { %16698 = vst [vmem:[#allocation259_spill] sm:$0xff] %v13168_v1  ;;  %16699 = vst [vmem:[#allocation260_spill] sm:$0xff] %v13175_v36  ;;  %v3518_v53 = vcombine.high %v16712_v48, %v16711_v35  ;;  %v3550_v17 = vcombine.high %v16714_v4, %v16713_v39  ;;  %v13218_v35 = vpop.permute.xlu1 %3195  ;;  %v16721_v48 = vld [vmem:[#allocation119_spill] sm:$0xff]  ;;  %v16722_v5 = vld [vmem:[#allocation109_spill] sm:$0xff]  ;;  %v3637_v4 = vcombine.low %v12913_v9, %v13005_v40 }
 0x424   : > { %16700 = vst [vmem:[#allocation261_spill] sm:$0xff] %v13178_v56  ;;  %16701 = vst [vmem:[#allocation262_spill] sm:$0xff] %v13185_v28  ;;  %v13192_v6 = vpack.i.bf16 %v5087_v32, %v16705_v34  ;;  %v13197_v21 = vpack.i.bf16 %v5086_v46, %v16709_v52  ;;  %v16718_v34 = vcombine.high %v16703_v0, %v16704_v29  ;;  %v16723_v29 = vld [vmem:[#allocation138_spill] sm:$0xff]  ;;  %v16724_v0 = vld [vmem:[#allocation128_spill] sm:$0xff] }
 0x425   : > { %16715 = vst [vmem:[#allocation131_spill] sm:$0xff] %v13205_v49  ;;  %v3653_v52 = vcombine.low %v12966_v31, %v13043_v18  ;;  %v3669_v46 = vcombine.low %v13086_v3, %v13168_v1  ;;  %16720 = vst [vmem:[#allocation116_spill] sm:$0xff] %v13218_v35  ;;  %v3502_v32 = vcombine.high %v16722_v5, %v16721_v48  ;;  %9375 = vrot.lane.b32.xlu0 %v12518_v45, %s10084_s28  ;;  %v16725_v39 = vld [vmem:[#allocation36_spill] sm:$0xff]  ;;  %v16736_v18 = vld [vmem:[#allocation126_spill] sm:$0xff] }
 0x426   : > { %16706 = vst [vmem:[#allocation241_spill] sm:$0xff] %v13192_v6  ;;  %16710 = vst [vmem:[#allocation133_spill] sm:$0xff] %v13197_v21  ;;  %v13212_v6 = vpack.i.bf16 %v5088_v60, %v16718_v34  ;;  %v3534_v60 = vcombine.high %v16724_v0, %v16723_v29  ;;  %v3685_v34 = vcombine.low %v13127_v33, %v13218_v35  ;;  %9345 = vrot.lane.b32.xlu1 %v16725_v39, %s10086_s30  ;;  %v13249_v9 = vpop.permute.xlu0 %7199  ;;  %v16734_v0 = vld [vmem:[#allocation123_spill] sm:$0xff]  ;;  %v16735_v39 = vld [vmem:[#allocation125_spill] sm:$0xff] }
 0x427   : > { %v3532_v45 = vrot.slane %v3518_v53, %v10513_v51  ;;  %v3564_v3 = vrot.slane %v3550_v17, %v10513_v51  ;;  %16729 = vst [vmem:[#allocation135_spill] sm:$0xff] %v13249_v9  ;;  %v13254_v48 = vrot.slane %v3653_v52, %v10513_v51  ;;  %v13257_v29 = vrot.slane %v3669_v46, %v10513_v51  ;;  %v13259_v40 = vpop.permute.xlu1 %7205  ;;  %v16737_v46 = vld [vmem:[#allocation141_spill] sm:$0xff]  ;;  %v16738_v35 = vld [vmem:[#allocation144_spill] sm:$0xff]  ;;  %v16747_v38 = vld [vmem:[#allocation146_spill] sm:$0xff] }
 0x428   : > { %16719 = vst [vmem:[#allocation122_spill] sm:$0xff] %v13212_v6  ;;  %v13247_v6 = vrot.slane %v3685_v34, %v10513_v51  ;;  %16732 = vst [vmem:[#allocation138_spill] sm:$0xff] %v13259_v40  ;;  %v16733_v34 = vld [vmem:[#allocation124_spill] sm:$0xff]  ;;  %v3516_v31 = vrot.slane %v3502_v32, %v10513_v51  ;;  %v4914_v52 = vcombine.high %v16736_v18, %v16735_v39  ;;  %v16767_v28 = vld [vmem:[#allocation145_spill] sm:$0xff] }
 0x429   : > { %16730 = vst [vmem:[#allocation119_spill] sm:$0xff] %v13254_v48  ;;  %16731 = vst [vmem:[#allocation109_spill] sm:$0xff] %v13257_v29  ;;  %v4882_v1 = vcombine.high %v16734_v0, %v16733_v34  ;;  %v3548_v33 = vrot.slane %v3534_v60, %v10513_v51  ;;  %9390 = vrot.lane.b32.xlu0 %v12529_v2, %s10089_s15  ;;  %v3566_v21 = vcombine.high %v16738_v35, %v16737_v46  ;;  %v16740_v60 = vld [vmem:[#allocation143_spill] sm:$0xff]  ;;  %v16741_v0 = vld [vmem:[#allocation142_spill] sm:$0xff] }
 0x42a   : > { %16728 = vst [vmem:[#allocation140_spill] sm:$0xff] %v13247_v6  ;;  %v13276_v53 = vrot.slane %v3637_v4, %v10513_v51  ;;  %v3733_v17 = vcombine.low %v13257_v29, %v13247_v6  ;;  %9350 = vrot.lane.b32.xlu1 %v12493_v37, %s10089_s15  ;;  %v3581_v32 = vcombine.low %v3516_v31, %v3532_v45  ;;  %v13286_v34 = vpop.permute.xlu0 %7207  ;;  %v16752_v35 = vld [vmem:[#allocation152_spill] sm:$0xff]  ;;  %v16866_v22 = vld [vmem:[#allocation211_spill] sm:$0xff] }
 0x42b   : > { %v3598_v39 = vcombine.high %v16741_v0, %v16740_v60  ;;  %v3613_v2 = vcombine.low %v3548_v33, %v3564_v3  ;;  %16742 = vst [vmem:[#allocation36_spill] sm:$0xff] %v13286_v34  ;;  %v3582_v4 = vcombine.high %v3516_v31, %v3532_v45  ;;  %v3614_v46 = vcombine.high %v3548_v33, %v3564_v3  ;;  %v13292_v6 = vpop.permute.xlu1 %7213  ;;  %v16746_v0 = vld [vmem:[#allocation149_spill] sm:$0xff]  ;;  %v16749_v33 = vld [vmem:[#allocation134_spill] sm:$0xff]  ;;  %v16750_v45 = vld [vmem:[#allocation127_spill] sm:$0xff] }
 0x42c   : > { %16739 = vst [vmem:[#allocation128_spill] sm:$0xff] %v13276_v53  ;;  %v3701_v29 = vcombine.low %v13276_v53, %v13254_v48  ;;  %16743 = vst [vmem:[#allocation124_spill] sm:$0xff] %v13292_v6  ;;  %v13297_v18 = vrot.slane %v4882_v1, %v10522_v63  ;;  %v13300_v60 = vrot.slane %v4914_v52, %v10522_v63  ;;  %v16751_v1 = vld [vmem:[#allocation154_spill] sm:$0xff] }
 0x42d   : > { %v7552_v62 = vcombine.high %v16747_v38, %v16746_v0  ;;  %9400 = vrot.lane.b32.xlu0 %v12534_v12, %s10088_s12  ;;  %v13309_v3 = vrot.slane %v3566_v21, %v10522_v63  ;;  %v7536_v37 = vcombine.high %v16750_v45, %v16749_v33  ;;  %v7584_v53 = vcombine.high %v16752_v35, %v16751_v1  ;;  %v16755_v38 = vld [vmem:[#allocation139_spill] sm:$0xff]  ;;  %v16756_v0 = vld [vmem:[#allocation137_spill] sm:$0xff] }
 0x42e   : > { %16744 = vst [vmem:[#allocation123_spill] sm:$0xff] %v13297_v18  ;;  %16745 = vst [vmem:[#allocation125_spill] sm:$0xff] %v13300_v60  ;;  %v13316_v52 = vrot.slane %v3733_v17, %v10522_v63  ;;  %9360 = vrot.lane.b32.xlu1 %v12495_v13, %s10087_s11  ;;  %v13321_v12 = vrot.slane %v3581_v32, %v10522_v63  ;;  %v7568_v31 = vcombine.high %v16756_v0, %v16755_v38  ;;  %v13331_v45 = vpop.permute.xlu0 %7215  ;;  %v16766_v0 = vld [vmem:[#allocation148_spill] sm:$0xff]  ;;  %v16772_v60 = vld [vmem:[#allocation158_spill] sm:$0xff] }
 0x42f   : > { %16748 = vst [vmem:[#allocation126_spill] sm:$0xff] %v13309_v3  ;;  %v13326_v21 = vrot.slane %v3598_v39, %v10522_v63  ;;  %v13329_v33 = vrot.slane %v3613_v2, %v10522_v63  ;;  %16759 = vst [vmem:[#allocation149_spill] sm:$0xff] %v13331_v45  ;;  %v13334_v17 = vrot.slane %v3582_v4, %v10522_v63  ;;  %v13342_v32 = vpop.permute.xlu1 %7221  ;;  %v16804_v4 = vld [vmem:[#allocation160_spill] sm:$0xff]  ;;  %v16824_v1 = vld [vmem:[#allocation19_spill] sm:$0xff] }
 0x430   : > { %16753 = vst [vmem:[#allocation141_spill] sm:$0xff] %v13316_v52  ;;  %16754 = vst [vmem:[#allocation144_spill] sm:$0xff] %v13321_v12  ;;  %v13337_v35 = vrot.slane %v3614_v46, %v10522_v63  ;;  %v13340_v13 = vrot.slane %v3701_v29, %v10522_v63  ;;  %v7264_v2 = vcombine.high %v16767_v28, %v16766_v0  ;;  %v16774_v29 = vld [vmem:[#allocation254_spill] sm:$0xff]  ;;  %v16820_v52 = vld [vmem:[#allocation172_spill] sm:$0xff] }
 0x431   : > { %16757 = vst [vmem:[#allocation143_spill] sm:$0xff] %v13326_v21  ;;  %16758 = vst [vmem:[#allocation142_spill] sm:$0xff] %v13329_v33  ;;  %v7566_v42 = vrot.slane %v7552_v62, %v10513_v51  ;;  %9410 = vrot.lane.b32.xlu0 %v12536_v54, %s10087_s11  ;;  %v7550_v46 = vrot.slane %v7536_v37, %v10513_v51  ;;  %v7598_v48 = vrot.slane %v7584_v53, %v10513_v51  ;;  %v16790_v33 = vld [vmem:[#allocation239_spill] sm:$0xff]  ;;  %v16860_v38 = vld [vmem:[#allocation73_spill] sm:$0xff] }
 0x432   : > { %16760 = vst [vmem:[#allocation146_spill] sm:$0xff] %v13334_v17  ;;  %16761 = vst [vmem:[#allocation134_spill] sm:$0xff] %v13337_v35  ;;  %9370 = vrot.lane.b32.xlu1 %v12553_v16, %s10085_s29  ;;  %v7582_v54 = vrot.slane %v7568_v31, %v10513_v51  ;;  %v13364_v0 = vpop.permute.xlu0 %7223  ;;  %v16771_v16 = vld [vmem:[#allocation155_spill] sm:$0xff]  ;;  %v7703_v28 = vcombine.low %v13163_v55, %v13205_v49  ;;  %v7687_v31 = vcombine.low %v13259_v40, %v13292_v6  ;;  %v16775_v55 = vld [vmem:[#allocation41_spill] sm:$0xff] }
 0x433   : > { %16762 = vst [vmem:[#allocation127_spill] sm:$0xff] %v13340_v13  ;;  %16763 = vst [vmem:[#allocation154_spill] sm:$0xff] %v13342_v32  ;;  %v7600_v18 = vcombine.high %v16772_v60, %v16771_v16  ;;  %v13378_v62 = vpop.permute.xlu1 %7229  ;;  %v13383_v24 = vrot.slane %v7264_v2, %v10513_v51  ;;  %v7615_v37 = vcombine.low %v7550_v46, %v7566_v42  ;;  %v16776_v49 = vld [vmem:[#allocation242_spill] sm:$0xff]  ;;  %v16779_v60 = vld [vmem:[#allocation153_spill] sm:$0xff] }
 0x434   : > { %16768 = vst [vmem:[#allocation152_spill] sm:$0xff] %v13364_v0  ;;  %16773 = vst [vmem:[#allocation139_spill] sm:$0xff] %v13378_v62  ;;  %v7719_v53 = vcombine.low %v13342_v32, %v13378_v62  ;;  %v7647_v16 = vcombine.low %v7582_v54, %v7598_v48  ;;  %v7648_v50 = vcombine.high %v7582_v54, %v7598_v48  ;;  %v16787_v35 = vld [vmem:[#allocation234_spill] sm:$0xff] }
 0x435   : > { %9420 = vrot.lane.b32.xlu0 %v12575_v15, %s10086_s30  ;;  %v7671_v40 = vcombine.low %v13079_v61, %v13116_v10  ;;  %v7616_v6 = vcombine.high %v7550_v46, %v7566_v42  ;;  %v2556_v32 = vcombine.high %v16776_v49, %v16775_v55  ;;  %v13407_v54 = vrot.slane %v7600_v18, %v10522_v63  ;;  %v16785_v46 = vld [vmem:[#allocation157_spill] sm:$0xff]  ;;  %v16788_v18 = vld [vmem:[#allocation223_spill] sm:$0xff] }
 0x436   : > { %9380 = vrot.lane.b32.xlu1 %v16774_v29, %s10083_s27  ;;  %v13400_v15 = vrot.slane %v7719_v53, %v10513_v51  ;;  %v13402_v62 = vpop.permute.xlu0 %5613  ;;  %v16780_v29 = vld [vmem:[#allocation151_spill] sm:$0xff]  ;;  %v13412_v2 = vrot.slane %v7703_v28, %v10513_v51  ;;  %v13415_v42 = vrot.slane %v7687_v31, %v10513_v51  ;;  %v13420_v49 = vrot.slane %v7615_v37, %v10522_v63  ;;  %v16786_v53 = vld [vmem:[#allocation156_spill] sm:$0xff]  ;;  %v16791_v28 = vld [vmem:[#allocation37_spill] sm:$0xff] }
 0x437   : > { %16778 = vst [vmem:[#allocation148_spill] sm:$0xff] %v13407_v54  ;;  %v7296_v61 = vcombine.high %v16780_v29, %v16779_v60  ;;  %v13417_v55 = vpop.permute.xlu1 %7203  ;;  %v7632_v48 = vcombine.high %v16786_v53, %v16785_v46  ;;  %v2524_v17 = vcombine.high %v16788_v18, %v16787_v35  ;;  %v16789_v10 = vld [vmem:[#allocation31_spill] sm:$0xff]  ;;  %v13431_v31 = vrot.slane %v7647_v16, %v10522_v63  ;;  %v16795_v35 = vld [vmem:[#allocation38_spill] sm:$0xff] }
 0x438   : > { %16777 = vst [vmem:[#allocation137_spill] sm:$0xff] %v13400_v15  ;;  %16781 = vst [vmem:[#allocation145_spill] sm:$0xff] %v13412_v2  ;;  %v2540_v60 = vcombine.high %v16790_v33, %v16789_v10  ;;  %v13434_v29 = vrot.slane %v7648_v50, %v10522_v63  ;;  %v13437_v37 = vrot.slane %v7671_v40, %v10513_v51  ;;  %v16797_v33 = vld [vmem:[#allocation29_spill] sm:$0xff]  ;;  %v16798_v53 = vld [vmem:[#allocation215_spill] sm:$0xff] }
 0x439   : > { %16782 = vst [vmem:[#allocation155_spill] sm:$0xff] %v13415_v42  ;;  %16783 = vst [vmem:[#allocation158_spill] sm:$0xff] %v13417_v55  ;;  %9430 = vrot.lane.b32.xlu0 %v16791_v28, %s10085_s29  ;;  %v7767_v46 = vcombine.low %v13412_v2, %v13400_v15  ;;  %v13444_v10 = vrot.slane %v7616_v6, %v10522_v63  ;;  %v2508_v18 = vcombine.high %v16798_v53, %v16797_v33  ;;  %v16799_v28 = vld [vmem:[#allocation248_spill] sm:$0xff]  ;;  %v16800_v50 = vld [vmem:[#allocation247_spill] sm:$0xff] }
 0x43a   : > { %16784 = vst [vmem:[#allocation254_spill] sm:$0xff] %v13420_v49  ;;  %16792 = vst [vmem:[#allocation41_spill] sm:$0xff] %v13431_v31  ;;  %9385 = vrot.lane.b32.xlu1 %v16795_v35, %s10089_s15  ;;  %v2570_v16 = vrot.slane %v2556_v32, %v10513_v51  ;;  %v2604_v12 = vcombine.high %v16800_v50, %v16799_v28  ;;  %v13451_v21 = vpop.permute.xlu0 %5621  ;;  %v13454_v40 = vrot.slane %v7296_v61, %v10513_v51  ;;  %v16801_v2 = vld [vmem:[#allocation162_spill] sm:$0xff]  ;;  %v16802_v15 = vld [vmem:[#allocation159_spill] sm:$0xff] }
 0x43b   : > { %16793 = vst [vmem:[#allocation242_spill] sm:$0xff] %v13434_v29  ;;  %16794 = vst [vmem:[#allocation153_spill] sm:$0xff] %v13437_v37  ;;  %v5948_v3 = vcombine.high %v16802_v15, %v16801_v2  ;;  %v16803_v35 = vld [vmem:[#allocation163_spill] sm:$0xff]  ;;  %v7735_v39 = vcombine.low %v13437_v37, %v13415_v42  ;;  %v13462_v33 = vpop.permute.xlu1 %7211  ;;  %v13465_v32 = vrot.slane %v7632_v48, %v10522_v63  ;;  %v16807_v28 = vld [vmem:[#allocation246_spill] sm:$0xff] }
 0x43c   : > { %16796 = vst [vmem:[#allocation151_spill] sm:$0xff] %v13444_v10  ;;  %v7280_v6 = vcombine.high %v16804_v4, %v16803_v35  ;;  %16805 = vst [vmem:[#allocation157_spill] sm:$0xff] %v13462_v33  ;;  %v2538_v53 = vrot.slane %v2524_v17, %v10513_v51  ;;  %v16808_v50 = vld [vmem:[#allocation250_spill] sm:$0xff]  ;;  %v2554_v13 = vrot.slane %v2540_v60, %v10513_v51  ;;  %v16809_v2 = vld [vmem:[#allocation48_spill] sm:$0xff] }
 0x43d   : > { %16806 = vst [vmem:[#allocation156_spill] sm:$0xff] %v13465_v32  ;;  %v2572_v61 = vcombine.high %v16808_v50, %v16807_v28  ;;  %9440 = vrot.lane.b32.xlu0 %v16809_v2, %s10084_s28  ;;  %v13474_v4 = vrot.slane %v7767_v46, %v10522_v63  ;;  %v16811_v15 = vld [vmem:[#allocation22_spill] sm:$0xff]  ;;  %v2522_v60 = vrot.slane %v2508_v18, %v10513_v51  ;;  %v16813_v2 = vld [vmem:[#allocation252_spill] sm:$0xff]  ;;  %v16814_v37 = vld [vmem:[#allocation253_spill] sm:$0xff] }
 0x43e   : > { %9395 = vrot.lane.b32.xlu1 %v16811_v15, %s10088_s12  ;;  %v13486_v28 = vrot.slane %v2604_v12, %v10522_v63  ;;  %v2619_v50 = vcombine.low %v2554_v13, %v2570_v16  ;;  %v13488_v46 = vpop.permute.xlu0 %5629  ;;  %v2636_v15 = vcombine.high %v16814_v37, %v16813_v2  ;;  %v13493_v42 = vrot.slane %v5948_v3, %v10513_v51  ;;  %v16819_v10 = vld [vmem:[#allocation169_spill] sm:$0xff]  ;;  %v16821_v3 = vld [vmem:[#allocation42_spill] sm:$0xff]  ;;  %v16826_v12 = vld [vmem:[#allocation79_spill] sm:$0xff] }
 0x43f   : > { %16810 = vst [vmem:[#allocation234_spill] sm:$0xff] %v13474_v4  ;;  %16812 = vst [vmem:[#allocation223_spill] sm:$0xff] %v13488_v46  ;;  %v7294_v48 = vrot.slane %v7280_v6, %v10513_v51  ;;  %v13497_v17 = vrot.slane %v7735_v39, %v10522_v63  ;;  %v13499_v35 = vpop.permute.xlu1 %7219  ;;  %v7328_v56 = vcombine.high %v16820_v52, %v16819_v10  ;;  %v16822_v39 = vld [vmem:[#allocation168_spill] sm:$0xff]  ;;  %v16823_v37 = vld [vmem:[#allocation166_spill] sm:$0xff] }
 0x440   : > { %16816 = vst [vmem:[#allocation239_spill] sm:$0xff] %v13499_v35  ;;  %v13506_v30 = vrot.slane %v2572_v61, %v10522_v63  ;;  %v2587_v2 = vcombine.low %v2522_v60, %v2538_v53  ;;  %v7312_v36 = vcombine.high %v16823_v37, %v16822_v39  ;;  %v2620_v25 = vcombine.high %v2554_v13, %v2570_v16  ;;  %v16827_v6 = vld [vmem:[#allocation77_spill] sm:$0xff]  ;;  %v16842_v4 = vld [vmem:[#allocation170_spill] sm:$0xff] }
 0x441   : > { %16815 = vst [vmem:[#allocation31_spill] sm:$0xff] %v13497_v17  ;;  %9450 = vrot.lane.b32.xlu0 %v16821_v3, %s10083_s27  ;;  %v13521_v61 = vrot.slane %v2619_v50, %v10522_v63  ;;  %v16828_v18 = vcombine.high %v16826_v12, %v16827_v6  ;;  %v7343_v37 = vcombine.low %v13383_v24, %v7294_v48  ;;  %v16841_v17 = vld [vmem:[#allocation171_spill] sm:$0xff] }
 0x442   : > { %9405 = vrot.lane.b32.xlu1 %v16824_v1, %s10087_s11  ;;  %v13523_v3 = vpop.permute.xlu0 %5637  ;;  %v2638_v13 = vcombine.high %v13506_v30, %v13486_v28  ;;  %v2588_v16 = vcombine.high %v2522_v60, %v2538_v53  ;;  %v7431_v39 = vcombine.low %v13331_v45, %v13364_v0  ;;  %v7415_v50 = vcombine.low %v13417_v55, %v13462_v33  ;;  %v16831_v53 = vld [vmem:[#allocation167_spill] sm:$0xff]  ;;  %v16832_v60 = vld [vmem:[#allocation165_spill] sm:$0xff] }
 0x443   : > { %16825 = vst [vmem:[#allocation37_spill] sm:$0xff] %v13523_v3  ;;  %v9459_v29 = vpack.i.bf16 %v2636_v15, %v16828_v18  ;;  %v13537_v10 = vpop.permute.xlu1 %7227  ;;  %v13540_v52 = vrot.slane %v7328_v56, %v10522_v63  ;;  %v7344_v15 = vcombine.high %v13383_v24, %v7294_v48  ;;  %v13544_v18 = vrot.slane %v2587_v2, %v10522_v63  ;;  %v16833_v24 = vld [vmem:[#allocation199_spill] sm:$0xff]  ;;  %v16853_v55 = vld [vmem:[#allocation69_spill] sm:$0xff] }
 0x444   : > { %16829 = vst [vmem:[#allocation38_spill] sm:$0xff] %v13537_v10  ;;  %v7447_v1 = vcombine.low %v13499_v35, %v13537_v10  ;;  %v5980_v6 = vcombine.high %v16832_v60, %v16831_v53  ;;  %v7326_v12 = vrot.slane %v7312_v36, %v10513_v51  ;;  %v13553_v32 = vrot.slane %v2620_v25, %v10522_v63  ;;  %v16834_v48 = vld [vmem:[#allocation71_spill] sm:$0xff]  ;;  %v16838_v53 = vld [vmem:[#allocation49_spill] sm:$0xff] }
 0x445   : > { %16830 = vst [vmem:[#allocation29_spill] sm:$0xff] %v13540_v52  ;;  %9460 = vrot.lane.b32.xlu0 %v9459_v29, %s10089_s15  ;;  %v7399_v56 = vcombine.low %v13249_v9, %v13286_v34  ;;  %v16835_v2 = vld [vmem:[#allocation47_spill] sm:$0xff]  ;;  %v2640_v25 = vcombine.high %v13544_v18, %v13521_v61  ;;  %v7360_v35 = vcombine.high %v16842_v4, %v16841_v17  ;;  %v16886_v52 = vld [vmem:[#allocation186_spill] sm:$0xff] }
 0x446   : > { %9415 = vrot.lane.b32.xlu1 %v16833_v24, %s10086_s30  ;;  %v3414_v54 = vcombine.high %v16835_v2, %v16834_v48  ;;  %v13562_v31 = vrot.slane %v7447_v1, %v10513_v51  ;;  %v13564_v29 = vpop.permute.xlu0 %4755  ;;  %v16839_v60 = vld [vmem:[#allocation207_spill] sm:$0xff]  ;;  %v13574_v24 = vrot.slane %v2588_v16, %v10522_v63  ;;  %v13577_v48 = vrot.slane %v7431_v39, %v10513_v51  ;;  %v16851_v16 = vld [vmem:[#allocation45_spill] sm:$0xff] }
 0x447   : > { %16837 = vst [vmem:[#allocation248_spill] sm:$0xff] %v13564_v29  ;;  %v16840_v36 = vcombine.high %v16838_v53, %v16839_v60  ;;  %v13580_v1 = vrot.slane %v7415_v50, %v10513_v51  ;;  %v13582_v2 = vpop.permute.xlu1 %5617  ;;  %v13585_v10 = vrot.slane %v7343_v37, %v10522_v63  ;;  %v16849_v45 = vld [vmem:[#allocation251_spill] sm:$0xff]  ;;  %v7375_v39 = vcombine.low %v13454_v40, %v7326_v12 }
 0x448   : > { %16836 = vst [vmem:[#allocation215_spill] sm:$0xff] %v13562_v31  ;;  %16843 = vst [vmem:[#allocation247_spill] sm:$0xff] %v13577_v48  ;;  %v16850_v17 = vld [vmem:[#allocation39_spill] sm:$0xff]  ;;  %v13597_v50 = vrot.slane %v7399_v56, %v10513_v51  ;;  %v7495_v37 = vcombine.low %v13577_v48, %v13562_v31  ;;  %v13616_v31 = vrot.slane %v5980_v6, %v10513_v51 }
 0x449   : > { %v9469_v49 = vpack.i.bf16 %v2638_v13, %v16840_v36  ;;  %16844 = vst [vmem:[#allocation162_spill] sm:$0xff] %v13580_v1  ;;  %16845 = vst [vmem:[#allocation159_spill] sm:$0xff] %v13582_v2  ;;  %v13588_v13 = vrot.slane %v7344_v15, %v10522_v63  ;;  %v16848_v36 = vld [vmem:[#allocation44_spill] sm:$0xff]  ;;  %v3398_v0 = vcombine.high %v16851_v16, %v16850_v17  ;;  %v16857_v16 = vld [vmem:[#allocation213_spill] sm:$0xff] }
 0x44a   : > { %16846 = vst [vmem:[#allocation163_spill] sm:$0xff] %v13585_v10  ;;  %v3382_v4 = vcombine.high %v16849_v45, %v16848_v36  ;;  %16852 = vst [vmem:[#allocation246_spill] sm:$0xff] %v13597_v50  ;;  %9425 = vrot.lane.b32.xlu1 %v16853_v55, %s10085_s29  ;;  %v2642_v15 = vcombine.high %v13574_v24, %v13553_v32  ;;  %v16854_v45 = vld [vmem:[#allocation255_spill] sm:$0xff]  ;;  %v16855_v36 = vld [vmem:[#allocation249_spill] sm:$0xff]  ;;  %v3428_v17 = vrot.slane %v3414_v54, %v10513_v51  ;;  %v13610_v34 = vpop.permute.xlu0 %4763 }
 0x44b   : > { %16847 = vst [vmem:[#allocation160_spill] sm:$0xff] %v13588_v13  ;;  %9470 = vrot.lane.b32.xlu0 %v9469_v49, %s10087_s11  ;;  %v3366_v33 = vcombine.high %v16855_v36, %v16854_v45  ;;  %v16856_v49 = vld [vmem:[#allocation66_spill] sm:$0xff]  ;;  %16858 = vst [vmem:[#allocation250_spill] sm:$0xff] %v13610_v34  ;;  %v16859_v56 = vld [vmem:[#allocation203_spill] sm:$0xff]  ;;  %v13619_v55 = vrot.slane %v7360_v35, %v10522_v63  ;;  %v7376_v7 = vcombine.high %v13454_v40, %v7326_v12  ;;  %v13624_v45 = vpop.permute.xlu1 %5625 }
 0x44c   : > { %v3462_v9 = vcombine.high %v16857_v16, %v16856_v49  ;;  %v16861_v5 = vcombine.high %v16859_v56, %v16860_v38  ;;  %v7463_v54 = vcombine.low %v13597_v50, %v13580_v1  ;;  %16863 = vst [vmem:[#allocation22_spill] sm:$0xff] %v13624_v45  ;;  %v16864_v36 = vld [vmem:[#allocation177_spill] sm:$0xff]  ;;  %v16865_v49 = vld [vmem:[#allocation174_spill] sm:$0xff]  ;;  %v3396_v11 = vrot.slane %v3382_v4, %v10513_v51  ;;  %v16869_v40 = vld [vmem:[#allocation176_spill] sm:$0xff] }
 0x44d   : > { %16862 = vst [vmem:[#allocation48_spill] sm:$0xff] %v13619_v55  ;;  %v5964_v16 = vcombine.high %v16865_v49, %v16864_v36  ;;  %v3412_v6 = vrot.slane %v3398_v0, %v10513_v51  ;;  %v13634_v35 = vrot.slane %v7375_v39, %v10522_v63  ;;  %v16870_v12 = vld [vmem:[#allocation173_spill] sm:$0xff]  ;;  %v13639_v1 = vrot.slane %v7495_v37, %v10522_v63  ;;  %v16872_v36 = vld [vmem:[#allocation60_spill] sm:$0xff] }
 0x44e   : > { %v9479_v48 = vpack.i.bf16 %v2640_v25, %v16861_v5  ;;  %v16867_v5 = vld [vmem:[#allocation219_spill] sm:$0xff]  ;;  %v5090_v50 = vcombine.high %v16870_v12, %v16869_v40  ;;  %9435 = vrot.lane.b32.xlu1 %v16872_v36, %s10084_s28  ;;  %v16873_v4 = vld [vmem:[#allocation65_spill] sm:$0xff]  ;;  %v16874_v49 = vld [vmem:[#allocation72_spill] sm:$0xff]  ;;  %v3380_v0 = vrot.slane %v3366_v33, %v10513_v51  ;;  %v13655_v37 = vrot.slane %v7376_v7, %v10522_v63 }
 0x44f   : > { %v3430_v25 = vcombine.high %v16867_v5, %v16866_v22  ;;  %16868 = vst [vmem:[#allocation169_spill] sm:$0xff] %v13634_v35  ;;  %16871 = vst [vmem:[#allocation172_spill] sm:$0xff] %v13639_v1  ;;  %v16875_v8 = vcombine.high %v16873_v4, %v16874_v49  ;;  %v3477_v39 = vcombine.low %v3412_v6, %v3428_v17  ;;  %v13650_v5 = vpop.permute.xlu0 %4771  ;;  %v16877_v40 = vld [vmem:[#allocation225_spill] sm:$0xff]  ;;  %v13660_v43 = vpop.permute.xlu1 %5633 }
 0x450   : > { %9480 = vrot.lane.b32.xlu0 %v9479_v48, %s10085_s29  ;;  %v13648_v48 = vrot.slane %v3462_v9, %v10522_v63  ;;  %16876 = vst [vmem:[#allocation42_spill] sm:$0xff] %v13650_v5  ;;  %v3494_v12 = vcombine.high %v16877_v40, %v12852_v59  ;;  %16878 = vst [vmem:[#allocation168_spill] sm:$0xff] %v13655_v37  ;;  %v13658_v36 = vrot.slane %v7463_v54, %v10522_v63  ;;  %v16882_v40 = vld [vmem:[#allocation59_spill] sm:$0xff] }
 0x451   : > { %v9489_v22 = vpack.i.bf16 %v2642_v15, %v16875_v8  ;;  %v16881_v15 = vld [vmem:[#allocation178_spill] sm:$0xff]  ;;  %v5978_v47 = vrot.slane %v5964_v16, %v10513_v51  ;;  %v13668_v29 = vrot.slane %v3430_v25, %v10522_v63  ;;  %v3445_v59 = vcombine.low %v3380_v0, %v3396_v11  ;;  %v16885_v9 = vld [vmem:[#allocation183_spill] sm:$0xff] }
 0x452   : > { %16879 = vst [vmem:[#allocation166_spill] sm:$0xff] %v13658_v36  ;;  %v13674_v54 = vrot.slane %v5090_v50, %v10513_v51  ;;  %9445 = vrot.lane.b32.xlu1 %v16882_v40, %s10083_s27  ;;  %v3478_v33 = vcombine.high %v3412_v6, %v3428_v17  ;;  %v16884_v50 = vcombine.high %v16643_v23, %v16642_v41  ;;  %v16887_v41 = vld [vmem:[#allocation182_spill] sm:$0xff]  ;;  %v16888_v23 = vld [vmem:[#allocation180_spill] sm:$0xff] }
 0x453   : > { %v13687_v7 = vpop.permute.xlu0 %4779  ;;  %v3496_v40 = vcombine.high %v13668_v29, %v13648_v48  ;;  %v6012_v8 = vcombine.high %v16886_v52, %v16885_v9  ;;  %v6115_v16 = vcombine.low %v13488_v46, %v13523_v3  ;;  %v6099_v17 = vcombine.low %v13582_v2, %v13624_v45  ;;  %v13700_v6 = vpop.permute.xlu1 %5641  ;;  %v16913_v45 = vld [vmem:[#allocation256_spill] sm:$0xff]  ;;  %v16915_v46 = vld [vmem:[#allocation18_spill] sm:$0xff] }
 0x454   : > { %9490 = vrot.lane.b32.xlu0 %v9489_v22, %s10083_s27  ;;  %v13685_v22 = vrot.slane %v3477_v39, %v10522_v63  ;;  %16883 = vst [vmem:[#allocation19_spill] sm:$0xff] %v13687_v7  ;;  %v9494_v55 = vpack.i.bf16 %v3494_v12, %v16884_v50  ;;  %v2637_v39 = vcombine.low %v13506_v30, %v13486_v28  ;;  %v16889_v30 = vld [vmem:[#allocation218_spill] sm:$0xff] }
 0x455   : > { %v6027_v25 = vcombine.low %v13493_v42, %v5978_v47  ;;  %v3446_v12 = vcombine.high %v3380_v0, %v3396_v11  ;;  %v13706_v50 = vrot.slane %v3445_v59, %v10522_v63  ;;  %v6131_v52 = vcombine.low %v13660_v43, %v13700_v6 }
 0x456   : > { %v6028_v9 = vcombine.high %v13493_v42, %v5978_v47  ;;  %v5996_v35 = vcombine.high %v16888_v23, %v16887_v41  ;;  %v6083_v10 = vcombine.low %v13402_v62, %v13451_v21  ;;  %9455 = vrot.lane.b32.xlu1 %v16889_v30, %s10089_s15  ;;  %v13721_v11 = vrot.slane %v3478_v33, %v10522_v63 }
 0x457   : > { %v13724_v28 = vrot.slane %v6131_v52, %v10513_v51  ;;  %v16892_v41 = vcombine.high %v12918_v57, %v12924_v26  ;;  %v3498_v47 = vcombine.high %v13706_v50, %v13685_v22  ;;  %v13734_v42 = vrot.slane %v6115_v16, %v10513_v51  ;;  %v13739_v33 = vpop.permute.xlu1 %4759 }
 0x458   : > { %9495 = vrot.lane.b32.xlu0 %v9494_v55, %s10089_s15  ;;  %v13726_v55 = vpop.permute.xlu0 %8059  ;;  %v13737_v0 = vrot.slane %v6099_v17, %v10513_v51  ;;  %16895 = vst [vmem:[#allocation47_spill] sm:$0xff] %v13739_v33  ;;  %v16896_v52 = vcombine.low %v16838_v53, %v16839_v60  ;;  %v2639_v59 = vcombine.low %v13544_v18, %v13521_v61  ;;  %v16906_v17 = vld [vmem:[#allocation179_spill] sm:$0xff] }
 0x459   : > { %16890 = vst [vmem:[#allocation167_spill] sm:$0xff] %v13724_v28  ;;  %16891 = vst [vmem:[#allocation165_spill] sm:$0xff] %v13726_v55  ;;  %v9504_v23 = vpack.i.bf16 %v3496_v40, %v16892_v41  ;;  %v13747_v40 = vrot.slane %v6012_v8, %v10522_v63  ;;  %v13750_v41 = vrot.slane %v6027_v25, %v10522_v63 }
 0x45a   : > { %16893 = vst [vmem:[#allocation199_spill] sm:$0xff] %v13734_v42  ;;  %16894 = vst [vmem:[#allocation71_spill] sm:$0xff] %v13737_v0  ;;  %v9464_v30 = vpack.i.bf16 %v2637_v39, %v16896_v52  ;;  %v13753_v16 = vrot.slane %v3446_v12, %v10522_v63  ;;  %v13759_v53 = vrot.slane %v6028_v9, %v10522_v63  ;;  %v16902_v12 = vld [vmem:[#allocation75_spill] sm:$0xff]  ;;  %v16903_v9 = vld [vmem:[#allocation82_spill] sm:$0xff] }
 0x45b   : > { %16897 = vst [vmem:[#allocation49_spill] sm:$0xff] %v13747_v40  ;;  %16898 = vst [vmem:[#allocation207_spill] sm:$0xff] %v13750_v41  ;;  %v6010_v60 = vrot.slane %v5996_v35, %v10513_v51  ;;  %v13763_v61 = vrot.slane %v6083_v10, %v10513_v51  ;;  %v6179_v18 = vcombine.low %v13734_v42, %v13724_v28  ;;  %v16905_v52 = vld [vmem:[#allocation181_spill] sm:$0xff]  ;;  %v13783_v13 = vpop.permute.xlu1 %4767 }
 0x45c   : > { %9505 = vrot.lane.b32.xlu0 %v9504_v23, %s10087_s11  ;;  %16899 = vst [vmem:[#allocation171_spill] sm:$0xff] %v13759_v53  ;;  %9465 = vrot.lane.b32.xlu1 %v9464_v30, %s10088_s12  ;;  %v5844_v8 = vcombine.high %v12854_v14, %v12885_v27  ;;  %v5908_v25 = vcombine.high %v13039_v58, %v13046_v44  ;;  %v13772_v39 = vpop.permute.xlu0 %8067  ;;  %16907 = vst [vmem:[#allocation251_spill] sm:$0xff] %v13783_v13  ;;  %v16909_v58 = vld [vmem:[#allocation185_spill] sm:$0xff]  ;;  %v17043_v53 = vld [vmem:[#allocation11_spill] sm:$0xff] }
 0x45d   : > { %16900 = vst [vmem:[#allocation170_spill] sm:$0xff] %v13763_v61  ;;  %16901 = vst [vmem:[#allocation44_spill] sm:$0xff] %v13772_v39  ;;  %v16904_v23 = vcombine.high %v16902_v12, %v16903_v9  ;;  %v3500_v10 = vcombine.high %v13753_v16, %v13721_v11  ;;  %v5122_v37 = vcombine.high %v16906_v17, %v16905_v52  ;;  %v16911_v42 = vld [vmem:[#allocation245_spill] sm:$0xff]  ;;  %v16914_v17 = vld [vmem:[#allocation50_spill] sm:$0xff] }
 0x45e   : > { %v6147_v30 = vcombine.low %v13763_v61, %v13737_v0  ;;  %v16908_v44 = vcombine.low %v16859_v56, %v16860_v38  ;;  %v2641_v27 = vcombine.low %v13574_v24, %v13553_v32  ;;  %v16912_v28 = vld [vmem:[#allocation33_spill] sm:$0xff]  ;;  %v5812_v52 = vcombine.high %v16914_v17, %v16913_v45  ;;  %v16916_v61 = vld [vmem:[#allocation23_spill] sm:$0xff]  ;;  %v16918_v32 = vld [vmem:[#allocation240_spill] sm:$0xff] }
 0x45f   : > { %v9514_v35 = vpack.i.bf16 %v3498_v47, %v16904_v23  ;;  %v16910_v47 = vld [vmem:[#allocation184_spill] sm:$0xff]  ;;  %v5860_v2 = vcombine.high %v16912_v28, %v16911_v42  ;;  %v5876_v0 = vcombine.high %v16916_v61, %v16915_v46  ;;  %v6059_v38 = vcombine.low %v13616_v31, %v6010_v60  ;;  %v16921_v42 = vld [vmem:[#allocation87_spill] sm:$0xff]  ;;  %v16922_v61 = vld [vmem:[#allocation85_spill] sm:$0xff] }
 0x460   : > { %v9474_v14 = vpack.i.bf16 %v2639_v59, %v16908_v44  ;;  %v6044_v23 = vcombine.high %v16910_v47, %v16909_v58  ;;  %v6060_v56 = vcombine.high %v13616_v31, %v6010_v60  ;;  %v16917_v59 = vld [vmem:[#allocation43_spill] sm:$0xff]  ;;  %v13804_v44 = vrot.slane %v6179_v18, %v10522_v63  ;;  %v13811_v46 = vpop.permute.xlu0 %8075  ;;  %v16924_v31 = vld [vmem:[#allocation106_spill] sm:$0xff]  ;;  %v16925_v60 = vld [vmem:[#allocation233_spill] sm:$0xff] }
 0x461   : > { %9515 = vrot.lane.b32.xlu0 %v9514_v35, %s10085_s29  ;;  %v5828_v24 = vcombine.high %v16918_v32, %v16917_v59  ;;  %v13808_v28 = vrot.slane %v5844_v8, %v10513_v51  ;;  %v5922_v45 = vrot.slane %v5908_v25, %v10522_v63  ;;  %16920 = vst [vmem:[#allocation45_spill] sm:$0xff] %v13811_v46 }
 0x462   : > { %16919 = vst [vmem:[#allocation39_spill] sm:$0xff] %v13804_v44  ;;  %9475 = vrot.lane.b32.xlu1 %v9474_v14, %s10086_s30  ;;  %v16923_v35 = vcombine.high %v16921_v42, %v16922_v61  ;;  %v5940_v47 = vcombine.high %v16925_v60, %v16924_v31  ;;  %v13819_v17 = vrot.slane %v5122_v37, %v10513_v51  ;;  %v13824_v14 = vpop.permute.xlu1 %4775  ;;  %v16939_v31 = vld [vmem:[#allocation46_spill] sm:$0xff] }
 0x463   : > { %v13822_v18 = vrot.slane %v6147_v30, %v10522_v63  ;;  %16927 = vst [vmem:[#allocation255_spill] sm:$0xff] %v13824_v14  ;;  %v16928_v8 = vcombine.low %v16873_v4, %v16874_v49  ;;  %v3495_v59 = vcombine.low %v13668_v29, %v13648_v48  ;;  %v13835_v32 = vrot.slane %v5860_v2, %v10513_v51  ;;  %v16938_v2 = vld [vmem:[#allocation28_spill] sm:$0xff] }
 0x464   : > { %v9524_v58 = vpack.i.bf16 %v3500_v10, %v16923_v35  ;;  %v13832_v10 = vrot.slane %v6044_v23, %v10522_v63  ;;  %v13838_v37 = vrot.slane %v5812_v52, %v10513_v51  ;;  %v5890_v30 = vrot.slane %v5876_v0, %v10522_v63  ;;  %v13858_v0 = vpop.permute.xlu0 %8083 }
 0x465   : > { %16926 = vst [vmem:[#allocation69_spill] sm:$0xff] %v13822_v18  ;;  %v9484_v25 = vpack.i.bf16 %v2641_v27, %v16928_v8  ;;  %v13843_v35 = vrot.slane %v6059_v38, %v10522_v63  ;;  %v13846_v4 = vrot.slane %v6060_v56, %v10522_v63  ;;  %v3497_v29 = vcombine.low %v13706_v50, %v13685_v22  ;;  %v16934_v38 = vld [vmem:[#allocation89_spill] sm:$0xff]  ;;  %v17031_v18 = vld [vmem:[#allocation194_spill] sm:$0xff] }
 0x466   : > { %16929 = vst [vmem:[#allocation249_spill] sm:$0xff] %v13832_v10  ;;  %9525 = vrot.lane.b32.xlu0 %v9524_v58, %s10083_s27  ;;  %v13854_v49 = vrot.slane %v5828_v24, %v10513_v51  ;;  %v5923_v48 = vcombine.low %v13808_v28, %v13835_v32  ;;  %16932 = vst [vmem:[#allocation203_spill] sm:$0xff] %v13858_v0  ;;  %v16933_v27 = vcombine.high %v16717_v20, %v16716_v19  ;;  %v16935_v56 = vld [vmem:[#allocation257_spill] sm:$0xff]  ;;  %v13869_v24 = vpop.permute.xlu1 %4783  ;;  %v16942_v20 = vld [vmem:[#allocation78_spill] sm:$0xff] }
 0x467   : > { %16930 = vst [vmem:[#allocation66_spill] sm:$0xff] %v13843_v35  ;;  %16931 = vst [vmem:[#allocation213_spill] sm:$0xff] %v13846_v4  ;;  %9485 = vrot.lane.b32.xlu1 %v9484_v25, %s10084_s28  ;;  %v5941_v52 = vcombine.low %v5890_v30, %v5922_v45  ;;  %v2828_v58 = vcombine.high %v16935_v56, %v16934_v38  ;;  %v5257_v22 = vcombine.low %v13650_v5, %v13687_v7  ;;  %v16943_v5 = vld [vmem:[#allocation70_spill] sm:$0xff] }
 0x468   : > { %v9529_v23 = vpack.i.bf16 %v5940_v47, %v16933_v27  ;;  %v5241_v50 = vcombine.low %v13739_v33, %v13783_v13  ;;  %16936 = vst [vmem:[#allocation73_spill] sm:$0xff] %v13869_v24  ;;  %v16937_v8 = vcombine.low %v12918_v57, %v12924_v26  ;;  %v2780_v60 = vcombine.high %v16939_v31, %v16938_v2  ;;  %v16940_v47 = vld [vmem:[#allocation74_spill] sm:$0xff]  ;;  %v16941_v27 = vld [vmem:[#allocation197_spill] sm:$0xff]  ;;  %v16944_v57 = vld [vmem:[#allocation248_spill] sm:$0xff] }
 0x469   : > { %v2796_v19 = vcombine.high %v16941_v27, %v16940_v47  ;;  %v5891_v38 = vcombine.low %v13838_v37, %v13854_v49  ;;  %v5273_v56 = vcombine.low %v13824_v14, %v13869_v24  ;;  %v2812_v7 = vcombine.high %v16943_v5, %v16942_v20  ;;  %v13899_v47 = vpop.permute.xlu0 %8057  ;;  %v16948_v20 = vld [vmem:[#allocation100_spill] sm:$0xff]  ;;  %v16949_v5 = vld [vmem:[#allocation110_spill] sm:$0xff]  ;;  %v16958_v24 = vld [vmem:[#allocation191_spill] sm:$0xff] }
 0x46a   : > { %v9499_v25 = vpack.i.bf16 %v3495_v59, %v16937_v8  ;;  %9530 = vrot.lane.b32.xlu0 %v9529_v23, %s10089_s15  ;;  %v5225_v26 = vcombine.low %v16944_v57, %v13610_v34  ;;  %v16945_v31 = vcombine.low %v16902_v12, %v16903_v9  ;;  %v3499_v2 = vcombine.low %v13753_v16, %v13721_v11  ;;  %v16951_v12 = vld [vmem:[#allocation229_spill] sm:$0xff]  ;;  %v16952_v9 = vld [vmem:[#allocation230_spill] sm:$0xff]  ;;  %v16959_v33 = vld [vmem:[#allocation188_spill] sm:$0xff] }
 0x46b   : > { %v13894_v8 = vrot.slane %v5923_v48, %v10522_v63  ;;  %v13897_v23 = vrot.slane %v5273_v56, %v10513_v51  ;;  %16947 = vst [vmem:[#allocation174_spill] sm:$0xff] %v13899_v47  ;;  %v16950_v27 = vcombine.low %v16948_v20, %v16949_v5  ;;  %v2842_v34 = vrot.slane %v2828_v58, %v10513_v51  ;;  %v13913_v48 = vpop.permute.xlu1 %8063  ;;  %v16956_v56 = vld [vmem:[#allocation190_spill] sm:$0xff]  ;;  %v16960_v58 = vld [vmem:[#allocation112_spill] sm:$0xff] }
 0x46c   : > { %9500 = vrot.lane.b32.xlu1 %v9499_v25, %s10088_s12  ;;  %v9509_v59 = vpack.i.bf16 %v3497_v29, %v16945_v31  ;;  %v5942_v25 = vcombine.high %v5890_v30, %v5922_v45  ;;  %v2876_v29 = vcombine.high %v16952_v9, %v16951_v12  ;;  %v13908_v11 = vrot.slane %v5257_v22, %v10513_v51  ;;  %v16957_v31 = vld [vmem:[#allocation187_spill] sm:$0xff]  ;;  %v16961_v22 = vld [vmem:[#allocation104_spill] sm:$0xff] }
 0x46d   : > { %16946 = vst [vmem:[#allocation177_spill] sm:$0xff] %v13897_v23  ;;  %v9534_v57 = vpack.i.bf16 %v5941_v52, %v16950_v27  ;;  %v13911_v16 = vrot.slane %v5241_v50, %v10513_v51  ;;  %16955 = vst [vmem:[#allocation176_spill] sm:$0xff] %v13913_v48  ;;  %v8394_v14 = vcombine.high %v16957_v31, %v16956_v56 }
 0x46e   : > { %16953 = vst [vmem:[#allocation211_spill] sm:$0xff] %v13908_v11  ;;  %v5106_v52 = vcombine.high %v16959_v33, %v16958_v24  ;;  %v2810_v45 = vrot.slane %v2796_v19, %v10513_v51  ;;  %v13921_v30 = vrot.slane %v5891_v38, %v10522_v63  ;;  %v2844_v27 = vcombine.high %v16961_v22, %v16960_v58  ;;  %v13934_v33 = vpop.permute.xlu0 %8065  ;;  %v16967_v58 = vld [vmem:[#allocation232_spill] sm:$0xff]  ;;  %v16968_v22 = vld [vmem:[#allocation113_spill] sm:$0xff] }
 0x46f   : > { %16954 = vst [vmem:[#allocation219_spill] sm:$0xff] %v13911_v16  ;;  %9535 = vrot.lane.b32.xlu0 %v9534_v57, %s10088_s12  ;;  %v2826_v50 = vrot.slane %v2812_v7, %v10513_v51  ;;  %v13928_v12 = vrot.slane %v5225_v26, %v10513_v51  ;;  %v5321_v9 = vcombine.low %v13908_v11, %v13897_v23  ;;  %16963 = vst [vmem:[#allocation60_spill] sm:$0xff] %v13934_v33  ;;  %v16978_v23 = vld [vmem:[#allocation237_spill] sm:$0xff] }
 0x470   : > { %9510 = vrot.lane.b32.xlu1 %v9509_v59, %s10086_s30  ;;  %v2794_v19 = vrot.slane %v2780_v60, %v10513_v51  ;;  %v16964_v24 = vcombine.high %v16948_v20, %v16949_v5  ;;  %v16965_v57 = vcombine.low %v16921_v42, %v16922_v61  ;;  %v5943_v26 = vcombine.low %v13921_v30, %v13894_v8  ;;  %v13949_v59 = vpop.permute.xlu1 %8071  ;;  %v16972_v61 = vld [vmem:[#allocation114_spill] sm:$0xff] }
 0x471   : > { %16962 = vst [vmem:[#allocation173_spill] sm:$0xff] %v13928_v12  ;;  %v13945_v56 = vrot.slane %v2876_v29, %v10522_v63  ;;  %v2891_v31 = vcombine.low %v2826_v50, %v2842_v34  ;;  %v5289_v60 = vcombine.low %v13928_v12, %v13911_v16  ;;  %16966 = vst [vmem:[#allocation65_spill] sm:$0xff] %v13949_v59  ;;  %v16976_v16 = vld [vmem:[#allocation107_spill] sm:$0xff] }
 0x472   : > { %v9539_v38 = vpack.i.bf16 %v5942_v25, %v16964_v24  ;;  %v9519_v7 = vpack.i.bf16 %v3499_v2, %v16965_v57  ;;  %v2908_v20 = vcombine.high %v16968_v22, %v16967_v58  ;;  %v13963_v24 = vrot.slane %v2844_v27, %v10522_v63  ;;  %v16973_v22 = vld [vmem:[#allocation17_spill] sm:$0xff]  ;;  %v13971_v12 = vpop.permute.xlu0 %8073  ;;  %v16975_v25 = vld [vmem:[#allocation111_spill] sm:$0xff]  ;;  %v16979_v27 = vld [vmem:[#allocation258_spill] sm:$0xff] }
 0x473   : > { %v2859_v57 = vcombine.low %v2794_v19, %v2810_v45  ;;  %v2892_v13 = vcombine.high %v2826_v50, %v2842_v34  ;;  %v13966_v58 = vrot.slane %v5321_v9, %v10522_v63  ;;  %v5050_v2 = vcombine.high %v16973_v22, %v16972_v61  ;;  %16974 = vst [vmem:[#allocation59_spill] sm:$0xff] %v13971_v12 }
 0x474   : > { %9540 = vrot.lane.b32.xlu0 %v9539_v38, %s10087_s11  ;;  %9520 = vrot.lane.b32.xlu1 %v9519_v7, %s10084_s28  ;;  %v2860_v38 = vcombine.high %v2794_v19, %v2810_v45  ;;  %v16977_v11 = vcombine.low %v16975_v25, %v16976_v16  ;;  %v5082_v10 = vcombine.high %v16979_v27, %v16978_v23  ;;  %v13984_v9 = vpop.permute.xlu1 %8079  ;;  %v16982_v45 = vld [vmem:[#allocation120_spill] sm:$0xff]  ;;  %v16983_v19 = vld [vmem:[#allocation118_spill] sm:$0xff]  ;;  %v16987_v23 = vld [vmem:[#allocation103_spill] sm:$0xff] }
 0x475   : > { %16971 = vst [vmem:[#allocation72_spill] sm:$0xff] %v13966_v58  ;;  %v13979_v34 = vrot.slane %v2891_v31, %v10522_v63  ;;  %v13982_v50 = vrot.slane %v5289_v60, %v10522_v63  ;;  %16981 = vst [vmem:[#allocation186_spill] sm:$0xff] %v13984_v9  ;;  %v16984_v7 = vcombine.high %v16982_v45, %v16983_v19  ;;  %v16986_v31 = vld [vmem:[#allocation98_spill] sm:$0xff]  ;;  %v16992_v45 = vld [vmem:[#allocation129_spill] sm:$0xff] }
 0x476   : > { %v9544_v29 = vpack.i.bf16 %v5943_v26, %v16977_v11  ;;  %v2910_v61 = vcombine.high %v13963_v24, %v13945_v56  ;;  %v13992_v11 = vrot.slane %v8394_v14, %v10513_v51  ;;  %v13995_v26 = vrot.slane %v5106_v52, %v10513_v51  ;;  %v14018_v60 = vpop.permute.xlu0 %8081  ;;  %v16995_v52 = vld [vmem:[#allocation88_spill] sm:$0xff] }
 0x477   : > { %16980 = vst [vmem:[#allocation183_spill] sm:$0xff] %v13982_v50  ;;  %v9584_v22 = vpack.i.bf16 %v2908_v20, %v16984_v7  ;;  %v5018_v27 = vcombine.high %v16987_v23, %v16986_v31  ;;  %v14003_v19 = vrot.slane %v2859_v57, %v10522_v63  ;;  %v5924_v20 = vcombine.high %v13808_v28, %v13835_v32  ;;  %v16989_v7 = vld [vmem:[#allocation35_spill] sm:$0xff]  ;;  %v16991_v57 = vld [vmem:[#allocation136_spill] sm:$0xff] }
 0x478   : > { %16985 = vst [vmem:[#allocation182_spill] sm:$0xff] %v13992_v11  ;;  %9545 = vrot.lane.b32.xlu0 %v9544_v29, %s10086_s30  ;;  %v14008_v14 = vrot.slane %v2892_v13, %v10522_v63  ;;  %v14014_v23 = vrot.slane %v5050_v2, %v10522_v63  ;;  %v16988_v29 = vld [vmem:[#allocation116_spill] sm:$0xff]  ;;  %16990 = vst [vmem:[#allocation180_spill] sm:$0xff] %v14018_v60  ;;  %v16993_v11 = vcombine.high %v16991_v57, %v16992_v45  ;;  %v14030_v2 = vpop.permute.xlu1 %8087 }
 0x479   : > { %9585 = vrot.lane.b32.xlu1 %v9584_v22, %s10089_s15  ;;  %v3686_v31 = vcombine.high %v16989_v7, %v16988_v29  ;;  %v5944_v13 = vcombine.high %v13921_v30, %v13894_v8  ;;  %v14026_v32 = vrot.slane %v2860_v38, %v10522_v63  ;;  %v5892_v22 = vcombine.high %v13838_v37, %v13854_v49  ;;  %v16996_v50 = vld [vmem:[#allocation260_spill] sm:$0xff]  ;;  %v16999_v8 = vld [vmem:[#allocation95_spill] sm:$0xff] }
 0x47a   : > { %v9549_v28 = vpack.i.bf16 %v5082_v10, %v16993_v11  ;;  %16994 = vst [vmem:[#allocation218_spill] sm:$0xff] %v14030_v2  ;;  %v16997_v29 = vcombine.high %v16995_v52, %v16996_v50  ;;  %v2912_v58 = vcombine.high %v14003_v19, %v13979_v34  ;;  %v14038_v10 = vrot.slane %v5018_v27, %v10522_v63  ;;  %v16998_v11 = vld [vmem:[#allocation24_spill] sm:$0xff]  ;;  %v17000_v38 = vld [vmem:[#allocation259_spill] sm:$0xff] }
 0x47b   : > { %v3654_v30 = vcombine.high %v16999_v8, %v16998_v11  ;;  %v17001_v45 = vld [vmem:[#allocation244_spill] sm:$0xff]  ;;  %v8577_v37 = vcombine.low %v13984_v9, %v14030_v2  ;;  %v14048_v49 = vrot.slane %v5924_v20, %v10522_v63  ;;  %v8561_v27 = vcombine.low %v13811_v46, %v13858_v0  ;;  %v14058_v8 = vpop.permute.xlu0 %9295  ;;  %v17007_v9 = vld [vmem:[#allocation109_spill] sm:$0xff] }
 0x47c   : > { %v9594_v7 = vpack.i.bf16 %v2910_v61, %v16997_v29  ;;  %v3670_v57 = vcombine.high %v17001_v45, %v17000_v38  ;;  %9550 = vrot.lane.b32.xlu0 %v9549_v28, %s10089_s15  ;;  %v17002_v61 = vld [vmem:[#allocation97_spill] sm:$0xff]  ;;  %v17003_v29 = vld [vmem:[#allocation227_spill] sm:$0xff]  ;;  %v8545_v11 = vcombine.low %v13913_v48, %v13949_v59  ;;  %v3700_v45 = vrot.slane %v3686_v31, %v10513_v51  ;;  %v17010_v48 = vld [vmem:[#allocation94_spill] sm:$0xff] }
 0x47d   : > { %v3638_v35 = vcombine.high %v17003_v29, %v17002_v61  ;;  %17004 = vst [vmem:[#allocation75_spill] sm:$0xff] %v14058_v8  ;;  %v17005_v28 = vcombine.high %v16975_v25, %v16976_v16  ;;  %v5083_v38 = vcombine.low %v14038_v10, %v14014_v23  ;;  %v2914_v61 = vcombine.high %v14026_v32, %v14008_v14  ;;  %v17006_v29 = vld [vmem:[#allocation140_spill] sm:$0xff]  ;;  %v14074_v8 = vpop.permute.xlu1 %8061  ;;  %v17011_v16 = vld [vmem:[#allocation261_spill] sm:$0xff] }
 0x47e   : > { %9595 = vrot.lane.b32.xlu1 %v9594_v7, %s10087_s11  ;;  %v3734_v2 = vcombine.high %v17007_v9, %v17006_v29  ;;  %v8529_v7 = vcombine.low %v13726_v55, %v13772_v39  ;;  %v14072_v31 = vrot.slane %v8577_v37, %v10513_v51  ;;  %17009 = vst [vmem:[#allocation181_spill] sm:$0xff] %v14074_v8  ;;  %v17014_v59 = vld [vmem:[#allocation8_spill] sm:$0xff]  ;;  %v17015_v55 = vld [vmem:[#allocation119_spill] sm:$0xff] }
 0x47f   : > { %v9554_v20 = vpack.i.bf16 %v5944_v13, %v17005_v28  ;;  %v17012_v25 = vcombine.high %v17010_v48, %v17011_v16  ;;  %v17013_v28 = vld [vmem:[#allocation9_spill] sm:$0xff]  ;;  %v14082_v0 = vrot.slane %v5892_v22, %v10522_v63  ;;  %v3668_v9 = vrot.slane %v3654_v30, %v10513_v51  ;;  %v17016_v39 = vld [vmem:[#allocation128_spill] sm:$0xff]  ;;  %v14097_v22 = vpop.permute.xlu0 %9305  ;;  %v17020_v30 = vld [vmem:[#allocation123_spill] sm:$0xff] }
 0x480   : > { %17008 = vst [vmem:[#allocation82_spill] sm:$0xff] %v14072_v31  ;;  %v5154_v46 = vcombine.high %v17014_v59, %v17013_v28  ;;  %v3684_v29 = vrot.slane %v3670_v57, %v10513_v51  ;;  %v3652_v37 = vrot.slane %v3638_v35, %v10513_v51  ;;  %v3702_v41 = vcombine.high %v17016_v39, %v17015_v55  ;;  %v17021_v57 = vld [vmem:[#allocation125_spill] sm:$0xff]  ;;  %v17023_v28 = vld [vmem:[#allocation96_spill] sm:$0xff]  ;;  %v17024_v35 = vld [vmem:[#allocation262_spill] sm:$0xff] }
 0x481   : > { %v9604_v13 = vpack.i.bf16 %v2912_v58, %v17012_v25  ;;  %9555 = vrot.lane.b32.xlu0 %v9554_v20, %s10085_s29  ;;  %v14091_v40 = vrot.slane %v8561_v27, %v10513_v51  ;;  %v14094_v58 = vrot.slane %v8545_v11, %v10513_v51  ;;  %17019 = vst [vmem:[#allocation184_spill] sm:$0xff] %v14097_v22  ;;  %v17028_v22 = vld [vmem:[#allocation141_spill] sm:$0xff] }
 0x482   : > { %v3749_v59 = vcombine.low %v3684_v29, %v3700_v45  ;;  %v17022_v25 = vcombine.low %v17020_v30, %v17021_v57  ;;  %v17025_v5 = vcombine.high %v17023_v28, %v17024_v35  ;;  %v5945_v55 = vcombine.low %v14082_v0, %v14048_v49 }
 0x483   : > { %17017 = vst [vmem:[#allocation179_spill] sm:$0xff] %v14091_v40  ;;  %17018 = vst [vmem:[#allocation185_spill] sm:$0xff] %v14094_v58  ;;  %9605 = vrot.lane.b32.xlu1 %v9604_v13, %s10085_s29  ;;  %v14108_v39 = vrot.slane %v3734_v2, %v10522_v63  ;;  %v14111_v27 = vrot.slane %v8529_v7, %v10513_v51  ;;  %v8625_v11 = vcombine.low %v14091_v40, %v14072_v31  ;;  %v14115_v13 = vpop.permute.xlu1 %8069  ;;  %v17033_v2 = vld [vmem:[#allocation115_spill] sm:$0xff]  ;;  %v17034_v31 = vld [vmem:[#allocation108_spill] sm:$0xff] }
 0x484   : > { %v9559_v20 = vpack.i.bf16 %v5083_v38, %v17022_v25  ;;  %v9614_v42 = vpack.i.bf16 %v2914_v61, %v17025_v5  ;;  %17027 = vst [vmem:[#allocation33_spill] sm:$0xff] %v14115_v13  ;;  %v17029_v38 = vld [vmem:[#allocation127_spill] sm:$0xff]  ;;  %v5169_v5 = vcombine.low %v13674_v54, %v13995_v26  ;;  %v17030_v61 = vld [vmem:[#allocation196_spill] sm:$0xff]  ;;  %v3717_v3 = vcombine.low %v3652_v37, %v3668_v9 }
 0x485   : > { %17026 = vst [vmem:[#allocation245_spill] sm:$0xff] %v14111_v27  ;;  %v3766_v25 = vcombine.high %v17029_v38, %v17028_v22  ;;  %v5138_v44 = vcombine.high %v17031_v18, %v17030_v61  ;;  %v5170_v7 = vcombine.high %v13674_v54, %v13995_v26  ;;  %v14129_v40 = vrot.slane %v3702_v41, %v10522_v63  ;;  %v14139_v38 = vpop.permute.xlu0 %9315 }
 0x486   : > { %9560 = vrot.lane.b32.xlu0 %v9559_v20, %s10088_s12  ;;  %v8593_v22 = vcombine.low %v14111_v27, %v14094_v58  ;;  %v3750_v61 = vcombine.high %v3684_v29, %v3700_v45  ;;  %v14137_v20 = vrot.slane %v3749_v59, %v10522_v63  ;;  %17032 = vst [vmem:[#allocation256_spill] sm:$0xff] %v14139_v38  ;;  %v17038_v45 = vld [vmem:[#allocation150_spill] sm:$0xff]  ;;  %v17039_v29 = vld [vmem:[#allocation147_spill] sm:$0xff] }
 0x487   : > { %9615 = vrot.lane.b32.xlu1 %v9614_v42, %s10083_s27  ;;  %v17035_v54 = vcombine.low %v17033_v2, %v17034_v31  ;;  %v5084_v41 = vcombine.high %v14038_v10, %v14014_v23  ;;  %v14147_v27 = vrot.slane %v5154_v46, %v10522_v63  ;;  %v14150_v42 = vrot.slane %v8625_v11, %v10522_v63  ;;  %v14152_v18 = vpop.permute.xlu1 %8077  ;;  %v17041_v11 = vld [vmem:[#allocation195_spill] sm:$0xff] }
 0x488   : > { %17037 = vst [vmem:[#allocation18_spill] sm:$0xff] %v14152_v18  ;;  %v17040_v59 = vcombine.high %v17038_v45, %v17039_v29  ;;  %v3768_v38 = vcombine.high %v14129_v40, %v14108_v39  ;;  %v5152_v23 = vrot.slane %v5138_v44, %v10513_v51  ;;  %v3718_v10 = vcombine.high %v3652_v37, %v3668_v9  ;;  %v17044_v29 = vld [vmem:[#allocation12_spill] sm:$0xff]  ;;  %v17057_v45 = vld [vmem:[#allocation101_spill] sm:$0xff] }
 0x489   : > { %v9564_v26 = vpack.i.bf16 %v5945_v55, %v17035_v54  ;;  %17036 = vst [vmem:[#allocation50_spill] sm:$0xff] %v14150_v42  ;;  %v14160_v55 = vrot.slane %v5169_v5, %v10522_v63  ;;  %v14164_v46 = vrot.slane %v3717_v3, %v10522_v63  ;;  %v17042_v54 = vld [vmem:[#allocation193_spill] sm:$0xff]  ;;  %v5946_v44 = vcombine.high %v14082_v0, %v14048_v49  ;;  %v14183_v37 = vpop.permute.xlu0 %9325 }
 0x48a   : > { %v9619_v58 = vpack.i.bf16 %v3766_v25, %v17040_v59  ;;  %v8426_v4 = vcombine.high %v17042_v54, %v17041_v11  ;;  %v5186_v25 = vcombine.high %v17044_v29, %v17043_v53  ;;  %v14172_v59 = vrot.slane %v8593_v22, %v10522_v63  ;;  %17046 = vst [vmem:[#allocation43_spill] sm:$0xff] %v14183_v37  ;;  %v17054_v11 = vld [vmem:[#allocation154_spill] sm:$0xff] }
 0x48b   : > { %9565 = vrot.lane.b32.xlu0 %v9564_v26, %s10084_s28  ;;  %v14178_v9 = vrot.slane %v5170_v7, %v10522_v63  ;;  %v14181_v3 = vrot.slane %v3750_v61, %v10522_v63  ;;  %v17047_v5 = vcombine.high %v17020_v30, %v17021_v57  ;;  %v3770_v22 = vcombine.high %v14164_v46, %v14137_v20  ;;  %v14194_v49 = vpop.permute.xlu1 %8085  ;;  %v17049_v7 = vld [vmem:[#allocation126_spill] sm:$0xff]  ;;  %v17050_v61 = vld [vmem:[#allocation143_spill] sm:$0xff] }
 0x48c   : > { %17045 = vst [vmem:[#allocation23_spill] sm:$0xff] %v14172_v59  ;;  %9620 = vrot.lane.b32.xlu1 %v9619_v58, %s10089_s15  ;;  %v8289_v58 = vcombine.low %v13971_v12, %v14018_v60  ;;  %v8273_v0 = vcombine.low %v14074_v8, %v14115_v13  ;;  %17048 = vst [vmem:[#allocation240_spill] sm:$0xff] %v14194_v49  ;;  %v17051_v26 = vcombine.high %v17049_v7, %v17050_v61  ;;  %v17059_v12 = vld [vmem:[#allocation215_spill] sm:$0xff]  ;;  %v17073_v59 = vld [vmem:[#allocation246_spill] sm:$0xff] }
 0x48d   : > { %v9569_v53 = vpack.i.bf16 %v5084_v41, %v17047_v5  ;;  %v5201_v30 = vcombine.low %v13819_v17, %v5152_v23  ;;  %v5202_v57 = vcombine.high %v13819_v17, %v5152_v23  ;;  %v14204_v41 = vrot.slane %v3718_v10, %v10522_v63  ;;  %v17053_v10 = vld [vmem:[#allocation139_spill] sm:$0xff] }
 0x48e   : > { %v9629_v29 = vpack.i.bf16 %v3768_v38, %v17051_v26  ;;  %v8305_v54 = vcombine.low %v14152_v18, %v14194_v49  ;;  %v14210_v5 = vrot.slane %v8426_v4, %v10513_v51  ;;  %v14213_v38 = vrot.slane %v5186_v25, %v10522_v63  ;;  %v14226_v4 = vpop.permute.xlu0 %9330  ;;  %v17058_v25 = vld [vmem:[#allocation235_spill] sm:$0xff]  ;;  %v17072_v49 = vld [vmem:[#allocation162_spill] sm:$0xff] }
 0x48f   : > { %9570 = vrot.lane.b32.xlu0 %v9569_v53, %s10087_s11  ;;  %v8257_v26 = vcombine.low %v13899_v47, %v13934_v33  ;;  %v17052_v17 = vcombine.high %v17033_v2, %v17034_v31  ;;  %v7720_v37 = vcombine.high %v17054_v11, %v17053_v10  ;;  %17056 = vst [vmem:[#allocation85_spill] sm:$0xff] %v14226_v4  ;;  %v17063_v11 = vld [vmem:[#allocation144_spill] sm:$0xff]  ;;  %v17066_v4 = vld [vmem:[#allocation201_spill] sm:$0xff] }
 0x490   : > { %9630 = vrot.lane.b32.xlu1 %v9629_v29, %s10087_s11  ;;  %v14224_v53 = vrot.slane %v8305_v54, %v10513_v51  ;;  %v5085_v8 = vcombine.low %v17058_v25, %v17057_v45  ;;  %v3772_v13 = vcombine.high %v14204_v41, %v14181_v3  ;;  %v17060_v29 = vld [vmem:[#allocation247_spill] sm:$0xff]  ;;  %v14235_v31 = vrot.slane %v8289_v58, %v10513_v51  ;;  %v17064_v54 = vld [vmem:[#allocation142_spill] sm:$0xff]  ;;  %v17069_v47 = vld [vmem:[#allocation32_spill] sm:$0xff] }
 0x491   : > { %v9574_v23 = vpack.i.bf16 %v5946_v44, %v17052_v17  ;;  %v7496_v60 = vcombine.high %v17060_v29, %v17059_v12  ;;  %v14238_v2 = vrot.slane %v8273_v0, %v10513_v51  ;;  %v14240_v44 = vpop.permute.xlu1 %9300  ;;  %v17065_v17 = vcombine.high %v17063_v11, %v17064_v54  ;;  %v17067_v12 = vld [vmem:[#allocation10_spill] sm:$0xff]  ;;  %v17068_v58 = vld [vmem:[#allocation131_spill] sm:$0xff]  ;;  %v17070_v0 = vld [vmem:[#allocation124_spill] sm:$0xff] }
 0x492   : > { %17055 = vst [vmem:[#allocation87_spill] sm:$0xff] %v14224_v53  ;;  %17061 = vst [vmem:[#allocation89_spill] sm:$0xff] %v14235_v31  ;;  %v14246_v45 = vrot.slane %v5201_v30, %v10522_v63  ;;  %v14249_v25 = vrot.slane %v5202_v57, %v10522_v63  ;;  %v8122_v29 = vcombine.high %v17067_v12, %v17066_v4  ;;  %v17075_v4 = vld [vmem:[#allocation231_spill] sm:$0xff] }
 0x493   : > { %17062 = vst [vmem:[#allocation257_spill] sm:$0xff] %v14240_v44  ;;  %v9639_v10 = vpack.i.bf16 %v3770_v22, %v17065_v17  ;;  %v7704_v33 = vcombine.high %v17069_v47, %v17068_v58  ;;  %9575 = vrot.lane.b32.xlu0 %v9574_v23, %s10083_s27  ;;  %v17071_v44 = vld [vmem:[#allocation138_spill] sm:$0xff]  ;;  %v7464_v22 = vcombine.high %v17073_v59, %v17072_v49  ;;  %v17076_v17 = vld [vmem:[#allocation105_spill] sm:$0xff]  ;;  %v14269_v23 = vpop.permute.xlu0 %9340  ;;  %v17078_v58 = vld [vmem:[#allocation132_spill] sm:$0xff] }
 0x494   : > { %v7688_v18 = vcombine.high %v17071_v44, %v17070_v0  ;;  %v14261_v30 = vrot.slane %v8257_v26, %v10513_v51  ;;  %v8353_v57 = vcombine.low %v14235_v31, %v14224_v53  ;;  %v7672_v12 = vcombine.high %v17076_v17, %v17075_v4  ;;  %17077 = vst [vmem:[#allocation46_spill] sm:$0xff] %v14269_v23  ;;  %v17079_v44 = vld [vmem:[#allocation130_spill] sm:$0xff] }
 0x495   : > { %9640 = vrot.lane.b32.xlu1 %v9639_v10, %s10085_s29  ;;  %v7734_v47 = vrot.slane %v7720_v37, %v10513_v51  ;;  %v17080_v0 = vcombine.low %v17078_v58, %v17079_v44  ;;  %v2909_v59 = vcombine.low %v13963_v24, %v13945_v56  ;;  %v7510_v49 = vrot.slane %v7496_v60, %v10522_v63  ;;  %v14279_v10 = vpop.permute.xlu1 %9310  ;;  %v17082_v31 = vld [vmem:[#allocation146_spill] sm:$0xff]  ;;  %v17087_v56 = vld [vmem:[#allocation200_spill] sm:$0xff] }
 0x496   : > { %17074 = vst [vmem:[#allocation28_spill] sm:$0xff] %v14261_v30  ;;  %v8321_v26 = vcombine.low %v14261_v30, %v14238_v2  ;;  %17081 = vst [vmem:[#allocation74_spill] sm:$0xff] %v14279_v10  ;;  %v17083_v4 = vld [vmem:[#allocation134_spill] sm:$0xff]  ;;  %v7528_v23 = vcombine.high %v13658_v36, %v13639_v1  ;;  %v7718_v44 = vrot.slane %v7704_v33, %v10513_v51  ;;  %v17088_v24 = vld [vmem:[#allocation204_spill] sm:$0xff] }
 0x497   : > { %v9579_v42 = vpack.i.bf16 %v5085_v8, %v17080_v0  ;;  %v17084_v17 = vcombine.high %v17082_v31, %v17083_v4  ;;  %v17085_v53 = vld [vmem:[#allocation202_spill] sm:$0xff]  ;;  %v7702_v10 = vrot.slane %v7688_v18, %v10513_v51  ;;  %v17089_v0 = vcombine.low %v16995_v52, %v16996_v50  ;;  %v17091_v33 = vld [vmem:[#allocation175_spill] sm:$0xff] }
 0x498   : > { %v17086_v58 = vld [vmem:[#allocation198_spill] sm:$0xff]  ;;  %v2911_v18 = vcombine.low %v14003_v19, %v13979_v34  ;;  %v17092_v1 = vcombine.high %v16881_v15, %v17091_v33  ;;  %v14319_v30 = vrot.slane %v8122_v29, %v10513_v51  ;;  %v2913_v50 = vcombine.low %v14026_v32, %v14008_v14  ;;  %v17095_v14 = vld [vmem:[#allocation155_spill] sm:$0xff]  ;;  %v17096_v32 = vld [vmem:[#allocation153_spill] sm:$0xff] }
 0x499   : > { %v9649_v37 = vpack.i.bf16 %v3772_v13, %v17084_v17  ;;  %v8410_v8 = vcombine.high %v17086_v58, %v17085_v53  ;;  %9580 = vrot.lane.b32.xlu0 %v9579_v42, %s10086_s30  ;;  %v7478_v13 = vrot.slane %v7464_v22, %v10522_v63  ;;  %v14297_v17 = vrot.slane %v8353_v57, %v10522_v63  ;;  %v14303_v58 = vpop.permute.xlu0 %9355  ;;  %v17100_v29 = vld [vmem:[#allocation48_spill] sm:$0xff] }
 0x49a   : > { %v7686_v42 = vrot.slane %v7672_v12, %v10513_v51  ;;  %v7783_v53 = vcombine.low %v7718_v44, %v7734_v47  ;;  %v9589_v60 = vpack.i.bf16 %v2909_v59, %v17089_v0  ;;  %v7784_v22 = vcombine.high %v7718_v44, %v7734_v47  ;;  %v17093_v59 = vld [vmem:[#allocation137_spill] sm:$0xff]  ;;  %v17102_v34 = vld [vmem:[#allocation36_spill] sm:$0xff] }
 0x49b   : > { %9650 = vrot.lane.b32.xlu1 %v9649_v37, %s10083_s27  ;;  %v14311_v57 = vrot.slane %v8321_v26, %v10522_v63  ;;  %v14313_v37 = vpop.permute.xlu1 %9320  ;;  %v9659_v12 = vpack.i.bf16 %v7528_v23, %v17092_v1  ;;  %v7529_v36 = vcombine.low %v7478_v13, %v7510_v49  ;;  %v17094_v26 = vld [vmem:[#allocation145_spill] sm:$0xff]  ;;  %v14334_v23 = vrot.slane %v8410_v8, %v10513_v51 }
 0x49c   : > { %17090 = vst [vmem:[#allocation197_spill] sm:$0xff] %v14313_v37  ;;  %v7751_v52 = vcombine.low %v7686_v42, %v7702_v10  ;;  %v7752_v47 = vcombine.high %v7686_v42, %v7702_v10  ;;  %v7768_v1 = vcombine.high %v17094_v26, %v17093_v59  ;;  %v7736_v44 = vcombine.high %v17096_v32, %v17095_v14  ;;  %v17099_v8 = vld [vmem:[#allocation29_spill] sm:$0xff]  ;;  %v17103_v37 = vld [vmem:[#allocation135_spill] sm:$0xff] }
 0x49d   : > { %9590 = vrot.lane.b32.xlu0 %v9589_v60, %s10088_s12  ;;  %v14338_v60 = vpop.permute.xlu0 %9365  ;;  %v17097_v0 = vcombine.low %v17010_v48, %v17011_v16  ;;  %v7798_v59 = vrot.slane %v7784_v22, %v10522_v63  ;;  %v17101_v19 = vcombine.low %v17099_v8, %v17100_v29  ;;  %v7530_v32 = vcombine.high %v7478_v13, %v7510_v49  ;;  %v17105_v13 = vld [vmem:[#allocation157_spill] sm:$0xff] }
 0x49e   : > { %v7400_v33 = vcombine.high %v17103_v37, %v17102_v34  ;;  %v17104_v48 = vcombine.low %v17023_v28, %v17024_v35  ;;  %v14365_v22 = vrot.slane %v7751_v52, %v10522_v63  ;;  %v7782_v49 = vrot.slane %v7768_v1, %v10522_v63  ;;  %v17106_v37 = vld [vmem:[#allocation158_spill] sm:$0xff]  ;;  %v17107_v35 = vld [vmem:[#allocation152_spill] sm:$0xff] }
 0x49f   : > { %9660 = vrot.lane.b32.xlu1 %v9659_v12, %s10089_s15  ;;  %v9599_v10 = vpack.i.bf16 %v2911_v18, %v17097_v0  ;;  %v14346_v12 = vrot.slane %v7783_v53, %v10522_v63  ;;  %v14349_v26 = vpop.permute.xlu1 %9335  ;;  %v9669_v14 = vpack.i.bf16 %v7529_v36, %v17101_v19  ;;  %v3767_v53 = vcombine.low %v14129_v40, %v14108_v39 }
 0x4a0   : > { %17098 = vst [vmem:[#allocation78_spill] sm:$0xff] %v14349_v26  ;;  %v9609_v16 = vpack.i.bf16 %v2913_v50, %v17104_v48  ;;  %v3769_v18 = vcombine.low %v14164_v46, %v14137_v20  ;;  %v7766_v36 = vrot.slane %v7752_v47, %v10522_v63  ;;  %v7416_v34 = vcombine.high %v17106_v37, %v17105_v13  ;;  %v17108_v50 = vld [vmem:[#allocation149_spill] sm:$0xff] }
 0x4a1   : > { %9600 = vrot.lane.b32.xlu0 %v9599_v10, %s10086_s30  ;;  %v7750_v28 = vrot.slane %v7736_v44, %v10522_v63  ;;  %v7432_v40 = vcombine.high %v17108_v50, %v17107_v35  ;;  %v6084_v39 = vcombine.high %v13402_v62, %v13451_v21  ;;  %v14377_v20 = vpop.permute.xlu0 %9375  ;;  %v3771_v46 = vcombine.low %v14204_v41, %v14181_v3  ;;  %v17111_v10 = vld [vmem:[#allocation212_spill] sm:$0xff]  ;;  %v17113_v21 = vld [vmem:[#allocation38_spill] sm:$0xff]  ;;  %v17114_v62 = vld [vmem:[#allocation239_spill] sm:$0xff] }
 0x4a2   : > { %v17110_v52 = vcombine.high %v17099_v8, %v17100_v29  ;;  %v7804_v1 = vcombine.high %v14365_v22, %v14346_v12  ;;  %v7805_v44 = vcombine.low %v7766_v36, %v7798_v59  ;;  %v7806_v0 = vcombine.high %v7766_v36, %v7798_v59  ;;  %v17115_v3 = vld [vmem:[#allocation234_spill] sm:$0xff]  ;;  %v17116_v41 = vld [vmem:[#allocation31_spill] sm:$0xff] }
 0x4a3   : > { %9670 = vrot.lane.b32.xlu1 %v9669_v14, %s10088_s12  ;;  %v14381_v19 = vpop.permute.xlu1 %9345  ;;  %v17112_v14 = vld [vmem:[#allocation20_spill] sm:$0xff]  ;;  %v7448_v13 = vcombine.high %v17114_v62, %v17113_v21  ;;  %v7800_v37 = vcombine.high %v17116_v41, %v17115_v3  ;;  %v14396_v29 = vrot.slane %v7400_v33, %v10513_v51  ;;  %v14399_v8 = vrot.slane %v7416_v34, %v10513_v51 }
 0x4a4   : > { %17109 = vst [vmem:[#allocation70_spill] sm:$0xff] %v14381_v19  ;;  %v9679_v47 = vpack.i.bf16 %v7530_v32, %v17110_v52  ;;  %v17117_v59 = vcombine.low %v17049_v7, %v17050_v61  ;;  %v7801_v36 = vcombine.low %v7750_v28, %v7782_v49  ;;  %v14406_v35 = vrot.slane %v7432_v40, %v10513_v51  ;;  %v17120_v7 = vld [vmem:[#allocation254_spill] sm:$0xff]  ;;  %v17121_v61 = vld [vmem:[#allocation41_spill] sm:$0xff]  ;;  %v17123_v40 = vld [vmem:[#allocation151_spill] sm:$0xff] }
 0x4a5   : > { %9610 = vrot.lane.b32.xlu0 %v9609_v16, %s10084_s28  ;;  %v14409_v16 = vrot.slane %v6084_v39, %v10513_v51  ;;  %v14411_v50 = vpop.permute.xlu0 %9390  ;;  %v17118_v33 = vcombine.low %v17063_v11, %v17064_v54  ;;  %v17119_v52 = vcombine.low %v17082_v31, %v17083_v4  ;;  %v7802_v26 = vcombine.high %v7750_v28, %v7782_v49  ;;  %v17127_v4 = vld [vmem:[#allocation164_spill] sm:$0xff] }
 0x4a6   : > { %v9624_v32 = vpack.i.bf16 %v3767_v53, %v17117_v59  ;;  %v17122_v53 = vcombine.high %v17120_v7, %v17121_v61  ;;  %v17124_v59 = vld [vmem:[#allocation242_spill] sm:$0xff]  ;;  %v14429_v11 = vrot.slane %v7448_v13, %v10513_v51  ;;  %v6132_v49 = vcombine.high %v13660_v43, %v13700_v6  ;;  %v17130_v28 = vld [vmem:[#allocation148_spill] sm:$0xff] }
 0x4a7   : > { %9680 = vrot.lane.b32.xlu1 %v9679_v47, %s10087_s11  ;;  %v9634_v34 = vpack.i.bf16 %v3769_v18, %v17118_v33  ;;  %v9644_v47 = vpack.i.bf16 %v3771_v46, %v17119_v52  ;;  %v9351_v21 = vpop.permute.xlu1 %9350  ;;  %v17125_v42 = vcombine.low %v17123_v40, %v17124_v59  ;;  %v17126_v48 = vcombine.high %v17123_v40, %v17124_v59  ;;  %v17128_v18 = vld [vmem:[#allocation161_spill] sm:$0xff]  ;;  %v17134_v33 = vld [vmem:[#allocation223_spill] sm:$0xff]  ;;  %v17135_v52 = vld [vmem:[#allocation22_spill] sm:$0xff] }
 0x4a8   : > { %v9694_v62 = vpack.i.bf16 %v7804_v1, %v17122_v53  ;;  %v9353_v31 = vunpack.i.h.bf16 %v9351_v21  ;;  %v9352_v54 = vunpack.i.l.bf16 %v9351_v21  ;;  %v17129_v46 = vcombine.high %v17127_v4, %v17128_v18  ;;  %v17136_v21 = vld [vmem:[#allocation159_spill] sm:$0xff]  ;;  %v17137_v40 = vld [vmem:[#allocation53_spill] sm:$0xff]  ;;  %v17138_v59 = vld [vmem:[#allocation56_spill] sm:$0xff] }
 0x4a9   : > { %v9704_v39 = vpack.i.bf16 %v7805_v44, %v17125_v42  ;;  %v9714_v19 = vpack.i.bf16 %v7806_v0, %v17126_v48  ;;  %9625 = vrot.lane.b32.xlu0 %v9624_v32, %s10088_s12  ;;  %v7479_v42 = vcombine.low %v14396_v29, %v14399_v8  ;;  %v17131_v0 = vld [vmem:[#allocation156_spill] sm:$0xff]  ;;  %v17133_v32 = vld [vmem:[#allocation37_spill] sm:$0xff]  ;;  %v6100_v53 = vcombine.high %v17136_v21, %v17135_v52  ;;  %v17140_v43 = vld [vmem:[#allocation34_spill] sm:$0xff]  ;;  %v14459_v3 = vpop.permute.xlu0 %9400 }
 0x4aa   : > { %v9654_v1 = vpack.i.bf16 %v7800_v37, %v17129_v46  ;;  %v17132_v48 = vcombine.low %v17130_v28, %v17131_v0  ;;  %v6116_v37 = vcombine.high %v17134_v33, %v17133_v32  ;;  %v17139_v46 = vcombine.low %v17137_v40, %v17138_v59  ;;  %v17141_v6 = vld [vmem:[#allocation52_spill] sm:$0xff] }
 0x4ab   : > { %9695 = vrot.lane.b32.xlu1 %v9694_v62, %s10085_s29  ;;  %v17142_v62 = vcombine.low %v17140_v43, %v17141_v6  ;;  %v9358_v32 = vunpack.i.h.bf16 %v14303_v58  ;;  %v9357_v33 = vunpack.i.l.bf16 %v14303_v58  ;;  %v9361_v52 = vpop.permute.xlu1 %9360  ;;  %v17145_v21 = vcombine.high %v17130_v28, %v17131_v0  ;;  %v17146_v43 = vld [vmem:[#allocation71_spill] sm:$0xff]  ;;  %v17147_v6 = vld [vmem:[#allocation170_spill] sm:$0xff] }
 0x4ac   : > { %v14445_v13 = vpack.i.bf16 %v7801_v36, %v17132_v48  ;;  %v2184_v44 = vsel %vm2163_vm7, %v17139_v46, %v9353_v31  ;;  %v17143_v36 = vld [vmem:[#allocation167_spill] sm:$0xff]  ;;  %v7511_v31 = vcombine.low %v14406_v35, %v14429_v11  ;;  %v9363_v59 = vunpack.i.h.bf16 %v9361_v52 }
 0x4ad   : > { %v2183_v15 = vsel %vm2163_vm7, %v17142_v62, %v9352_v54  ;;  %v17144_v48 = vld [vmem:[#allocation199_spill] sm:$0xff]  ;;  %v14468_v40 = vpack.i.bf16 %v7802_v26, %v17145_v21  ;;  %v9362_v54 = vunpack.i.l.bf16 %v9361_v52  ;;  %9635 = vrot.lane.b32.xlu0 %v9634_v34, %s10086_s30  ;;  %v7803_v46 = vcombine.low %v14365_v22, %v14346_v12 }
 0x4ae   : > { %v6180_v41 = vcombine.high %v17144_v48, %v17143_v36  ;;  %v6148_v62 = vcombine.high %v17147_v6, %v17146_v43  ;;  %v14478_v58 = vrot.slane %v6132_v49, %v10513_v51  ;;  %v2185_v28 = vsel %vm603_vm0, %v2183_v15, %v9357_v33  ;;  %v14491_v36 = vpop.permute.xlu0 %9410 }
 0x4af   : > { %v2186_v26 = vsel %vm603_vm0, %v2184_v44, %v9358_v32  ;;  %9705 = vrot.lane.b32.xlu1 %v9704_v39, %s10084_s28  ;;  %v14484_v0 = vrot.slane %v6116_v37, %v10513_v51  ;;  %v14487_v34 = vrot.slane %v6100_v53, %v10513_v51  ;;  %v2187_v12 = vsel %vm2168_vm8, %v2185_v28, %v9362_v54  ;;  %v9371_v48 = vpop.permute.xlu1 %9370  ;;  %v17148_v39 = vld [vmem:[#allocation39_spill] sm:$0xff]  ;;  %v17149_v32 = vld [vmem:[#allocation69_spill] sm:$0xff] }
 0x4b0   : > { %v2188_v22 = vsel %vm2168_vm8, %v2186_v26, %v9363_v59  ;;  %v6194_v49 = vrot.slane %v6180_v41, %v10522_v63  ;;  %v9368_v15 = vunpack.i.h.bf16 %v14338_v60  ;;  %v9367_v44 = vunpack.i.l.bf16 %v14338_v60 }
 0x4b1   : > { %v6212_v37 = vcombine.high %v17149_v32, %v17148_v39  ;;  %v14499_v33 = vrot.slane %v7479_v42, %v10522_v63  ;;  %v14502_v53 = vrot.slane %v7511_v31, %v10522_v63  ;;  %v9373_v52 = vunpack.i.h.bf16 %v9371_v48  ;;  %9645 = vrot.lane.b32.xlu0 %v9644_v47, %s10084_s28 }
 0x4b2   : > { %v9372_v21 = vunpack.i.l.bf16 %v9371_v48  ;;  %v6162_v41 = vrot.slane %v6148_v62, %v10522_v63  ;;  %v6195_v59 = vcombine.low %v14484_v0, %v14478_v58  ;;  %v2189_v60 = vsel %vm2171_vm9, %v2187_v12, %v9367_v44  ;;  %v9421_v6 = vpop.permute.xlu0 %9420  ;;  %v17150_v12 = vld [vmem:[#allocation192_spill] sm:$0xff] }
 0x4b3   : > { %v2190_v54 = vsel %vm2171_vm9, %v2188_v22, %v9368_v15  ;;  %9715 = vrot.lane.b32.xlu1 %v9714_v19, %s10083_s27  ;;  %v7512_v42 = vcombine.high %v14406_v35, %v14429_v11  ;;  %v6163_v31 = vcombine.low %v14409_v16, %v14487_v34  ;;  %v9378_v62 = vunpack.i.h.bf16 %v14377_v20  ;;  %v9381_v26 = vpop.permute.xlu1 %9380  ;;  %v17151_v22 = vld [vmem:[#allocation189_spill] sm:$0xff] }
 0x4b4   : > { %v2191_v43 = vsel %vm2174_vm10, %v2189_v60, %v9372_v21  ;;  %v2192_v47 = vsel %vm2174_vm10, %v2190_v54, %v9373_v52  ;;  %v9377_v28 = vunpack.i.l.bf16 %v14377_v20  ;;  %v17152_v15 = vcombine.high %v17150_v12, %v17151_v22  ;;  %v17168_v22 = vld [vmem:[#allocation51_spill] sm:$0xff] }
 0x4b5   : > { %v6213_v44 = vcombine.low %v6162_v41, %v6194_v49  ;;  %v9383_v48 = vunpack.i.h.bf16 %v9381_v26  ;;  %v9382_v35 = vunpack.i.l.bf16 %v9381_v26  ;;  %9655 = vrot.lane.b32.xlu0 %v9654_v1, %s10089_s15  ;;  %v7531_v11 = vcombine.low %v14499_v33, %v14502_v53 }
 0x4b6   : > { %v9729_v19 = vpack.i.bf16 %v6212_v37, %v17152_v15  ;;  %v14526_v52 = vrot.slane %v6195_v59, %v10522_v63  ;;  %v2193_v20 = vsel %vm2177_vm11, %v2191_v43, %v9377_v28  ;;  %v2194_v21 = vsel %vm2177_vm11, %v2192_v47, %v9378_v62  ;;  %v9431_v60 = vpop.permute.xlu0 %9430  ;;  %v17155_v43 = vld [vmem:[#allocation49_spill] sm:$0xff] }
 0x4b7   : > { %v14532_v37 = vrot.slane %v6163_v31, %v10522_v63  ;;  %v6214_v54 = vcombine.high %v6162_v41, %v6194_v49  ;;  %v14535_v1 = vsel %vm2180_vm12, %v2193_v20, %v9382_v35  ;;  %v14538_v26 = vsel %vm2180_vm12, %v2194_v21, %v9383_v48  ;;  %v17156_v28 = vld [vmem:[#allocation249_spill] sm:$0xff]  ;;  %v17164_v31 = vld [vmem:[#allocation55_spill] sm:$0xff] }
 0x4b8   : > { %9730 = vrot.lane.b32.xlu1 %v9729_v19, %s10089_s15  ;;  %17153 = vst [vmem:[#allocation100_spill] sm:$0xff] %v14535_v1  ;;  %17154 = vst [vmem:[#allocation110_spill] sm:$0xff] %v14538_v26  ;;  %v9393_v59 = vunpack.i.h.bf16 %v14411_v50  ;;  %v9392_v15 = vunpack.i.l.bf16 %v14411_v50  ;;  %v14542_v19 = vpop.permute.xlu1 %9385  ;;  %v17157_v47 = vcombine.low %v17155_v43, %v17156_v28  ;;  %v17158_v49 = vcombine.high %v14396_v29, %v14399_v8  ;;  %v17165_v1 = vld [vmem:[#allocation54_spill] sm:$0xff] }
 0x4b9   : > { %v9403_v48 = vunpack.i.h.bf16 %v14459_v3  ;;  %v9402_v35 = vunpack.i.l.bf16 %v14459_v3  ;;  %9665 = vrot.lane.b32.xlu0 %v14445_v13, %s10088_s12  ;;  %v17159_v50 = vcombine.low %v17120_v7, %v17121_v61  ;;  %v14563_v20 = vrot.slane %v7512_v42, %v10522_v63  ;;  %v17161_v61 = vld [vmem:[#allocation163_spill] sm:$0xff] }
 0x4ba   : > { %v9734_v62 = vpack.i.bf16 %v6213_v44, %v17157_v47  ;;  %v14553_v41 = vrot.slane %v17158_v49, %v10522_v63  ;;  %v9413_v21 = vunpack.i.h.bf16 %v14491_v36  ;;  %v9412_v29 = vunpack.i.l.bf16 %v14491_v36  ;;  %v9441_v49 = vpop.permute.xlu0 %9440 }
 0x4bb   : > { %v9684_v44 = vpack.i.bf16 %v7803_v46, %v17159_v50  ;;  %v6215_v8 = vcombine.low %v14532_v37, %v14526_v52  ;;  %v9423_v3 = vunpack.i.h.bf16 %v9421_v6  ;;  %v9422_v47 = vunpack.i.l.bf16 %v9421_v6  ;;  %v17162_v46 = vld [vmem:[#allocation169_spill] sm:$0xff] }
 0x4bc   : > { %9735 = vrot.lane.b32.xlu1 %v9734_v62, %s10088_s12  ;;  %v17160_v13 = vcombine.high %v17155_v43, %v17156_v28  ;;  %v17163_v42 = vcombine.low %v17161_v61, %v17162_v46  ;;  %v17166_v26 = vcombine.low %v17164_v31, %v17165_v1  ;;  %v17167_v62 = vld [vmem:[#allocation40_spill] sm:$0xff]  ;;  %v9433_v6 = vunpack.i.h.bf16 %v9431_v60  ;;  %v14584_v18 = vpop.permute.xlu1 %9395  ;;  %v17174_v31 = vld [vmem:[#allocation211_spill] sm:$0xff] }
 0x4bd   : > { %v17169_v12 = vcombine.low %v17167_v62, %v17168_v22  ;;  %v9432_v32 = vunpack.i.l.bf16 %v9431_v60  ;;  %v9443_v28 = vunpack.i.h.bf16 %v9441_v49  ;;  %9675 = vrot.lane.b32.xlu0 %v14468_v40, %s10087_s11  ;;  %v6196_v1 = vcombine.high %v14484_v0, %v14478_v58  ;;  %v17170_v60 = vld [vmem:[#allocation207_spill] sm:$0xff] }
 0x4be   : > { %v9739_v7 = vpack.i.bf16 %v6214_v54, %v17160_v13  ;;  %v9689_v50 = vpack.i.bf16 %v7531_v11, %v17163_v42  ;;  %v7062_v36 = vsel %vm2163_vm7, %v17166_v26, %v9393_v59  ;;  %v9442_v11 = vunpack.i.l.bf16 %v9441_v49  ;;  %v17171_v26 = vld [vmem:[#allocation66_spill] sm:$0xff]  ;;  %v9451_v49 = vpop.permute.xlu0 %9450  ;;  %v17175_v13 = vld [vmem:[#allocation72_spill] sm:$0xff]  ;;  %v17176_v58 = vld [vmem:[#allocation183_spill] sm:$0xff] }
 0x4bf   : > { %v7061_v39 = vsel %vm2163_vm7, %v17169_v12, %v9392_v15  ;;  %v7064_v43 = vsel %vm603_vm0, %v7062_v36, %v9403_v48  ;;  %v17172_v59 = vcombine.low %v17170_v60, %v17171_v26  ;;  %v17173_v15 = vld [vmem:[#allocation177_spill] sm:$0xff]  ;;  %v5354_v0 = vcombine.high %v17176_v58, %v17175_v13 }
 0x4c0   : > { %v7063_v54 = vsel %vm603_vm0, %v7061_v39, %v9402_v35  ;;  %v7066_v12 = vsel %vm2168_vm8, %v7064_v43, %v9413_v21  ;;  %9740 = vrot.lane.b32.xlu1 %v9739_v7, %s10087_s11  ;;  %v5322_v48 = vcombine.high %v17174_v31, %v17173_v15  ;;  %v9453_v7 = vunpack.i.h.bf16 %v9451_v49  ;;  %v14606_v36 = vpop.permute.xlu1 %9405  ;;  %v17212_v13 = vld [vmem:[#allocation57_spill] sm:$0xff] }
 0x4c1   : > { %v7065_v22 = vsel %vm2168_vm8, %v7063_v54, %v9412_v29  ;;  %v9744_v39 = vpack.i.bf16 %v6215_v8, %v17172_v59  ;;  %v7068_v40 = vsel %vm2171_vm9, %v7066_v12, %v9423_v3  ;;  %v9452_v42 = vunpack.i.l.bf16 %v9451_v49  ;;  %9685 = vrot.lane.b32.xlu0 %v9684_v44, %s10086_s30  ;;  %v17178_v54 = vld [vmem:[#allocation173_spill] sm:$0xff] }
 0x4c2   : > { %v7067_v35 = vsel %vm2171_vm9, %v7065_v22, %v9422_v47  ;;  %v7070_v21 = vsel %vm2174_vm10, %v7068_v40, %v9433_v6  ;;  %v6164_v8 = vcombine.high %v14409_v16, %v14487_v34  ;;  %v7532_v3 = vcombine.high %v14499_v33, %v14502_v53  ;;  %v17177_v6 = vld [vmem:[#allocation219_spill] sm:$0xff]  ;;  %v17183_v44 = vld [vmem:[#allocation73_spill] sm:$0xff]  ;;  %v9461_v12 = vpop.permute.xlu0 %9460 }
 0x4c3   : > { %v7069_v29 = vsel %vm2174_vm10, %v7067_v35, %v9432_v32  ;;  %v7072_v62 = vsel %vm2177_vm11, %v7070_v21, %v9443_v28  ;;  %v14616_v32 = vrot.slane %v6196_v1, %v10522_v63  ;;  %v5290_v43 = vcombine.high %v17178_v54, %v17177_v6  ;;  %v17181_v34 = vld [vmem:[#allocation251_spill] sm:$0xff]  ;;  %v17187_v21 = vld [vmem:[#allocation248_spill] sm:$0xff] }
 0x4c4   : > { %v7071_v47 = vsel %vm2177_vm11, %v7069_v29, %v9442_v11  ;;  %9745 = vrot.lane.b32.xlu1 %v9744_v39, %s10086_s30  ;;  %v14625_v16 = vsel %vm2180_vm12, %v7072_v62, %v9453_v7  ;;  %v17182_v33 = vld [vmem:[#allocation47_spill] sm:$0xff]  ;;  %v6216_v1 = vcombine.high %v14532_v37, %v14526_v52  ;;  %v14636_v39 = vrot.slane %v5322_v48, %v10522_v63  ;;  %v9416_v35 = vpop.permute.xlu1 %9415  ;;  %v17186_v29 = vld [vmem:[#allocation250_spill] sm:$0xff]  ;;  %v17191_v54 = vld [vmem:[#allocation252_spill] sm:$0xff] }
 0x4c5   : > { %v14622_v22 = vsel %vm2180_vm12, %v7071_v47, %v9452_v42  ;;  %17180 = vst [vmem:[#allocation230_spill] sm:$0xff] %v14625_v16  ;;  %v5242_v53 = vcombine.high %v17182_v33, %v17181_v34  ;;  %v17184_v11 = vld [vmem:[#allocation255_spill] sm:$0xff]  ;;  %v9463_v15 = vunpack.i.h.bf16 %v9461_v12  ;;  %v9462_v31 = vunpack.i.l.bf16 %v9461_v12  ;;  %v17189_v47 = vld [vmem:[#allocation42_spill] sm:$0xff]  ;;  %9690 = vrot.lane.b32.xlu0 %v9689_v50, %s10086_s30  ;;  %v17194_v50 = vld [vmem:[#allocation77_spill] sm:$0xff] }
 0x4c6   : > { %17179 = vst [vmem:[#allocation229_spill] sm:$0xff] %v14622_v22  ;;  %v5274_v28 = vcombine.high %v17184_v11, %v17183_v44  ;;  %v17185_v40 = vcombine.high %v17088_v24, %v17087_v56  ;;  %v5226_v7 = vcombine.high %v17187_v21, %v17186_v29  ;;  %v17188_v42 = vld [vmem:[#allocation19_spill] sm:$0xff]  ;;  %v7533_v52 = vcombine.low %v14553_v41, %v14563_v20  ;;  %v17198_v21 = vld [vmem:[#allocation210_spill] sm:$0xff] }
 0x4c7   : > { %v5258_v62 = vcombine.high %v17189_v47, %v17188_v42  ;;  %v7534_v37 = vcombine.high %v14553_v41, %v14563_v20  ;;  %v14651_v48 = vrot.slane %v6164_v8, %v10522_v63  ;;  %v14654_v6 = vrot.slane %v5290_v43, %v10522_v63  ;;  %v17193_v44 = vld [vmem:[#allocation79_spill] sm:$0xff]  ;;  %v17196_v41 = vld [vmem:[#allocation182_spill] sm:$0xff] }
 0x4c8   : > { %v9749_v49 = vpack.i.bf16 %v5354_v0, %v17185_v40  ;;  %v17190_v0 = vld [vmem:[#allocation253_spill] sm:$0xff]  ;;  %v17195_v11 = vcombine.low %v17193_v44, %v17194_v50  ;;  %v14672_v8 = vrot.slane %v5242_v53, %v10513_v51  ;;  %v5288_v43 = vrot.slane %v5274_v28, %v10513_v51  ;;  %v14675_v40 = vpop.permute.xlu0 %9470  ;;  %v17199_v42 = vld [vmem:[#allocation206_spill] sm:$0xff]  ;;  %v9426_v47 = vpop.permute.xlu1 %9425  ;;  %v17206_v20 = vld [vmem:[#allocation171_spill] sm:$0xff] }
 0x4c9   : > { %v17192_v34 = vcombine.low %v17190_v0, %v17191_v54  ;;  %v5355_v53 = vcombine.low %v14654_v6, %v14636_v39  ;;  %v6217_v28 = vcombine.low %v14651_v48, %v14616_v32  ;;  %v14690_v54 = vrot.slane %v5226_v7, %v10513_v51 }
 0x4ca   : > { %v14666_v12 = vsel %vm2163_vm7, %v17195_v11, %v9462_v31  ;;  %9750 = vrot.lane.b32.xlu1 %v9749_v49, %s10089_s15  ;;  %v17200_v49 = vcombine.high %v17170_v60, %v17171_v26  ;;  %v9398_v60 = vunpack.i.h.bf16 %v14584_v18  ;;  %v9397_v26 = vunpack.i.l.bf16 %v14584_v18  ;;  %v17210_v31 = vld [vmem:[#allocation61_spill] sm:$0xff] }
 0x4cb   : > { %v14660_v33 = vsel %vm2163_vm7, %v17192_v34, %v9463_v15  ;;  %v17197_v15 = vcombine.high %v17161_v61, %v17162_v46  ;;  %v5272_v61 = vrot.slane %v5258_v62, %v10513_v51  ;;  %v9388_v46 = vunpack.i.h.bf16 %v14542_v19  ;;  %v17202_v34 = vld [vmem:[#allocation168_spill] sm:$0xff] }
 0x4cc   : > { %v9754_v0 = vpack.i.bf16 %v6216_v1, %v17200_v49  ;;  %v17201_v1 = vld [vmem:[#allocation160_spill] sm:$0xff]  ;;  %v5306_v11 = vcombine.high %v14690_v54, %v14672_v8  ;;  %v14709_v49 = vpop.permute.xlu0 %9480  ;;  %v9418_v18 = vunpack.i.h.bf16 %v9416_v35  ;;  %v9436_v59 = vpop.permute.xlu1 %9435  ;;  %v9427_v16 = vunpack.i.l.bf16 %v9426_v47 }
 0x4cd   : > { %v9699_v29 = vpack.i.bf16 %v7532_v3, %v17197_v15  ;;  %v9387_v3 = vunpack.i.l.bf16 %v14542_v19  ;;  %v17203_v44 = vcombine.low %v17201_v1, %v17202_v34  ;;  %v17204_v7 = vcombine.high %v17201_v1, %v17202_v34  ;;  %v17207_v1 = vld [vmem:[#allocation213_spill] sm:$0xff] }
 0x4ce   : > { %9755 = vrot.lane.b32.xlu1 %v9754_v0, %s10085_s29  ;;  %v5338_v19 = vcombine.high %v5272_v61, %v5288_v43  ;;  %v9408_v15 = vunpack.i.h.bf16 %v14606_v36  ;;  %v9417_v0 = vunpack.i.l.bf16 %v9416_v35  ;;  %v9428_v35 = vunpack.i.h.bf16 %v9426_v47 }
 0x4cf   : > { %9700 = vrot.lane.b32.xlu0 %v9699_v29, %s10085_s29  ;;  %v9709_v50 = vpack.i.bf16 %v7533_v52, %v17203_v44  ;;  %v9719_v62 = vpack.i.bf16 %v7534_v37, %v17204_v7  ;;  %v9407_v29 = vunpack.i.l.bf16 %v14606_v36  ;;  %v17205_v52 = vcombine.low %v14147_v27, %v14213_v38  ;;  %v17209_v7 = vld [vmem:[#allocation63_spill] sm:$0xff]  ;;  %v17213_v36 = vld [vmem:[#allocation58_spill] sm:$0xff] }
 0x4d0   : > { %v17208_v37 = vcombine.low %v17206_v20, %v17207_v1  ;;  %v17211_v56 = vcombine.low %v17209_v7, %v17210_v31  ;;  %v17214_v58 = vcombine.low %v17212_v13, %v17213_v36  ;;  %v9438_v4 = vunpack.i.h.bf16 %v9436_v59  ;;  %v17217_v36 = vld [vmem:[#allocation76_spill] sm:$0xff] }
 0x4d1   : > { %v9759_v44 = vpack.i.bf16 %v5355_v53, %v17205_v52  ;;  %v5337_v31 = vcombine.low %v5272_v61, %v5288_v43  ;;  %v14737_v47 = vrot.slane %v5306_v11, %v10522_v63  ;;  %v5356_v43 = vcombine.high %v14654_v6, %v14636_v39 }
 0x4d2   : > { %v9764_v34 = vpack.i.bf16 %v6217_v28, %v17208_v37  ;;  %v7076_v24 = vsel %vm2163_vm7, %v17211_v56, %v9388_v46  ;;  %v7075_v22 = vsel %vm2163_vm7, %v17214_v58, %v9387_v3  ;;  %v9437_v28 = vunpack.i.l.bf16 %v9436_v59  ;;  %v14734_v46 = vpop.permute.xlu0 %9490  ;;  %v9446_v59 = vpop.permute.xlu1 %9445 }
 0x4d3   : > { %9710 = vrot.lane.b32.xlu0 %v9709_v50, %s10084_s28  ;;  %v7077_v53 = vsel %vm603_vm0, %v7075_v22, %v9397_v26  ;;  %v7078_v52 = vsel %vm603_vm0, %v7076_v24, %v9398_v60  ;;  %9760 = vrot.lane.b32.xlu1 %v9759_v44, %s10088_s12  ;;  %v14730_v56 = vrot.slane %v5338_v19, %v10522_v63  ;;  %v9448_v60 = vunpack.i.h.bf16 %v9446_v59 }
 0x4d4   : > { %v7079_v13 = vsel %vm2168_vm8, %v7077_v53, %v9407_v29  ;;  %v7080_v58 = vsel %vm2168_vm8, %v7078_v52, %v9408_v15  ;;  %v9447_v26 = vunpack.i.l.bf16 %v9446_v59  ;;  %v5305_v50 = vcombine.low %v14690_v54, %v14672_v8  ;;  %v17219_v53 = vld [vmem:[#allocation205_spill] sm:$0xff] }
 0x4d5   : > { %v7081_v22 = vsel %vm2171_vm9, %v7079_v13, %v9417_v0  ;;  %v7082_v24 = vsel %vm2171_vm9, %v7080_v58, %v9418_v18  ;;  %v6218_v11 = vcombine.high %v14651_v48, %v14616_v32  ;;  %v5359_v15 = vcombine.low %v14737_v47, %v14730_v56  ;;  %v17220_v52 = vld [vmem:[#allocation225_spill] sm:$0xff]  ;;  %v17223_v58 = vld [vmem:[#allocation102_spill] sm:$0xff] }
 0x4d6   : > { %v7083_v61 = vsel %vm2174_vm10, %v7081_v22, %v9427_v16  ;;  %v7084_v3 = vsel %vm2174_vm10, %v7082_v24, %v9428_v35  ;;  %v14754_v16 = vrot.slane %v5337_v31, %v10522_v63  ;;  %v9496_v6 = vpop.permute.xlu0 %9495  ;;  %v9456_v32 = vpop.permute.xlu1 %9455  ;;  %v17215_v48 = vcombine.high %v14147_v27, %v14213_v38  ;;  %v17218_v35 = vld [vmem:[#allocation209_spill] sm:$0xff]  ;;  %v17224_v22 = vld [vmem:[#allocation99_spill] sm:$0xff]  ;;  %v17226_v24 = vld [vmem:[#allocation214_spill] sm:$0xff] }
 0x4d7   : > { %9720 = vrot.lane.b32.xlu0 %v9719_v62, %s10083_s27  ;;  %9765 = vrot.lane.b32.xlu1 %v9764_v34, %s10084_s28  ;;  %v7085_v19 = vsel %vm2177_vm11, %v7083_v61, %v9437_v28  ;;  %v7086_v39 = vsel %vm2177_vm11, %v7084_v3, %v9438_v4  ;;  %v9498_v54 = vunpack.i.h.bf16 %v9496_v6  ;;  %v9497_v29 = vunpack.i.l.bf16 %v9496_v6  ;;  %v17221_v28 = vld [vmem:[#allocation81_spill] sm:$0xff]  ;;  %v17228_v61 = vld [vmem:[#allocation67_spill] sm:$0xff]  ;;  %v17229_v3 = vld [vmem:[#allocation68_spill] sm:$0xff] }
 0x4d8   : > { %v14759_v62 = vsel %vm2180_vm12, %v7085_v19, %v9447_v26  ;;  %v14762_v8 = vsel %vm2180_vm12, %v7086_v39, %v9448_v60  ;;  %v9769_v4 = vpack.i.bf16 %v5356_v43, %v17215_v48  ;;  %v8474_v0 = vcombine.high %v17196_v41, %v14334_v23  ;;  %v17227_v59 = vld [vmem:[#allocation21_spill] sm:$0xff]  ;;  %v17232_v19 = vld [vmem:[#allocation62_spill] sm:$0xff] }
 0x4d9   : > { %v17216_v44 = vcombine.high %v17199_v42, %v17198_v21  ;;  %v9458_v34 = vunpack.i.h.bf16 %v9456_v32  ;;  %v9457_v7 = vunpack.i.l.bf16 %v9456_v32  ;;  %v8154_v27 = vcombine.high %v17219_v53, %v17218_v35 }
 0x4da   : > { %v5313_v38 = vrot.slane %v5305_v50, %v10522_v63  ;;  %v17222_v31 = vcombine.low %v17220_v52, %v17221_v28  ;;  %v17225_v21 = vcombine.low %v17223_v58, %v17224_v22  ;;  %v8490_v43 = vcombine.high %v17227_v59, %v17226_v24  ;;  %v17231_v50 = vld [vmem:[#allocation64_spill] sm:$0xff] }
 0x4db   : > { %v8456_v37 = vrot.slane %v17216_v44, %v10513_v51  ;;  %9725 = vrot.lane.b32.xlu0 %v17217_v36, %s10088_s12  ;;  %9770 = vrot.lane.b32.xlu1 %v9769_v4, %s10087_s11  ;;  %v17230_v60 = vcombine.low %v17228_v61, %v17229_v3  ;;  %v17233_v39 = vcombine.low %v17231_v50, %v17232_v19  ;;  %v9466_v44 = vpop.permute.xlu1 %9465  ;;  %v17240_v61 = vld [vmem:[#allocation44_spill] sm:$0xff]  ;;  %v17241_v3 = vld [vmem:[#allocation165_spill] sm:$0xff]  ;;  %v17242_v50 = vld [vmem:[#allocation203_spill] sm:$0xff] }
 0x4dc   : > { %v14784_v13 = vsel %vm2163_vm7, %v17222_v31, %v9498_v54  ;;  %v14790_v42 = vsel %vm2163_vm7, %v17225_v21, %v9497_v29  ;;  %v14807_v54 = vpop.permute.xlu0 %9505  ;;  %v17234_v29 = vcombine.low %v14178_v9, %v14249_v25  ;;  %v17235_v48 = vcombine.high %v17112_v14, %v17111_v10  ;;  %v17243_v19 = vld [vmem:[#allocation45_spill] sm:$0xff] }
 0x4dd   : > { %v14799_v26 = vsel %vm2163_vm7, %v17230_v60, %v9458_v34  ;;  %v14805_v6 = vsel %vm2163_vm7, %v17233_v39, %v9457_v7  ;;  %v17236_v34 = vcombine.high %v17206_v20, %v17207_v1  ;;  %v5357_v7 = vcombine.low %v5313_v38, %v14754_v16 }
 0x4de   : > { %v9794_v32 = vpack.i.bf16 %v5359_v15, %v17234_v29  ;;  %v14816_v4 = vrot.slane %v17235_v48, %v10522_v63  ;;  %v5224_v35 = vcombine.high %v14178_v9, %v14249_v25  ;;  %v8505_v53 = vcombine.low %v14210_v5, %v8456_v37  ;;  %v17268_v25 = vld [vmem:[#allocation50_spill] sm:$0xff] }
 0x4df   : > { %v9774_v36 = vpack.i.bf16 %v6218_v11, %v17236_v34  ;;  %v8506_v15 = vcombine.high %v14210_v5, %v8456_v37  ;;  %v9468_v52 = vunpack.i.h.bf16 %v9466_v44  ;;  %v9467_v28 = vunpack.i.l.bf16 %v9466_v44  ;;  %v9476_v31 = vpop.permute.xlu1 %9475  ;;  %v17246_v44 = vld [vmem:[#allocation65_spill] sm:$0xff]  ;;  %v17247_v34 = vld [vmem:[#allocation176_spill] sm:$0xff] }
 0x4e0   : > { %9795 = vrot.lane.b32.xlu0 %v9794_v32, %s10084_s28  ;;  %v17237_v10 = vcombine.low %v17196_v41, %v14334_v23  ;;  %v14834_v20 = vrot.slane %v8474_v0, %v10522_v63  ;;  %v9473_v1 = vunpack.i.h.bf16 %v14675_v40  ;;  %v9472_v11 = vunpack.i.l.bf16 %v14675_v40  ;;  %v14849_v0 = vpop.permute.xlu0 %9515  ;;  %v17245_v32 = vld [vmem:[#allocation217_spill] sm:$0xff] }
 0x4e1   : > { %9775 = vrot.lane.b32.xlu1 %v9774_v36, %s10083_s27  ;;  %v14840_v5 = vrot.slane %v8154_v27, %v10513_v51  ;;  %v14843_v37 = vrot.slane %v8490_v43, %v10522_v63  ;;  %v3030_v23 = vsel %vm603_vm0, %v14660_v33, %v9468_v52  ;;  %v3029_v41 = vsel %vm603_vm0, %v14666_v12, %v9467_v28  ;;  %v17239_v43 = vld [vmem:[#allocation241_spill] sm:$0xff] }
 0x4e2   : > { %v14831_v14 = vrot.slane %v17237_v10, %v10522_v63  ;;  %v3031_v58 = vsel %vm2168_vm8, %v3029_v41, %v9472_v11  ;;  %v3032_v40 = vsel %vm2168_vm8, %v3030_v23, %v9473_v1  ;;  %v17238_v27 = vcombine.low %v14160_v55, %v14246_v45  ;;  %v17249_v11 = vld [vmem:[#allocation222_spill] sm:$0xff] }
 0x4e3   : > { %v5358_v21 = vcombine.high %v5313_v38, %v14754_v16  ;;  %v14858_v24 = vrot.slane %v8505_v53, %v10522_v63  ;;  %v14861_v33 = vrot.slane %v8506_v15, %v10522_v63  ;;  %v9478_v12 = vunpack.i.h.bf16 %v9476_v31  ;;  %v17244_v38 = vld [vmem:[#allocation224_spill] sm:$0xff]  ;;  %v9486_v52 = vpop.permute.xlu1 %9485  ;;  %v17250_v23 = vld [vmem:[#allocation226_spill] sm:$0xff] }
 0x4e4   : > { %v9779_v22 = vpack.i.bf16 %v5357_v7, %v17238_v27  ;;  %v9477_v59 = vunpack.i.l.bf16 %v9476_v31  ;;  %9805 = vrot.lane.b32.xlu0 %v17239_v43, %s10084_s28  ;;  %v8530_v60 = vcombine.high %v17241_v3, %v17240_v61  ;;  %v8562_v39 = vcombine.high %v17243_v19, %v17242_v50  ;;  %v14878_v15 = vpop.permute.xlu0 %9525 }
 0x4e5   : > { %v9483_v29 = vunpack.i.h.bf16 %v14709_v49  ;;  %v9482_v16 = vunpack.i.l.bf16 %v14709_v49  ;;  %v8138_v48 = vcombine.high %v17245_v32, %v17244_v38  ;;  %v8546_v36 = vcombine.high %v17247_v34, %v17246_v44  ;;  %v17253_v44 = vld [vmem:[#allocation186_spill] sm:$0xff] }
 0x4e6   : > { %9780 = vrot.lane.b32.xlu1 %v9779_v22, %s10086_s30  ;;  %v3033_v7 = vsel %vm2171_vm9, %v3031_v58, %v9477_v59  ;;  %v3034_v53 = vsel %vm2171_vm9, %v3032_v40, %v9478_v12  ;;  %v17248_v49 = vcombine.high %v14160_v55, %v14246_v45  ;;  %v8522_v41 = vcombine.high %v17250_v23, %v17249_v11  ;;  %v17251_v58 = vld [vmem:[#allocation84_spill] sm:$0xff]  ;;  %v17276_v38 = vld [vmem:[#allocation118_spill] sm:$0xff] }
 0x4e7   : > { %v3035_v28 = vsel %vm2174_vm10, %v3033_v7, %v9482_v16  ;;  %v3036_v10 = vsel %vm2174_vm10, %v3034_v53, %v9483_v29  ;;  %v9488_v31 = vunpack.i.h.bf16 %v9486_v52  ;;  %v9487_v27 = vunpack.i.l.bf16 %v9486_v52  ;;  %v17252_v16 = vld [vmem:[#allocation218_spill] sm:$0xff]  ;;  %v17254_v53 = vld [vmem:[#allocation80_spill] sm:$0xff] }
 0x4e8   : > { %v9784_v1 = vpack.i.bf16 %v5358_v21, %v17248_v49  ;;  %9815 = vrot.lane.b32.xlu0 %v17251_v58, %s10086_s30  ;;  %v8523_v40 = vcombine.low %v14816_v4, %v14843_v37  ;;  %v8524_v22 = vcombine.high %v14816_v4, %v14843_v37  ;;  %v14894_v12 = vrot.slane %v8530_v60, %v10513_v51  ;;  %v9531_v3 = vpop.permute.xlu0 %9530  ;;  %v17297_v4 = vld [vmem:[#allocation180_spill] sm:$0xff]  ;;  %v17298_v37 = vld [vmem:[#allocation59_spill] sm:$0xff] }
 0x4e9   : > { %v14897_v55 = vrot.slane %v8562_v39, %v10513_v51  ;;  %v9493_v45 = vunpack.i.h.bf16 %v14734_v46  ;;  %v9492_v21 = vunpack.i.l.bf16 %v14734_v46  ;;  %v14903_v59 = vrot.slane %v8546_v36, %v10513_v51  ;;  %v9501_v39 = vpop.permute.xlu1 %9500 }
 0x4ea   : > { %9785 = vrot.lane.b32.xlu1 %v9784_v1, %s10085_s29  ;;  %v3037_v43 = vsel %vm2177_vm11, %v3035_v28, %v9487_v27  ;;  %v3038_v61 = vsel %vm2177_vm11, %v3036_v10, %v9488_v31  ;;  %v5360_v60 = vcombine.high %v14737_v47, %v14730_v56  ;;  %v9533_v50 = vunpack.i.h.bf16 %v9531_v3  ;;  %v17255_v28 = vld [vmem:[#allocation121_spill] sm:$0xff]  ;;  %v17259_v27 = vld [vmem:[#allocation106_spill] sm:$0xff] }
 0x4eb   : > { %v9532_v19 = vunpack.i.l.bf16 %v9531_v3  ;;  %v14910_v29 = vsel %vm2180_vm12, %v3037_v43, %v9492_v21  ;;  %v14913_v46 = vsel %vm2180_vm12, %v3038_v61, %v9493_v45  ;;  %v8578_v34 = vcombine.high %v17253_v44, %v17252_v16  ;;  %v17256_v10 = vld [vmem:[#allocation117_spill] sm:$0xff]  ;;  %v17265_v16 = vld [vmem:[#allocation179_spill] sm:$0xff] }
 0x4ec   : > { %v9503_v36 = vunpack.i.h.bf16 %v9501_v39  ;;  %v9502_v7 = vunpack.i.l.bf16 %v9501_v39  ;;  %9825 = vrot.lane.b32.xlu0 %v17254_v53, %s10085_s29  ;;  %v9508_v47 = vunpack.i.h.bf16 %v14807_v54  ;;  %v9507_v52 = vunpack.i.l.bf16 %v14807_v54  ;;  %v17258_v31 = vld [vmem:[#allocation233_spill] sm:$0xff]  ;;  %v17264_v39 = vld [vmem:[#allocation82_spill] sm:$0xff]  ;;  %v9536_v53 = vpop.permute.xlu0 %9535 }
 0x4ed   : > { %v17257_v49 = vcombine.low %v17255_v28, %v17256_v10  ;;  %v17260_v58 = vcombine.low %v17258_v31, %v17259_v27  ;;  %v17261_v21 = vld [vmem:[#allocation133_spill] sm:$0xff]  ;;  %v8626_v44 = vcombine.high %v17265_v16, %v17264_v39  ;;  %v9538_v28 = vunpack.i.h.bf16 %v9536_v53 }
 0x4ee   : > { %9790 = vrot.lane.b32.xlu1 %v17261_v21, %s10085_s29  ;;  %v17262_v43 = vld [vmem:[#allocation185_spill] sm:$0xff]  ;;  %v3888_v54 = vsel %vm603_vm0, %v14784_v13, %v9503_v36  ;;  %v9537_v10 = vunpack.i.l.bf16 %v9536_v53  ;;  %v14944_v27 = vrot.slane %v8578_v34, %v10513_v51  ;;  %v9809_v13 = vpack.i.bf16 %v5360_v60, %v5224_v35  ;;  %v17267_v34 = vld [vmem:[#allocation86_spill] sm:$0xff]  ;;  %v17269_v35 = vld [vmem:[#allocation23_spill] sm:$0xff] }
 0x4ef   : > { %v6331_v1 = vsel %vm2163_vm7, %v17257_v49, %v9532_v19  ;;  %v6332_v45 = vsel %vm2163_vm7, %v17260_v58, %v9533_v50  ;;  %v17263_v61 = vld [vmem:[#allocation245_spill] sm:$0xff]  ;;  %v3887_v19 = vsel %vm603_vm0, %v14790_v42, %v9502_v7  ;;  %v9511_v49 = vpop.permute.xlu1 %9510  ;;  %v3890_v31 = vsel %vm2168_vm8, %v3888_v54, %v9508_v47 }
 0x4f0   : > { %v8594_v3 = vcombine.high %v17263_v61, %v17262_v43  ;;  %v3889_v50 = vsel %vm2168_vm8, %v3887_v19, %v9507_v52  ;;  %v9513_v58 = vunpack.i.h.bf16 %v9511_v49  ;;  %v9512_v21 = vunpack.i.l.bf16 %v9511_v49  ;;  %v17266_v43 = vld [vmem:[#allocation90_spill] sm:$0xff]  ;;  %v9541_v9 = vpop.permute.xlu0 %9540 }
 0x4f1   : > { %9835 = vrot.lane.b32.xlu0 %v17266_v43, %s10084_s28  ;;  %v9518_v42 = vunpack.i.h.bf16 %v14849_v0  ;;  %v9517_v36 = vunpack.i.l.bf16 %v14849_v0  ;;  %v6333_v7 = vsel %vm603_vm0, %v6331_v1, %v9537_v10  ;;  %v6334_v47 = vsel %vm603_vm0, %v6332_v45, %v9538_v28  ;;  %v17270_v10 = vld [vmem:[#allocation83_spill] sm:$0xff] }
 0x4f2   : > { %9800 = vrot.lane.b32.xlu1 %v17267_v34, %s10087_s11  ;;  %v14958_v52 = vrot.slane %v8626_v44, %v10522_v63  ;;  %v3891_v61 = vsel %vm2171_vm9, %v3889_v50, %v9512_v21  ;;  %v3892_v39 = vsel %vm2171_vm9, %v3890_v31, %v9513_v58  ;;  %v8658_v60 = vcombine.high %v17269_v35, %v17268_v25 }
 0x4f3   : > { %v9543_v16 = vunpack.i.h.bf16 %v9541_v9  ;;  %v9542_v0 = vunpack.i.l.bf16 %v9541_v9  ;;  %v9521_v54 = vpop.permute.xlu1 %9520  ;;  %v3893_v1 = vsel %vm2174_vm10, %v3891_v61, %v9517_v36  ;;  %v3894_v45 = vsel %vm2174_vm10, %v3892_v39, %v9518_v42 }
 0x4f4   : > { %v8608_v19 = vrot.slane %v8594_v3, %v10522_v63  ;;  %v8641_v44 = vcombine.low %v14897_v55, %v14944_v27  ;;  %v9523_v53 = vunpack.i.h.bf16 %v9521_v54  ;;  %v9522_v28 = vunpack.i.l.bf16 %v9521_v54  ;;  %v9546_v43 = vpop.permute.xlu0 %9545 }
 0x4f5   : > { %9845 = vrot.lane.b32.xlu0 %v17270_v10, %s10083_s27  ;;  %v9528_v49 = vunpack.i.h.bf16 %v14878_v15  ;;  %v9527_v50 = vunpack.i.l.bf16 %v14878_v15  ;;  %v6335_v31 = vsel %vm2168_vm8, %v6333_v7, %v9542_v0  ;;  %v6336_v58 = vsel %vm2168_vm8, %v6334_v47, %v9543_v16 }
 0x4f6   : > { %9810 = vrot.lane.b32.xlu1 %v9809_v13, %s10083_s27  ;;  %v3895_v3 = vsel %vm2177_vm11, %v3893_v1, %v9522_v28  ;;  %v3896_v21 = vsel %vm2177_vm11, %v3894_v45, %v9523_v53  ;;  %v9854_v42 = vpack.i.bf16 %v8658_v60, %v8522_v41  ;;  %v8659_v36 = vcombine.low %v8608_v19, %v14958_v52  ;;  %v17271_v1 = vld [vmem:[#allocation122_spill] sm:$0xff]  ;;  %v17272_v45 = vld [vmem:[#allocation113_spill] sm:$0xff]  ;;  %v17273_v53 = vld [vmem:[#allocation232_spill] sm:$0xff] }
 0x4f7   : > { %v9548_v34 = vunpack.i.h.bf16 %v9546_v43  ;;  %v9547_v61 = vunpack.i.l.bf16 %v9546_v43  ;;  %v9586_v15 = vpop.permute.xlu1 %9585  ;;  %v14983_v7 = vsel %vm2180_vm12, %v3895_v3, %v9527_v50  ;;  %v14986_v47 = vsel %vm2180_vm12, %v3896_v21, %v9528_v49  ;;  %v17275_v49 = vld [vmem:[#allocation120_spill] sm:$0xff] }
 0x4f8   : > { %v8609_v13 = vcombine.low %v14894_v12, %v14903_v59  ;;  %v9588_v39 = vunpack.i.h.bf16 %v9586_v15  ;;  %v9587_v9 = vunpack.i.l.bf16 %v9586_v15  ;;  %v14997_v60 = vrot.slane %v8138_v48, %v10513_v51  ;;  %v17279_v3 = vld [vmem:[#allocation228_spill] sm:$0xff] }
 0x4f9   : > { %9855 = vrot.lane.b32.xlu0 %v9854_v42, %s10089_s15  ;;  %v15000_v16 = vrot.slane %v8641_v44, %v10522_v63  ;;  %v6337_v0 = vsel %vm2171_vm9, %v6335_v31, %v9547_v61  ;;  %v6338_v54 = vsel %vm2171_vm9, %v6336_v58, %v9548_v34  ;;  %v17274_v28 = vcombine.low %v17272_v45, %v17273_v53  ;;  %v9551_v44 = vpop.permute.xlu0 %9550  ;;  %v17278_v58 = vld [vmem:[#allocation236_spill] sm:$0xff]  ;;  %v17283_v53 = vld [vmem:[#allocation129_spill] sm:$0xff] }
 0x4fa   : > { %9820 = vrot.lane.b32.xlu1 %v17271_v1, %s10083_s27  ;;  %v17277_v32 = vcombine.low %v17275_v49, %v17276_v38  ;;  %v9864_v50 = vpack.i.bf16 %v8659_v36, %v8523_v40  ;;  %v8660_v31 = vcombine.high %v8608_v19, %v14958_v52  ;;  %v8170_v21 = vcombine.high %v17279_v3, %v17278_v58  ;;  %v17280_v19 = vld [vmem:[#allocation27_spill] sm:$0xff]  ;;  %v17281_v36 = vld [vmem:[#allocation26_spill] sm:$0xff]  ;;  %v17282_v45 = vld [vmem:[#allocation136_spill] sm:$0xff] }
 0x4fb   : > { %v15010_v10 = vsel %vm2163_vm7, %v17274_v28, %v9588_v39  ;;  %v9553_v43 = vunpack.i.h.bf16 %v9551_v44  ;;  %v9552_v42 = vunpack.i.l.bf16 %v9551_v44  ;;  %v15024_v34 = vpop.permute.xlu1 %9595  ;;  %v8525_v61 = vcombine.low %v14831_v14, %v14858_v24  ;;  %v17290_v44 = vld [vmem:[#allocation18_spill] sm:$0xff]  ;;  %v17310_v1 = vld [vmem:[#allocation147_spill] sm:$0xff] }
 0x4fc   : > { %v15016_v48 = vsel %vm2163_vm7, %v17277_v32, %v9587_v9  ;;  %v8617_v15 = vrot.slane %v8609_v13, %v10522_v63  ;;  %v8642_v39 = vcombine.high %v14897_v55, %v14944_v27  ;;  %v8526_v40 = vcombine.high %v14831_v14, %v14858_v24  ;;  %v17285_v55 = vld [vmem:[#allocation258_spill] sm:$0xff]  ;;  %v17286_v27 = vld [vmem:[#allocation237_spill] sm:$0xff]  ;;  %v17289_v32 = vld [vmem:[#allocation240_spill] sm:$0xff] }
 0x4fd   : > { %9865 = vrot.lane.b32.xlu0 %v9864_v50, %s10088_s12  ;;  %v8527_v52 = vcombine.low %v14834_v20, %v14861_v33  ;;  %v8186_v9 = vcombine.high %v17281_v36, %v17280_v19  ;;  %v17284_v13 = vcombine.low %v17282_v45, %v17283_v53  ;;  %v17287_v49 = vcombine.low %v17285_v55, %v17286_v27  ;;  %v17288_v14 = vld [vmem:[#allocation93_spill] sm:$0xff]  ;;  %v9556_v58 = vpop.permute.xlu0 %9555 }
 0x4fe   : > { %9830 = vrot.lane.b32.xlu1 %v17288_v14, %s10085_s29  ;;  %v8610_v24 = vcombine.high %v14894_v12, %v14903_v59  ;;  %v8306_v50 = vcombine.high %v17290_v44, %v17289_v32  ;;  %v9874_v3 = vpack.i.bf16 %v8660_v31, %v8524_v22  ;;  %v15059_v19 = vrot.slane %v8170_v21, %v10513_v51  ;;  %v17292_v36 = vld [vmem:[#allocation89_spill] sm:$0xff]  ;;  %v17293_v12 = vld [vmem:[#allocation238_spill] sm:$0xff] }
 0x4ff   : > { %v5473_v28 = vsel %vm2163_vm7, %v17284_v13, %v9552_v42  ;;  %v5474_v38 = vsel %vm2163_vm7, %v17287_v49, %v9553_v43  ;;  %v8661_v42 = vcombine.low %v8617_v15, %v15000_v16  ;;  %v17291_v43 = vld [vmem:[#allocation87_spill] sm:$0xff]  ;;  %v9558_v53 = vunpack.i.h.bf16 %v9556_v58  ;;  %v15063_v55 = vpop.permute.xlu1 %9605  ;;  %v17294_v59 = vld [vmem:[#allocation30_spill] sm:$0xff]  ;;  %v17295_v49 = vld [vmem:[#allocation60_spill] sm:$0xff] }
 0x500   : > { %v8354_v45 = vcombine.high %v17292_v36, %v17291_v43  ;;  %v9557_v13 = vunpack.i.l.bf16 %v9556_v58  ;;  %v8218_v27 = vcombine.high %v17294_v59, %v17293_v12  ;;  %v17296_v14 = vld [vmem:[#allocation174_spill] sm:$0xff]  ;;  %v8290_v22 = vcombine.high %v17298_v37, %v17297_v4  ;;  %v17299_v21 = vld [vmem:[#allocation33_spill] sm:$0xff]  ;;  %v17301_v58 = vld [vmem:[#allocation28_spill] sm:$0xff] }
 0x501   : > { %v8258_v32 = vcombine.high %v17296_v14, %v17295_v49  ;;  %v15072_v31 = vrot.slane %v8642_v39, %v10522_v63  ;;  %9875 = vrot.lane.b32.xlu0 %v9874_v3, %s10087_s11  ;;  %v17300_v44 = vld [vmem:[#allocation181_spill] sm:$0xff]  ;;  %v8322_v36 = vcombine.high %v17301_v58, %v14238_v2  ;;  %v6340_v56 = vsel %vm2174_vm10, %v6338_v54, %v9558_v53  ;;  %v17302_v59 = vld [vmem:[#allocation91_spill] sm:$0xff]  ;;  %v9561_v14 = vpop.permute.xlu0 %9560 }
 0x502   : > { %v8274_v43 = vcombine.high %v17300_v44, %v17299_v21  ;;  %v6339_v12 = vsel %vm2174_vm10, %v6337_v0, %v9557_v13  ;;  %9840 = vrot.lane.b32.xlu1 %v17302_v59, %s10084_s28  ;;  %v8624_v49 = vrot.slane %v8610_v24, %v10522_v63  ;;  %v15085_v39 = vrot.slane %v8306_v50, %v10513_v51  ;;  %v17303_v50 = vld [vmem:[#allocation25_spill] sm:$0xff] }
 0x503   : > { %v9884_v3 = vpack.i.bf16 %v8661_v42, %v8525_v61  ;;  %v8662_v4 = vcombine.high %v8617_v15, %v15000_v16  ;;  %v8368_v37 = vrot.slane %v8354_v45, %v10522_v63  ;;  %v9563_v21 = vunpack.i.h.bf16 %v9561_v14  ;;  %v15089_v44 = vpop.permute.xlu1 %9615  ;;  %v17304_v61 = vld [vmem:[#allocation243_spill] sm:$0xff] }
 0x504   : > { %v9562_v2 = vunpack.i.l.bf16 %v9561_v14  ;;  %v8386_v0 = vcombine.high %v14311_v57, %v14297_v17  ;;  %v8232_v54 = vrot.slane %v8218_v27, %v10522_v63  ;;  %v15095_v24 = vrot.slane %v8290_v22, %v10513_v51  ;;  %v17305_v27 = vld [vmem:[#allocation92_spill] sm:$0xff] }
 0x505   : > { %9885 = vrot.lane.b32.xlu0 %v9884_v3, %s10086_s30  ;;  %v8250_v42 = vcombine.high %v17304_v61, %v17303_v50  ;;  %v8663_v16 = vcombine.low %v8624_v49, %v15072_v31  ;;  %v15102_v15 = vrot.slane %v8274_v43, %v10513_v51  ;;  %v8336_v45 = vrot.slane %v8322_v36, %v10522_v63  ;;  %v9566_v14 = vpop.permute.xlu0 %9565 }
 0x506   : > { %v5475_v53 = vsel %vm603_vm0, %v5473_v28, %v9562_v2  ;;  %v5476_v13 = vsel %vm603_vm0, %v5474_v38, %v9563_v21  ;;  %9850 = vrot.lane.b32.xlu1 %v17305_v27, %s10083_s27  ;;  %v8200_v22 = vrot.slane %v8186_v9, %v10522_v63  ;;  %v15111_v58 = vrot.slane %v8258_v32, %v10513_v51  ;;  %v17307_v27 = vld [vmem:[#allocation141_spill] sm:$0xff] }
 0x507   : > { %v8369_v59 = vcombine.low %v15095_v24, %v15085_v39  ;;  %v9894_v43 = vpack.i.bf16 %v8662_v4, %v8526_v40  ;;  %v9568_v3 = vunpack.i.h.bf16 %v9566_v14  ;;  %v9567_v41 = vunpack.i.l.bf16 %v9566_v14  ;;  %v9621_v36 = vpop.permute.xlu1 %9620 }
 0x508   : > { %v9859_v18 = vpack.i.bf16 %v8386_v0, %v8250_v42  ;;  %v8387_v28 = vcombine.low %v8336_v45, %v8368_v37  ;;  %v8233_v38 = vcombine.low %v14840_v5, %v15059_v19  ;;  %v9623_v21 = vunpack.i.h.bf16 %v9621_v36  ;;  %v17306_v42 = vld [vmem:[#allocation127_spill] sm:$0xff] }
 0x509   : > { %v9622_v2 = vunpack.i.l.bf16 %v9621_v36  ;;  %9895 = vrot.lane.b32.xlu0 %v9894_v43, %s10085_s29  ;;  %v8251_v9 = vcombine.low %v8200_v22, %v8232_v54  ;;  %v8337_v51 = vcombine.low %v15111_v58, %v15102_v15  ;;  %v6341_v32 = vsel %vm2177_vm11, %v6339_v12, %v9567_v41  ;;  %v17309_v36 = vld [vmem:[#allocation150_spill] sm:$0xff] }
 0x50a   : > { %v6342_v40 = vsel %vm2177_vm11, %v6340_v56, %v9568_v3  ;;  %9860 = vrot.lane.b32.xlu1 %v9859_v18, %s10089_s15  ;;  %v9904_v4 = vpack.i.bf16 %v8663_v16, %v8527_v52  ;;  %v8377_v0 = vrot.slane %v8369_v59, %v10522_v63  ;;  %v17308_v14 = vcombine.low %v17306_v42, %v17307_v27  ;;  %v9571_v56 = vpop.permute.xlu0 %9570 }
 0x50b   : > { %v17311_v50 = vcombine.low %v17309_v36, %v17310_v1  ;;  %v8664_v18 = vcombine.high %v8624_v49, %v15072_v31  ;;  %v9573_v12 = vunpack.i.h.bf16 %v9571_v56  ;;  %v9572_v3 = vunpack.i.l.bf16 %v9571_v56  ;;  %v15140_v52 = vpop.permute.xlu1 %9630 }
 0x50c   : > { %v15131_v43 = vsel %vm2163_vm7, %v17308_v14, %v9623_v21  ;;  %v9869_v16 = vpack.i.bf16 %v8387_v28, %v8251_v9  ;;  %v8388_v59 = vcombine.high %v8336_v45, %v8368_v37  ;;  %v8241_v42 = vrot.slane %v8233_v38, %v10522_v63 }
 0x50d   : > { %v15137_v41 = vsel %vm2163_vm7, %v17311_v50, %v9622_v2  ;;  %9905 = vrot.lane.b32.xlu0 %v9904_v4, %s10084_s28  ;;  %v8528_v21 = vcombine.high %v14834_v20, %v14861_v33  ;;  %v8345_v1 = vrot.slane %v8337_v51, %v10522_v63  ;;  %v5477_v50 = vsel %vm2168_vm8, %v5475_v53, %v9572_v3 }
 0x50e   : > { %v5478_v2 = vsel %vm2168_vm8, %v5476_v13, %v9573_v12  ;;  %9870 = vrot.lane.b32.xlu1 %v9869_v16, %s10088_s12  ;;  %v8252_v31 = vcombine.high %v8200_v22, %v8232_v54  ;;  %v17312_v49 = vcombine.low %v14319_v30, %v14997_v60  ;;  %v8370_v45 = vcombine.high %v15095_v24, %v15085_v39  ;;  %v9576_v28 = vpop.permute.xlu0 %9575  ;;  %v506_v39 = vld [vmem:[%s15587_s7] sm:$0xff] }
 0x50f   : > { %v9914_v38 = vpack.i.bf16 %v8664_v18, %v8528_v21  ;;  %v9578_v20 = vunpack.i.h.bf16 %v9576_v28  ;;  %v9577_v33 = vunpack.i.l.bf16 %v9576_v28  ;;  %v15156_v9 = vpop.permute.xlu1 %9640  ;;  %v8389_v51 = vcombine.low %v8345_v1, %v8377_v0 }
 0x510   : > { %v8209_v37 = vrot.slane %v17312_v49, %v10522_v63  ;;  %v9879_v53 = vpack.i.bf16 %v8388_v59, %v8252_v31  ;;  %v8234_v13 = vcombine.high %v14840_v5, %v15059_v19  ;;  %v8338_v54 = vcombine.high %v15111_v58, %v15102_v15 }
 0x511   : > { %9915 = vrot.lane.b32.xlu0 %v9914_v38, %s10083_s27  ;;  %v15168_v22 = vsel %vm2180_vm12, %v6341_v32, %v9577_v33  ;;  %v15171_v4 = vsel %vm2180_vm12, %v6342_v40, %v9578_v20  ;;  %v8202_v5 = vcombine.high %v14319_v30, %v14997_v60  ;;  %v8384_v19 = vrot.slane %v8370_v45, %v10522_v63  ;;  %v508_v60 = vld [vmem:[%s15588_s8] sm:$0xff] }
 0x512   : > { %9880 = vrot.lane.b32.xlu1 %v9879_v53, %s10087_s11  ;;  %v8253_v24 = vcombine.low %v8209_v37, %v8241_v42  ;;  %v9581_v27 = vpop.permute.xlu0 %9580  ;;  %v9262_v15 = vpack.c.bf16 %v15171_v4, %v15168_v22  ;;  %v8390_v18 = vcombine.high %v8345_v1, %v8377_v0  ;;  %v8248_v32 = vrot.slane %v8234_v13, %v10522_v63 }
 0x513   : > { %v9583_v58 = vunpack.i.h.bf16 %v9581_v27  ;;  %v9582_v14 = vunpack.i.l.bf16 %v9581_v27  ;;  %v15178_v36 = vpop.permute.xlu1 %9650  ;;  %v8352_v40 = vrot.slane %v8338_v54, %v10522_v63  ;;  %v8254_v3 = vcombine.high %v8209_v37, %v8241_v42  ;;  %v10071_v37 = vld [vmem:[%s15586_s6 + $0x4] ss:$8 sps:$4 sm:$0xff]  }
 0x514   : > { %v9889_v56 = vpack.i.bf16 %v8389_v51, %v8253_v24  ;;  %v8216_v0 = vrot.slane %v8202_v5, %v10522_v63  ;;  %v9598_v49 = vunpack.i.h.bf16 %v15024_v34  ;;  %9217 = vmatprep.mubr.msk.bf16.mxu1 %vm2163_vm7, %v10071_v37  ;;  %v9607_v13 = vunpack.i.l.bf16 %v15063_v55 }
 0x515   : > { %8984 = vperm.xlu0 %9292, %v506_v39   ;;  %v15183_v12 = vsel %vm2171_vm9, %v5477_v50, %v9582_v14  ;;  %v15186_v30 = vsel %vm2171_vm9, %v5478_v2, %v9583_v58  ;;  %v9899_v31 = vpack.i.bf16 %v8390_v18, %v8254_v3  ;;  %v8391_v50 = vcombine.low %v8352_v40, %v8384_v19 }
 0x516   : > { %9890 = vrot.lane.b32.xlu1 %v9889_v56, %s10086_s30  ;;  %v9591_v16 = vpop.permute.xlu0 %9590  ;;  %v9597_v2 = vunpack.i.l.bf16 %v15024_v34  ;;  %v8255_v63 = vcombine.low %v8216_v0, %v8248_v32  ;;  %v8392_v51 = vcombine.high %v8352_v40, %v8384_v19  ;;  %v8256_v24 = vcombine.high %v8216_v0, %v8248_v32  ;;  %v507_v0 = vld [vmem:[%s15587_s7 + $0x8] sm:$0xff] }
 0x517   : > { %v9593_v59 = vunpack.i.h.bf16 %v9591_v16  ;;  %v9592_v21 = vunpack.i.l.bf16 %v9591_v16  ;;  %v15193_v1 = vpop.permute.xlu1 %9660  ;;  %v9618_v40 = vunpack.i.h.bf16 %v15089_v44 }
 0x518   : > { %v9919_v18 = vpack.i.bf16 %v8392_v51, %v8256_v24 }
 0x519   : > { %8998 = vperm.xlu0 %9292, %v508_v60   ;;  %v3043_v45 = vsel %vm603_vm0, %v15016_v48, %v9592_v21  ;;  %v3044_v42 = vsel %vm603_vm0, %v15010_v10, %v9593_v59  ;;  %v9909_v48 = vpack.i.bf16 %v8391_v50, %v8255_v63  ;;  %v9608_v10 = vunpack.i.h.bf16 %v15063_v55 }
 0x51a   : > { %9900 = vrot.lane.b32.xlu1 %v9899_v31, %s10085_s29  ;;  %v9601_v28 = vpop.permute.xlu0 %9600  ;;  %v3045_v38 = vsel %vm2168_vm8, %v3043_v45, %v9597_v2  ;;  %v3046_v20 = vsel %vm2168_vm8, %v3044_v42, %v9598_v49  ;;  %v9617_v55 = vunpack.i.l.bf16 %v15089_v44  ;;  %v9633_v49 = vunpack.i.h.bf16 %v15140_v52 }
 0x51b   : > { %v9603_v34 = vunpack.i.h.bf16 %v9601_v28  ;;  %v9602_v33 = vunpack.i.l.bf16 %v9601_v28  ;;  %v15207_v53 = vpop.permute.xlu1 %9670  ;;  %v9632_v2 = vunpack.i.l.bf16 %v15140_v52  ;;  %v9643_v52 = vunpack.i.h.bf16 %v15156_v9 }
 0x51d   : > { %v3047_v54 = vsel %vm2171_vm9, %v3045_v38, %v9602_v33  ;;  %v3048_v39 = vsel %vm2171_vm9, %v3046_v20, %v9603_v34  ;;  %v509_v38 = vld [vmem:[%s15588_s8 + $0x8] sm:$0xff] }
 0x51e   : > { %9910 = vrot.lane.b32.xlu1 %v9909_v48, %s10084_s28  ;;  %v9611_v5 = vpop.permute.xlu0 %9610  ;;  %v3049_v27 = vsel %vm2174_vm10, %v3047_v54, %v9607_v13  ;;  %v3050_v58 = vsel %vm2174_vm10, %v3048_v39, %v9608_v10 }
 0x51f   : > { %v9613_v14 = vunpack.i.h.bf16 %v9611_v5  ;;  %v9612_v19 = vunpack.i.l.bf16 %v9611_v5  ;;  %v15217_v56 = vpop.permute.xlu1 %9680  ;;  %v9653_v5 = vunpack.i.h.bf16 %v15178_v36 }
 0x521   : > { %v3051_v60 = vsel %vm2177_vm11, %v3049_v27, %v9612_v19  ;;  %v3052_v3 = vsel %vm2177_vm11, %v3050_v58, %v9613_v14  ;;  %v9652_v27 = vunpack.i.l.bf16 %v15178_v36 }
 0x522   : > { %9920 = vrot.lane.b32.xlu1 %v9919_v18, %s10083_s27  ;;  %v9626_v32 = vpop.permute.xlu0 %9625  ;;  %v15228_v16 = vsel %vm2180_vm12, %v3051_v60, %v9617_v55  ;;  %v15231_v59 = vsel %vm2180_vm12, %v3052_v3, %v9618_v40 }
 0x523   : > { %v9628_v21 = vunpack.i.h.bf16 %v9626_v32  ;;  %v9627_v31 = vunpack.i.l.bf16 %v9626_v32  ;;  %v15233_v44 = vpop.permute.xlu1 %9695  ;;  %v9255_v50 = vpack.c.bf16 %v15231_v59, %v15228_v16  ;;  %v17365_v16 = vpack.c.bf16 %v14913_v46, %v14910_v29 }
 0x525   : > { %v3901_v45 = vsel %vm603_vm0, %v15137_v41, %v9627_v31  ;;  %v3902_v42 = vsel %vm603_vm0, %v15131_v43, %v9628_v21  ;;  %v9642_v41 = vunpack.i.l.bf16 %v15156_v9 }
 0x526   : > { %8989 = vperm.xlu1 %9293, %v507_v0   ;;  %v9636_v63 = vpop.permute.xlu0 %9635  ;;  %v3903_v37 = vsel %vm2168_vm8, %v3901_v45, %v9632_v2  ;;  %v3904_v28 = vsel %vm2168_vm8, %v3902_v42, %v9633_v49  ;;  %v17313_v42 = vld [vmem:[#allocation164_spill] sm:$0xff] }
 0x527   : > { %v9638_v20 = vunpack.i.h.bf16 %v9636_v63  ;;  %v9637_v34 = vunpack.i.l.bf16 %v9636_v63  ;;  %v9706_v33 = vpop.permute.xlu1 %9705  ;;  %v17314_v63 = vld [vmem:[#allocation161_spill] sm:$0xff] }
 0x529   : > { %v3905_v48 = vsel %vm2171_vm9, %v3903_v37, %v9637_v34  ;;  %v3906_v43 = vsel %vm2171_vm9, %v3904_v28, %v9638_v20  ;;  %v17315_v37 = vcombine.low %v17313_v42, %v17314_v63  ;;  %v17317_v20 = vld [vmem:[#allocation234_spill] sm:$0xff] }
 0x52a   : > { %9003 = vperm.xlu1 %9293, %v509_v38   ;;  %v9646_v51 = vpop.permute.xlu0 %9645  ;;  %v3907_v10 = vsel %vm2174_vm10, %v3905_v48, %v9642_v41  ;;  %v3908_v13 = vsel %vm2174_vm10, %v3906_v43, %v9643_v52  ;;  %v17316_v38 = vld [vmem:[#allocation31_spill] sm:$0xff] }
 0x52b   : > { %v9648_v54 = vunpack.i.h.bf16 %v9646_v51  ;;  %v9647_v39 = vunpack.i.l.bf16 %v9646_v51  ;;  %v9716_v24 = vpop.permute.xlu1 %9715  ;;  %v17318_v34 = vcombine.low %v17316_v38, %v17317_v20  ;;  %v9673_v20 = vunpack.i.h.bf16 %v15207_v53 }
 0x52d   : > { %v3909_v58 = vsel %vm2177_vm11, %v3907_v10, %v9647_v39  ;;  %v3910_v9 = vsel %vm2177_vm11, %v3908_v13, %v9648_v54  ;;  %v9698_v54 = vunpack.i.h.bf16 %v15233_v44  ;;  %v9697_v39 = vunpack.i.l.bf16 %v15233_v44 }
 0x52e   : > { %v9656_v14 = vpop.permute.xlu0 %9655  ;;  %v15259_v19 = vsel %vm2180_vm12, %v3909_v58, %v9652_v27  ;;  %v15262_v18 = vsel %vm2180_vm12, %v3910_v9, %v9653_v5  ;;  %v9708_v58 = vunpack.i.h.bf16 %v9706_v33  ;;  %v9707_v9 = vunpack.i.l.bf16 %v9706_v33 }
 0x52f   : > { %v15264_v40 = vpop.permute.xlu1 %9730  ;;  %v9257_v55 = vpack.c.bf16 %v15262_v18, %v15259_v19  ;;  %v9658_v36 = vunpack.i.h.bf16 %v9656_v14  ;;  %v9657_v32 = vunpack.i.l.bf16 %v9656_v14 }
 0x531   : > { %v7933_v28 = vsel %vm2163_vm7, %v17315_v37, %v9657_v32  ;;  %v7934_v52 = vsel %vm2163_vm7, %v17318_v34, %v9658_v36  ;;  %v9718_v36 = vunpack.i.h.bf16 %v9716_v24  ;;  %v9717_v32 = vunpack.i.l.bf16 %v9716_v24 }
 0x532   : > { %v9666_v60 = vpop.permute.xlu0 %9665  ;;  %v9662_v24 = vunpack.i.l.bf16 %v15193_v1  ;;  %v9672_v34 = vunpack.i.l.bf16 %v15207_v53 }
 0x533   : > { %v15268_v3 = vpop.permute.xlu1 %9735  ;;  %v9668_v21 = vunpack.i.h.bf16 %v9666_v60  ;;  %v9667_v31 = vunpack.i.l.bf16 %v9666_v60 }
 0x535   : > { %v7935_v48 = vsel %vm603_vm0, %v7933_v28, %v9667_v31  ;;  %v7936_v43 = vsel %vm603_vm0, %v7934_v52, %v9668_v21  ;;  %v9663_v28 = vunpack.i.h.bf16 %v15193_v1  ;;  %v9683_v52 = vunpack.i.h.bf16 %v15217_v56  ;;  %v17323_v1 = vld [vmem:[#allocation175_spill] sm:$0xff] }
 0x536   : > { %v9676_v0 = vpop.permute.xlu0 %9675 }
 0x537   : > { %v15270_v49 = vpop.permute.xlu1 %9740  ;;  %v9678_v2 = vunpack.i.h.bf16 %v9676_v0  ;;  %v9677_v45 = vunpack.i.l.bf16 %v9676_v0 }
 0x539   : > { %v7937_v5 = vsel %vm2168_vm8, %v7935_v48, %v9677_v45  ;;  %v7938_v27 = vsel %vm2168_vm8, %v7936_v43, %v9678_v2 }
 0x53a   : > { %v9686_v41 = vpop.permute.xlu0 %9685 }
 0x53b   : > { %v9688_v51 = vunpack.i.h.bf16 %v9686_v41  ;;  %v9687_v10 = vunpack.i.l.bf16 %v9686_v41  ;;  %v15282_v13 = vpop.permute.xlu1 %9745  ;;  %v9682_v41 = vunpack.i.l.bf16 %v15217_v56 }
 0x53d   : > { %v7939_v14 = vsel %vm2171_vm9, %v7937_v5, %v9687_v10  ;;  %v7940_v60 = vsel %vm2171_vm9, %v7938_v27, %v9688_v51  ;;  %v17319_v10 = vld [vmem:[#allocation166_spill] sm:$0xff] }
 0x53e   : > { %v9691_v0 = vpop.permute.xlu0 %9690  ;;  %v7941_v21 = vsel %vm2174_vm10, %v7939_v14, %v9697_v39  ;;  %v7942_v31 = vsel %vm2174_vm10, %v7940_v60, %v9698_v54  ;;  %v17320_v54 = vld [vmem:[#allocation172_spill] sm:$0xff]  ;;  %v17322_v27 = vld [vmem:[#allocation178_spill] sm:$0xff] }
 0x53f   : > { %v15292_v42 = vpop.permute.xlu1 %9750  ;;  %v7943_v44 = vsel %vm2177_vm11, %v7941_v21, %v9707_v9  ;;  %v7944_v45 = vsel %vm2177_vm11, %v7942_v31, %v9708_v58  ;;  %v9693_v48 = vunpack.i.h.bf16 %v9691_v0  ;;  %v9692_v43 = vunpack.i.l.bf16 %v9691_v0 }
 0x540   : > { %v7945_v2 = vsel %vm2180_vm12, %v7943_v44, %v9717_v32  ;;  %v7946_v33 = vsel %vm2180_vm12, %v7944_v45, %v9718_v36  ;;  %v17321_v39 = vcombine.low %v17319_v10, %v17320_v54  ;;  %v17324_v58 = vcombine.low %v17322_v27, %v17323_v1 }
 0x541   : > { %v9267_v63 = vpack.c.bf16 %v7946_v33, %v7945_v2  ;;  %v9743_v54 = vunpack.i.h.bf16 %v15270_v49  ;;  %v9747_v1 = vunpack.i.l.bf16 %v15282_v13 }
 0x542   : > { %v9701_v37 = vpop.permute.xlu0 %9700  ;;  %v7920_v5 = vsel %vm2163_vm7, %v17321_v39, %v9663_v28  ;;  %v7919_v9 = vsel %vm2163_vm7, %v17324_v58, %v9662_v24  ;;  %v9742_v39 = vunpack.i.l.bf16 %v15270_v49 }
 0x543   : > { %v9756_v38 = vpop.permute.xlu1 %9755  ;;  %8939 = vmatprep.subr.bf16.mxu1 %v9267_v63  ;;  %v9703_v14 = vunpack.i.h.bf16 %v9701_v37  ;;  %v9702_v60 = vunpack.i.l.bf16 %v9701_v37  ;;  %v7921_v36 = vsel %vm603_vm0, %v7919_v9, %v9672_v34  ;;  %v7922_v56 = vsel %vm603_vm0, %v7920_v5, %v9673_v20  ;;  %v17325_v9 = vld [vmem:[#allocation69_spill] sm:$0xff] }
 0x544   : > { %v7923_v21 = vsel %vm2168_vm8, %v7921_v36, %v9682_v41  ;;  %v7924_v31 = vsel %vm2168_vm8, %v7922_v56, %v9683_v52  ;;  %v9733_v20 = vunpack.i.h.bf16 %v15264_v40  ;;  %v9732_v34 = vunpack.i.l.bf16 %v15264_v40  ;;  %v17328_v36 = vld [vmem:[#allocation192_spill] sm:$0xff]  ;;  %v17329_v56 = vld [vmem:[#allocation189_spill] sm:$0xff] }
 0x545   : > { %v7925_v44 = vsel %vm2171_vm9, %v7923_v21, %v9692_v43  ;;  %v7926_v45 = vsel %vm2171_vm9, %v7924_v31, %v9693_v48  ;;  %v9738_v43 = vunpack.i.h.bf16 %v15268_v3  ;;  %v9737_v48 = vunpack.i.l.bf16 %v15268_v3 }
 0x546   : > { %v9711_v51 = vpop.permute.xlu0 %9710  ;;  %v7927_v33 = vsel %vm2174_vm10, %v7925_v44, %v9702_v60  ;;  %v7928_v63 = vsel %vm2174_vm10, %v7926_v45, %v9703_v14  ;;  %v9748_v40 = vunpack.i.h.bf16 %v15282_v13  ;;  %v17326_v14 = vld [vmem:[#allocation39_spill] sm:$0xff]  ;;  %v9758_v21 = vunpack.i.h.bf16 %v9756_v38 }
 0x547   : > { %v15312_v53 = vpop.permute.xlu1 %9760  ;;  %v9713_v32 = vunpack.i.h.bf16 %v9711_v51  ;;  %v9712_v0 = vunpack.i.l.bf16 %v9711_v51  ;;  %v17327_v60 = vcombine.low %v17325_v9, %v17326_v14  ;;  %v9757_v31 = vunpack.i.l.bf16 %v9756_v38 }
 0x548   : > { %v9752_v9 = vunpack.i.l.bf16 %v15292_v42 }
 0x549   : > { %v7929_v41 = vsel %vm2177_vm11, %v7927_v33, %v9712_v0  ;;  %v7930_v52 = vsel %vm2177_vm11, %v7928_v63, %v9713_v32  ;;  %v6346_v3 = vsel %vm2163_vm7, %v17327_v60, %v9733_v20  ;;  %v17330_v32 = vcombine.low %v17328_v36, %v17329_v56 }
 0x54a   : > { %v9721_v2 = vpop.permute.xlu0 %9720  ;;  %v6348_v44 = vsel %vm603_vm0, %v6346_v3, %v9738_v43  ;;  %v17332_v43 = vld [vmem:[#allocation230_spill] sm:$0xff]  ;;  %v9763_v60 = vunpack.i.h.bf16 %v15312_v53  ;;  %v9762_v3 = vunpack.i.l.bf16 %v15312_v53 }
 0x54b   : > { %v9723_v37 = vunpack.i.h.bf16 %v9721_v2  ;;  %v9722_v28 = vunpack.i.l.bf16 %v9721_v2  ;;  %v9766_v24 = vpop.permute.xlu1 %9765  ;;  %v6345_v0 = vsel %vm2163_vm7, %v17330_v32, %v9732_v34  ;;  %v17331_v2 = vpack.c.bf16 %v14762_v8, %v14759_v62 }
 0x54c   : > { %v6347_v49 = vsel %vm603_vm0, %v6345_v0, %v9737_v48  ;;  %v9768_v45 = vunpack.i.h.bf16 %v9766_v24  ;;  %v9767_v13 = vunpack.i.l.bf16 %v9766_v24  ;;  %v6350_v63 = vsel %vm2168_vm8, %v6348_v44, %v9743_v54  ;;  %v17333_v48 = vld [vmem:[#allocation229_spill] sm:$0xff]  ;;  %v17335_v0 = vld [vmem:[#allocation183_spill] sm:$0xff]  ;;  %v17338_v44 = vld [vmem:[#allocation204_spill] sm:$0xff] }
 0x54d   : > { %v7931_v51 = vsel %vm2180_vm12, %v7929_v41, %v9722_v28  ;;  %v7932_v10 = vsel %vm2180_vm12, %v7930_v52, %v9723_v37  ;;  %v6349_v33 = vsel %vm2168_vm8, %v6347_v49, %v9742_v39  ;;  %v6352_v38 = vsel %vm2171_vm9, %v6350_v63, %v9748_v40 }
 0x54e   : > { %v9726_v5 = vpop.permute.xlu0 %9725  ;;  %v9266_v27 = vpack.c.bf16 %v7932_v10, %v7931_v51  ;;  %v6351_v28 = vsel %vm2171_vm9, %v6349_v33, %v9747_v1  ;;  %v6354_v41 = vsel %vm2174_vm10, %v6352_v38, %v9758_v21  ;;  %v17334_v62 = vpack.c.bf16 %v17332_v43, %v17333_v48  ;;  %v17336_v21 = vld [vmem:[#allocation72_spill] sm:$0xff] }
 0x54f   : > { %v9771_v58 = vpop.permute.xlu1 %9770  ;;  %v6353_v34 = vsel %vm2174_vm10, %v6351_v28, %v9757_v31  ;;  %v6356_v51 = vsel %vm2177_vm11, %v6354_v41, %v9768_v45  ;;  %v9753_v1 = vunpack.i.h.bf16 %v15292_v42  ;;  %v17337_v31 = vcombine.low %v17335_v0, %v17336_v21  ;;  %v17339_v42 = vld [vmem:[#allocation200_spill] sm:$0xff] }
 0x550   : > { %8940 = vmatpush1.bf16.msra.mxu1 %v9266_v27  ;;  %v6355_v8 = vsel %vm2177_vm11, %v6353_v34, %v9767_v13  ;;  %v9773_v56 = vunpack.i.h.bf16 %v9771_v58  ;;  %v9772_v32 = vunpack.i.l.bf16 %v9771_v58  ;;  %v17340_v45 = vcombine.low %v17338_v44, %v17339_v42 }
 0x551   : > { %8941 = vmatprep.subr.bf16.mxu1 %v17331_v2  ;;  %v5488_v49 = vsel %vm2163_vm7, %v17337_v31, %v9753_v1  ;;  %v9727_v2 = vunpack.i.l.bf16 %v9726_v5 }
 0x552   : > { %v9796_v37 = vpop.permute.xlu0 %9795  ;;  %v5487_v13 = vsel %vm2163_vm7, %v17340_v45, %v9752_v9  ;;  %v5490_v58 = vsel %vm603_vm0, %v5488_v49, %v9763_v60 }
 0x553   : > { %v9776_v20 = vpop.permute.xlu1 %9775  ;;  %v5489_v28 = vsel %vm603_vm0, %v5487_v13, %v9762_v3  ;;  %v5492_v34 = vsel %vm2168_vm8, %v5490_v58, %v9773_v56 }
 0x554   : > { %v9778_v52 = vunpack.i.h.bf16 %v9776_v20  ;;  %v9777_v24 = vunpack.i.l.bf16 %v9776_v20  ;;  %8942 = vmatpush1.bf16.msra.mxu1 %v17334_v62  ;;  %v5491_v20 = vsel %vm2168_vm8, %v5489_v28, %v9772_v32 }
 0x556   : > { %v15358_v10 = vpop.permute.xlu0 %9805  ;;  %v6357_v54 = vsel %vm2180_vm12, %v6355_v8, %v9777_v24  ;;  %v6358_v39 = vsel %vm2180_vm12, %v6356_v51, %v9778_v52  ;;  %v4631_v24 = vsel %vm603_vm0, %v14805_v6, %v9727_v2  ;;  %v9798_v8 = vunpack.i.h.bf16 %v9796_v37 }
 0x557   : > { %v9263_v40 = vpack.c.bf16 %v6358_v39, %v6357_v54  ;;  %v9797_v51 = vunpack.i.l.bf16 %v9796_v37 }
 0x558   : > { %v9781_v27 = vpop.permute.xlu1 %9780 }
 0x559   : > { %8943 = vmatprep.subr.bf16.mxu1 %v9263_v40  ;;  %v9783_v22 = vunpack.i.h.bf16 %v9781_v27  ;;  %v9782_v4 = vunpack.i.l.bf16 %v9781_v27 }
 0x55a   : > { %8944 = vmatpush1.bf16.msra.mxu1 %v9262_v15  ;;  %v9816_v14 = vpop.permute.xlu0 %9815  ;;  %v9728_v15 = vunpack.i.h.bf16 %v9726_v5 }
 0x55b   : > { %v5493_v41 = vsel %vm2171_vm9, %v5491_v20, %v9782_v4  ;;  %v5494_v52 = vsel %vm2171_vm9, %v5492_v34, %v9783_v22  ;;  %v9818_v54 = vunpack.i.h.bf16 %v9816_v14  ;;  %v9817_v39 = vunpack.i.l.bf16 %v9816_v14 }
 0x55c   : > { %v9786_v36 = vpop.permute.xlu1 %9785  ;;  %v4632_v5 = vsel %vm603_vm0, %v14799_v26, %v9728_v15  ;;  %v9808_v34 = vunpack.i.h.bf16 %v15358_v10 }
 0x55d   : > { %v9788_v33 = vunpack.i.h.bf16 %v9786_v36  ;;  %v9787_v63 = vunpack.i.l.bf16 %v9786_v36 }
 0x55e   : > { %v9826_v53 = vpop.permute.xlu0 %9825 }
 0x55f   : > { %v5495_v43 = vsel %vm2174_vm10, %v5493_v41, %v9787_v63  ;;  %v5496_v48 = vsel %vm2174_vm10, %v5494_v52, %v9788_v33  ;;  %v9828_v40 = vunpack.i.h.bf16 %v9826_v53  ;;  %v9827_v1 = vunpack.i.l.bf16 %v9826_v53 }
 0x560   : > { %v9791_v38 = vpop.permute.xlu1 %9790  ;;  %v5497_v6 = vsel %vm2177_vm11, %v5495_v43, %v9797_v51  ;;  %v5498_v26 = vsel %vm2177_vm11, %v5496_v48, %v9798_v8  ;;  %v17341_v43 = vld [vmem:[#allocation75_spill] sm:$0xff] }
 0x561   : > { %v9793_v3 = vunpack.i.h.bf16 %v9791_v38  ;;  %v9792_v36 = vunpack.i.l.bf16 %v9791_v38  ;;  %v9298_v48 = vunpack.i.h.bf16 %v17341_v43 }
 0x563   : > { %v9836_v62 = vpop.permute.xlu0 %9835  ;;  %v5482_v15 = vsel %vm2174_vm10, %v15186_v30, %v9793_v3  ;;  %v5481_v2 = vsel %vm2174_vm10, %v15183_v12, %v9792_v36  ;;  %v9807_v30 = vunpack.i.l.bf16 %v15358_v10  ;;  %v17345_v36 = vld [vmem:[#allocation78_spill] sm:$0xff] }
 0x564   : > { %v9801_v27 = vpop.permute.xlu1 %9800  ;;  %v9838_v56 = vunpack.i.h.bf16 %v9836_v62  ;;  %v9837_v32 = vunpack.i.l.bf16 %v9836_v62  ;;  %v9297_v62 = vunpack.i.l.bf16 %v17341_v43  ;;  %v5484_v51 = vsel %vm2177_vm11, %v5482_v15, %v9808_v34 }
 0x565   : > { %v9803_v9 = vunpack.i.h.bf16 %v9801_v27  ;;  %v9802_v60 = vunpack.i.l.bf16 %v9801_v27  ;;  %v5483_v8 = vsel %vm2177_vm11, %v5481_v2, %v9807_v30  ;;  %v17354_v2 = vld [vmem:[#allocation257_spill] sm:$0xff] }
 0x567   : > { %v4633_v0 = vsel %vm2168_vm8, %v4631_v24, %v9802_v60  ;;  %v4634_v21 = vsel %vm2168_vm8, %v4632_v5, %v9803_v9  ;;  %v9846_v37 = vpop.permute.xlu0 %9845  ;;  %v17343_v9 = vld [vmem:[#allocation216_spill] sm:$0xff] }
 0x568   : > { %v4635_v14 = vsel %vm2171_vm9, %v4633_v0, %v9817_v39  ;;  %v4636_v31 = vsel %vm2171_vm9, %v4634_v21, %v9818_v54  ;;  %v9848_v49 = vunpack.i.h.bf16 %v9846_v37  ;;  %v9847_v44 = vunpack.i.l.bf16 %v9846_v37  ;;  %v9811_v42 = vpop.permute.xlu1 %9810  ;;  %v17342_v54 = vld [vmem:[#allocation85_spill] sm:$0xff]  ;;  %v17344_v60 = vld [vmem:[#allocation208_spill] sm:$0xff] }
 0x569   : > { %v9813_v45 = vunpack.i.h.bf16 %v9811_v42  ;;  %v9812_v13 = vunpack.i.l.bf16 %v9811_v42  ;;  %v4637_v22 = vsel %vm2174_vm10, %v4635_v14, %v9827_v1  ;;  %v4638_v4 = vsel %vm2174_vm10, %v4636_v31, %v9828_v40  ;;  %v17346_v0 = vld [vmem:[#allocation221_spill] sm:$0xff]  ;;  %v17347_v21 = vld [vmem:[#allocation220_spill] sm:$0xff]  ;;  %v17348_v31 = vld [vmem:[#allocation15_spill] sm:$0xff] }
 0x56a   : > { %v4639_v33 = vsel %vm2177_vm11, %v4637_v22, %v9837_v32  ;;  %v4640_v63 = vsel %vm2177_vm11, %v4638_v4, %v9838_v56  ;;  %v9333_v39 = vunpack.i.h.bf16 %v17342_v54  ;;  %v9332_v27 = vunpack.i.l.bf16 %v17342_v54  ;;  %v17352_v22 = vld [vmem:[#allocation14_spill] sm:$0xff] }
 0x56b   : > { %v15403_v53 = vpop.permute.xlu0 %9855  ;;  %v5499_v28 = vsel %vm2180_vm12, %v5497_v6, %v9812_v13  ;;  %v5500_v58 = vsel %vm2180_vm12, %v5498_v26, %v9813_v45  ;;  %v4641_v38 = vsel %vm2180_vm12, %v4639_v33, %v9847_v44  ;;  %v4642_v20 = vsel %vm2180_vm12, %v4640_v63, %v9848_v49  ;;  %v17349_v49 = vld [vmem:[#allocation13_spill] sm:$0xff]  ;;  %v17351_v13 = vld [vmem:[#allocation16_spill] sm:$0xff] }
 0x56c   : > { %v9821_v41 = vpop.permute.xlu1 %9820  ;;  %v9261_v12 = vpack.c.bf16 %v5500_v58, %v5499_v28  ;;  %v9259_v52 = vpack.c.bf16 %v4642_v20, %v4641_v38  ;;  %v1771_v3 = vcombine.low %v17344_v60, %v17343_v9  ;;  %v9338_v6 = vunpack.i.h.bf16 %v17345_v36  ;;  %v17355_v20 = vld [vmem:[#allocation70_spill] sm:$0xff] }
 0x56d   : > { %v9823_v24 = vunpack.i.h.bf16 %v9821_v41  ;;  %v9822_v5 = vunpack.i.l.bf16 %v9821_v41  ;;  %v9337_v26 = vunpack.i.l.bf16 %v17345_v36  ;;  %v4223_v37 = vcombine.low %v17347_v21, %v17346_v0 }
 0x56e   : > { %8945 = vmatprep.subr.bf16.mxu1 %v9261_v12  ;;  %v2165_v14 = vsel %vm2163_vm7, %v1771_v3, %v9298_v48  ;;  %v17350_v44 = vcombine.low %v17348_v31, %v17349_v49  ;;  %v17353_v4 = vcombine.low %v17351_v13, %v17352_v22  ;;  %v9303_v33 = vunpack.i.h.bf16 %v17354_v2  ;;  %v17356_v12 = vld [vmem:[#allocation46_spill] sm:$0xff] }
 0x56f   : > { %v15417_v40 = vpop.permute.xlu0 %9865  ;;  %v5485_v10 = vsel %vm2180_vm12, %v5483_v8, %v9822_v5  ;;  %v5486_v1 = vsel %vm2180_vm12, %v5484_v51, %v9823_v24  ;;  %v4616_v45 = vsel %vm2163_vm7, %v4223_v37, %v9333_v39  ;;  %v9302_v63 = vunpack.i.l.bf16 %v17354_v2 }
 0x570   : > { %v9831_v56 = vpop.permute.xlu1 %9830  ;;  %v9260_v32 = vpack.c.bf16 %v5486_v1, %v5485_v10  ;;  %v2164_v42 = vsel %vm2163_vm7, %v17350_v44, %v9297_v62  ;;  %v4615_v15 = vsel %vm2163_vm7, %v17353_v4, %v9332_v27  ;;  %v4618_v58 = vsel %vm603_vm0, %v4616_v45, %v9338_v6  ;;  %v17357_v62 = vld [vmem:[#allocation184_spill] sm:$0xff]  ;;  %v17358_v27 = vld [vmem:[#allocation74_spill] sm:$0xff] }
 0x571   : > { %v4617_v38 = vsel %vm603_vm0, %v4615_v15, %v9337_v26  ;;  %v9348_v34 = vunpack.i.h.bf16 %v17355_v20  ;;  %v9347_v30 = vunpack.i.l.bf16 %v17355_v20  ;;  %v9343_v24 = vunpack.i.h.bf16 %v17356_v12 }
 0x572   : > { %8946 = vmatpush1.bf16.msra.mxu1 %v9260_v32  ;;  %v9342_v5 = vunpack.i.l.bf16 %v17356_v12  ;;  %v9833_v43 = vunpack.i.h.bf16 %v9831_v56  ;;  %v9832_v48 = vunpack.i.l.bf16 %v9831_v56  ;;  %v9308_v8 = vunpack.i.h.bf16 %v17357_v62 }
 0x573   : > { %8947 = vmatprep.subr.bf16.mxu1 %v9259_v52  ;;  %v15439_v28 = vpop.permute.xlu0 %9875  ;;  %v9307_v52 = vunpack.i.l.bf16 %v17357_v62  ;;  %v2166_v39 = vsel %vm603_vm0, %v2164_v42, %v9302_v63  ;;  %v9312_v10 = vunpack.i.l.bf16 %v17358_v27  ;;  %v4620_v9 = vsel %vm2168_vm8, %v4618_v58, %v9343_v24  ;;  %v17359_v58 = vld [vmem:[#allocation256_spill] sm:$0xff] }
 0x574   : > { %v9841_v41 = vpop.permute.xlu1 %9840  ;;  %v4619_v1 = vsel %vm2168_vm8, %v4617_v38, %v9342_v5  ;;  %v2167_v3 = vsel %vm603_vm0, %v2165_v14, %v9303_v33  ;;  %v9313_v36 = vunpack.i.h.bf16 %v17358_v27  ;;  %v4622_v26 = vsel %vm2171_vm9, %v4620_v9, %v9348_v34 }
 0x575   : > { %v9843_v51 = vunpack.i.h.bf16 %v9841_v41  ;;  %v9842_v54 = vunpack.i.l.bf16 %v9841_v41  ;;  %v4621_v6 = vsel %vm2171_vm9, %v4619_v1, %v9347_v30  ;;  %v4624_v0 = vsel %vm2174_vm10, %v4622_v26, %v9833_v43  ;;  %v17360_v41 = vld [vmem:[#allocation197_spill] sm:$0xff] }
 0x576   : > { %v4623_v32 = vsel %vm2174_vm10, %v4621_v6, %v9832_v48  ;;  %v2169_v31 = vsel %vm2168_vm8, %v2166_v39, %v9307_v52  ;;  %v2170_v14 = vsel %vm2168_vm8, %v2167_v3, %v9308_v8  ;;  %v9858_v15 = vunpack.i.h.bf16 %v15403_v53 }
 0x577   : > { %v9886_v60 = vpop.permute.xlu0 %9885  ;;  %v4625_v49 = vsel %vm2177_vm11, %v4623_v32, %v9842_v54  ;;  %v4626_v44 = vsel %vm2177_vm11, %v4624_v0, %v9843_v51  ;;  %v2172_v42 = vsel %vm2171_vm9, %v2169_v31, %v9312_v10  ;;  %v2173_v4 = vsel %vm2171_vm9, %v2170_v14, %v9313_v36  ;;  %v17366_v14 = vld [vmem:[#allocation110_spill] sm:$0xff] }
 0x578   : > { %v9851_v56 = vpop.permute.xlu1 %9850  ;;  %v9857_v2 = vunpack.i.l.bf16 %v15403_v53  ;;  %v9318_v38 = vunpack.i.h.bf16 %v17359_v58  ;;  %v9317_v20 = vunpack.i.l.bf16 %v17359_v58  ;;  %v9868_v34 = vunpack.i.h.bf16 %v15417_v40 }
 0x579   : > { %v9853_v21 = vunpack.i.h.bf16 %v9851_v56  ;;  %v9852_v37 = vunpack.i.l.bf16 %v9851_v56  ;;  %v9867_v30 = vunpack.i.l.bf16 %v15417_v40  ;;  %v9323_v12 = vunpack.i.h.bf16 %v17360_v41 }
 0x57a   : > { %v9322_v24 = vunpack.i.l.bf16 %v17360_v41  ;;  %v9878_v5 = vunpack.i.h.bf16 %v15439_v28  ;;  %v9877_v43 = vunpack.i.l.bf16 %v15439_v28  ;;  %v9888_v53 = vunpack.i.h.bf16 %v9886_v60 }
 0x57b   : > { %v9896_v45 = vpop.permute.xlu0 %9895  ;;  %v4627_v13 = vsel %vm2180_vm12, %v4625_v49, %v9852_v37  ;;  %v4628_v22 = vsel %vm2180_vm12, %v4626_v44, %v9853_v21  ;;  %v9887_v48 = vunpack.i.l.bf16 %v9886_v60  ;;  %v2175_v8 = vsel %vm2174_vm10, %v2172_v42, %v9317_v20  ;;  %v17364_v60 = vld [vmem:[#allocation43_spill] sm:$0xff]  ;;  %v17367_v42 = vld [vmem:[#allocation100_spill] sm:$0xff] }
 0x57c   : > { %v15469_v33 = vpop.permute.xlu1 %9860  ;;  %v9258_v63 = vpack.c.bf16 %v4628_v22, %v4627_v13  ;;  %v2176_v40 = vsel %vm2174_vm10, %v2173_v4, %v9318_v38  ;;  %v17361_v52 = vcombine.low %v17250_v23, %v17249_v11  ;;  %v17362_v28 = vcombine.low %v17269_v35, %v17268_v25 }
 0x57d   : > { %v9898_v39 = vunpack.i.h.bf16 %v9896_v45  ;;  %v9897_v27 = vunpack.i.l.bf16 %v9896_v45  ;;  %v17363_v23 = vpack.c.bf16 %v14986_v47, %v14983_v7  ;;  %v2178_v25 = vsel %vm2177_vm11, %v2175_v8, %v9322_v24  ;;  %v17370_v24 = vld [vmem:[#allocation25_spill] sm:$0xff] }
 0x57e   : > { %8948 = vmatpush1.bf16.msra.mxu1 %v9258_v63  ;;  %v8791_v51 = vsel %vm2163_vm7, %v17361_v52, %v9857_v2  ;;  %v8792_v54 = vsel %vm2163_vm7, %v17362_v28, %v9858_v15  ;;  %v2179_v35 = vsel %vm2177_vm11, %v2176_v40, %v9323_v12  ;;  %v9328_v3 = vunpack.i.h.bf16 %v17364_v60 }
 0x57f   : > { %8949 = vmatprep.subr.bf16.mxu1 %v9257_v55  ;;  %v9906_v62 = vpop.permute.xlu0 %9905  ;;  %v8793_v19 = vsel %vm603_vm0, %v8791_v51, %v9867_v30  ;;  %v8794_v18 = vsel %vm603_vm0, %v8792_v54, %v9868_v34  ;;  %v9327_v36 = vunpack.i.l.bf16 %v17364_v60  ;;  %v17368_v45 = vpack.c.bf16 %v17366_v14, %v17367_v42  ;;  %v10072_v14 = vld [vmem:[%s15589_s9] sm:$0xff]  }
 0x580   : > { %v9871_v10 = vpop.permute.xlu1 %9870  ;;  %v9908_v55 = vunpack.i.h.bf16 %v9906_v62  ;;  %v9907_v1 = vunpack.i.l.bf16 %v9906_v62  ;;  %v8795_v9 = vsel %vm2168_vm8, %v8793_v19, %v9877_v43  ;;  %v8796_v11 = vsel %vm2168_vm8, %v8794_v18, %v9878_v5 }
 0x581   : > { %v8797_v6 = vsel %vm2171_vm9, %v8795_v9, %v9887_v48  ;;  %v8798_v26 = vsel %vm2171_vm9, %v8796_v11, %v9888_v53  ;;  %v2181_v49 = vsel %vm2180_vm12, %v2178_v25, %v9327_v36  ;;  %v2182_v44 = vsel %vm2180_vm12, %v2179_v35, %v9328_v3  ;;  %v10069_v9 = vld [vmem:[%s15586_s6] ss:$8 sps:$4 sm:$0xff]  }
 0x582   : > { %8950 = vmatpush1.bf16.msra.mxu1 %v17363_v23  ;;  %v8799_v7 = vsel %vm2174_vm10, %v8797_v6, %v9897_v27  ;;  %v8800_v47 = vsel %vm2174_vm10, %v8798_v26, %v9898_v39  ;;  %v9252_v4 = vpack.c.bf16 %v2182_v44, %v2181_v49  ;;  %v9863_v2 = vunpack.i.h.bf16 %v15469_v33 }
 0x583   : > { %8951 = vmatprep.subr.bf16.mxu1 %v9255_v50  ;;  %v9916_v56 = vpop.permute.xlu0 %9915  ;;  %v8801_v37 = vsel %vm2177_vm11, %v8799_v7, %v9907_v1  ;;  %v8802_v31 = vsel %vm2177_vm11, %v8800_v47, %v9908_v55  ;;  %v9862_v63 = vunpack.i.l.bf16 %v15469_v33  ;;  %v9873_v29 = vunpack.i.h.bf16 %v9871_v10 }
 0x584   : > { %v9918_v32 = vunpack.i.h.bf16 %v9916_v56  ;;  %v9917_v0 = vunpack.i.l.bf16 %v9916_v56  ;;  %v9881_v21 = vpop.permute.xlu1 %9880  ;;  %v9872_v46 = vunpack.i.l.bf16 %v9871_v10  ;;  %v17369_v41 = vcombine.low %v14311_v57, %v14297_v17 }
 0x585   : > { %v9883_v58 = vunpack.i.h.bf16 %v9881_v21  ;;  %v9882_v38 = vunpack.i.l.bf16 %v9881_v21  ;;  %v17371_v5 = vcombine.low %v17304_v61, %v17370_v24  ;;  %v17372_v42 = vmov 0  }
 0x586   : > { %8952 = vmatpush1.bf16.msra.mxu1 %v17365_v16  ;;  %v8803_v59 = vsel %vm2180_vm12, %v8801_v37, %v9917_v0  ;;  %v8804_v50 = vsel %vm2180_vm12, %v8802_v31, %v9918_v32  ;;  %v8778_v12 = vsel %vm2163_vm7, %v17369_v41, %v9863_v2 }
 0x587   : > { %8953 = vmatprep.subr.bf16.mxu1 %v17368_v45  ;;  %v9269_v13 = vpack.c.bf16 %v8804_v50, %v8803_v59  ;;  %v8777_v43 = vsel %vm2163_vm7, %v17371_v5, %v9862_v63  ;;  %v8780_v62 = vsel %vm603_vm0, %v8778_v12, %v9873_v29  ;;  %v10073_v45 = vld [vmem:[%s15589_s9 + $0x8] sm:$0xff]  }
 0x588   : > { %v9891_v22 = vpop.permute.xlu1 %9890  ;;  %v8779_v33 = vsel %vm603_vm0, %v8777_v43, %v9872_v46  ;;  %v8782_v51 = vsel %vm2168_vm8, %v8780_v62, %v9883_v58 }
 0x589   : > { %v9893_v20 = vunpack.i.h.bf16 %v9891_v22  ;;  %v9892_v34 = vunpack.i.l.bf16 %v9891_v22  ;;  %v8781_v52 = vsel %vm2168_vm8, %v8779_v33, %v9882_v38 }
 0x58a   : > { %8954 = vmatpush1.bf16.msra.mxu1 %v9252_v4  ;;  %v17373_v4 = vld [vmem:[#allocation4_spill] sm:$0xff] }
 0x58b   : > { %8969 = vmatprep.subr.bf16.mxu1 %v9269_v13  ;;  %v8783_v17 = vsel %vm2171_vm9, %v8781_v52, %v9892_v34  ;;  %v8784_v57 = vsel %vm2171_vm9, %v8782_v51, %v9893_v20  ;;  %v17375_v63 = vunpack.c.h.bf16 %v17373_v4  ;;  %v17376_v20 = vld [vmem:[#allocation5_spill] sm:$0xff] }
 0x58c   : > { %v9901_v15 = vpop.permute.xlu1 %9900  ;;  %v17377_v34 = vunpack.c.l.bf16 %v17376_v20  ;;  %v17378_v41 = vunpack.c.h.bf16 %v17376_v20 }
 0x58d   : > { %v9903_v53 = vunpack.i.h.bf16 %v9901_v15  ;;  %v9902_v48 = vunpack.i.l.bf16 %v9901_v15  ;;  %v17374_v15 = vunpack.c.l.bf16 %v17373_v4 }
 0x58f   : > { %v8785_v61 = vsel %vm2174_vm10, %v8783_v17, %v9902_v48  ;;  %v8786_v54 = vsel %vm2174_vm10, %v8784_v57, %v9903_v53  ;;  %v17379_v53 = vld [vmem:[#allocation6_spill] sm:$0xff]  ;;  %v17382_v17 = vld [vmem:[#allocation7_spill] sm:$0xff] }
 0x590   : > { %v9911_v30 = vpop.permute.xlu1 %9910  ;;  %v8985_v11 = vpop.permute.xlu0 %8984  ;;  %v17380_v48 = vunpack.c.l.bf16 %v17379_v53  ;;  %v17381_v62 = vunpack.c.h.bf16 %v17379_v53  ;;  %v17383_v57 = vunpack.c.l.bf16 %v17382_v17 }
 0x591   : > { %v9913_v8 = vunpack.i.h.bf16 %v9911_v30  ;;  %v9912_v40 = vunpack.i.l.bf16 %v9911_v30 }
 0x593   : > { %v8787_v10 = vsel %vm2177_vm11, %v8785_v61, %v9912_v40  ;;  %v8788_v19 = vsel %vm2177_vm11, %v8786_v54, %v9913_v8  ;;  %v17384_v61 = vunpack.c.h.bf16 %v17382_v17 }
 0x594   : > { %v9921_v28 = vpop.permute.xlu1 %9920  ;;  %v8999_v6 = vpop.permute.xlu0 %8998 }
 0x595   : > { %v9923_v39 = vunpack.i.h.bf16 %v9921_v28  ;;  %v9922_v27 = vunpack.i.l.bf16 %v9921_v28 }
 0x597   : > { %v8789_v18 = vsel %vm2180_vm12, %v8787_v10, %v9922_v27  ;;  %v8790_v55 = vsel %vm2180_vm12, %v8788_v19, %v9923_v39 }
 0x598   : > { %v9268_v1 = vpack.c.bf16 %v8790_v55, %v8789_v18 }
 0x59a   : > { %8970 = vmatpush2.bf16.msra.mxu1 %v9268_v1 }
 0x59d   : > { %8972 = vmatmul.mubr.bf16.vlgmr.msra.gmra.mxu1 %v10069_v9 }
 0x5a1   : > { %v8990_v23 = vpop.permute.xlu1 %8989 }
 0x5a5   : > { %v9004_v56 = vpop.permute.xlu1 %9003 }
 0x65d   : > { %v8973_v25 = vpop.f32.mrf.mxu1 }
 0x65e   : > { %v8992_v3 = vmul.f32 %v8985_v11, %v8973_v25 }
 0x65f   : > { %v8975_v35 = vpop.f32.mrf.mxu1 }
 0x660   : > { %v8993_v60 = vmul.f32 %v8985_v11, %v8975_v35  ;;  %v9006_v21 = vadd.f32 %v8999_v6, %v8992_v3 }
 0x661   : > { %v8977_v36 = vpop.f32.mrf.mxu1 }
 0x662   : > { %v8994_v26 = vmul.f32 %v8990_v23, %v8977_v36  ;;  %v9007_v47 = vadd.f32 %v8999_v6, %v8993_v60  ;;  %v9010_v16 = vmax.f32 %v9006_v21, 0.0 }
 0x663   : > { %v8979_v7 = vpop.f32.mrf.mxu1 }
 0x664   : > { %v9008_v32 = vadd.f32 %v9004_v56, %v8994_v26  ;;  %v8995_v0 = vmul.f32 %v8990_v23, %v8979_v7  ;;  %v9011_v49 = vmax.f32 %v9007_v47, 0.0 }
 0x666   : > { %v9009_v37 = vadd.f32 %v9004_v56, %v8995_v0  ;;  %v9012_v31 = vmax.f32 %v9008_v32, 0.0 }
 0x668   : > { %v9013_v44 = vmax.f32 %v9009_v37, 0.0  ;;  %v9014_v50 = vpack.c.bf16 %v9012_v31, %v9010_v16 }
 0x66a   : > { %v9015_v59 = vpack.c.bf16 %v9013_v44, %v9011_v49 }
 0x66c   : > { %9046 = vmatprep.subr.bf16.mxu0 %v9015_v59 }
 0x66d   : > { %9047 = vmatpush1.bf16.msra.mxu0 %v9014_v50 }
 0x670   : > { %9220 = vmatmul.mubr.msk.bf16.vlgmr.msra.gmra.mxu0 %vm2163_vm7, %v10072_v14 }
 0x671   : > { %9074 = vmatprep.mubr.bf16.mxu0 %v17372_v42 }
 0x678   : > { %9221 = vmatmul.mubr.msk.bf16.gmra.mxu0 %vm2163_vm7, %v10073_v45 }
 0x730   : > { %v9066_v13 = vpop.f32.mrf.mxu0 }
 0x731   : > { %v9067_v2 = vadd.f32 %v9066_v13, %v17374_v15 }
 0x732   : > { %v9068_v22 = vpop.f32.mrf.mxu0 }
 0x733   : > { %v9069_v29 = vadd.f32 %v9068_v22, %v17375_v63 }
 0x734   : > { %v9070_v46 = vpop.f32.mrf.mxu0 }
 0x735   : > { %v9248_v58 = vpack.c.bf16 %v9069_v29, %v9067_v2  ;;  %v9071_v30 = vadd.f32 %v9070_v46, %v17377_v34 }
 0x736   : > { %v9072_v38 = vpop.f32.mrf.mxu0 }
 0x737   : > { %9109 = vst [vmem:[%s359_s20] sm:$0xff] %v9248_v58  ;;  %v9073_v12 = vadd.f32 %v9072_v38, %v17378_v41 }
 0x738   : > { %v9076_v24 = vpop.f32.mrf.mxu0 }
 0x739   : > { %v9249_v5 = vpack.c.bf16 %v9073_v12, %v9071_v30  ;;  %v9077_v33 = vadd.f32 %v9076_v24, %v17380_v48 }
 0x73a   : > { %v9078_v43 = vpop.f32.mrf.mxu0 }
 0x73b   : > { %9110 = vst [vmem:[%s359_s20 + $0x8] sm:$0xff] %v9249_v5  ;;  %v9079_v8 = vadd.f32 %v9078_v43, %v17381_v62 }
 0x73c   : > { %v9080_v40 = vpop.f32.mrf.mxu0 }
 0x73d   : > { %v9250_v52 = vpack.c.bf16 %v9079_v8, %v9077_v33  ;;  %v9081_v28 = vadd.f32 %v9080_v40, %v17383_v57 }
 0x73e   : > { %v9082_v51 = vpop.f32.mrf.mxu0 }
 0x73f   : > { %9111 = vst [vmem:[%s359_s20 + $0x10] sm:$0xff] %v9250_v52  ;;  %v9083_v54 = vadd.f32 %v9082_v51, %v17384_v61 }
 0x741   : > { %v9251_v39 = vpack.c.bf16 %v9083_v54, %v9081_v28 }
 0x743   : > { %9112 = vst [vmem:[%s359_s20 + $0x18] sm:$0xff] %v9251_v39 }
 0x744 PF: > { %s20_s13 = sadd.s32 1, %s10080_s13  }
 0x745   : > { %p17_p4 = scmp.ge.s32.totalorder %s20_s13, 4  }
 0x747   :  { %19 = sbr.rel (!%p17_p4) target bundleno = 1 (0x1), region = 90 }

</bundles_post_ra>
